<compile_context>
chip_gen: v7x
topology: tpu7x:2x2x1
jax: 0.10.0
libtpu: 0.0.40
codegen_flags: <defaults>
</compile_context>

<pallas_src>
import functools

import jax
import jax.numpy as jnp
from jax.experimental import pallas as pl
from jax.experimental.pallas import tpu as pltpu

EPS = 1e-5     # nn.BatchNorm2d default
LANES = 128


def _round_up(x, m):
    return ((x + m - 1) // m) * m


# ----------------------------- Pallas kernels ------------------------------ #

def _conv_bn_relu_kernel(p_ref, w_ref, o_ref, *, inv_m):
    """Fused im2col-GEMM + BatchNorm(batch stats) + ReLU, single block.

    p_ref: (Mp, Kp) bf16 patches (rows ordered (N, OH, OW); padded rows are 0)
    w_ref: (Kp, 128) bf16 weights (padded rows/cols are 0)
    o_ref: (Mp, 128) bf16 relu(normalize(conv))

    The conv bias is intentionally absent: BN (beta=0) subtracts the per-channel
    batch mean, so the bias cancels.  Zero-padded rows contribute 0 to the
    per-channel sums, so stats only need a divide by the true row count.
    """
    y = jnp.dot(p_ref[...], w_ref[...], preferred_element_type=jnp.float32)
    mean = jnp.sum(y, axis=0, keepdims=True) * inv_m
    var = jnp.sum(y * y, axis=0, keepdims=True) * inv_m - mean * mean   # biased
    var = jnp.maximum(var, 0.0)                       # f32 cancellation guard
    scale = jax.lax.rsqrt(var + EPS)                  # gamma=1, beta=0
    o_ref[...] = jnp.maximum((y - mean) * scale, 0.0).astype(o_ref.dtype)


def _fc_fused_kernel(x_ref, w1_ref, b1_ref, w2_ref, b2_ref, w3_ref, b3_ref, o_ref):
    """fc1 -> ReLU -> fc2 -> ReLU -> fc3 in one kernel (all weights resident)."""
    h1 = jnp.dot(x_ref[...], w1_ref[...], preferred_element_type=jnp.float32) + b1_ref[...]
    h1 = jnp.maximum(h1, 0.0).astype(jnp.bfloat16)
    h2 = jnp.dot(h1, w2_ref[...], preferred_element_type=jnp.float32) + b2_ref[...]
    h2 = jnp.maximum(h2, 0.0).astype(jnp.bfloat16)
    o_ref[...] = jnp.dot(h2, w3_ref[...], preferred_element_type=jnp.float32) + b3_ref[...]


# ------------------------------ layer wrappers ------------------------------ #

def conv_bn_relu_nhwc(x, w_p, cout):
    """Conv2d(k=3, s=2) + BatchNorm2d(batch stats) + ReLU, NHWC in / NHWC out.

    x: (N, H, W, Cin); w_p: prepared (Kp, 128) bf16 weight (rows = (kh, kw, cin)).
    """
    N, H, W, Cin = x.shape
    k, s = 3, 2
    OH = (H - k) // s + 1
    OW = (W - k) // s + 1

    # im2col via 9 strided slices; columns ordered (kh, kw, Cin).
    cols = []
    for kh in range(k):
        for kw in range(k):
            cols.append(x[:, kh:kh + (OH - 1) * s + 1:s, kw:kw + (OW - 1) * s + 1:s, :])
    M, K = N * OH * OW, k * k * Cin
    patches = jnp.stack(cols, axis=3).reshape(M, K).astype(jnp.bfloat16)

    Mp = _round_up(M, 16)            # bf16 sublane packing (16, 128)
    Kp = w_p.shape[0]                # prepared weight carries the padded K
    p_p = jnp.pad(patches, ((0, Mp - M), (0, Kp - K)))   # single fused pad+cast

    y = pl.pallas_call(
        functools.partial(_conv_bn_relu_kernel, inv_m=1.0 / M),
        out_shape=jax.ShapeDtypeStruct((Mp, LANES), jnp.bfloat16),
    )(p_p, w_p)

    return y[:M, :cout].reshape(N, OH, OW, cout)


def fc_fused(h, p):
    """relu(fc1) -> relu(fc2) -> fc3 in one Pallas call. h: (N, 1200) HWC order."""
    M = h.shape[0]
    Mp = _round_up(M, 16)
    x_p = jnp.pad(h.astype(jnp.bfloat16), ((0, Mp - M), (0, 0)))

    out = pl.pallas_call(
        _fc_fused_kernel,
        out_shape=jax.ShapeDtypeStruct((Mp, LANES), jnp.float32),
        compiler_params=pltpu.CompilerParams(vmem_limit_bytes=32 << 20),
    )(x_p, p["fc1_w"], p["fc1_b"], p["fc2_w"], p["fc2_b"], p["fc3_w"], p["fc3_b"])

    return out[:M, :4]


# ------------------------------- full forward ------------------------------ #

def conv3_forward(x, p):
    """x: (N, 3, 48, 48) f32; p: prepared params from prepare_params()."""
    h = x.transpose(0, 2, 3, 1)                       # NCHW -> NHWC once
    h = conv_bn_relu_nhwc(h, p["c1_w"], 12)           # (N, 23, 23, 12)
    h = conv_bn_relu_nhwc(h, p["c2_w"], 24)           # (N, 11, 11, 24)
    h = conv_bn_relu_nhwc(h, p["c3_w"], 48)           # (N, 5, 5, 48)
    # TODO(synk): original module does x.view(-1, 24*5*5), inconsistent with
    # fc1 (in_features = 48*5*5 = 1200) and would raise in PyTorch; we flatten
    # all 1200 features.  PyTorch's (C, H, W) flatten order is baked into the
    # prepared fc1 weight, so a plain NHWC reshape suffices here.
    h = h.reshape(h.shape[0], -1)                     # (N, 1200), HWC order
    return fc_fused(h, p)                             # (N, 4)


# ----------------------- one-time parameter preparation --------------------- #

def prepare_params(params):
    """Transpose / pad / bf16-cast all weights ONCE, outside the jitted forward.

    Conv biases are dropped: BatchNorm in training mode (beta=0) subtracts the
    per-channel batch mean, so the conv bias cancels exactly in the output.
    """
    def conv_w(w):
        cout, cin = w.shape[0], w.shape[1]
        kk = 9 * cin
        wm = w.transpose(2, 3, 1, 0).reshape(kk, cout)          # rows = (kh,kw,cin)
        wm = jnp.pad(wm, ((0, _round_up(kk, LANES) - kk), (0, LANES - cout)))
        return wm.astype(jnp.bfloat16)

    # fc1: bake the NHWC -> (C, H, W) flatten permutation into the weight rows.
    w1 = params["fc1_w"].T                                       # (in=1200, out=1200), rows c*25+hw
    w1 = w1.reshape(48, 25, 1200).transpose(1, 0, 2).reshape(1200, 1200)  # rows hw*48+c
    n1p = _round_up(1200, LANES)                                 # 1280

    return {
        "c1_w": conv_w(params["conv1_w"]),
        "c2_w": conv_w(params["conv2_w"]),
        "c3_w": conv_w(params["conv3_w"]),
        "fc1_w": jnp.pad(w1, ((0, 0), (0, n1p - 1200))).astype(jnp.bfloat16),
        "fc1_b": jnp.pad(params["fc1_b"], (0, n1p - 1200)).reshape(1, n1p).astype(jnp.float32),
        "fc2_w": jnp.pad(params["fc2_w"].T, ((0, n1p - 1200), (0, 0))).astype(jnp.bfloat16),
        "fc2_b": params["fc2_b"].reshape(1, LANES).astype(jnp.float32),
        "fc3_w": jnp.pad(params["fc3_w"].T, ((0, 0), (0, LANES - 4))).astype(jnp.bfloat16),
        "fc3_b": jnp.pad(params["fc3_b"], (0, LANES - 4)).reshape(1, LANES).astype(jnp.float32),
    }


def init_params(key):
    ks = jax.random.split(key, 12)
    s = 0.1
    return {
        "conv1_w": s * jax.random.normal(ks[0], (12, 3, 3, 3), jnp.float32),
        "conv1_b": s * jax.random.normal(ks[1], (12,), jnp.float32),   # unused: cancelled by BN
        "conv2_w": s * jax.random.normal(ks[2], (24, 12, 3, 3), jnp.float32),
        "conv2_b": s * jax.random.normal(ks[3], (24,), jnp.float32),   # unused: cancelled by BN
        "conv3_w": s * jax.random.normal(ks[4], (48, 24, 3, 3), jnp.float32),
        "conv3_b": s * jax.random.normal(ks[5], (48,), jnp.float32),   # unused: cancelled by BN
        "fc1_w": s * jax.random.normal(ks[6], (1200, 1200), jnp.float32),
        "fc1_b": s * jax.random.normal(ks[7], (1200,), jnp.float32),
        "fc2_w": s * jax.random.normal(ks[8], (128, 1200), jnp.float32),
        "fc2_b": s * jax.random.normal(ks[9], (128,), jnp.float32),
        "fc3_w": s * jax.random.normal(ks[10], (4, 128), jnp.float32),
        "fc3_b": s * jax.random.normal(ks[11], (4,), jnp.float32),
    }


if __name__ == "__main__":
    key = jax.random.PRNGKey(0)
    k_x, k_p = jax.random.split(key)
    # 48x48 input -> 23 -> 11 -> 5 spatial after three stride-2 3x3 convs,
    # consistent with fc1's 48*5*5 input features.
    x = jax.random.normal(k_x, (2, 3, 48, 48), jnp.float32)
    params = init_params(k_p)

    prepped = prepare_params(params)          # one-time weight prep, outside jit
    fwd = jax.jit(conv3_forward)

    out = fwd(x, prepped)
    out = jax.block_until_ready(out)
    assert out.shape == (2, 4), out.shape
    assert bool(jnp.all(jnp.isfinite(out)))
    print("KERNEL_OK")
</pallas_src>

<mosaic_0001>
module attributes {stable_mosaic.version = 11 : i64} {
  func.func @_conv_bn_relu_kernel(%arg0: memref<1072x128xbf16, #tpu.memory_space<vmem>>, %arg1: memref<128x128xbf16, #tpu.memory_space<vmem>>, %arg2: memref<1072x128xbf16, #tpu.memory_space<vmem>>) attributes {dimension_semantics = [], scalar_prefetch = 0 : i64, scratch_operands = 0 : i64, tpu.core_type = #tpu.core_type<tc>} {
    %c0 = arith.constant 0 : index
    %c0_0 = arith.constant 0 : index
    %0 = vector.load %arg0[%c0, %c0_0] : memref<1072x128xbf16, #tpu.memory_space<vmem>>, vector<1072x128xbf16>
    %c0_1 = arith.constant 0 : index
    %c0_2 = arith.constant 0 : index
    %1 = vector.load %arg1[%c0_1, %c0_2] : memref<128x128xbf16, #tpu.memory_space<vmem>>, vector<128x128xbf16>
    %cst = arith.constant dense<0.000000e+00> : vector<1072x128xf32>
    %2 = tpu.matmul %0, %1, %cst {dimension_numbers = #tpu.dot_dimension_numbers<[1], [0], [0], [1], [0, 0, 1, 1], [], []>} : vector<1072x128xbf16>, vector<128x128xbf16>, vector<1072x128xf32> -> vector<1072x128xf32>
    %cst_3 = arith.constant dense<0.000000e+00> : vector<128xf32>
    %3 = vector.multi_reduction <add>, %2, %cst_3 [0] : vector<1072x128xf32> to vector<128xf32>
    %4 = vector.shape_cast %3 : vector<128xf32> to vector<1x128xf32>
    %cst_4 = arith.constant 9.45179606E-4 : f32
    %5 = vector.broadcast %cst_4 : f32 to vector<1x128xf32>
    %6 = arith.mulf %4, %5 : vector<1x128xf32>
    %7 = arith.mulf %2, %2 : vector<1072x128xf32>
    %cst_5 = arith.constant dense<0.000000e+00> : vector<128xf32>
    %8 = vector.multi_reduction <add>, %7, %cst_5 [0] : vector<1072x128xf32> to vector<128xf32>
    %9 = vector.shape_cast %8 : vector<128xf32> to vector<1x128xf32>
    %cst_6 = arith.constant 9.45179606E-4 : f32
    %10 = vector.broadcast %cst_6 : f32 to vector<1x128xf32>
    %11 = arith.mulf %9, %10 : vector<1x128xf32>
    %12 = arith.mulf %6, %6 : vector<1x128xf32>
    %13 = arith.subf %11, %12 : vector<1x128xf32>
    %cst_7 = arith.constant 0.000000e+00 : f32
    %14 = vector.broadcast %cst_7 : f32 to vector<1x128xf32>
    %15 = arith.maximumf %13, %14 : vector<1x128xf32>
    %cst_8 = arith.constant 9.99999974E-6 : f32
    %16 = vector.broadcast %cst_8 : f32 to vector<1x128xf32>
    %17 = arith.addf %15, %16 : vector<1x128xf32>
    %18 = math.rsqrt %17 : vector<1x128xf32>
    %19 = vector.broadcast %6 : vector<1x128xf32> to vector<1072x128xf32>
    %20 = arith.subf %2, %19 : vector<1072x128xf32>
    %21 = vector.broadcast %18 : vector<1x128xf32> to vector<1072x128xf32>
    %22 = arith.mulf %20, %21 : vector<1072x128xf32>
    %cst_9 = arith.constant 0.000000e+00 : f32
    %23 = vector.broadcast %cst_9 : f32 to vector<1072x128xf32>
    %24 = arith.maximumf %22, %23 : vector<1072x128xf32>
    %25 = arith.truncf %24 : vector<1072x128xf32> to vector<1072x128xbf16>
    %c0_10 = arith.constant 0 : index
    %c0_11 = arith.constant 0 : index
    %26 = vector.load %arg2[%c0_10, %c0_11] : memref<1072x128xbf16, #tpu.memory_space<vmem>>, vector<1072x128xbf16>
    tpu.vector_store %arg2[%c0_10, %c0_11], %25 {strides = array<i32>} : memref<1072x128xbf16, #tpu.memory_space<vmem>>, vector<1072x128xbf16>,
    return
  }
}

module attributes {stable_mosaic.version = 11 : i64} {
  func.func @_conv_bn_relu_kernel(%arg0: memref<256x128xbf16, #tpu.memory_space<vmem>>, %arg1: memref<128x128xbf16, #tpu.memory_space<vmem>>, %arg2: memref<256x128xbf16, #tpu.memory_space<vmem>>) attributes {dimension_semantics = [], scalar_prefetch = 0 : i64, scratch_operands = 0 : i64, tpu.core_type = #tpu.core_type<tc>} {
    %c0 = arith.constant 0 : index
    %c0_0 = arith.constant 0 : index
    %0 = vector.load %arg0[%c0, %c0_0] : memref<256x128xbf16, #tpu.memory_space<vmem>>, vector<256x128xbf16>
    %c0_1 = arith.constant 0 : index
    %c0_2 = arith.constant 0 : index
    %1 = vector.load %arg1[%c0_1, %c0_2] : memref<128x128xbf16, #tpu.memory_space<vmem>>, vector<128x128xbf16>
    %cst = arith.constant dense<0.000000e+00> : vector<256x128xf32>
    %2 = tpu.matmul %0, %1, %cst {dimension_numbers = #tpu.dot_dimension_numbers<[1], [0], [0], [1], [0, 0, 1, 1], [], []>} : vector<256x128xbf16>, vector<128x128xbf16>, vector<256x128xf32> -> vector<256x128xf32>
    %cst_3 = arith.constant dense<0.000000e+00> : vector<128xf32>
    %3 = vector.multi_reduction <add>, %2, %cst_3 [0] : vector<256x128xf32> to vector<128xf32>
    %4 = vector.shape_cast %3 : vector<128xf32> to vector<1x128xf32>
    %cst_4 = arith.constant 0.00413223123 : f32
    %5 = vector.broadcast %cst_4 : f32 to vector<1x128xf32>
    %6 = arith.mulf %4, %5 : vector<1x128xf32>
    %7 = arith.mulf %2, %2 : vector<256x128xf32>
    %cst_5 = arith.constant dense<0.000000e+00> : vector<128xf32>
    %8 = vector.multi_reduction <add>, %7, %cst_5 [0] : vector<256x128xf32> to vector<128xf32>
    %9 = vector.shape_cast %8 : vector<128xf32> to vector<1x128xf32>
    %cst_6 = arith.constant 0.00413223123 : f32
    %10 = vector.broadcast %cst_6 : f32 to vector<1x128xf32>
    %11 = arith.mulf %9, %10 : vector<1x128xf32>
    %12 = arith.mulf %6, %6 : vector<1x128xf32>
    %13 = arith.subf %11, %12 : vector<1x128xf32>
    %cst_7 = arith.constant 0.000000e+00 : f32
    %14 = vector.broadcast %cst_7 : f32 to vector<1x128xf32>
    %15 = arith.maximumf %13, %14 : vector<1x128xf32>
    %cst_8 = arith.constant 9.99999974E-6 : f32
    %16 = vector.broadcast %cst_8 : f32 to vector<1x128xf32>
    %17 = arith.addf %15, %16 : vector<1x128xf32>
    %18 = math.rsqrt %17 : vector<1x128xf32>
    %19 = vector.broadcast %6 : vector<1x128xf32> to vector<256x128xf32>
    %20 = arith.subf %2, %19 : vector<256x128xf32>
    %21 = vector.broadcast %18 : vector<1x128xf32> to vector<256x128xf32>
    %22 = arith.mulf %20, %21 : vector<256x128xf32>
    %cst_9 = arith.constant 0.000000e+00 : f32
    %23 = vector.broadcast %cst_9 : f32 to vector<256x128xf32>
    %24 = arith.maximumf %22, %23 : vector<256x128xf32>
    %25 = arith.truncf %24 : vector<256x128xf32> to vector<256x128xbf16>
    %c0_10 = arith.constant 0 : index
    %c0_11 = arith.constant 0 : index
    %26 = vector.load %arg2[%c0_10, %c0_11] : memref<256x128xbf16, #tpu.memory_space<vmem>>, vector<256x128xbf16>
    tpu.vector_store %arg2[%c0_10, %c0_11], %25 {strides = array<i32>} : memref<256x128xbf16, #tpu.memory_space<vmem>>, vector<256x128xbf16>,
    return
  }
}

module attributes {stable_mosaic.version = 11 : i64} {
  func.func @_conv_bn_relu_kernel(%arg0: memref<64x256xbf16, #tpu.memory_space<vmem>>, %arg1: memref<256x128xbf16, #tpu.memory_space<vmem>>, %arg2: memref<64x128xbf16, #tpu.memory_space<vmem>>) attributes {dimension_semantics = [], scalar_prefetch = 0 : i64, scratch_operands = 0 : i64, tpu.core_type = #tpu.core_type<tc>} {
    %c0 = arith.constant 0 : index
    %c0_0 = arith.constant 0 : index
    %0 = vector.load %arg0[%c0, %c0_0] : memref<64x256xbf16, #tpu.memory_space<vmem>>, vector<64x256xbf16>
    %c0_1 = arith.constant 0 : index
    %c0_2 = arith.constant 0 : index
    %1 = vector.load %arg1[%c0_1, %c0_2] : memref<256x128xbf16, #tpu.memory_space<vmem>>, vector<256x128xbf16>
    %cst = arith.constant dense<0.000000e+00> : vector<64x128xf32>
    %2 = tpu.matmul %0, %1, %cst {dimension_numbers = #tpu.dot_dimension_numbers<[1], [0], [0], [1], [0, 0, 1, 1], [], []>} : vector<64x256xbf16>, vector<256x128xbf16>, vector<64x128xf32> -> vector<64x128xf32>
    %cst_3 = arith.constant dense<0.000000e+00> : vector<128xf32>
    %3 = vector.multi_reduction <add>, %2, %cst_3 [0] : vector<64x128xf32> to vector<128xf32>
    %4 = vector.shape_cast %3 : vector<128xf32> to vector<1x128xf32>
    %cst_4 = arith.constant 2.000000e-02 : f32
    %5 = vector.broadcast %cst_4 : f32 to vector<1x128xf32>
    %6 = arith.mulf %4, %5 : vector<1x128xf32>
    %7 = arith.mulf %2, %2 : vector<64x128xf32>
    %cst_5 = arith.constant dense<0.000000e+00> : vector<128xf32>
    %8 = vector.multi_reduction <add>, %7, %cst_5 [0] : vector<64x128xf32> to vector<128xf32>
    %9 = vector.shape_cast %8 : vector<128xf32> to vector<1x128xf32>
    %cst_6 = arith.constant 2.000000e-02 : f32
    %10 = vector.broadcast %cst_6 : f32 to vector<1x128xf32>
    %11 = arith.mulf %9, %10 : vector<1x128xf32>
    %12 = arith.mulf %6, %6 : vector<1x128xf32>
    %13 = arith.subf %11, %12 : vector<1x128xf32>
    %cst_7 = arith.constant 0.000000e+00 : f32
    %14 = vector.broadcast %cst_7 : f32 to vector<1x128xf32>
    %15 = arith.maximumf %13, %14 : vector<1x128xf32>
    %cst_8 = arith.constant 9.99999974E-6 : f32
    %16 = vector.broadcast %cst_8 : f32 to vector<1x128xf32>
    %17 = arith.addf %15, %16 : vector<1x128xf32>
    %18 = math.rsqrt %17 : vector<1x128xf32>
    %19 = vector.broadcast %6 : vector<1x128xf32> to vector<64x128xf32>
    %20 = arith.subf %2, %19 : vector<64x128xf32>
    %21 = vector.broadcast %18 : vector<1x128xf32> to vector<64x128xf32>
    %22 = arith.mulf %20, %21 : vector<64x128xf32>
    %cst_9 = arith.constant 0.000000e+00 : f32
    %23 = vector.broadcast %cst_9 : f32 to vector<64x128xf32>
    %24 = arith.maximumf %22, %23 : vector<64x128xf32>
    %25 = arith.truncf %24 : vector<64x128xf32> to vector<64x128xbf16>
    %c0_10 = arith.constant 0 : index
    %c0_11 = arith.constant 0 : index
    %26 = vector.load %arg2[%c0_10, %c0_11] : memref<64x128xbf16, #tpu.memory_space<vmem>>, vector<64x128xbf16>
    tpu.vector_store %arg2[%c0_10, %c0_11], %25 {strides = array<i32>} : memref<64x128xbf16, #tpu.memory_space<vmem>>, vector<64x128xbf16>,
    return
  }
}

module attributes {stable_mosaic.version = 11 : i64} {
  func.func @_fc_fused_kernel(%arg0: memref<16x1200xbf16, #tpu.memory_space<vmem>>, %arg1: memref<1200x1280xbf16, #tpu.memory_space<vmem>>, %arg2: memref<1x1280xf32, #tpu.memory_space<vmem>>, %arg3: memref<1280x128xbf16, #tpu.memory_space<vmem>>, %arg4: memref<1x128xf32, #tpu.memory_space<vmem>>, %arg5: memref<128x128xbf16, #tpu.memory_space<vmem>>, %arg6: memref<1x128xf32, #tpu.memory_space<vmem>>, %arg7: memref<16x128xf32, #tpu.memory_space<vmem>>) attributes {dimension_semantics = [], scalar_prefetch = 0 : i64, scratch_operands = 0 : i64, tpu.core_type = #tpu.core_type<tc>} {
    %c0 = arith.constant 0 : index
    %c0_0 = arith.constant 0 : index
    %0 = vector.load %arg0[%c0, %c0_0] : memref<16x1200xbf16, #tpu.memory_space<vmem>>, vector<16x1200xbf16>
    %c0_1 = arith.constant 0 : index
    %c0_2 = arith.constant 0 : index
    %1 = vector.load %arg1[%c0_1, %c0_2] : memref<1200x1280xbf16, #tpu.memory_space<vmem>>, vector<1200x1280xbf16>
    %cst = arith.constant dense<0.000000e+00> : vector<16x1280xf32>
    %2 = tpu.matmul %0, %1, %cst {dimension_numbers = #tpu.dot_dimension_numbers<[1], [0], [0], [1], [0, 0, 1, 1], [], []>} : vector<16x1200xbf16>, vector<1200x1280xbf16>, vector<16x1280xf32> -> vector<16x1280xf32>
    %c0_3 = arith.constant 0 : index
    %c0_4 = arith.constant 0 : index
    %3 = vector.load %arg2[%c0_3, %c0_4] : memref<1x1280xf32, #tpu.memory_space<vmem>>, vector<1x1280xf32>
    %4 = vector.broadcast %3 : vector<1x1280xf32> to vector<16x1280xf32>
    %5 = arith.addf %2, %4 : vector<16x1280xf32>
    %cst_5 = arith.constant 0.000000e+00 : f32
    %6 = vector.broadcast %cst_5 : f32 to vector<16x1280xf32>
    %7 = arith.maximumf %5, %6 : vector<16x1280xf32>
    %8 = arith.truncf %7 : vector<16x1280xf32> to vector<16x1280xbf16>
    %c0_6 = arith.constant 0 : index
    %c0_7 = arith.constant 0 : index
    %9 = vector.load %arg3[%c0_6, %c0_7] : memref<1280x128xbf16, #tpu.memory_space<vmem>>, vector<1280x128xbf16>
    %cst_8 = arith.constant dense<0.000000e+00> : vector<16x128xf32>
    %10 = tpu.matmul %8, %9, %cst_8 {dimension_numbers = #tpu.dot_dimension_numbers<[1], [0], [0], [1], [0, 0, 1, 1], [], []>} : vector<16x1280xbf16>, vector<1280x128xbf16>, vector<16x128xf32> -> vector<16x128xf32>
    %c0_9 = arith.constant 0 : index
    %c0_10 = arith.constant 0 : index
    %11 = vector.load %arg4[%c0_9, %c0_10] : memref<1x128xf32, #tpu.memory_space<vmem>>, vector<1x128xf32>
    %12 = vector.broadcast %11 : vector<1x128xf32> to vector<16x128xf32>
    %13 = arith.addf %10, %12 : vector<16x128xf32>
    %cst_11 = arith.constant 0.000000e+00 : f32
    %14 = vector.broadcast %cst_11 : f32 to vector<16x128xf32>
    %15 = arith.maximumf %13, %14 : vector<16x128xf32>
    %16 = arith.truncf %15 : vector<16x128xf32> to vector<16x128xbf16>
    %c0_12 = arith.constant 0 : index
    %c0_13 = arith.constant 0 : index
    %17 = vector.load %arg5[%c0_12, %c0_13] : memref<128x128xbf16, #tpu.memory_space<vmem>>, vector<128x128xbf16>
    %cst_14 = arith.constant dense<0.000000e+00> : vector<16x128xf32>
    %18 = tpu.matmul %16, %17, %cst_14 {dimension_numbers = #tpu.dot_dimension_numbers<[1], [0], [0], [1], [0, 0, 1, 1], [], []>} : vector<16x128xbf16>, vector<128x128xbf16>, vector<16x128xf32> -> vector<16x128xf32>
    %c0_15 = arith.constant 0 : index
    %c0_16 = arith.constant 0 : index
    %19 = vector.load %arg6[%c0_15, %c0_16] : memref<1x128xf32, #tpu.memory_space<vmem>>, vector<1x128xf32>
    %20 = vector.broadcast %19 : vector<1x128xf32> to vector<16x128xf32>
    %21 = arith.addf %18, %20 : vector<16x128xf32>
    %c0_17 = arith.constant 0 : index
    %c0_18 = arith.constant 0 : index
    %22 = vector.load %arg7[%c0_17, %c0_18] : memref<16x128xf32, #tpu.memory_space<vmem>>, vector<16x128xf32>
    tpu.vector_store %arg7[%c0_17, %c0_18], %21 {strides = array<i32>} : memref<16x128xf32, #tpu.memory_space<vmem>>, vector<16x128xf32>,
    return
  }
}

</mosaic_0001>

<bundles_post_ra>
// kernel: conv3_forward.4
= control target key start
LH: loop header
LB: loop body
LE: loop exit
PB: predicated region body
PF: predicated region fallthrough
CT: control target
= control target key end

     0   :  { %v3874_v0 = vmov 0.0   ;;  %vm3875_vm0 = vmmov 0   ;;  %s6617_s1 = inlined_call_operand.vmem [shape: bf16[128,128], index: 1, kind: input, shape index: {}]   ;;  %s6618_s0 = inlined_call_operand.vmem [shape: bf16[1072,128], index: 0, kind: input, shape index: {}]   ;;  %s6619_s2 = inlined_call_operand.vmem [shape: bf16[1072,128], index: 2, kind: output, shape index: {}]  }
   0x1   :  { %3495 = vmatprep.subr.bf16.mxu0 %v3874_v0  ;;  %v3797_v1 = vld [vmem:[%s6617_s1] sm:$0xff]   ;;  %3511 = vmatprep.mubr.msk.bf16.mxu0 %vm3875_vm0, %v3874_v0  ;;  %v3798_v2 = vld [vmem:[%s6617_s1 + $0x8] sm:$0xff]   ;;  %v3799_v3 = vld [vmem:[%s6617_s1 + $0x10] sm:$0xff]  }
   0x2   :  { %3779 = vmatprep.subr.bf16.mxu1 %v3874_v0  ;;  %3647 = vmatprep.mubr.msk.bf16.mxu1 %vm3875_vm0, %v3874_v0  ;;  %v3800_v4 = vld [vmem:[%s6617_s1 + $0x18] sm:$0xff]   ;;  %v3801_v5 = vld [vmem:[%s6617_s1 + $0x20] sm:$0xff]   ;;  %v3802_v6 = vld [vmem:[%s6617_s1 + $0x28] sm:$0xff]  }
   0x3   :  { %3496 = vmatpush3.bf16.msra.mxu0 %v3797_v1  ;;  %3787 = vmatpush3.bf16.msra.mxu1 %v3797_v1  ;;  %v3803_v7 = vld [vmem:[%s6617_s1 + $0x30] sm:$0xff]   ;;  %v3804_v8 = vld [vmem:[%s6617_s1 + $0x38] sm:$0xff]   ;;  %v3805_v9 = vld [vmem:[%s6618_s0] sm:$0xff]  }
   0x4   :  { %3497 = vmatprep.subr.bf16.mxu0 %v3874_v0  ;;  %3780 = vmatprep.subr.bf16.mxu1 %v3874_v0  ;;  %v3806_v10 = vld [vmem:[%s6618_s0 + $0x8] sm:$0xff]   ;;  %v3823_v11 = vld [vmem:[%s6618_s0 + $0x110] sm:$0xff]   ;;  %v3825_v13 = vld [vmem:[%s6618_s0 + $0x118] sm:$0xff]  }
   0x5   :  { %v3807_v12 = vld [vmem:[%s6618_s0 + $0x10] sm:$0xff]   ;;  %v3808_v14 = vld [vmem:[%s6618_s0 + $0x18] sm:$0xff]   ;;  %v3827_v15 = vld [vmem:[%s6618_s0 + $0x120] sm:$0xff]  }
   0x6   :  { %v3809_v16 = vld [vmem:[%s6618_s0 + $0x20] sm:$0xff]   ;;  %v3829_v17 = vld [vmem:[%s6618_s0 + $0x128] sm:$0xff]   ;;  %v3831_v19 = vld [vmem:[%s6618_s0 + $0x130] sm:$0xff]  }
   0x7   :  { %3498 = vmatpush3.bf16.msra.mxu0 %v3798_v2  ;;  %3788 = vmatpush3.bf16.msra.mxu1 %v3798_v2  ;;  %v3810_v18 = vld [vmem:[%s6618_s0 + $0x28] sm:$0xff]   ;;  %v3811_v20 = vld [vmem:[%s6618_s0 + $0x30] sm:$0xff]   ;;  %v3833_v21 = vld [vmem:[%s6618_s0 + $0x138] sm:$0xff]  }
   0x8   :  { %3499 = vmatprep.subr.bf16.mxu0 %v3874_v0  ;;  %3781 = vmatprep.subr.bf16.mxu1 %v3874_v0  ;;  %v3812_v22 = vld [vmem:[%s6618_s0 + $0x38] sm:$0xff]   ;;  %v3835_v23 = vld [vmem:[%s6618_s0 + $0x140] sm:$0xff]   ;;  %v3837_v25 = vld [vmem:[%s6618_s0 + $0x148] sm:$0xff]  }
   0x9   :  { %v3813_v24 = vld [vmem:[%s6618_s0 + $0x40] sm:$0xff]   ;;  %v3814_v26 = vld [vmem:[%s6618_s0 + $0x48] sm:$0xff]   ;;  %v3839_v27 = vld [vmem:[%s6618_s0 + $0x150] sm:$0xff]  }
   0xa   :  { %v3815_v28 = vld [vmem:[%s6618_s0 + $0x50] sm:$0xff]   ;;  %v3841_v29 = vld [vmem:[%s6618_s0 + $0x158] sm:$0xff]   ;;  %v3843_v31 = vld [vmem:[%s6618_s0 + $0x160] sm:$0xff]  }
   0xb   :  { %3500 = vmatpush3.bf16.msra.mxu0 %v3799_v3  ;;  %3789 = vmatpush3.bf16.msra.mxu1 %v3799_v3  ;;  %v3816_v30 = vld [vmem:[%s6618_s0 + $0x58] sm:$0xff]   ;;  %v3817_v32 = vld [vmem:[%s6618_s0 + $0x60] sm:$0xff]   ;;  %v3845_v33 = vld [vmem:[%s6618_s0 + $0x168] sm:$0xff]  }
   0xc   :  { %3501 = vmatprep.subr.bf16.mxu0 %v3874_v0  ;;  %3782 = vmatprep.subr.bf16.mxu1 %v3874_v0  ;;  %v3818_v34 = vld [vmem:[%s6618_s0 + $0x68] sm:$0xff]   ;;  %v3847_v35 = vld [vmem:[%s6618_s0 + $0x170] sm:$0xff]   ;;  %v3849_v37 = vld [vmem:[%s6618_s0 + $0x178] sm:$0xff]  }
   0xd   :  { %v3819_v36 = vld [vmem:[%s6618_s0 + $0x70] sm:$0xff]   ;;  %v3820_v38 = vld [vmem:[%s6618_s0 + $0x78] sm:$0xff]   ;;  %v3851_v39 = vld [vmem:[%s6618_s0 + $0x180] sm:$0xff]  }
   0xe   :  { %v3821_v40 = vld [vmem:[%s6618_s0 + $0x80] sm:$0xff]   ;;  %v3853_v41 = vld [vmem:[%s6618_s0 + $0x188] sm:$0xff]   ;;  %v3855_v43 = vld [vmem:[%s6618_s0 + $0x190] sm:$0xff]  }
   0xf   :  { %3502 = vmatpush3.bf16.msra.mxu0 %v3800_v4  ;;  %3790 = vmatpush3.bf16.msra.mxu1 %v3800_v4  ;;  %v3822_v42 = vld [vmem:[%s6618_s0 + $0x88] sm:$0xff]   ;;  %v3824_v44 = vld [vmem:[%s6618_s0 + $0x90] sm:$0xff]   ;;  %v3856_v45 = vld [vmem:[%s6618_s0 + $0x198] sm:$0xff]  }
  0x10   :  { %3503 = vmatprep.subr.bf16.mxu0 %v3874_v0  ;;  %3783 = vmatprep.subr.bf16.mxu1 %v3874_v0  ;;  %v3826_v46 = vld [vmem:[%s6618_s0 + $0x98] sm:$0xff]   ;;  %v3857_v47 = vld [vmem:[%s6618_s0 + $0x1a0] sm:$0xff]   ;;  %v3858_v49 = vld [vmem:[%s6618_s0 + $0x1a8] sm:$0xff]  }
  0x11   :  { %v3828_v48 = vld [vmem:[%s6618_s0 + $0xa0] sm:$0xff]   ;;  %v3830_v50 = vld [vmem:[%s6618_s0 + $0xa8] sm:$0xff]   ;;  %v3859_v51 = vld [vmem:[%s6618_s0 + $0x1b0] sm:$0xff]  }
  0x12   :  { %v3832_v52 = vld [vmem:[%s6618_s0 + $0xb0] sm:$0xff]   ;;  %v3860_v53 = vld [vmem:[%s6618_s0 + $0x1b8] sm:$0xff]   ;;  %v3861_v55 = vld [vmem:[%s6618_s0 + $0x1c0] sm:$0xff]  }
  0x13   :  { %3504 = vmatpush3.bf16.msra.mxu0 %v3801_v5  ;;  %3791 = vmatpush3.bf16.msra.mxu1 %v3801_v5  ;;  %v3834_v54 = vld [vmem:[%s6618_s0 + $0xb8] sm:$0xff]   ;;  %v3836_v56 = vld [vmem:[%s6618_s0 + $0xc0] sm:$0xff]   ;;  %v3862_v57 = vld [vmem:[%s6618_s0 + $0x1c8] sm:$0xff]  }
  0x14   :  { %3505 = vmatprep.subr.bf16.mxu0 %v3874_v0  ;;  %3784 = vmatprep.subr.bf16.mxu1 %v3874_v0  ;;  %v3838_v58 = vld [vmem:[%s6618_s0 + $0xc8] sm:$0xff]   ;;  %v3863_v59 = vld [vmem:[%s6618_s0 + $0x1d0] sm:$0xff]   ;;  %v3864_v61 = vld [vmem:[%s6618_s0 + $0x1d8] sm:$0xff]  }
  0x15   :  { %v3840_v60 = vld [vmem:[%s6618_s0 + $0xd0] sm:$0xff]   ;;  %v3842_v1 = vld [vmem:[%s6618_s0 + $0xd8] sm:$0xff]  }
  0x17   :  { %3506 = vmatpush3.bf16.msra.mxu0 %v3802_v6  ;;  %3792 = vmatpush3.bf16.msra.mxu1 %v3802_v6 }
  0x18   :  { %3507 = vmatprep.subr.bf16.mxu0 %v3874_v0  ;;  %3785 = vmatprep.subr.bf16.mxu1 %v3874_v0 }
  0x1b   :  { %3508 = vmatpush3.bf16.msra.mxu0 %v3803_v7  ;;  %3793 = vmatpush3.bf16.msra.mxu1 %v3803_v7  ;;  %v3865_v7 = vld [vmem:[%s6618_s0 + $0x1e0] sm:$0xff]  }
  0x1c   :  { %3509 = vmatprep.subr.bf16.mxu0 %v3874_v0  ;;  %3786 = vmatprep.subr.bf16.mxu1 %v3874_v0 }
  0x1f   :  { %3510 = vmatpush3.bf16.msra.mxu0 %v3804_v8  ;;  %3794 = vmatpush3.bf16.msra.mxu1 %v3804_v8 }
  0x22   :  { %3512 = vmatmul.mubr.bf16.vlgmr.msra.gmra.mrb[0].mxu0 %v3805_v9  ;;  %3648 = vmatmul.mubr.bf16.vlgmr.msra.gmra.mrb[0].mxu1 %v3823_v11 }
  0x23   :  { %3515 = vmatprep.mubr.msk.bf16.mxu0 %vm3875_vm0, %v3874_v0  ;;  %3651 = vmatprep.mubr.msk.bf16.mxu1 %vm3875_vm0, %v3874_v0 }
  0x2a   :  { %3516 = vmatmul.mubr.bf16.gmra.mrb[4].mxu0 %v3806_v10  ;;  %3652 = vmatmul.mubr.bf16.gmra.mrb[4].mxu1 %v3825_v13  ;;  %v3844_v13 = vld [vmem:[%s6618_s0 + $0xe0] sm:$0xff]  }
  0x2b   :  { %3519 = vmatprep.mubr.msk.bf16.mxu0 %vm3875_vm0, %v3874_v0  ;;  %3655 = vmatprep.mubr.msk.bf16.mxu1 %vm3875_vm0, %v3874_v0 }
  0x32   :  { %3520 = vmatmul.mubr.bf16.gmra.mrb[8].mxu0 %v3807_v12  ;;  %3656 = vmatmul.mubr.bf16.gmra.mrb[8].mxu1 %v3827_v15 }
  0x33   :  { %3523 = vmatprep.mubr.msk.bf16.mxu0 %vm3875_vm0, %v3874_v0  ;;  %3659 = vmatprep.mubr.msk.bf16.mxu1 %vm3875_vm0, %v3874_v0 }
  0x3a   :  { %3524 = vmatmul.mubr.bf16.gmra.mrb[12].mxu0 %v3808_v14  ;;  %3660 = vmatmul.mubr.bf16.gmra.mrb[12].mxu1 %v3829_v17 }
  0x3b   :  { %3527 = vmatprep.mubr.msk.bf16.mxu0 %vm3875_vm0, %v3874_v0  ;;  %3663 = vmatprep.mubr.msk.bf16.mxu1 %vm3875_vm0, %v3874_v0 }
  0x42   :  { %3528 = vmatmul.mubr.bf16.gmra.mrb[16].mxu0 %v3809_v16  ;;  %3664 = vmatmul.mubr.bf16.gmra.mrb[16].mxu1 %v3831_v19 }
  0x43   :  { %3531 = vmatprep.mubr.msk.bf16.mxu0 %vm3875_vm0, %v3874_v0  ;;  %3667 = vmatprep.mubr.msk.bf16.mxu1 %vm3875_vm0, %v3874_v0 }
  0x4a   :  { %3532 = vmatmul.mubr.bf16.gmra.mrb[20].mxu0 %v3810_v18  ;;  %3668 = vmatmul.mubr.bf16.gmra.mrb[20].mxu1 %v3833_v21 }
  0x4b   :  { %3535 = vmatprep.mubr.msk.bf16.mxu0 %vm3875_vm0, %v3874_v0  ;;  %3671 = vmatprep.mubr.msk.bf16.mxu1 %vm3875_vm0, %v3874_v0 }
  0x52   :  { %3536 = vmatmul.mubr.bf16.gmra.mrb[24].mxu0 %v3811_v20  ;;  %3672 = vmatmul.mubr.bf16.gmra.mrb[24].mxu1 %v3835_v23  ;;  %v3866_v23 = vld [vmem:[%s6618_s0 + $0x1e8] sm:$0xff]  }
  0x53   :  { %3539 = vmatprep.mubr.msk.bf16.mxu0 %vm3875_vm0, %v3874_v0  ;;  %3675 = vmatprep.mubr.msk.bf16.mxu1 %vm3875_vm0, %v3874_v0 }
  0x5a   :  { %3540 = vmatmul.mubr.bf16.gmra.mrb[28].mxu0 %v3812_v22  ;;  %3676 = vmatmul.mubr.bf16.gmra.mrb[28].mxu1 %v3837_v25 }
  0x5b   :  { %3543 = vmatprep.mubr.msk.bf16.mxu0 %vm3875_vm0, %v3874_v0  ;;  %3679 = vmatprep.mubr.msk.bf16.mxu1 %vm3875_vm0, %v3874_v0 }
  0x62   :  { %3544 = vmatmul.mubr.bf16.gmra.mrb[32].mxu0 %v3813_v24  ;;  %3680 = vmatmul.mubr.bf16.gmra.mrb[32].mxu1 %v3839_v27 }
  0x63   :  { %3547 = vmatprep.mubr.msk.bf16.mxu0 %vm3875_vm0, %v3874_v0  ;;  %3683 = vmatprep.mubr.msk.bf16.mxu1 %vm3875_vm0, %v3874_v0 }
  0x6a   :  { %3548 = vmatmul.mubr.bf16.gmra.mrb[36].mxu0 %v3814_v26  ;;  %3684 = vmatmul.mubr.bf16.gmra.mrb[36].mxu1 %v3841_v29  ;;  %v3846_v29 = vld [vmem:[%s6618_s0 + $0xe8] sm:$0xff]  }
  0x6b   :  { %3551 = vmatprep.mubr.msk.bf16.mxu0 %vm3875_vm0, %v3874_v0  ;;  %3687 = vmatprep.mubr.msk.bf16.mxu1 %vm3875_vm0, %v3874_v0 }
  0x72   :  { %3552 = vmatmul.mubr.bf16.gmra.mrb[40].mxu0 %v3815_v28  ;;  %3688 = vmatmul.mubr.bf16.gmra.mrb[40].mxu1 %v3843_v31 }
  0x73   :  { %3555 = vmatprep.mubr.msk.bf16.mxu0 %vm3875_vm0, %v3874_v0  ;;  %3691 = vmatprep.mubr.msk.bf16.mxu1 %vm3875_vm0, %v3874_v0 }
  0x7a   :  { %3556 = vmatmul.mubr.bf16.gmra.mrb[44].mxu0 %v3816_v30  ;;  %3692 = vmatmul.mubr.bf16.gmra.mrb[44].mxu1 %v3845_v33 }
  0x7b   :  { %3559 = vmatprep.mubr.msk.bf16.mxu0 %vm3875_vm0, %v3874_v0  ;;  %3695 = vmatprep.mubr.msk.bf16.mxu1 %vm3875_vm0, %v3874_v0 }
  0x82   :  { %3560 = vmatmul.mubr.bf16.gmra.mrb[48].mxu0 %v3817_v32  ;;  %3696 = vmatmul.mubr.bf16.gmra.mrb[48].mxu1 %v3847_v35 }
  0x83   :  { %3563 = vmatprep.mubr.msk.bf16.mxu0 %vm3875_vm0, %v3874_v0  ;;  %3699 = vmatprep.mubr.msk.bf16.mxu1 %vm3875_vm0, %v3874_v0 }
  0x8a   :  { %3564 = vmatmul.mubr.bf16.gmra.mrb[52].mxu0 %v3818_v34  ;;  %3700 = vmatmul.mubr.bf16.gmra.mrb[52].mxu1 %v3849_v37 }
  0x8b   :  { %3567 = vmatprep.mubr.msk.bf16.mxu0 %vm3875_vm0, %v3874_v0  ;;  %3703 = vmatprep.mubr.msk.bf16.mxu1 %vm3875_vm0, %v3874_v0 }
  0x92   :  { %3568 = vmatmul.mubr.bf16.gmra.mrb[56].mxu0 %v3819_v36  ;;  %3704 = vmatmul.mubr.bf16.gmra.mrb[56].mxu1 %v3851_v39  ;;  %v3867_v39 = vld [vmem:[%s6618_s0 + $0x1f0] sm:$0xff]  }
  0x93   :  { %3571 = vmatprep.mubr.msk.bf16.mxu0 %vm3875_vm0, %v3874_v0  ;;  %3707 = vmatprep.mubr.msk.bf16.mxu1 %vm3875_vm0, %v3874_v0 }
  0x9a   :  { %3572 = vmatmul.mubr.bf16.gmra.mrb[60].mxu0 %v3820_v38  ;;  %3708 = vmatmul.mubr.bf16.gmra.mrb[60].mxu1 %v3853_v41 }
  0x9b   :  { %3575 = vmatprep.mubr.msk.bf16.mxu0 %vm3875_vm0, %v3874_v0  ;;  %3711 = vmatprep.mubr.msk.bf16.mxu1 %vm3875_vm0, %v3874_v0 }
  0xa2   :  { %3576 = vmatmul.mubr.bf16.gmra.mrb[64].mxu0 %v3821_v40  ;;  %3712 = vmatmul.mubr.bf16.gmra.mrb[64].mxu1 %v3855_v43 }
  0xa3   :  { %3579 = vmatprep.mubr.msk.bf16.mxu0 %vm3875_vm0, %v3874_v0  ;;  %3715 = vmatprep.mubr.msk.bf16.mxu1 %vm3875_vm0, %v3874_v0 }
  0xaa   :  { %3580 = vmatmul.mubr.bf16.gmra.mrb[68].mxu0 %v3822_v42  ;;  %3716 = vmatmul.mubr.bf16.gmra.mrb[68].mxu1 %v3856_v45  ;;  %v3848_v45 = vld [vmem:[%s6618_s0 + $0xf0] sm:$0xff]  }
  0xab   :  { %3583 = vmatprep.mubr.msk.bf16.mxu0 %vm3875_vm0, %v3874_v0  ;;  %3719 = vmatprep.mubr.msk.bf16.mxu1 %vm3875_vm0, %v3874_v0 }
  0xb2   :  { %3584 = vmatmul.mubr.bf16.gmra.mrb[72].mxu0 %v3824_v44  ;;  %3720 = vmatmul.mubr.bf16.gmra.mrb[72].mxu1 %v3857_v47 }
  0xb3   :  { %3587 = vmatprep.mubr.msk.bf16.mxu0 %vm3875_vm0, %v3874_v0  ;;  %3723 = vmatprep.mubr.msk.bf16.mxu1 %vm3875_vm0, %v3874_v0 }
  0xba   :  { %3588 = vmatmul.mubr.bf16.gmra.mrb[76].mxu0 %v3826_v46  ;;  %3724 = vmatmul.mubr.bf16.gmra.mrb[76].mxu1 %v3858_v49 }
  0xbb   :  { %3591 = vmatprep.mubr.msk.bf16.mxu0 %vm3875_vm0, %v3874_v0  ;;  %3727 = vmatprep.mubr.msk.bf16.mxu1 %vm3875_vm0, %v3874_v0 }
  0xc2   :  { %3592 = vmatmul.mubr.bf16.gmra.mrb[80].mxu0 %v3828_v48  ;;  %3728 = vmatmul.mubr.bf16.gmra.mrb[80].mxu1 %v3859_v51 }
  0xc3   :  { %3595 = vmatprep.mubr.msk.bf16.mxu0 %vm3875_vm0, %v3874_v0  ;;  %3731 = vmatprep.mubr.msk.bf16.mxu1 %vm3875_vm0, %v3874_v0 }
  0xca   :  { %3596 = vmatmul.mubr.bf16.gmra.mrb[84].mxu0 %v3830_v50  ;;  %3732 = vmatmul.mubr.bf16.gmra.mrb[84].mxu1 %v3860_v53 }
  0xcb   :  { %3599 = vmatprep.mubr.msk.bf16.mxu0 %vm3875_vm0, %v3874_v0  ;;  %3735 = vmatprep.mubr.msk.bf16.mxu1 %vm3875_vm0, %v3874_v0 }
  0xd2   :  { %3600 = vmatmul.mubr.bf16.gmra.mrb[88].mxu0 %v3832_v52  ;;  %3736 = vmatmul.mubr.bf16.gmra.mrb[88].mxu1 %v3861_v55  ;;  %v3868_v55 = vld [vmem:[%s6618_s0 + $0x1f8] sm:$0xff]  }
  0xd3   :  { %3603 = vmatprep.mubr.msk.bf16.mxu0 %vm3875_vm0, %v3874_v0  ;;  %3739 = vmatprep.mubr.msk.bf16.mxu1 %vm3875_vm0, %v3874_v0 }
  0xda   :  { %3604 = vmatmul.mubr.bf16.gmra.mrb[92].mxu0 %v3834_v54  ;;  %3740 = vmatmul.mubr.bf16.gmra.mrb[92].mxu1 %v3862_v57 }
  0xdb   :  { %3607 = vmatprep.mubr.msk.bf16.mxu0 %vm3875_vm0, %v3874_v0  ;;  %3743 = vmatprep.mubr.msk.bf16.mxu1 %vm3875_vm0, %v3874_v0 }
  0xe2   :  { %3608 = vmatmul.mubr.bf16.gmra.mrb[96].mxu0 %v3836_v56  ;;  %3744 = vmatmul.mubr.bf16.gmra.mrb[96].mxu1 %v3863_v59 }
  0xe3   :  { %3611 = vmatprep.mubr.msk.bf16.mxu0 %vm3875_vm0, %v3874_v0  ;;  %3747 = vmatprep.mubr.msk.bf16.mxu1 %vm3875_vm0, %v3874_v0 }
  0xea   :  { %3612 = vmatmul.mubr.bf16.gmra.mrb[100].mxu0 %v3838_v58  ;;  %3748 = vmatmul.mubr.bf16.gmra.mrb[100].mxu1 %v3864_v61  ;;  %v3850_v61 = vld [vmem:[%s6618_s0 + $0xf8] sm:$0xff]  }
  0xeb   :  { %3615 = vmatprep.mubr.msk.bf16.mxu0 %vm3875_vm0, %v3874_v0  ;;  %3751 = vmatprep.mubr.msk.bf16.mxu1 %vm3875_vm0, %v3874_v0 }
  0xf2   :  { %3616 = vmatmul.mubr.bf16.gmra.mrb[104].mxu0 %v3840_v60  ;;  %3752 = vmatmul.mubr.bf16.gmra.mrb[104].mxu1 %v3865_v7 }
  0xf3   :  { %3619 = vmatprep.mubr.msk.bf16.mxu0 %vm3875_vm0, %v3874_v0  ;;  %3755 = vmatprep.mubr.msk.bf16.mxu1 %vm3875_vm0, %v3874_v0 }
  0xf5   :  { %v4200_v62 = vpop.f32.mrb[0].mxu0  ;;  %v4228_v14 = vpop.f32.mrb[0].mxu1 }
  0xf6   :  { %6916 = vst [vmem:[#allocation2_spill] sm:$0xff] %v4200_v62  ;;  %v3513_v63 = vpop.f32.mrb[1].mxu0  ;;  %v1321_v3 = vmul.f32 %v4200_v62, %v4200_v62  ;;  %v3649_v16 = vpop.f32.mrb[1].mxu1 }
  0xf7   :  { %v4205_v2 = vpop.f32.mrb[2].mxu0  ;;  %v4235_v21 = vpop.f32.mrb[2].mxu1 }
  0xf8   :  { %6917 = vst [vmem:[#allocation3_spill] sm:$0xff] %v4205_v2  ;;  %v1181_v4 = vadd.f32 %v4205_v2, %v4200_v62  ;;  %v1322_v5 = vmul.f32 %v4205_v2, %v4205_v2  ;;  %v3514_v6 = vpop.f32.mrb[3].mxu0  ;;  %v3650_v22 = vpop.f32.mrb[3].mxu1 }
  0xfa   :  { %v1455_v8 = vadd.f32 %v1322_v5, %v1321_v3  ;;  %3620 = vmatmul.mubr.bf16.gmra.mrb[108].mxu0 %v3842_v1  ;;  %3756 = vmatmul.mubr.bf16.gmra.mrb[108].mxu1 %v3866_v23 }
  0xfb   :  { %3623 = vmatprep.mubr.msk.bf16.mxu0 %vm3875_vm0, %v3874_v0  ;;  %3759 = vmatprep.mubr.msk.bf16.mxu1 %vm3875_vm0, %v3874_v0 }
  0xfd   :  { %v4220_v9 = vpop.f32.mrb[4].mxu0  ;;  %v4252_v30 = vpop.f32.mrb[4].mxu1 }
  0xfe   :  { %6918 = vst [vmem:[#allocation4_spill] sm:$0xff] %v4220_v9  ;;  %v1182_v10 = vadd.f32 %v1181_v4, %v4220_v9  ;;  %v1323_v11 = vmul.f32 %v4220_v9, %v4220_v9  ;;  %v3517_v12 = vpop.f32.mrb[5].mxu0  ;;  %v3653_v32 = vpop.f32.mrb[5].mxu1 }
  0xff   :  { %v4230_v15 = vpop.f32.mrb[6].mxu0  ;;  %v4259_v37 = vpop.f32.mrb[6].mxu1 }
 0x100   :  { %6919 = vst [vmem:[#allocation5_spill] sm:$0xff] %v4230_v15  ;;  %v1456_v17 = vadd.f32 %v1455_v8, %v1323_v11  ;;  %v1183_v18 = vadd.f32 %v1182_v10, %v4230_v15  ;;  %v1324_v19 = vmul.f32 %v4230_v15, %v4230_v15  ;;  %v3518_v20 = vpop.f32.mrb[7].mxu0  ;;  %v3654_v38 = vpop.f32.mrb[7].mxu1  ;;  %v3869_v11 = vld [vmem:[%s6618_s0 + $0x200] sm:$0xff]  }
 0x102   :  { %v1457_v24 = vadd.f32 %v1456_v17, %v1324_v19  ;;  %3624 = vmatmul.mubr.bf16.gmra.mrb[112].mxu0 %v3844_v13  ;;  %3760 = vmatmul.mubr.bf16.gmra.mrb[112].mxu1 %v3867_v39  ;;  %v3852_v19 = vld [vmem:[%s6618_s0 + $0x100] sm:$0xff]  }
 0x103   :  { %3627 = vmatprep.mubr.msk.bf16.mxu0 %vm3875_vm0, %v3874_v0  ;;  %3763 = vmatprep.mubr.msk.bf16.mxu1 %vm3875_vm0, %v3874_v0 }
 0x105   :  { %v4244_v25 = vpop.f32.mrb[8].mxu0  ;;  %v4276_v46 = vpop.f32.mrb[8].mxu1 }
 0x106   :  { %6920 = vst [vmem:[#allocation6_spill] sm:$0xff] %v4244_v25  ;;  %v1184_v26 = vadd.f32 %v1183_v18, %v4244_v25  ;;  %v1325_v27 = vmul.f32 %v4244_v25, %v4244_v25  ;;  %v3521_v28 = vpop.f32.mrb[9].mxu0  ;;  %v3657_v48 = vpop.f32.mrb[9].mxu1 }
 0x107   :  { %v4254_v31 = vpop.f32.mrb[10].mxu0  ;;  %v4283_v53 = vpop.f32.mrb[10].mxu1 }
 0x108   :  { %6921 = vst [vmem:[#allocation7_spill] sm:$0xff] %v4254_v31  ;;  %v1458_v33 = vadd.f32 %v1457_v24, %v1325_v27  ;;  %v1185_v34 = vadd.f32 %v1184_v26, %v4254_v31  ;;  %v1326_v35 = vmul.f32 %v4254_v31, %v4254_v31  ;;  %v3522_v36 = vpop.f32.mrb[11].mxu0  ;;  %v3658_v54 = vpop.f32.mrb[11].mxu1 }
 0x10a   :  { %v1459_v40 = vadd.f32 %v1458_v33, %v1326_v35  ;;  %3628 = vmatmul.mubr.bf16.gmra.mrb[116].mxu0 %v3846_v29  ;;  %3764 = vmatmul.mubr.bf16.gmra.mrb[116].mxu1 %v3868_v55  ;;  %v3870_v33 = vld [vmem:[%s6618_s0 + $0x208] sm:$0xff]  }
 0x10b   :  { %3631 = vmatprep.mubr.msk.bf16.mxu0 %vm3875_vm0, %v3874_v0  ;;  %3767 = vmatprep.mubr.msk.bf16.mxu1 %vm3875_vm0, %v3874_v0 }
 0x10d   :  { %v4268_v41 = vpop.f32.mrb[12].mxu0  ;;  %v4300_v63 = vpop.f32.mrb[12].mxu1 }
 0x10e   :  { %6922 = vst [vmem:[#allocation8_spill] sm:$0xff] %v4268_v41  ;;  %v1186_v42 = vadd.f32 %v1185_v34, %v4268_v41  ;;  %v1327_v43 = vmul.f32 %v4268_v41, %v4268_v41  ;;  %v3525_v44 = vpop.f32.mrb[13].mxu0  ;;  %v3661_v3 = vpop.f32.mrb[13].mxu1 }
 0x10f   :  { %v4278_v47 = vpop.f32.mrb[14].mxu0  ;;  %v4307_v8 = vpop.f32.mrb[14].mxu1 }
 0x110   :  { %6923 = vst [vmem:[#allocation9_spill] sm:$0xff] %v4278_v47  ;;  %v1460_v49 = vadd.f32 %v1459_v40, %v1327_v43  ;;  %v1187_v50 = vadd.f32 %v1186_v42, %v4278_v47  ;;  %v1328_v51 = vmul.f32 %v4278_v47, %v4278_v47  ;;  %v3526_v52 = vpop.f32.mrb[15].mxu0  ;;  %v3662_v10 = vpop.f32.mrb[15].mxu1  ;;  %v3854_v40 = vld [vmem:[%s6618_s0 + $0x108] sm:$0xff]  }
 0x111   :  { %v3871_v52 = vld [vmem:[%s6618_s0 + $0x210] sm:$0xff]  }
 0x112   :  { %v1461_v56 = vadd.f32 %v1460_v49, %v1328_v51  ;;  %3632 = vmatmul.mubr.bf16.gmra.mrb[120].mxu0 %v3848_v45  ;;  %3768 = vmatmul.mubr.bf16.gmra.mrb[120].mxu1 %v3869_v11 }
 0x113   :  { %3635 = vmatprep.mubr.msk.bf16.mxu0 %vm3875_vm0, %v3874_v0  ;;  %3771 = vmatprep.mubr.msk.bf16.mxu1 %vm3875_vm0, %v3874_v0 }
 0x115   :  { %v4292_v57 = vpop.f32.mrb[16].mxu0  ;;  %v4324_v20 = vpop.f32.mrb[16].mxu1 }
 0x116   :  { %6924 = vst [vmem:[#allocation10_spill] sm:$0xff] %v4292_v57  ;;  %v1188_v58 = vadd.f32 %v1187_v50, %v4292_v57  ;;  %v1329_v59 = vmul.f32 %v4292_v57, %v4292_v57  ;;  %v3529_v60 = vpop.f32.mrb[17].mxu0  ;;  %v3665_v23 = vpop.f32.mrb[17].mxu1 }
 0x117   :  { %v4302_v1 = vpop.f32.mrb[18].mxu0  ;;  %v4331_v29 = vpop.f32.mrb[18].mxu1 }
 0x118   :  { %6925 = vst [vmem:[#allocation11_spill] sm:$0xff] %v4302_v1  ;;  %v1462_v4 = vadd.f32 %v1461_v56, %v1329_v59  ;;  %v1189_v5 = vadd.f32 %v1188_v58, %v4302_v1  ;;  %v1330_v6 = vmul.f32 %v4302_v1, %v4302_v1  ;;  %v3530_v7 = vpop.f32.mrb[19].mxu0  ;;  %v3666_v32 = vpop.f32.mrb[19].mxu1 }
 0x11a   :  { %v1463_v12 = vadd.f32 %v1462_v4, %v1330_v6  ;;  %3636 = vmatmul.mubr.bf16.gmra.mrb[124].mxu0 %v3850_v61  ;;  %3772 = vmatmul.mubr.bf16.gmra.mrb[124].mxu1 %v3870_v33 }
 0x11b   :  { %3639 = vmatprep.mubr.msk.bf16.mxu0 %vm3875_vm0, %v3874_v0  ;;  %3775 = vmatprep.mubr.msk.bf16.mxu1 %vm3875_vm0, %v3874_v0 }
 0x11d   :  { %v4316_v13 = vpop.f32.mrb[20].mxu0  ;;  %v4348_v42 = vpop.f32.mrb[20].mxu1 }
 0x11e   :  { %6926 = vst [vmem:[#allocation12_spill] sm:$0xff] %v4316_v13  ;;  %v1190_v16 = vadd.f32 %v1189_v5, %v4316_v13  ;;  %v1331_v17 = vmul.f32 %v4316_v13, %v4316_v13  ;;  %v3533_v18 = vpop.f32.mrb[21].mxu0  ;;  %v3669_v44 = vpop.f32.mrb[21].mxu1 }
 0x11f   :  { %v4326_v22 = vpop.f32.mrb[22].mxu0  ;;  %v4355_v50 = vpop.f32.mrb[22].mxu1 }
 0x120   :  { %6927 = vst [vmem:[#allocation13_spill] sm:$0xff] %v4326_v22  ;;  %v1464_v24 = vadd.f32 %v1463_v12, %v1331_v17  ;;  %v1191_v26 = vadd.f32 %v1190_v16, %v4326_v22  ;;  %v1332_v27 = vmul.f32 %v4326_v22, %v4326_v22  ;;  %v3534_v28 = vpop.f32.mrb[23].mxu0  ;;  %v3670_v51 = vpop.f32.mrb[23].mxu1 }
 0x122   :  { %v1465_v34 = vadd.f32 %v1464_v24, %v1332_v27  ;;  %3640 = vmatmul.mubr.bf16.gmra.mrb[128].mxu0 %v3852_v19  ;;  %3776 = vmatmul.mubr.bf16.gmra.mrb[128].mxu1 %v3871_v52 }
 0x123   :  { %3643 = vmatprep.mubr.msk.bf16.mxu0 %vm3875_vm0, %v3874_v0 }
 0x125   :  { %v4340_v35 = vpop.f32.mrb[24].mxu0  ;;  %v4365_v60 = vpop.f32.mrb[24].mxu1 }
 0x126   :  { %6928 = vst [vmem:[#allocation14_spill] sm:$0xff] %v4340_v35  ;;  %v1192_v36 = vadd.f32 %v1191_v26, %v4340_v35  ;;  %v1333_v38 = vmul.f32 %v4340_v35, %v4340_v35  ;;  %v3537_v39 = vpop.f32.mrb[25].mxu0  ;;  %v3673_v3 = vpop.f32.mrb[25].mxu1 }
 0x127   :  { %v4350_v43 = vpop.f32.mrb[26].mxu0  ;;  %v4372_v10 = vpop.f32.mrb[26].mxu1 }
 0x128   :  { %6929 = vst [vmem:[#allocation15_spill] sm:$0xff] %v4350_v43  ;;  %v1466_v45 = vadd.f32 %v1465_v34, %v1333_v38  ;;  %v1193_v0 = vadd.f32 %v1192_v36, %v4350_v43  ;;  %v1334_v48 = vmul.f32 %v4350_v43, %v4350_v43  ;;  %v3538_v49 = vpop.f32.mrb[27].mxu0  ;;  %v3674_v11 = vpop.f32.mrb[27].mxu1 }
 0x12a   :  { %v1467_v54 = vadd.f32 %v1466_v45, %v1334_v48  ;;  %3644 = vmatmul.mubr.bf16.gmra.mrb[132].mxu0 %v3854_v40 }
 0x12d   :  { %v4360_v55 = vpop.f32.mrb[28].mxu0  ;;  %v4379_v23 = vpop.f32.mrb[28].mxu1 }
 0x12e   :  { %6930 = vst [vmem:[#allocation16_spill] sm:$0xff] %v4360_v55  ;;  %v1194_v56 = vadd.f32 %v1193_v0, %v4360_v55  ;;  %v1335_v58 = vmul.f32 %v4360_v55, %v4360_v55  ;;  %v3541_v59 = vpop.f32.mrb[29].mxu0  ;;  %v3677_v26 = vpop.f32.mrb[29].mxu1 }
 0x12f   :  { %v4367_v61 = vpop.f32.mrb[30].mxu0  ;;  %v4386_v34 = vpop.f32.mrb[30].mxu1 }
 0x130   :  { %6931 = vst [vmem:[#allocation17_spill] sm:$0xff] %v4367_v61  ;;  %v1468_v4 = vadd.f32 %v1467_v54, %v1335_v58  ;;  %v1195_v5 = vadd.f32 %v1194_v56, %v4367_v61  ;;  %v1336_v6 = vmul.f32 %v4367_v61, %v4367_v61  ;;  %v3542_v7 = vpop.f32.mrb[31].mxu0  ;;  %v3678_v36 = vpop.f32.mrb[31].mxu1 }
 0x132   :  { %v1469_v12 = vadd.f32 %v1468_v4, %v1336_v6 }
 0x135   :  { %v4374_v16 = vpop.f32.mrb[32].mxu0  ;;  %v4393_v0 = vpop.f32.mrb[32].mxu1 }
 0x136   :  { %6932 = vst [vmem:[#allocation18_spill] sm:$0xff] %v4374_v16  ;;  %v1196_v17 = vadd.f32 %v1195_v5, %v4374_v16  ;;  %v1337_v18 = vmul.f32 %v4374_v16, %v4374_v16  ;;  %v3545_v19 = vpop.f32.mrb[33].mxu0  ;;  %v3681_v49 = vpop.f32.mrb[33].mxu1 }
 0x137   :  { %v4381_v24 = vpop.f32.mrb[34].mxu0  ;;  %v4400_v58 = vpop.f32.mrb[34].mxu1 }
 0x138   :  { %6933 = vst [vmem:[#allocation19_spill] sm:$0xff] %v4381_v24  ;;  %v1470_v27 = vadd.f32 %v1469_v12, %v1337_v18  ;;  %v1197_v28 = vadd.f32 %v1196_v17, %v4381_v24  ;;  %v1338_v32 = vmul.f32 %v4381_v24, %v4381_v24  ;;  %v3546_v33 = vpop.f32.mrb[35].mxu0  ;;  %v3682_v59 = vpop.f32.mrb[35].mxu1 }
 0x13a   :  { %v1471_v38 = vadd.f32 %v1470_v27, %v1338_v32 }
 0x13d   :  { %v4388_v39 = vpop.f32.mrb[36].mxu0  ;;  %v4407_v11 = vpop.f32.mrb[36].mxu1 }
 0x13e   :  { %6934 = vst [vmem:[#allocation20_spill] sm:$0xff] %v4388_v39  ;;  %v1198_v40 = vadd.f32 %v1197_v28, %v4388_v39  ;;  %v1339_v44 = vmul.f32 %v4388_v39, %v4388_v39  ;;  %v3549_v45 = vpop.f32.mrb[37].mxu0  ;;  %v3685_v17 = vpop.f32.mrb[37].mxu1 }
 0x13f   :  { %v4395_v48 = vpop.f32.mrb[38].mxu0  ;;  %v4414_v28 = vpop.f32.mrb[38].mxu1 }
 0x140   :  { %6935 = vst [vmem:[#allocation21_spill] sm:$0xff] %v4395_v48  ;;  %v1472_v51 = vadd.f32 %v1471_v38, %v1339_v44  ;;  %v1199_v52 = vadd.f32 %v1198_v40, %v4395_v48  ;;  %v1340_v54 = vmul.f32 %v4395_v48, %v4395_v48  ;;  %v3550_v56 = vpop.f32.mrb[39].mxu0  ;;  %v3686_v32 = vpop.f32.mrb[39].mxu1 }
 0x142   :  { %v1473_v3 = vadd.f32 %v1472_v51, %v1340_v54 }
 0x145   :  { %v4402_v4 = vpop.f32.mrb[40].mxu0  ;;  %v4421_v45 = vpop.f32.mrb[40].mxu1 }
 0x146   :  { %6936 = vst [vmem:[#allocation22_spill] sm:$0xff] %v4402_v4  ;;  %v1200_v5 = vadd.f32 %v1199_v52, %v4402_v4  ;;  %v1341_v6 = vmul.f32 %v4402_v4, %v4402_v4  ;;  %v3553_v7 = vpop.f32.mrb[41].mxu0  ;;  %v3689_v51 = vpop.f32.mrb[41].mxu1 }
 0x147   :  { %v4409_v12 = vpop.f32.mrb[42].mxu0 }
 0x148   :  { %6937 = vst [vmem:[#allocation23_spill] sm:$0xff] %v4409_v12  ;;  %v1474_v18 = vadd.f32 %v1473_v3, %v1341_v6  ;;  %v1201_v19 = vadd.f32 %v1200_v5, %v4409_v12  ;;  %v1342_v26 = vmul.f32 %v4409_v12, %v4409_v12  ;;  %v3554_v27 = vpop.f32.mrb[43].mxu0  ;;  %v4428_v3 = vpop.f32.mrb[42].mxu1 }
 0x149   :  { %v3690_v5 = vpop.f32.mrb[43].mxu1 }
 0x14a   :  { %v1475_v33 = vadd.f32 %v1474_v18, %v1342_v26 }
 0x14d   :  { %v4416_v36 = vpop.f32.mrb[44].mxu0  ;;  %v4435_v26 = vpop.f32.mrb[44].mxu1 }
 0x14e   :  { %6938 = vst [vmem:[#allocation24_spill] sm:$0xff] %v4416_v36  ;;  %v1202_v38 = vadd.f32 %v1201_v19, %v4416_v36  ;;  %v1343_v40 = vmul.f32 %v4416_v36, %v4416_v36  ;;  %v3557_v44 = vpop.f32.mrb[45].mxu0  ;;  %v3693_v32 = vpop.f32.mrb[45].mxu1 }
 0x14f   :  { %v4423_v49 = vpop.f32.mrb[46].mxu0  ;;  %v4442_v51 = vpop.f32.mrb[46].mxu1 }
 0x150   :  { %6939 = vst [vmem:[#allocation25_spill] sm:$0xff] %v4423_v49  ;;  %v1476_v52 = vadd.f32 %v1475_v33, %v1343_v40  ;;  %v1203_v54 = vadd.f32 %v1202_v38, %v4423_v49  ;;  %v1344_v56 = vmul.f32 %v4423_v49, %v4423_v49  ;;  %v3558_v59 = vpop.f32.mrb[47].mxu0 }
 0x152   :  { %v1477_v6 = vadd.f32 %v1476_v52, %v1344_v56  ;;  %v3694_v52 = vpop.f32.mrb[47].mxu1 }
 0x155   :  { %v4430_v7 = vpop.f32.mrb[48].mxu0  ;;  %v4449_v32 = vpop.f32.mrb[48].mxu1 }
 0x156   :  { %6940 = vst [vmem:[#allocation26_spill] sm:$0xff] %v4430_v7  ;;  %v1204_v17 = vadd.f32 %v1203_v54, %v4430_v7  ;;  %v1345_v18 = vmul.f32 %v4430_v7, %v4430_v7  ;;  %v3561_v19 = vpop.f32.mrb[49].mxu0 }
 0x157   :  { %v4437_v27 = vpop.f32.mrb[50].mxu0 }
 0x158   :  { %6941 = vst [vmem:[#allocation27_spill] sm:$0xff] %v4437_v27  ;;  %v1478_v33 = vadd.f32 %v1477_v6, %v1345_v18  ;;  %v1205_v38 = vadd.f32 %v1204_v17, %v4437_v27  ;;  %v1346_v40 = vmul.f32 %v4437_v27, %v4437_v27  ;;  %v3562_v44 = vpop.f32.mrb[51].mxu0  ;;  %v3697_v17 = vpop.f32.mrb[49].mxu1 }
 0x15a   :  { %v1479_v54 = vadd.f32 %v1478_v33, %v1346_v40  ;;  %v4456_v40 = vpop.f32.mrb[50].mxu1 }
 0x15b   :  { %v3698_v27 = vpop.f32.mrb[51].mxu1 }
 0x15d   :  { %v4444_v56 = vpop.f32.mrb[52].mxu0  ;;  %v4463_v17 = vpop.f32.mrb[52].mxu1 }
 0x15e   :  { %6942 = vst [vmem:[#allocation28_spill] sm:$0xff] %v4444_v56  ;;  %v1206_v59 = vadd.f32 %v1205_v38, %v4444_v56  ;;  %v1347_v5 = vmul.f32 %v4444_v56, %v4444_v56  ;;  %v3565_v19 = vpop.f32.mrb[53].mxu0 }
 0x15f   :  { %v4451_v6 = vpop.f32.mrb[54].mxu0 }
 0x160   :  { %6943 = vst [vmem:[#allocation29_spill] sm:$0xff] %v4451_v6  ;;  %v1480_v18 = vadd.f32 %v1479_v54, %v1347_v5  ;;  %v1207_v44 = vadd.f32 %v1206_v59, %v4451_v6  ;;  %v1348_v52 = vmul.f32 %v4451_v6, %v4451_v6  ;;  %v3566_v33 = vpop.f32.mrb[55].mxu0  ;;  %v3701_v59 = vpop.f32.mrb[53].mxu1 }
 0x162   :  { %v1481_v38 = vadd.f32 %v1480_v18, %v1348_v52  ;;  %v4470_v52 = vpop.f32.mrb[54].mxu1 }
 0x163   :  { %v3702_v6 = vpop.f32.mrb[55].mxu1 }
 0x165   :  { %v4458_v7 = vpop.f32.mrb[56].mxu0  ;;  %v4477_v59 = vpop.f32.mrb[56].mxu1 }
 0x166   :  { %6944 = vst [vmem:[#allocation30_spill] sm:$0xff] %v4458_v7  ;;  %v1208_v19 = vadd.f32 %v1207_v44, %v4458_v7  ;;  %v1349_v56 = vmul.f32 %v4458_v7, %v4458_v7  ;;  %v3569_v49 = vpop.f32.mrb[57].mxu0 }
 0x167   :  { %v4465_v54 = vpop.f32.mrb[58].mxu0 }
 0x168   :  { %6945 = vst [vmem:[#allocation31_spill] sm:$0xff] %v4465_v54  ;;  %v1482_v5 = vadd.f32 %v1481_v38, %v1349_v56  ;;  %v1209_v33 = vadd.f32 %v1208_v19, %v4465_v54  ;;  %v1350_v27 = vmul.f32 %v4465_v54, %v4465_v54  ;;  %v3570_v18 = vpop.f32.mrb[59].mxu0  ;;  %v3705_v38 = vpop.f32.mrb[57].mxu1 }
 0x16a   :  { %v1483_v44 = vadd.f32 %v1482_v5, %v1350_v27  ;;  %v4484_v27 = vpop.f32.mrb[58].mxu1 }
 0x16b   :  { %v3706_v54 = vpop.f32.mrb[59].mxu1 }
 0x16d   :  { %v4472_v36 = vpop.f32.mrb[60].mxu0  ;;  %v4491_v38 = vpop.f32.mrb[60].mxu1 }
 0x16e   :  { %6946 = vst [vmem:[#allocation32_spill] sm:$0xff] %v4472_v36  ;;  %v1210_v49 = vadd.f32 %v1209_v33, %v4472_v36  ;;  %v1351_v7 = vmul.f32 %v4472_v36, %v4472_v36  ;;  %v3573_v12 = vpop.f32.mrb[61].mxu0 }
 0x16f   :  { %v4479_v56 = vpop.f32.mrb[62].mxu0 }
 0x170   :  { %6947 = vst [vmem:[#allocation33_spill] sm:$0xff] %v4479_v56  ;;  %v1484_v19 = vadd.f32 %v1483_v44, %v1351_v7  ;;  %v1211_v18 = vadd.f32 %v1210_v49, %v4479_v56  ;;  %v1352_v6 = vmul.f32 %v4479_v56, %v4479_v56  ;;  %v3574_v5 = vpop.f32.mrb[63].mxu0  ;;  %v3709_v44 = vpop.f32.mrb[61].mxu1 }
 0x172   :  { %v1485_v33 = vadd.f32 %v1484_v19, %v1352_v6  ;;  %v4498_v6 = vpop.f32.mrb[62].mxu1 }
 0x173   :  { %v3710_v56 = vpop.f32.mrb[63].mxu1 }
 0x175   :  { %v4486_v4 = vpop.f32.mrb[64].mxu0  ;;  %v4505_v44 = vpop.f32.mrb[64].mxu1 }
 0x176   :  { %6948 = vst [vmem:[#allocation34_spill] sm:$0xff] %v4486_v4  ;;  %v1212_v12 = vadd.f32 %v1211_v18, %v4486_v4  ;;  %v1353_v36 = vmul.f32 %v4486_v4, %v4486_v4  ;;  %v3577_v48 = vpop.f32.mrb[65].mxu0 }
 0x177   :  { %v4493_v7 = vpop.f32.mrb[66].mxu0 }
 0x178   :  { %6949 = vst [vmem:[#allocation35_spill] sm:$0xff] %v4493_v7  ;;  %v1486_v49 = vadd.f32 %v1485_v33, %v1353_v36  ;;  %v1213_v5 = vadd.f32 %v1212_v12, %v4493_v7  ;;  %v1354_v54 = vmul.f32 %v4493_v7, %v4493_v7  ;;  %v3578_v19 = vpop.f32.mrb[67].mxu0  ;;  %v3713_v33 = vpop.f32.mrb[65].mxu1 }
 0x17a   :  { %v1487_v18 = vadd.f32 %v1486_v49, %v1354_v54  ;;  %v4512_v54 = vpop.f32.mrb[66].mxu1 }
 0x17b   :  { %v3714_v7 = vpop.f32.mrb[67].mxu1 }
 0x17d   :  { %v4500_v39 = vpop.f32.mrb[68].mxu0  ;;  %v4519_v33 = vpop.f32.mrb[68].mxu1 }
 0x17e   :  { %6950 = vst [vmem:[#allocation36_spill] sm:$0xff] %v4500_v39  ;;  %v1214_v48 = vadd.f32 %v1213_v5, %v4500_v39  ;;  %v1355_v4 = vmul.f32 %v4500_v39, %v4500_v39  ;;  %v3581_v24 = vpop.f32.mrb[69].mxu0 }
 0x17f   :  { %v4507_v36 = vpop.f32.mrb[70].mxu0 }
 0x180   :  { %6951 = vst [vmem:[#allocation37_spill] sm:$0xff] %v4507_v36  ;;  %v1488_v12 = vadd.f32 %v1487_v18, %v1355_v4  ;;  %v1215_v19 = vadd.f32 %v1214_v48, %v4507_v36  ;;  %v1356_v56 = vmul.f32 %v4507_v36, %v4507_v36  ;;  %v3582_v49 = vpop.f32.mrb[71].mxu0  ;;  %v3717_v18 = vpop.f32.mrb[69].mxu1 }
 0x182   :  { %v1489_v5 = vadd.f32 %v1488_v12, %v1356_v56  ;;  %v4526_v56 = vpop.f32.mrb[70].mxu1 }
 0x183   :  { %6954 = vst [vmem:[#allocation40_spill] sm:$0xff] %v4526_v56  ;;  %v3718_v36 = vpop.f32.mrb[71].mxu1 }
 0x185   :  { %v4514_v16 = vpop.f32.mrb[72].mxu0  ;;  %v4533_v18 = vpop.f32.mrb[72].mxu1 }
 0x186   :  { %6952 = vst [vmem:[#allocation38_spill] sm:$0xff] %v4514_v16  ;;  %v1216_v24 = vadd.f32 %v1215_v19, %v4514_v16  ;;  %v1357_v39 = vmul.f32 %v4514_v16, %v4514_v16  ;;  %v3585_v61 = vpop.f32.mrb[73].mxu0  ;;  %6956 = vst [vmem:[#allocation42_spill] sm:$0xff] %v4533_v18 }
 0x187   :  { %v4521_v4 = vpop.f32.mrb[74].mxu0 }
 0x188   :  { %6953 = vst [vmem:[#allocation39_spill] sm:$0xff] %v4521_v4  ;;  %v1490_v48 = vadd.f32 %v1489_v5, %v1357_v39  ;;  %v1217_v49 = vadd.f32 %v1216_v24, %v4521_v4  ;;  %v1358_v7 = vmul.f32 %v4521_v4, %v4521_v4  ;;  %v3586_v12 = vpop.f32.mrb[75].mxu0  ;;  %v3721_v5 = vpop.f32.mrb[73].mxu1 }
 0x18a   :  { %v1491_v19 = vadd.f32 %v1490_v48, %v1358_v7  ;;  %v4540_v7 = vpop.f32.mrb[74].mxu1 }
 0x18b   :  { %6958 = vst [vmem:[#allocation44_spill] sm:$0xff] %v4540_v7  ;;  %v3722_v4 = vpop.f32.mrb[75].mxu1 }
 0x18d   :  { %v4528_v55 = vpop.f32.mrb[76].mxu0  ;;  %v4547_v5 = vpop.f32.mrb[76].mxu1 }
 0x18e   :  { %6955 = vst [vmem:[#allocation41_spill] sm:$0xff] %v4528_v55  ;;  %v1218_v61 = vadd.f32 %v1217_v49, %v4528_v55  ;;  %v1359_v16 = vmul.f32 %v4528_v55, %v4528_v55  ;;  %v3589_v43 = vpop.f32.mrb[77].mxu0  ;;  %6960 = vst [vmem:[#allocation46_spill] sm:$0xff] %v4547_v5 }
 0x18f   :  { %v4535_v39 = vpop.f32.mrb[78].mxu0 }
 0x190   :  { %6957 = vst [vmem:[#allocation43_spill] sm:$0xff] %v4535_v39  ;;  %v1492_v24 = vadd.f32 %v1491_v19, %v1359_v16  ;;  %v1219_v12 = vadd.f32 %v1218_v61, %v4535_v39  ;;  %v1360_v36 = vmul.f32 %v4535_v39, %v4535_v39  ;;  %v3590_v48 = vpop.f32.mrb[79].mxu0  ;;  %v3725_v19 = vpop.f32.mrb[77].mxu1 }
 0x192   :  { %v1493_v49 = vadd.f32 %v1492_v24, %v1360_v36  ;;  %v4554_v36 = vpop.f32.mrb[78].mxu1 }
 0x193   :  { %6962 = vst [vmem:[#allocation48_spill] sm:$0xff] %v4554_v36  ;;  %v3726_v39 = vpop.f32.mrb[79].mxu1 }
 0x195   :  { %v4542_v35 = vpop.f32.mrb[80].mxu0  ;;  %v4561_v19 = vpop.f32.mrb[80].mxu1 }
 0x196   :  { %6959 = vst [vmem:[#allocation45_spill] sm:$0xff] %v4542_v35  ;;  %v1220_v43 = vadd.f32 %v1219_v12, %v4542_v35  ;;  %v1361_v55 = vmul.f32 %v4542_v35, %v4542_v35  ;;  %v3593_v22 = vpop.f32.mrb[81].mxu0  ;;  %6964 = vst [vmem:[#allocation50_spill] sm:$0xff] %v4561_v19 }
 0x197   :  { %v4549_v16 = vpop.f32.mrb[82].mxu0 }
 0x198   :  { %6961 = vst [vmem:[#allocation47_spill] sm:$0xff] %v4549_v16  ;;  %v1494_v61 = vadd.f32 %v1493_v49, %v1361_v55  ;;  %v1221_v48 = vadd.f32 %v1220_v43, %v4549_v16  ;;  %v1362_v4 = vmul.f32 %v4549_v16, %v4549_v16  ;;  %v3594_v24 = vpop.f32.mrb[83].mxu0  ;;  %v3729_v49 = vpop.f32.mrb[81].mxu1 }
 0x19a   :  { %v1495_v12 = vadd.f32 %v1494_v61, %v1362_v4  ;;  %v4568_v4 = vpop.f32.mrb[82].mxu1 }
 0x19b   :  { %6966 = vst [vmem:[#allocation52_spill] sm:$0xff] %v4568_v4  ;;  %v3730_v16 = vpop.f32.mrb[83].mxu1 }
 0x19d   :  { %v4556_v13 = vpop.f32.mrb[84].mxu0  ;;  %v4575_v49 = vpop.f32.mrb[84].mxu1 }
 0x19e   :  { %6963 = vst [vmem:[#allocation49_spill] sm:$0xff] %v4556_v13  ;;  %v1222_v22 = vadd.f32 %v1221_v48, %v4556_v13  ;;  %v1363_v35 = vmul.f32 %v4556_v13, %v4556_v13  ;;  %v3597_v1 = vpop.f32.mrb[85].mxu0  ;;  %6968 = vst [vmem:[#allocation54_spill] sm:$0xff] %v4575_v49 }
 0x19f   :  { %v4563_v55 = vpop.f32.mrb[86].mxu0 }
 0x1a0   :  { %6965 = vst [vmem:[#allocation51_spill] sm:$0xff] %v4563_v55  ;;  %v1496_v43 = vadd.f32 %v1495_v12, %v1363_v35  ;;  %v1223_v24 = vadd.f32 %v1222_v22, %v4563_v55  ;;  %v1364_v39 = vmul.f32 %v4563_v55, %v4563_v55  ;;  %v3598_v61 = vpop.f32.mrb[87].mxu0  ;;  %v3733_v12 = vpop.f32.mrb[85].mxu1 }
 0x1a2   :  { %v1497_v48 = vadd.f32 %v1496_v43, %v1364_v39  ;;  %v4582_v39 = vpop.f32.mrb[86].mxu1 }
 0x1a3   :  { %6970 = vst [vmem:[#allocation56_spill] sm:$0xff] %v4582_v39  ;;  %v3734_v55 = vpop.f32.mrb[87].mxu1 }
 0x1a5   :  { %v4570_v57 = vpop.f32.mrb[88].mxu0  ;;  %v4589_v12 = vpop.f32.mrb[88].mxu1 }
 0x1a6   :  { %6967 = vst [vmem:[#allocation53_spill] sm:$0xff] %v4570_v57  ;;  %v1224_v1 = vadd.f32 %v1223_v24, %v4570_v57  ;;  %v1365_v13 = vmul.f32 %v4570_v57, %v4570_v57  ;;  %v3601_v47 = vpop.f32.mrb[89].mxu0  ;;  %6972 = vst [vmem:[#allocation58_spill] sm:$0xff] %v4589_v12 }
 0x1a7   :  { %v4577_v35 = vpop.f32.mrb[90].mxu0 }
 0x1a8   :  { %6969 = vst [vmem:[#allocation55_spill] sm:$0xff] %v4577_v35  ;;  %v1498_v22 = vadd.f32 %v1497_v48, %v1365_v13  ;;  %v1225_v61 = vadd.f32 %v1224_v1, %v4577_v35  ;;  %v1366_v16 = vmul.f32 %v4577_v35, %v4577_v35  ;;  %v3602_v43 = vpop.f32.mrb[91].mxu0  ;;  %v3737_v48 = vpop.f32.mrb[89].mxu1 }
 0x1aa   :  { %v1499_v24 = vadd.f32 %v1498_v22, %v1366_v16  ;;  %v4596_v16 = vpop.f32.mrb[90].mxu1 }
 0x1ab   :  { %6974 = vst [vmem:[#allocation60_spill] sm:$0xff] %v4596_v16  ;;  %v3738_v35 = vpop.f32.mrb[91].mxu1 }
 0x1ad   :  { %v4584_v41 = vpop.f32.mrb[92].mxu0  ;;  %v4603_v48 = vpop.f32.mrb[92].mxu1 }
 0x1ae   :  { %6971 = vst [vmem:[#allocation57_spill] sm:$0xff] %v4584_v41  ;;  %v1226_v47 = vadd.f32 %v1225_v61, %v4584_v41  ;;  %v1367_v57 = vmul.f32 %v4584_v41, %v4584_v41  ;;  %v3605_v31 = vpop.f32.mrb[93].mxu0  ;;  %6976 = vst [vmem:[#allocation62_spill] sm:$0xff] %v4603_v48 }
 0x1af   :  { %v4591_v13 = vpop.f32.mrb[94].mxu0 }
 0x1b0   :  { %6973 = vst [vmem:[#allocation59_spill] sm:$0xff] %v4591_v13  ;;  %v1500_v1 = vadd.f32 %v1499_v24, %v1367_v57  ;;  %v1227_v43 = vadd.f32 %v1226_v47, %v4591_v13  ;;  %v1368_v55 = vmul.f32 %v4591_v13, %v4591_v13  ;;  %v3606_v22 = vpop.f32.mrb[95].mxu0  ;;  %v3741_v24 = vpop.f32.mrb[93].mxu1 }
 0x1b2   :  { %v1501_v61 = vadd.f32 %v1500_v1, %v1368_v55  ;;  %v4610_v55 = vpop.f32.mrb[94].mxu1 }
 0x1b3   :  { %6978 = vst [vmem:[#allocation64_spill] sm:$0xff] %v4610_v55  ;;  %v3742_v13 = vpop.f32.mrb[95].mxu1 }
 0x1b5   :  { %v4598_v25 = vpop.f32.mrb[96].mxu0  ;;  %v4617_v24 = vpop.f32.mrb[96].mxu1 }
 0x1b6   :  { %6975 = vst [vmem:[#allocation61_spill] sm:$0xff] %v4598_v25  ;;  %v1228_v31 = vadd.f32 %v1227_v43, %v4598_v25  ;;  %v1369_v41 = vmul.f32 %v4598_v25, %v4598_v25  ;;  %v3609_v15 = vpop.f32.mrb[97].mxu0  ;;  %6980 = vst [vmem:[#allocation66_spill] sm:$0xff] %v4617_v24 }
 0x1b7   :  { %v4605_v57 = vpop.f32.mrb[98].mxu0 }
 0x1b8   :  { %6977 = vst [vmem:[#allocation63_spill] sm:$0xff] %v4605_v57  ;;  %v1502_v47 = vadd.f32 %v1501_v61, %v1369_v41  ;;  %v1229_v22 = vadd.f32 %v1228_v31, %v4605_v57  ;;  %v1370_v35 = vmul.f32 %v4605_v57, %v4605_v57  ;;  %v3610_v1 = vpop.f32.mrb[99].mxu0  ;;  %v3745_v61 = vpop.f32.mrb[97].mxu1 }
 0x1ba   :  { %v1503_v43 = vadd.f32 %v1502_v47, %v1370_v35  ;;  %v4624_v35 = vpop.f32.mrb[98].mxu1 }
 0x1bb   :  { %6982 = vst [vmem:[#allocation68_spill] sm:$0xff] %v4624_v35  ;;  %v3746_v57 = vpop.f32.mrb[99].mxu1 }
 0x1bd   :  { %v4612_v9 = vpop.f32.mrb[100].mxu0  ;;  %v4631_v61 = vpop.f32.mrb[100].mxu1 }
 0x1be   :  { %6979 = vst [vmem:[#allocation65_spill] sm:$0xff] %v4612_v9  ;;  %v1230_v15 = vadd.f32 %v1229_v22, %v4612_v9  ;;  %v1371_v25 = vmul.f32 %v4612_v9, %v4612_v9  ;;  %v3613_v2 = vpop.f32.mrb[101].mxu0  ;;  %6984 = vst [vmem:[#allocation70_spill] sm:$0xff] %v4631_v61 }
 0x1bf   :  { %v4619_v41 = vpop.f32.mrb[102].mxu0 }
 0x1c0   :  { %6981 = vst [vmem:[#allocation67_spill] sm:$0xff] %v4619_v41  ;;  %v1504_v31 = vadd.f32 %v1503_v43, %v1371_v25  ;;  %v1231_v1 = vadd.f32 %v1230_v15, %v4619_v41  ;;  %v1372_v13 = vmul.f32 %v4619_v41, %v4619_v41  ;;  %v3614_v47 = vpop.f32.mrb[103].mxu0  ;;  %v3749_v43 = vpop.f32.mrb[101].mxu1 }
 0x1c2   :  { %v1505_v22 = vadd.f32 %v1504_v31, %v1372_v13  ;;  %v4638_v13 = vpop.f32.mrb[102].mxu1 }
 0x1c3   :  { %6986 = vst [vmem:[#allocation72_spill] sm:$0xff] %v4638_v13  ;;  %v3750_v41 = vpop.f32.mrb[103].mxu1 }
 0x1c5   :  { %v4626_v62 = vpop.f32.mrb[104].mxu0  ;;  %v4645_v43 = vpop.f32.mrb[104].mxu1 }
 0x1c6   :  { %6983 = vst [vmem:[#allocation69_spill] sm:$0xff] %v4626_v62  ;;  %v1232_v2 = vadd.f32 %v1231_v1, %v4626_v62  ;;  %v1373_v9 = vmul.f32 %v4626_v62, %v4626_v62  ;;  %v3617_v24 = vpop.f32.mrb[105].mxu0  ;;  %6988 = vst [vmem:[#allocation74_spill] sm:$0xff] %v4645_v43 }
 0x1c7   :  { %v4633_v25 = vpop.f32.mrb[106].mxu0 }
 0x1c8   :  { %6985 = vst [vmem:[#allocation71_spill] sm:$0xff] %v4633_v25  ;;  %v1506_v15 = vadd.f32 %v1505_v22, %v1373_v9  ;;  %v1233_v47 = vadd.f32 %v1232_v2, %v4633_v25  ;;  %v1374_v57 = vmul.f32 %v4633_v25, %v4633_v25  ;;  %v3618_v31 = vpop.f32.mrb[107].mxu0  ;;  %v3753_v22 = vpop.f32.mrb[105].mxu1 }
 0x1ca   :  { %v1507_v1 = vadd.f32 %v1506_v15, %v1374_v57  ;;  %v4652_v57 = vpop.f32.mrb[106].mxu1 }
 0x1cb   :  { %6990 = vst [vmem:[#allocation76_spill] sm:$0xff] %v4652_v57  ;;  %v3754_v25 = vpop.f32.mrb[107].mxu1 }
 0x1cd   :  { %v4640_v35 = vpop.f32.mrb[108].mxu0  ;;  %v4659_v22 = vpop.f32.mrb[108].mxu1 }
 0x1ce   :  { %6987 = vst [vmem:[#allocation73_spill] sm:$0xff] %v4640_v35  ;;  %v1234_v24 = vadd.f32 %v1233_v47, %v4640_v35  ;;  %v1375_v62 = vmul.f32 %v4640_v35, %v4640_v35  ;;  %v3621_v61 = vpop.f32.mrb[109].mxu0  ;;  %6992 = vst [vmem:[#allocation78_spill] sm:$0xff] %v4659_v22 }
 0x1cf   :  { %v4647_v9 = vpop.f32.mrb[110].mxu0 }
 0x1d0   :  { %6989 = vst [vmem:[#allocation75_spill] sm:$0xff] %v4647_v9  ;;  %v1508_v2 = vadd.f32 %v1507_v1, %v1375_v62  ;;  %v1235_v31 = vadd.f32 %v1234_v24, %v4647_v9  ;;  %v1376_v41 = vmul.f32 %v4647_v9, %v4647_v9  ;;  %v3622_v15 = vpop.f32.mrb[111].mxu0  ;;  %v3757_v1 = vpop.f32.mrb[109].mxu1 }
 0x1d2   :  { %v1509_v47 = vadd.f32 %v1508_v2, %v1376_v41  ;;  %v4666_v41 = vpop.f32.mrb[110].mxu1 }
 0x1d3   :  { %6994 = vst [vmem:[#allocation80_spill] sm:$0xff] %v4666_v41  ;;  %v3758_v9 = vpop.f32.mrb[111].mxu1 }
 0x1d5   :  { %v4654_v13 = vpop.f32.mrb[112].mxu0  ;;  %v4673_v1 = vpop.f32.mrb[112].mxu1 }
 0x1d6   :  { %6991 = vst [vmem:[#allocation77_spill] sm:$0xff] %v4654_v13  ;;  %v1236_v61 = vadd.f32 %v1235_v31, %v4654_v13  ;;  %v1377_v35 = vmul.f32 %v4654_v13, %v4654_v13  ;;  %v3625_v43 = vpop.f32.mrb[113].mxu0  ;;  %6996 = vst [vmem:[#allocation82_spill] sm:$0xff] %v4673_v1 }
 0x1d7   :  { %v4661_v62 = vpop.f32.mrb[114].mxu0 }
 0x1d8   :  { %6993 = vst [vmem:[#allocation79_spill] sm:$0xff] %v4661_v62  ;;  %v1510_v24 = vadd.f32 %v1509_v47, %v1377_v35  ;;  %v1237_v15 = vadd.f32 %v1236_v61, %v4661_v62  ;;  %v1378_v25 = vmul.f32 %v4661_v62, %v4661_v62  ;;  %v3626_v2 = vpop.f32.mrb[115].mxu0  ;;  %v3761_v47 = vpop.f32.mrb[113].mxu1 }
 0x1da   :  { %v1511_v31 = vadd.f32 %v1510_v24, %v1378_v25  ;;  %v4680_v25 = vpop.f32.mrb[114].mxu1 }
 0x1db   :  { %6998 = vst [vmem:[#allocation84_spill] sm:$0xff] %v4680_v25  ;;  %v3762_v62 = vpop.f32.mrb[115].mxu1 }
 0x1dd   :  { %v4668_v57 = vpop.f32.mrb[116].mxu0  ;;  %v4687_v47 = vpop.f32.mrb[116].mxu1 }
 0x1de   :  { %6995 = vst [vmem:[#allocation81_spill] sm:$0xff] %v4668_v57  ;;  %v1238_v43 = vadd.f32 %v1237_v15, %v4668_v57  ;;  %v1379_v13 = vmul.f32 %v4668_v57, %v4668_v57  ;;  %v3629_v22 = vpop.f32.mrb[117].mxu0  ;;  %7000 = vst [vmem:[#allocation86_spill] sm:$0xff] %v4687_v47 }
 0x1df   :  { %v4675_v35 = vpop.f32.mrb[118].mxu0 }
 0x1e0   :  { %6997 = vst [vmem:[#allocation83_spill] sm:$0xff] %v4675_v35  ;;  %v1512_v61 = vadd.f32 %v1511_v31, %v1379_v13  ;;  %v1239_v2 = vadd.f32 %v1238_v43, %v4675_v35  ;;  %v1380_v9 = vmul.f32 %v4675_v35, %v4675_v35  ;;  %v3630_v24 = vpop.f32.mrb[119].mxu0  ;;  %v3765_v31 = vpop.f32.mrb[117].mxu1 }
 0x1e2   :  { %v1513_v15 = vadd.f32 %v1512_v61, %v1380_v9  ;;  %v4694_v9 = vpop.f32.mrb[118].mxu1 }
 0x1e3   :  { %7002 = vst [vmem:[#allocation88_spill] sm:$0xff] %v4694_v9  ;;  %v3766_v35 = vpop.f32.mrb[119].mxu1 }
 0x1e5   :  { %v4682_v41 = vpop.f32.mrb[120].mxu0  ;;  %v4701_v31 = vpop.f32.mrb[120].mxu1 }
 0x1e6   :  { %6999 = vst [vmem:[#allocation85_spill] sm:$0xff] %v4682_v41  ;;  %v1240_v22 = vadd.f32 %v1239_v2, %v4682_v41  ;;  %v1381_v57 = vmul.f32 %v4682_v41, %v4682_v41  ;;  %v3633_v1 = vpop.f32.mrb[121].mxu0  ;;  %7004 = vst [vmem:[#allocation90_spill] sm:$0xff] %v4701_v31 }
 0x1e7   :  { %v4689_v13 = vpop.f32.mrb[122].mxu0 }
 0x1e8   :  { %7001 = vst [vmem:[#allocation87_spill] sm:$0xff] %v4689_v13  ;;  %v1514_v43 = vadd.f32 %v1513_v15, %v1381_v57  ;;  %v1241_v24 = vadd.f32 %v1240_v22, %v4689_v13  ;;  %v1382_v62 = vmul.f32 %v4689_v13, %v4689_v13  ;;  %v3634_v61 = vpop.f32.mrb[123].mxu0  ;;  %v3769_v15 = vpop.f32.mrb[121].mxu1 }
 0x1ea   :  { %v1515_v2 = vadd.f32 %v1514_v43, %v1382_v62  ;;  %v4708_v62 = vpop.f32.mrb[122].mxu1 }
 0x1eb   :  { %7006 = vst [vmem:[#allocation92_spill] sm:$0xff] %v4708_v62  ;;  %v3770_v13 = vpop.f32.mrb[123].mxu1 }
 0x1ed   :  { %v4696_v25 = vpop.f32.mrb[124].mxu0  ;;  %v4715_v15 = vpop.f32.mrb[124].mxu1 }
 0x1ee   :  { %7003 = vst [vmem:[#allocation89_spill] sm:$0xff] %v4696_v25  ;;  %v1242_v1 = vadd.f32 %v1241_v24, %v4696_v25  ;;  %v1383_v41 = vmul.f32 %v4696_v25, %v4696_v25  ;;  %v3637_v47 = vpop.f32.mrb[125].mxu0  ;;  %7008 = vst [vmem:[#allocation94_spill] sm:$0xff] %v4715_v15 }
 0x1ef   :  { %v4703_v57 = vpop.f32.mrb[126].mxu0 }
 0x1f0   :  { %7005 = vst [vmem:[#allocation91_spill] sm:$0xff] %v4703_v57  ;;  %v1516_v22 = vadd.f32 %v1515_v2, %v1383_v41  ;;  %v1243_v61 = vadd.f32 %v1242_v1, %v4703_v57  ;;  %v1384_v35 = vmul.f32 %v4703_v57, %v4703_v57  ;;  %v3638_v43 = vpop.f32.mrb[127].mxu0  ;;  %v3773_v2 = vpop.f32.mrb[125].mxu1 }
 0x1f2   :  { %v1517_v24 = vadd.f32 %v1516_v22, %v1384_v35  ;;  %v4722_v35 = vpop.f32.mrb[126].mxu1 }
 0x1f3   :  { %7010 = vst [vmem:[#allocation96_spill] sm:$0xff] %v4722_v35  ;;  %v3774_v57 = vpop.f32.mrb[127].mxu1 }
 0x1f5   :  { %v4710_v9 = vpop.f32.mrb[128].mxu0  ;;  %v4729_v2 = vpop.f32.mrb[128].mxu1 }
 0x1f6   :  { %7007 = vst [vmem:[#allocation93_spill] sm:$0xff] %v4710_v9  ;;  %v1244_v47 = vadd.f32 %v1243_v61, %v4710_v9  ;;  %v1385_v25 = vmul.f32 %v4710_v9, %v4710_v9  ;;  %v3641_v31 = vpop.f32.mrb[129].mxu0  ;;  %7012 = vst [vmem:[#allocation98_spill] sm:$0xff] %v4729_v2  ;;  %v1390_v2 = vmul.f32 %v4235_v21, %v4235_v21 }
 0x1f7   :  { %v4717_v41 = vpop.f32.mrb[130].mxu0 }
 0x1f8   :  { %7009 = vst [vmem:[#allocation95_spill] sm:$0xff] %v4717_v41  ;;  %v1518_v1 = vadd.f32 %v1517_v24, %v1385_v25  ;;  %v1245_v43 = vadd.f32 %v1244_v47, %v4717_v41  ;;  %v1386_v13 = vmul.f32 %v4717_v41, %v4717_v41  ;;  %v3642_v22 = vpop.f32.mrb[131].mxu0  ;;  %v3777_v24 = vpop.f32.mrb[129].mxu1 }
 0x1fa   :  { %v1519_v61 = vadd.f32 %v1518_v1, %v1386_v13  ;;  %v4736_v13 = vpop.f32.mrb[130].mxu1 }
 0x1fb   :  { %7014 = vst [vmem:[#allocation100_spill] sm:$0xff] %v4736_v13  ;;  %v3778_v41 = vpop.f32.mrb[131].mxu1 }
 0x1fc   :  { %v1392_v41 = vmul.f32 %v4259_v37, %v4259_v37 }
 0x1fd   :  { %v4724_v62 = vpop.f32.mrb[132].mxu0 }
 0x1fe   :  { %7011 = vst [vmem:[#allocation97_spill] sm:$0xff] %v4724_v62  ;;  %v1246_v31 = vadd.f32 %v1245_v43, %v4724_v62  ;;  %v1387_v9 = vmul.f32 %v4724_v62, %v4724_v62  ;;  %v3645_v15 = vpop.f32.mrb[133].mxu0  ;;  %v1389_v43 = vmul.f32 %v4228_v14, %v4228_v14 }
 0x1ff   :  { %v4731_v25 = vpop.f32.mrb[134].mxu0 }
 0x200   :  { %7013 = vst [vmem:[#allocation99_spill] sm:$0xff] %v4731_v25  ;;  %v1520_v47 = vadd.f32 %v1519_v61, %v1387_v9  ;;  %v1247_v22 = vadd.f32 %v1246_v31, %v4731_v25  ;;  %v1388_v57 = vmul.f32 %v4731_v25, %v4731_v25  ;;  %v3646_v1 = vpop.f32.mrb[135].mxu0  ;;  %v1391_v31 = vmul.f32 %v4252_v30, %v4252_v30 }
 0x202   :  { %v1248_v15 = vadd.f32 %v1247_v22, %v4228_v14  ;;  %v1521_v62 = vadd.f32 %v1520_v47, %v1388_v57  ;;  %v1393_v47 = vmul.f32 %v4276_v46, %v4276_v46 }
 0x204   :  { %v1249_v9 = vadd.f32 %v1248_v15, %v4235_v21  ;;  %v1522_v61 = vadd.f32 %v1521_v62, %v1389_v43  ;;  %v1394_v62 = vmul.f32 %v4283_v53, %v4283_v53 }
 0x206   :  { %v1250_v24 = vadd.f32 %v1249_v9, %v4252_v30  ;;  %v1523_v1 = vadd.f32 %v1522_v61, %v1390_v2  ;;  %v1395_v2 = vmul.f32 %v4300_v63, %v4300_v63 }
 0x208   :  { %v1251_v25 = vadd.f32 %v1250_v24, %v4259_v37  ;;  %v1524_v13 = vadd.f32 %v1523_v1, %v1391_v31  ;;  %v1396_v31 = vmul.f32 %v4307_v8, %v4307_v8 }
 0x20a   :  { %v1252_v22 = vadd.f32 %v1251_v25, %v4276_v46  ;;  %v1525_v57 = vadd.f32 %v1524_v13, %v1392_v41  ;;  %v1397_v25 = vmul.f32 %v4324_v20, %v4324_v20 }
 0x20c   :  { %v1253_v43 = vadd.f32 %v1252_v22, %v4283_v53  ;;  %v1526_v15 = vadd.f32 %v1525_v57, %v1393_v47  ;;  %v1398_v47 = vmul.f32 %v4331_v29, %v4331_v29 }
 0x20e   :  { %v1254_v9 = vadd.f32 %v1253_v43, %v4300_v63  ;;  %v1527_v61 = vadd.f32 %v1526_v15, %v1394_v62  ;;  %v1399_v62 = vmul.f32 %v4348_v42, %v4348_v42 }
 0x210   :  { %v1255_v24 = vadd.f32 %v1254_v9, %v4307_v8  ;;  %v1528_v1 = vadd.f32 %v1527_v61, %v1395_v2  ;;  %v1400_v2 = vmul.f32 %v4355_v50, %v4355_v50 }
 0x212   :  { %v1256_v13 = vadd.f32 %v1255_v24, %v4324_v20  ;;  %v1529_v41 = vadd.f32 %v1528_v1, %v1396_v31  ;;  %v1401_v31 = vmul.f32 %v4365_v60, %v4365_v60 }
 0x214   :  { %v1257_v22 = vadd.f32 %v1256_v13, %v4331_v29  ;;  %v1530_v57 = vadd.f32 %v1529_v41, %v1397_v25  ;;  %v1402_v25 = vmul.f32 %v4372_v10, %v4372_v10 }
 0x216   :  { %v1258_v43 = vadd.f32 %v1257_v22, %v4348_v42  ;;  %v1531_v15 = vadd.f32 %v1530_v57, %v1398_v47  ;;  %v1403_v47 = vmul.f32 %v4379_v23, %v4379_v23 }
 0x218   :  { %v1259_v9 = vadd.f32 %v1258_v43, %v4355_v50  ;;  %v1532_v61 = vadd.f32 %v1531_v15, %v1399_v62  ;;  %v1404_v62 = vmul.f32 %v4386_v34, %v4386_v34 }
 0x21a   :  { %v1260_v24 = vadd.f32 %v1259_v9, %v4365_v60  ;;  %v1533_v1 = vadd.f32 %v1532_v61, %v1400_v2  ;;  %v1405_v2 = vmul.f32 %v4393_v0, %v4393_v0 }
 0x21c   :  { %v1261_v13 = vadd.f32 %v1260_v24, %v4372_v10  ;;  %v1534_v41 = vadd.f32 %v1533_v1, %v1401_v31  ;;  %v1406_v31 = vmul.f32 %v4400_v58, %v4400_v58 }
 0x21e   :  { %v1262_v22 = vadd.f32 %v1261_v13, %v4379_v23  ;;  %v1535_v57 = vadd.f32 %v1534_v41, %v1402_v25  ;;  %v1407_v25 = vmul.f32 %v4407_v11, %v4407_v11 }
 0x220   :  { %v1263_v43 = vadd.f32 %v1262_v22, %v4386_v34  ;;  %v1536_v15 = vadd.f32 %v1535_v57, %v1403_v47  ;;  %v1408_v47 = vmul.f32 %v4414_v28, %v4414_v28 }
 0x222   :  { %v1264_v9 = vadd.f32 %v1263_v43, %v4393_v0  ;;  %v1537_v61 = vadd.f32 %v1536_v15, %v1404_v62  ;;  %v1409_v62 = vmul.f32 %v4421_v45, %v4421_v45 }
 0x224   :  { %v1265_v24 = vadd.f32 %v1264_v9, %v4400_v58  ;;  %v1538_v1 = vadd.f32 %v1537_v61, %v1405_v2  ;;  %v1410_v2 = vmul.f32 %v4428_v3, %v4428_v3 }
 0x226   :  { %v1539_v13 = vadd.f32 %v1538_v1, %v1406_v31  ;;  %v1266_v41 = vadd.f32 %v1265_v24, %v4407_v11  ;;  %v1411_v31 = vmul.f32 %v4435_v26, %v4435_v26 }
 0x228   :  { %v1267_v22 = vadd.f32 %v1266_v41, %v4414_v28  ;;  %v1540_v57 = vadd.f32 %v1539_v13, %v1407_v25  ;;  %v1412_v25 = vmul.f32 %v4442_v51, %v4442_v51 }
 0x22a   :  { %v1268_v43 = vadd.f32 %v1267_v22, %v4421_v45  ;;  %v1541_v15 = vadd.f32 %v1540_v57, %v1408_v47  ;;  %v1413_v47 = vmul.f32 %v4449_v32, %v4449_v32 }
 0x22c   :  { %v1269_v9 = vadd.f32 %v1268_v43, %v4428_v3  ;;  %v1542_v61 = vadd.f32 %v1541_v15, %v1409_v62  ;;  %v1414_v62 = vmul.f32 %v4456_v40, %v4456_v40 }
 0x22e   :  { %v1270_v24 = vadd.f32 %v1269_v9, %v4435_v26  ;;  %v1543_v1 = vadd.f32 %v1542_v61, %v1410_v2  ;;  %v1415_v2 = vmul.f32 %v4463_v17, %v4463_v17 }
 0x230   :  { %v1271_v13 = vadd.f32 %v1270_v24, %v4442_v51  ;;  %v1544_v41 = vadd.f32 %v1543_v1, %v1411_v31  ;;  %v1416_v31 = vmul.f32 %v4470_v52, %v4470_v52 }
 0x232   :  { %v1272_v22 = vadd.f32 %v1271_v13, %v4449_v32  ;;  %v1545_v57 = vadd.f32 %v1544_v41, %v1412_v25  ;;  %v1417_v25 = vmul.f32 %v4477_v59, %v4477_v59 }
 0x234   :  { %v1273_v43 = vadd.f32 %v1272_v22, %v4456_v40  ;;  %v1546_v15 = vadd.f32 %v1545_v57, %v1413_v47  ;;  %v1418_v47 = vmul.f32 %v4484_v27, %v4484_v27 }
 0x236   :  { %v1274_v9 = vadd.f32 %v1273_v43, %v4463_v17  ;;  %v1547_v61 = vadd.f32 %v1546_v15, %v1414_v62  ;;  %v1419_v62 = vmul.f32 %v4491_v38, %v4491_v38 }
 0x238   :  { %v1275_v24 = vadd.f32 %v1274_v9, %v4470_v52  ;;  %v1548_v1 = vadd.f32 %v1547_v61, %v1415_v2  ;;  %v1420_v2 = vmul.f32 %v4498_v6, %v4498_v6 }
 0x23a   :  { %v1276_v13 = vadd.f32 %v1275_v24, %v4477_v59  ;;  %v1549_v41 = vadd.f32 %v1548_v1, %v1416_v31  ;;  %v1421_v31 = vmul.f32 %v4505_v44, %v4505_v44 }
 0x23c   :  { %v1277_v22 = vadd.f32 %v1276_v13, %v4484_v27  ;;  %v1550_v57 = vadd.f32 %v1549_v41, %v1417_v25  ;;  %v1422_v13 = vmul.f32 %v4512_v54, %v4512_v54 }
 0x23e   :  { %v1278_v43 = vadd.f32 %v1277_v22, %v4491_v38  ;;  %v1551_v15 = vadd.f32 %v1550_v57, %v1418_v47  ;;  %v1423_v57 = vmul.f32 %v4519_v33, %v4519_v33 }
 0x240   :  { %v1279_v9 = vadd.f32 %v1278_v43, %v4498_v6  ;;  %v1552_v61 = vadd.f32 %v1551_v15, %v1419_v62  ;;  %v1424_v15 = vmul.f32 %v4526_v56, %v4526_v56 }
 0x242   :  { %v1280_v24 = vadd.f32 %v1279_v9, %v4505_v44  ;;  %v1553_v1 = vadd.f32 %v1552_v61, %v1420_v2  ;;  %v1425_v61 = vmul.f32 %v4533_v18, %v4533_v18 }
 0x244   :  { %v1281_v25 = vadd.f32 %v1280_v24, %v4512_v54  ;;  %v1554_v41 = vadd.f32 %v1553_v1, %v1421_v31  ;;  %v1426_v1 = vmul.f32 %v4540_v7, %v4540_v7 }
 0x246   :  { %v1555_v22 = vadd.f32 %v1554_v41, %v1422_v13  ;;  %v1282_v47 = vadd.f32 %v1281_v25, %v4519_v33  ;;  %v1427_v41 = vmul.f32 %v4547_v5, %v4547_v5 }
 0x248   :  { %v1556_v43 = vadd.f32 %v1555_v22, %v1423_v57  ;;  %v1283_v62 = vadd.f32 %v1282_v47, %v4526_v56  ;;  %v1428_v57 = vmul.f32 %v4554_v36, %v4554_v36  ;;  %v7121_v56 = vld [vmem:[#allocation96_spill] sm:$0xff] }
 0x24a   :  { %v1557_v9 = vadd.f32 %v1556_v43, %v1424_v15  ;;  %v1284_v2 = vadd.f32 %v1283_v62, %v4533_v18  ;;  %v1429_v15 = vmul.f32 %v4561_v19, %v4561_v19 }
 0x24c   :  { %v1558_v24 = vadd.f32 %v1557_v9, %v1425_v61  ;;  %v1285_v31 = vadd.f32 %v1284_v2, %v4540_v7  ;;  %v1430_v61 = vmul.f32 %v4568_v4, %v4568_v4 }
 0x24e   :  { %v1559_v25 = vadd.f32 %v1558_v24, %v1426_v1  ;;  %v1286_v13 = vadd.f32 %v1285_v31, %v4547_v5  ;;  %v1431_v1 = vmul.f32 %v4575_v49, %v4575_v49 }
 0x250   :  { %v1560_v22 = vadd.f32 %v1559_v25, %v1427_v41  ;;  %v1287_v47 = vadd.f32 %v1286_v13, %v4554_v36  ;;  %v1432_v41 = vmul.f32 %v4582_v39, %v4582_v39 }
 0x252   :  { %v1561_v43 = vadd.f32 %v1560_v22, %v1428_v57  ;;  %v1288_v62 = vadd.f32 %v1287_v47, %v4561_v19  ;;  %v1433_v57 = vmul.f32 %v4589_v12, %v4589_v12 }
 0x254   :  { %v1562_v9 = vadd.f32 %v1561_v43, %v1429_v15  ;;  %v1289_v2 = vadd.f32 %v1288_v62, %v4568_v4  ;;  %v1434_v15 = vmul.f32 %v4596_v16, %v4596_v16 }
 0x256   :  { %v1563_v24 = vadd.f32 %v1562_v9, %v1430_v61  ;;  %v1290_v31 = vadd.f32 %v1289_v2, %v4575_v49  ;;  %v1435_v61 = vmul.f32 %v4603_v48, %v4603_v48 }
 0x258   :  { %v1564_v25 = vadd.f32 %v1563_v24, %v1431_v1  ;;  %v1291_v13 = vadd.f32 %v1290_v31, %v4582_v39  ;;  %v1436_v1 = vmul.f32 %v4610_v55, %v4610_v55 }
 0x25a   :  { %v1565_v22 = vadd.f32 %v1564_v25, %v1432_v41  ;;  %v1292_v47 = vadd.f32 %v1291_v13, %v4589_v12  ;;  %v7015_v13 = vld [vmem:[#allocation66_spill] sm:$0xff] }
 0x25c   :  { %v1566_v43 = vadd.f32 %v1565_v22, %v1433_v57  ;;  %v1293_v62 = vadd.f32 %v1292_v47, %v4596_v16  ;;  %v1437_v22 = vmul.f32 %v7015_v13, %v7015_v13  ;;  %v7016_v57 = vld [vmem:[#allocation68_spill] sm:$0xff] }
 0x25e   :  { %v1567_v9 = vadd.f32 %v1566_v43, %v1434_v15  ;;  %v1294_v2 = vadd.f32 %v1293_v62, %v4603_v48  ;;  %v1438_v62 = vmul.f32 %v7016_v57, %v7016_v57  ;;  %v7017_v48 = vld [vmem:[#allocation70_spill] sm:$0xff] }
 0x260   :  { %v1568_v24 = vadd.f32 %v1567_v9, %v1435_v61  ;;  %v1295_v31 = vadd.f32 %v1294_v2, %v4610_v55  ;;  %v1439_v2 = vmul.f32 %v7017_v48, %v7017_v48  ;;  %v7018_v55 = vld [vmem:[#allocation72_spill] sm:$0xff] }
 0x262   :  { %v1569_v25 = vadd.f32 %v1568_v24, %v1436_v1  ;;  %v1296_v41 = vadd.f32 %v1295_v31, %v7015_v13  ;;  %v1440_v31 = vmul.f32 %v7018_v55, %v7018_v55  ;;  %v7019_v13 = vld [vmem:[#allocation74_spill] sm:$0xff] }
 0x264   :  { %v1570_v47 = vadd.f32 %v1569_v25, %v1437_v22  ;;  %v1297_v43 = vadd.f32 %v1296_v41, %v7016_v57  ;;  %v1441_v41 = vmul.f32 %v7019_v13, %v7019_v13  ;;  %v7020_v57 = vld [vmem:[#allocation76_spill] sm:$0xff] }
 0x266   :  { %v1571_v15 = vadd.f32 %v1570_v47, %v1438_v62  ;;  %v1298_v9 = vadd.f32 %v1297_v43, %v7017_v48  ;;  %v1442_v43 = vmul.f32 %v7020_v57, %v7020_v57  ;;  %v7021_v48 = vld [vmem:[#allocation78_spill] sm:$0xff] }
 0x268   :  { %v1572_v61 = vadd.f32 %v1571_v15, %v1439_v2  ;;  %v1299_v24 = vadd.f32 %v1298_v9, %v7018_v55  ;;  %v1443_v9 = vmul.f32 %v7021_v48, %v7021_v48  ;;  %v7022_v55 = vld [vmem:[#allocation80_spill] sm:$0xff] }
 0x26a   :  { %v1573_v1 = vadd.f32 %v1572_v61, %v1440_v31  ;;  %v1300_v25 = vadd.f32 %v1299_v24, %v7019_v13  ;;  %v1444_v24 = vmul.f32 %v7022_v55, %v7022_v55  ;;  %v7023_v13 = vld [vmem:[#allocation82_spill] sm:$0xff] }
 0x26c   :  { %v1574_v22 = vadd.f32 %v1573_v1, %v1441_v41  ;;  %v1301_v47 = vadd.f32 %v1300_v25, %v7020_v57  ;;  %v1445_v25 = vmul.f32 %v7023_v13, %v7023_v13  ;;  %v7024_v57 = vld [vmem:[#allocation84_spill] sm:$0xff] }
 0x26e   :  { %v1575_v62 = vadd.f32 %v1574_v22, %v1442_v43  ;;  %v1302_v15 = vadd.f32 %v1301_v47, %v7021_v48  ;;  %v1446_v47 = vmul.f32 %v7024_v57, %v7024_v57  ;;  %v7025_v48 = vld [vmem:[#allocation86_spill] sm:$0xff] }
 0x270   :  { %v1576_v2 = vadd.f32 %v1575_v62, %v1443_v9  ;;  %v1303_v61 = vadd.f32 %v1302_v15, %v7022_v55  ;;  %v1447_v15 = vmul.f32 %v7025_v48, %v7025_v48  ;;  %v7026_v55 = vld [vmem:[#allocation88_spill] sm:$0xff] }
 0x272   :  { %v1577_v31 = vadd.f32 %v1576_v2, %v1444_v24  ;;  %v1304_v1 = vadd.f32 %v1303_v61, %v7023_v13  ;;  %v1448_v61 = vmul.f32 %v7026_v55, %v7026_v55  ;;  %v7027_v13 = vld [vmem:[#allocation90_spill] sm:$0xff] }
 0x274   :  { %v1578_v41 = vadd.f32 %v1577_v31, %v1445_v25  ;;  %v1305_v22 = vadd.f32 %v1304_v1, %v7024_v57  ;;  %v1449_v1 = vmul.f32 %v7027_v13, %v7027_v13  ;;  %v7028_v57 = vld [vmem:[#allocation92_spill] sm:$0xff] }
 0x276   :  { %v1579_v43 = vadd.f32 %v1578_v41, %v1446_v47  ;;  %v1306_v62 = vadd.f32 %v1305_v22, %v7025_v48  ;;  %v1450_v22 = vmul.f32 %v7028_v57, %v7028_v57  ;;  %v7029_v48 = vld [vmem:[#allocation94_spill] sm:$0xff] }
 0x278   :  { %v1580_v9 = vadd.f32 %v1579_v43, %v1447_v15  ;;  %v1307_v2 = vadd.f32 %v1306_v62, %v7026_v55  ;;  %v1451_v62 = vmul.f32 %v7029_v48, %v7029_v48 }
 0x27a   :  { %v1581_v24 = vadd.f32 %v1580_v9, %v1448_v61  ;;  %v1308_v31 = vadd.f32 %v1307_v2, %v7027_v13  ;;  %v1452_v2 = vmul.f32 %v4722_v35, %v4722_v35  ;;  %v7030_v61 = vld [vmem:[#allocation98_spill] sm:$0xff] }
 0x27c   :  { %v1582_v25 = vadd.f32 %v1581_v24, %v1449_v1  ;;  %v1309_v41 = vadd.f32 %v1308_v31, %v7028_v57  ;;  %v1453_v24 = vmul.f32 %v7030_v61, %v7030_v61  ;;  %v7031_v57 = vld [vmem:[#allocation100_spill] sm:$0xff] }
 0x27e   :  { %v1583_v47 = vadd.f32 %v1582_v25, %v1450_v22  ;;  %v1310_v43 = vadd.f32 %v1309_v41, %v7029_v48  ;;  %v1454_v41 = vmul.f32 %v7031_v57, %v7031_v57 }
 0x280   :  { %v1584_v15 = vadd.f32 %v1583_v47, %v1451_v62  ;;  %v1311_v9 = vadd.f32 %v1310_v43, %v4722_v35 }
 0x282   :  { %v1585_v1 = vadd.f32 %v1584_v15, %v1452_v2  ;;  %v1312_v31 = vadd.f32 %v1311_v9, %v7030_v61  ;;  %v7129_v61 = vld [vmem:[#allocation5_spill] sm:$0xff] }
 0x284   :  { %v1586_v13 = vadd.f32 %v1585_v1, %v1453_v24  ;;  %v1313_v25 = vadd.f32 %v1312_v31, %v7031_v57  ;;  %v7032_v31 = vld [vmem:[#allocation2_spill] sm:$0xff] }
 0x286   :  { %v1314_v22 = vrot.slane %v1313_v25, 4  ;;  %v1587_v48 = vadd.f32 %v1586_v13, %v1454_v41  ;;  %v7096_v41 = vld [vmem:[#allocation93_spill] sm:$0xff]  ;;  %v7116_v13 = vld [vmem:[#allocation86_spill] sm:$0xff] }
 0x288   :  { %v1315_v47 = vadd.f32 %v1314_v22, %v1313_v25  ;;  %v1588_v62 = vrot.slane %v1587_v48, 4  ;;  %v7033_v25 = vld [vmem:[#allocation3_spill] sm:$0xff]  ;;  %v7118_v22 = vld [vmem:[#allocation90_spill] sm:$0xff] }
 0x28a   :  { %v1316_v43 = vrot.slane %v1315_v47, 2  ;;  %v1589_v55 = vadd.f32 %v1588_v62, %v1587_v48  ;;  %v7094_v62 = vld [vmem:[#allocation89_spill] sm:$0xff]  ;;  %v7117_v48 = vld [vmem:[#allocation88_spill] sm:$0xff] }
 0x28c   :  { %v1317_v16 = vadd.f32 %v1316_v43, %v1315_v47  ;;  %v1590_v35 = vrot.slane %v1589_v55, 2 }
 0x28e   :  { %v1318_v12 = vrot.slane %v1317_v16, 1  ;;  %v1591_v39 = vadd.f32 %v1590_v35, %v1589_v55  ;;  %v7091_v55 = vld [vmem:[#allocation83_spill] sm:$0xff] }
 0x290   :  { %v1319_v49 = vadd.f32 %v1318_v12, %v1317_v16  ;;  %v1592_v15 = vrot.slane %v1591_v39, 1  ;;  %v7098_v12 = vld [vmem:[#allocation97_spill] sm:$0xff]  ;;  %v7119_v16 = vld [vmem:[#allocation92_spill] sm:$0xff] }
 0x292   :  { %v4936_v2 = vmul.f32 0.0009451796, %v1319_v49  ;;  %v1593_v9 = vadd.f32 %v1592_v15, %v1591_v39  ;;  %v7037_v39 = vld [vmem:[#allocation7_spill] sm:$0xff] }
 0x293   :  { %v7095_v15 = vld [vmem:[#allocation91_spill] sm:$0xff] }
 0x294   :  { %v1594_v24 = vmul.f32 0.0009451796, %v1593_v9  ;;  %v1595_v1 = vmul.f32 %v4936_v2, %v4936_v2  ;;  %v7099_v49 = vld [vmem:[#allocation99_spill] sm:$0xff]  ;;  %v7115_v9 = vld [vmem:[#allocation84_spill] sm:$0xff]  ;;  %v7122_v5 = vsub.f32 %v7032_v31, %v4936_v2  ;;  %v7124_v19 = vsub.f32 %v7033_v25, %v4936_v2 }
 0x295   :  { %v7130_v7 = vsub.f32 %v7129_v61, %v4936_v2 }
 0x296   :  { %v1596_v47 = vsub.f32 %v1594_v24, %v1595_v1  ;;  %v7126_v1 = vld [vmem:[#allocation4_spill] sm:$0xff] }
 0x297   :  { %v7127_v43 = vsub.f32 %v7126_v1, %v4936_v2 }
 0x298   :  { %v1597_v35 = vmax.f32 %v1596_v47, 0.0  ;;  %v7051_v47 = vld [vmem:[#allocation21_spill] sm:$0xff] }
 0x29a   :  { %v1598_v24 = vadd.f32 1e-05, %v1597_v35 }
 0x29c   :  { %3872 = vrsqrt.f32 %v1598_v24  ;;  %v7093_v24 = vld [vmem:[#allocation87_spill] sm:$0xff] }
 0x2a6   :  { %v5072_v35 = vpop.eup %3872 }
 0x2a7   :  { %v5214_v36 = vmul.f32 %v5072_v35, %v7122_v5  ;;  %v5220_v4 = vmul.f32 %v5072_v35, %v7124_v19  ;;  %v5226_v18 = vmul.f32 %v5072_v35, %v7127_v43  ;;  %v5232_v31 = vmul.f32 %v5072_v35, %v7130_v7  ;;  %v7132_v5 = vld [vmem:[#allocation6_spill] sm:$0xff]  ;;  %v7137_v43 = vld [vmem:[#allocation8_spill] sm:$0xff]  ;;  %v7140_v7 = vld [vmem:[#allocation9_spill] sm:$0xff] }
 0x2a8   :  { %v7135_v19 = vsub.f32 %v7037_v39, %v4936_v2 }
 0x2a9   :  { %7123 = vst [vmem:[#allocation100_spill] sm:$0xff] %v5214_v36  ;;  %7125 = vst [vmem:[#allocation2_spill] sm:$0xff] %v5220_v4  ;;  %v7133_v36 = vsub.f32 %v7132_v5, %v4936_v2 }
 0x2aa   :  { %7128 = vst [vmem:[#allocation3_spill] sm:$0xff] %v5226_v18  ;;  %7131 = vst [vmem:[#allocation7_spill] sm:$0xff] %v5232_v31  ;;  %v5244_v1 = vmul.f32 %v5072_v35, %v7135_v19  ;;  %v7138_v18 = vsub.f32 %v7137_v43, %v4936_v2  ;;  %v7141_v31 = vsub.f32 %v7140_v7, %v4936_v2  ;;  %v7146_v19 = vld [vmem:[#allocation11_spill] sm:$0xff] }
 0x2ab   :  { %v5238_v25 = vmul.f32 %v5072_v35, %v7133_v36  ;;  %v7143_v36 = vld [vmem:[#allocation10_spill] sm:$0xff] }
 0x2ac   :  { %7136 = vst [vmem:[#allocation83_spill] sm:$0xff] %v5244_v1  ;;  %v5250_v61 = vmul.f32 %v5072_v35, %v7138_v18  ;;  %v5256_v5 = vmul.f32 %v5072_v35, %v7141_v31  ;;  %v7147_v1 = vsub.f32 %v7146_v19, %v4936_v2  ;;  %v7149_v18 = vld [vmem:[#allocation12_spill] sm:$0xff]  ;;  %v7152_v31 = vld [vmem:[#allocation13_spill] sm:$0xff] }
 0x2ad   :  { %7134 = vst [vmem:[#allocation21_spill] sm:$0xff] %v5238_v25  ;;  %v7144_v25 = vsub.f32 %v7143_v36, %v4936_v2 }
 0x2ae   :  { %7139 = vst [vmem:[#allocation87_spill] sm:$0xff] %v5250_v61  ;;  %7142 = vst [vmem:[#allocation89_spill] sm:$0xff] %v5256_v5  ;;  %v5268_v43 = vmul.f32 %v5072_v35, %v7147_v1  ;;  %v7150_v61 = vsub.f32 %v7149_v18, %v4936_v2  ;;  %v7153_v5 = vsub.f32 %v7152_v31, %v4936_v2  ;;  %v7158_v1 = vld [vmem:[#allocation15_spill] sm:$0xff] }
 0x2af   :  { %v5262_v39 = vmul.f32 %v5072_v35, %v7144_v25  ;;  %v7155_v25 = vld [vmem:[#allocation14_spill] sm:$0xff] }
 0x2b0   :  { %7148 = vst [vmem:[#allocation93_spill] sm:$0xff] %v5268_v43  ;;  %v5274_v7 = vmul.f32 %v5072_v35, %v7150_v61  ;;  %v5280_v36 = vmul.f32 %v5072_v35, %v7153_v5  ;;  %v7159_v43 = vsub.f32 %v7158_v1, %v4936_v2  ;;  %v7161_v61 = vld [vmem:[#allocation16_spill] sm:$0xff]  ;;  %v7164_v5 = vld [vmem:[#allocation17_spill] sm:$0xff] }
 0x2b1   :  { %7145 = vst [vmem:[#allocation91_spill] sm:$0xff] %v5262_v39  ;;  %v7156_v39 = vsub.f32 %v7155_v25, %v4936_v2 }
 0x2b2   :  { %7151 = vst [vmem:[#allocation97_spill] sm:$0xff] %v5274_v7  ;;  %7154 = vst [vmem:[#allocation99_spill] sm:$0xff] %v5280_v36  ;;  %v5292_v18 = vmul.f32 %v5072_v35, %v7159_v43  ;;  %v7162_v7 = vsub.f32 %v7161_v61, %v4936_v2  ;;  %v7165_v36 = vsub.f32 %v7164_v5, %v4936_v2  ;;  %v7170_v43 = vld [vmem:[#allocation19_spill] sm:$0xff] }
 0x2b3   :  { %v5286_v19 = vmul.f32 %v5072_v35, %v7156_v39  ;;  %v7167_v39 = vld [vmem:[#allocation18_spill] sm:$0xff] }
 0x2b4   :  { %7160 = vst [vmem:[#allocation86_spill] sm:$0xff] %v5292_v18  ;;  %v5298_v31 = vmul.f32 %v5072_v35, %v7162_v7  ;;  %v5304_v25 = vmul.f32 %v5072_v35, %v7165_v36  ;;  %v7171_v18 = vsub.f32 %v7170_v43, %v4936_v2  ;;  %v7173_v7 = vld [vmem:[#allocation20_spill] sm:$0xff]  ;;  %v7176_v36 = vsub.f32 %v7051_v47, %v4936_v2 }
 0x2b5   :  { %7157 = vst [vmem:[#allocation84_spill] sm:$0xff] %v5286_v19  ;;  %v7168_v19 = vsub.f32 %v7167_v39, %v4936_v2 }
 0x2b6   :  { %7163 = vst [vmem:[#allocation88_spill] sm:$0xff] %v5298_v31  ;;  %7166 = vst [vmem:[#allocation90_spill] sm:$0xff] %v5304_v25  ;;  %v5316_v61 = vmul.f32 %v5072_v35, %v7171_v18  ;;  %v7174_v31 = vsub.f32 %v7173_v7, %v4936_v2  ;;  %v5328_v39 = vmul.f32 %v5072_v35, %v7176_v36  ;;  %v7181_v18 = vld [vmem:[#allocation23_spill] sm:$0xff]  ;;  %v7187_v36 = vld [vmem:[#allocation25_spill] sm:$0xff] }
 0x2b7   :  { %v5310_v1 = vmul.f32 %v5072_v35, %v7168_v19  ;;  %v7178_v19 = vld [vmem:[#allocation22_spill] sm:$0xff] }
 0x2b8   :  { %7172 = vst [vmem:[#allocation96_spill] sm:$0xff] %v5316_v61  ;;  %v5322_v5 = vmul.f32 %v5072_v35, %v7174_v31  ;;  %7177 = vst [vmem:[#allocation5_spill] sm:$0xff] %v5328_v39  ;;  %v7182_v61 = vsub.f32 %v7181_v18, %v4936_v2  ;;  %v7184_v31 = vld [vmem:[#allocation24_spill] sm:$0xff]  ;;  %v7188_v39 = vsub.f32 %v7187_v36, %v4936_v2 }
 0x2b9   :  { %7169 = vst [vmem:[#allocation92_spill] sm:$0xff] %v5310_v1  ;;  %v7179_v1 = vsub.f32 %v7178_v19, %v4936_v2 }
 0x2ba   :  { %7175 = vst [vmem:[#allocation4_spill] sm:$0xff] %v5322_v5  ;;  %v5340_v7 = vmul.f32 %v5072_v35, %v7182_v61  ;;  %v7185_v5 = vsub.f32 %v7184_v31, %v4936_v2  ;;  %v5352_v19 = vmul.f32 %v5072_v35, %v7188_v39  ;;  %v7193_v61 = vld [vmem:[#allocation27_spill] sm:$0xff]  ;;  %v7199_v39 = vld [vmem:[#allocation29_spill] sm:$0xff] }
 0x2bb   :  { %v5334_v43 = vmul.f32 %v5072_v35, %v7179_v1  ;;  %v7190_v1 = vld [vmem:[#allocation26_spill] sm:$0xff] }
 0x2bc   :  { %7183 = vst [vmem:[#allocation8_spill] sm:$0xff] %v5340_v7  ;;  %v5346_v47 = vmul.f32 %v5072_v35, %v7185_v5  ;;  %7189 = vst [vmem:[#allocation10_spill] sm:$0xff] %v5352_v19  ;;  %v7194_v7 = vsub.f32 %v7193_v61, %v4936_v2  ;;  %v7196_v5 = vld [vmem:[#allocation28_spill] sm:$0xff]  ;;  %v7200_v19 = vsub.f32 %v7199_v39, %v4936_v2 }
 0x2bd   :  { %7180 = vst [vmem:[#allocation6_spill] sm:$0xff] %v5334_v43  ;;  %v7191_v43 = vsub.f32 %v7190_v1, %v4936_v2 }
 0x2be   :  { %7186 = vst [vmem:[#allocation9_spill] sm:$0xff] %v5346_v47  ;;  %v5364_v31 = vmul.f32 %v5072_v35, %v7194_v7  ;;  %v7197_v47 = vsub.f32 %v7196_v5, %v4936_v2  ;;  %v5376_v1 = vmul.f32 %v5072_v35, %v7200_v19  ;;  %v7205_v7 = vld [vmem:[#allocation31_spill] sm:$0xff]  ;;  %v7211_v19 = vld [vmem:[#allocation33_spill] sm:$0xff] }
 0x2bf   :  { %v5358_v18 = vmul.f32 %v5072_v35, %v7191_v43  ;;  %v7202_v43 = vld [vmem:[#allocation30_spill] sm:$0xff] }
 0x2c0   :  { %7195 = vst [vmem:[#allocation12_spill] sm:$0xff] %v5364_v31  ;;  %v5370_v36 = vmul.f32 %v5072_v35, %v7197_v47  ;;  %7201 = vst [vmem:[#allocation14_spill] sm:$0xff] %v5376_v1  ;;  %v7206_v31 = vsub.f32 %v7205_v7, %v4936_v2  ;;  %v7208_v47 = vld [vmem:[#allocation32_spill] sm:$0xff]  ;;  %v7212_v1 = vsub.f32 %v7211_v19, %v4936_v2 }
 0x2c1   :  { %7192 = vst [vmem:[#allocation11_spill] sm:$0xff] %v5358_v18  ;;  %v7203_v18 = vsub.f32 %v7202_v43, %v4936_v2 }
 0x2c2   :  { %7198 = vst [vmem:[#allocation13_spill] sm:$0xff] %v5370_v36  ;;  %v5388_v5 = vmul.f32 %v5072_v35, %v7206_v31  ;;  %v7209_v36 = vsub.f32 %v7208_v47, %v4936_v2  ;;  %v5400_v43 = vmul.f32 %v5072_v35, %v7212_v1  ;;  %v7217_v31 = vld [vmem:[#allocation35_spill] sm:$0xff]  ;;  %v7223_v1 = vld [vmem:[#allocation37_spill] sm:$0xff] }
 0x2c3   :  { %v5382_v61 = vmul.f32 %v5072_v35, %v7203_v18  ;;  %v7214_v18 = vld [vmem:[#allocation34_spill] sm:$0xff] }
 0x2c4   :  { %7207 = vst [vmem:[#allocation16_spill] sm:$0xff] %v5388_v5  ;;  %v5394_v39 = vmul.f32 %v5072_v35, %v7209_v36  ;;  %7213 = vst [vmem:[#allocation18_spill] sm:$0xff] %v5400_v43  ;;  %v7218_v5 = vsub.f32 %v7217_v31, %v4936_v2  ;;  %v7220_v36 = vld [vmem:[#allocation36_spill] sm:$0xff]  ;;  %v7224_v43 = vsub.f32 %v7223_v1, %v4936_v2 }
 0x2c5   :  { %7204 = vst [vmem:[#allocation15_spill] sm:$0xff] %v5382_v61  ;;  %v7215_v61 = vsub.f32 %v7214_v18, %v4936_v2 }
 0x2c6   :  { %7210 = vst [vmem:[#allocation17_spill] sm:$0xff] %v5394_v39  ;;  %v5412_v47 = vmul.f32 %v5072_v35, %v7218_v5  ;;  %v7221_v39 = vsub.f32 %v7220_v36, %v4936_v2  ;;  %v5424_v18 = vmul.f32 %v5072_v35, %v7224_v43  ;;  %v7229_v5 = vld [vmem:[#allocation39_spill] sm:$0xff] }
 0x2c7   :  { %v5406_v7 = vmul.f32 %v5072_v35, %v7215_v61  ;;  %v7226_v61 = vld [vmem:[#allocation38_spill] sm:$0xff]  ;;  %v7235_v43 = vld [vmem:[#allocation43_spill] sm:$0xff] }
 0x2c8   :  { %7219 = vst [vmem:[#allocation20_spill] sm:$0xff] %v5412_v47  ;;  %v5418_v19 = vmul.f32 %v5072_v35, %v7221_v39  ;;  %7225 = vst [vmem:[#allocation23_spill] sm:$0xff] %v5424_v18  ;;  %v7230_v47 = vsub.f32 %v7229_v5, %v4936_v2  ;;  %v7232_v39 = vld [vmem:[#allocation41_spill] sm:$0xff]  ;;  %v7236_v18 = vsub.f32 %v7235_v43, %v4936_v2 }
 0x2c9   :  { %7216 = vst [vmem:[#allocation19_spill] sm:$0xff] %v5406_v7  ;;  %v7227_v7 = vsub.f32 %v7226_v61, %v4936_v2 }
 0x2ca   :  { %7222 = vst [vmem:[#allocation22_spill] sm:$0xff] %v5418_v19  ;;  %v5436_v36 = vmul.f32 %v5072_v35, %v7230_v47  ;;  %v7233_v19 = vsub.f32 %v7232_v39, %v4936_v2  ;;  %v5448_v61 = vmul.f32 %v5072_v35, %v7236_v18  ;;  %v7241_v47 = vld [vmem:[#allocation47_spill] sm:$0xff] }
 0x2cb   :  { %v5430_v31 = vmul.f32 %v5072_v35, %v7227_v7  ;;  %v7238_v7 = vld [vmem:[#allocation45_spill] sm:$0xff]  ;;  %v7247_v18 = vld [vmem:[#allocation51_spill] sm:$0xff] }
 0x2cc   :  { %7231 = vst [vmem:[#allocation25_spill] sm:$0xff] %v5436_v36  ;;  %v5442_v1 = vmul.f32 %v5072_v35, %v7233_v19  ;;  %7237 = vst [vmem:[#allocation27_spill] sm:$0xff] %v5448_v61  ;;  %v7242_v36 = vsub.f32 %v7241_v47, %v4936_v2  ;;  %v7244_v19 = vld [vmem:[#allocation49_spill] sm:$0xff]  ;;  %v7248_v61 = vsub.f32 %v7247_v18, %v4936_v2 }
 0x2cd   :  { %7228 = vst [vmem:[#allocation24_spill] sm:$0xff] %v5430_v31  ;;  %v7239_v31 = vsub.f32 %v7238_v7, %v4936_v2 }
 0x2ce   :  { %7234 = vst [vmem:[#allocation26_spill] sm:$0xff] %v5442_v1  ;;  %v5460_v39 = vmul.f32 %v5072_v35, %v7242_v36  ;;  %v7245_v1 = vsub.f32 %v7244_v19, %v4936_v2  ;;  %v5472_v7 = vmul.f32 %v5072_v35, %v7248_v61  ;;  %v7253_v36 = vld [vmem:[#allocation55_spill] sm:$0xff] }
 0x2cf   :  { %v5454_v5 = vmul.f32 %v5072_v35, %v7239_v31  ;;  %v7250_v31 = vld [vmem:[#allocation53_spill] sm:$0xff]  ;;  %v7259_v61 = vld [vmem:[#allocation59_spill] sm:$0xff] }
 0x2d0   :  { %7243 = vst [vmem:[#allocation29_spill] sm:$0xff] %v5460_v39  ;;  %v5466_v43 = vmul.f32 %v5072_v35, %v7245_v1  ;;  %7249 = vst [vmem:[#allocation31_spill] sm:$0xff] %v5472_v7  ;;  %v7254_v39 = vsub.f32 %v7253_v36, %v4936_v2  ;;  %v7256_v1 = vld [vmem:[#allocation57_spill] sm:$0xff]  ;;  %v7260_v7 = vsub.f32 %v7259_v61, %v4936_v2 }
 0x2d1   :  { %7240 = vst [vmem:[#allocation28_spill] sm:$0xff] %v5454_v5  ;;  %v7251_v5 = vsub.f32 %v7250_v31, %v4936_v2 }
 0x2d2   :  { %7246 = vst [vmem:[#allocation30_spill] sm:$0xff] %v5466_v43  ;;  %v5484_v19 = vmul.f32 %v5072_v35, %v7254_v39  ;;  %v7257_v43 = vsub.f32 %v7256_v1, %v4936_v2  ;;  %v5496_v31 = vmul.f32 %v5072_v35, %v7260_v7  ;;  %v7265_v39 = vld [vmem:[#allocation63_spill] sm:$0xff] }
 0x2d3   :  { %v5478_v47 = vmul.f32 %v5072_v35, %v7251_v5  ;;  %v7262_v5 = vld [vmem:[#allocation61_spill] sm:$0xff]  ;;  %v7271_v7 = vld [vmem:[#allocation67_spill] sm:$0xff] }
 0x2d4   :  { %7255 = vst [vmem:[#allocation33_spill] sm:$0xff] %v5484_v19  ;;  %v5490_v18 = vmul.f32 %v5072_v35, %v7257_v43  ;;  %7261 = vst [vmem:[#allocation35_spill] sm:$0xff] %v5496_v31  ;;  %v7266_v19 = vsub.f32 %v7265_v39, %v4936_v2  ;;  %v7268_v43 = vld [vmem:[#allocation65_spill] sm:$0xff]  ;;  %v7272_v31 = vsub.f32 %v7271_v7, %v4936_v2 }
 0x2d5   :  { %7252 = vst [vmem:[#allocation32_spill] sm:$0xff] %v5478_v47  ;;  %v7263_v47 = vsub.f32 %v7262_v5, %v4936_v2 }
 0x2d6   :  { %7258 = vst [vmem:[#allocation34_spill] sm:$0xff] %v5490_v18  ;;  %v5508_v1 = vmul.f32 %v5072_v35, %v7266_v19  ;;  %v7269_v18 = vsub.f32 %v7268_v43, %v4936_v2  ;;  %v5520_v5 = vmul.f32 %v5072_v35, %v7272_v31  ;;  %v7277_v19 = vld [vmem:[#allocation71_spill] sm:$0xff] }
 0x2d7   :  { %v5502_v36 = vmul.f32 %v5072_v35, %v7263_v47  ;;  %v7274_v47 = vld [vmem:[#allocation69_spill] sm:$0xff]  ;;  %v7283_v31 = vld [vmem:[#allocation75_spill] sm:$0xff] }
 0x2d8   :  { %7267 = vst [vmem:[#allocation37_spill] sm:$0xff] %v5508_v1  ;;  %v5514_v61 = vmul.f32 %v5072_v35, %v7269_v18  ;;  %7273 = vst [vmem:[#allocation39_spill] sm:$0xff] %v5520_v5  ;;  %v7278_v1 = vsub.f32 %v7277_v19, %v4936_v2  ;;  %v7280_v18 = vld [vmem:[#allocation73_spill] sm:$0xff]  ;;  %v7284_v5 = vsub.f32 %v7283_v31, %v4936_v2 }
 0x2d9   :  { %7264 = vst [vmem:[#allocation36_spill] sm:$0xff] %v5502_v36  ;;  %v7275_v36 = vsub.f32 %v7274_v47, %v4936_v2 }
 0x2da   :  { %7270 = vst [vmem:[#allocation38_spill] sm:$0xff] %v5514_v61  ;;  %v5532_v43 = vmul.f32 %v5072_v35, %v7278_v1  ;;  %v7281_v61 = vsub.f32 %v7280_v18, %v4936_v2  ;;  %v5544_v47 = vmul.f32 %v5072_v35, %v7284_v5  ;;  %v7288_v1 = vld [vmem:[#allocation79_spill] sm:$0xff]  ;;  %v7292_v5 = vsub.f32 %v7091_v55, %v4936_v2 }
 0x2db   :  { %v5526_v39 = vmul.f32 %v5072_v35, %v7275_v36  ;;  %v7285_v36 = vld [vmem:[#allocation77_spill] sm:$0xff] }
 0x2dc   :  { %7279 = vst [vmem:[#allocation43_spill] sm:$0xff] %v5532_v43  ;;  %v5538_v7 = vmul.f32 %v5072_v35, %v7281_v61  ;;  %v7289_v43 = vsub.f32 %v7288_v1, %v4936_v2  ;;  %v7290_v61 = vld [vmem:[#allocation81_spill] sm:$0xff] }
 0x2dd   :  { %7276 = vst [vmem:[#allocation41_spill] sm:$0xff] %v5526_v39  ;;  %v7286_v39 = vsub.f32 %v7285_v36, %v4936_v2  ;;  %v5568_v36 = vmul.f32 %v5072_v35, %v7292_v5  ;;  %v7298_v5 = vsub.f32 %v7095_v15, %v4936_v2 }
 0x2de   :  { %7282 = vst [vmem:[#allocation45_spill] sm:$0xff] %v5538_v7  ;;  %v5556_v18 = vmul.f32 %v5072_v35, %v7289_v43  ;;  %v7291_v7 = vsub.f32 %v7290_v61, %v4936_v2  ;;  %v7295_v43 = vsub.f32 %v7093_v24, %v4936_v2 }
 0x2df   :  { %v5550_v19 = vmul.f32 %v5072_v35, %v7286_v39  ;;  %v7293_v39 = vld [vmem:[#allocation85_spill] sm:$0xff] }
 0x2e0   :  { %v5562_v31 = vmul.f32 %v5072_v35, %v7291_v7  ;;  %v5580_v61 = vmul.f32 %v5072_v35, %v7295_v43  ;;  %v7297_v7 = vsub.f32 %v7094_v62, %v4936_v2  ;;  %v7300_v43 = vld [vmem:[#allocation95_spill] sm:$0xff]  ;;  %v7489_v25 = vld [vmem:[#allocation36_spill] sm:$0xff] }
 0x2e1   :  { %7287 = vst [vmem:[#allocation47_spill] sm:$0xff] %v5550_v19  ;;  %v7294_v19 = vsub.f32 %v7293_v39, %v4936_v2  ;;  %v5592_v39 = vmul.f32 %v5072_v35, %v7298_v5  ;;  %v7303_v5 = vsub.f32 %v7099_v49, %v4936_v2 }
 0x2e2   :  { %7296 = vst [vmem:[#allocation49_spill] sm:$0xff] %v5580_v61  ;;  %v5586_v55 = vmul.f32 %v5072_v35, %v7297_v7  ;;  %v7301_v61 = vsub.f32 %v7300_v43, %v4936_v2  ;;  %v7302_v7 = vsub.f32 %v7098_v12, %v4936_v2 }
 0x2e3   :  { %v5574_v1 = vmul.f32 %v5072_v35, %v7294_v19  ;;  %v7299_v19 = vsub.f32 %v7096_v41, %v4936_v2  ;;  %v5616_v41 = vmul.f32 %v5072_v35, %v7303_v5  ;;  %v7307_v5 = vsub.f32 %v4259_v37, %v4936_v2 }
 0x2e4   :  { %v5604_v62 = vmul.f32 %v5072_v35, %v7301_v61  ;;  %v5610_v15 = vmul.f32 %v5072_v35, %v7302_v7  ;;  %v7305_v61 = vsub.f32 %v4235_v21, %v4936_v2  ;;  %v7306_v7 = vsub.f32 %v4252_v30, %v4936_v2 }
 0x2e5   :  { %v5598_v24 = vmul.f32 %v5072_v35, %v7299_v19  ;;  %v7304_v19 = vsub.f32 %v4228_v14, %v4936_v2  ;;  %v5640_v14 = vmul.f32 %v5072_v35, %v7307_v5  ;;  %v7311_v5 = vsub.f32 %v4307_v8, %v4936_v2 }
 0x2e6   :  { %v5628_v12 = vmul.f32 %v5072_v35, %v7305_v61  ;;  %v5634_v49 = vmul.f32 %v5072_v35, %v7306_v7  ;;  %v7309_v61 = vsub.f32 %v4283_v53, %v4936_v2  ;;  %v7310_v7 = vsub.f32 %v4300_v63, %v4936_v2 }
 0x2e7   :  { %v5622_v43 = vmul.f32 %v5072_v35, %v7304_v19  ;;  %v7308_v19 = vsub.f32 %v4276_v46, %v4936_v2  ;;  %v5664_v46 = vmul.f32 %v5072_v35, %v7311_v5  ;;  %v7315_v5 = vsub.f32 %v4355_v50, %v4936_v2 }
 0x2e8   :  { %v5652_v30 = vmul.f32 %v5072_v35, %v7309_v61  ;;  %v5658_v37 = vmul.f32 %v5072_v35, %v7310_v7  ;;  %v7313_v61 = vsub.f32 %v4331_v29, %v4936_v2  ;;  %v7314_v7 = vsub.f32 %v4348_v42, %v4936_v2  ;;  %v7496_v4 = vld [vmem:[#allocation47_spill] sm:$0xff] }
 0x2e9   :  { %v5646_v21 = vmul.f32 %v5072_v35, %v7308_v19  ;;  %v7312_v19 = vsub.f32 %v4324_v20, %v4936_v2  ;;  %v5688_v20 = vmul.f32 %v5072_v35, %v7315_v5  ;;  %v7319_v5 = vsub.f32 %v4386_v34, %v4936_v2 }
 0x2ea   :  { %v5676_v63 = vmul.f32 %v5072_v35, %v7313_v61  ;;  %v5682_v8 = vmul.f32 %v5072_v35, %v7314_v7  ;;  %v7317_v61 = vsub.f32 %v4372_v10, %v4936_v2  ;;  %v7318_v7 = vsub.f32 %v4379_v23, %v4936_v2 }
 0x2eb   :  { %v5670_v53 = vmul.f32 %v5072_v35, %v7312_v19  ;;  %v7316_v19 = vsub.f32 %v4365_v60, %v4936_v2  ;;  %v5712_v60 = vmul.f32 %v5072_v35, %v7319_v5  ;;  %v7325_v5 = vsub.f32 %v4414_v28, %v4936_v2 }
 0x2ec   :  { %v5700_v42 = vmul.f32 %v5072_v35, %v7317_v61  ;;  %v5706_v50 = vmul.f32 %v5072_v35, %v7318_v7  ;;  %v7321_v61 = vsub.f32 %v4400_v58, %v4936_v2  ;;  %v7323_v7 = vsub.f32 %v4407_v11, %v4936_v2 }
 0x2ed   :  { %v5694_v29 = vmul.f32 %v5072_v35, %v7316_v19  ;;  %v7320_v19 = vsub.f32 %v4393_v0, %v4936_v2  ;;  %v5736_v0 = vmul.f32 %v5072_v35, %v7325_v5  ;;  %v7333_v5 = vsub.f32 %v4442_v51, %v4936_v2 }
 0x2ee   :  { %v5724_v23 = vmul.f32 %v5072_v35, %v7321_v61  ;;  %v5730_v34 = vmul.f32 %v5072_v35, %v7323_v7  ;;  %v7329_v61 = vsub.f32 %v4428_v3, %v4936_v2  ;;  %v7331_v7 = vsub.f32 %v4435_v26, %v4936_v2 }
 0x2ef   :  { %v5718_v10 = vmul.f32 %v5072_v35, %v7320_v19  ;;  %7326 = vst [vmem:[#allocation55_spill] sm:$0xff] %v5736_v0  ;;  %v7327_v19 = vsub.f32 %v4421_v45, %v4936_v2  ;;  %v5760_v45 = vmul.f32 %v5072_v35, %v7333_v5  ;;  %v7341_v5 = vsub.f32 %v4470_v52, %v4936_v2  ;;  %v7554_v0 = vld [vmem:[#allocation99_spill] sm:$0xff] }
 0x2f0   :  { %7322 = vst [vmem:[#allocation51_spill] sm:$0xff] %v5724_v23  ;;  %7324 = vst [vmem:[#allocation53_spill] sm:$0xff] %v5730_v34  ;;  %v5748_v11 = vmul.f32 %v5072_v35, %v7329_v61  ;;  %v5754_v28 = vmul.f32 %v5072_v35, %v7331_v7  ;;  %v7337_v61 = vsub.f32 %v4456_v40, %v4936_v2  ;;  %v7558_v34 = vld [vmem:[#allocation86_spill] sm:$0xff] }
 0x2f1   :  { %v5742_v58 = vmul.f32 %v5072_v35, %v7327_v19  ;;  %7334 = vst [vmem:[#allocation63_spill] sm:$0xff] %v5760_v45  ;;  %v7335_v19 = vsub.f32 %v4449_v32, %v4936_v2  ;;  %v7339_v7 = vsub.f32 %v4463_v17, %v4936_v2  ;;  %v5784_v32 = vmul.f32 %v5072_v35, %v7341_v5  ;;  %v7535_v45 = vld [vmem:[#allocation2_spill] sm:$0xff] }
 0x2f2   :  { %7330 = vst [vmem:[#allocation59_spill] sm:$0xff] %v5748_v11  ;;  %7332 = vst [vmem:[#allocation61_spill] sm:$0xff] %v5754_v28  ;;  %v5772_v26 = vmul.f32 %v5072_v35, %v7337_v61  ;;  %v7345_v61 = vsub.f32 %v4484_v27, %v4936_v2  ;;  %v7349_v5 = vsub.f32 %v4498_v6, %v4936_v2  ;;  %v7533_v28 = vld [vmem:[#allocation100_spill] sm:$0xff]  ;;  %v7548_v11 = vld [vmem:[#allocation91_spill] sm:$0xff] }
 0x2f3   :  { %7328 = vst [vmem:[#allocation57_spill] sm:$0xff] %v5742_v58  ;;  %v5766_v3 = vmul.f32 %v5072_v35, %v7335_v19  ;;  %v5778_v51 = vmul.f32 %v5072_v35, %v7339_v7  ;;  %7342 = vst [vmem:[#allocation71_spill] sm:$0xff] %v5784_v32  ;;  %v7343_v19 = vsub.f32 %v4477_v59, %v4936_v2  ;;  %v7550_v32 = vld [vmem:[#allocation93_spill] sm:$0xff]  ;;  %v7562_v23 = vld [vmem:[#allocation90_spill] sm:$0xff] }
 0x2f4   :  { %7338 = vst [vmem:[#allocation67_spill] sm:$0xff] %v5772_v26  ;;  %v5796_v17 = vmul.f32 %v5072_v35, %v7345_v61  ;;  %v7347_v7 = vsub.f32 %v4491_v38, %v4936_v2  ;;  %v5808_v59 = vmul.f32 %v5072_v35, %v7349_v5  ;;  %v7353_v61 = vsub.f32 %v4512_v54, %v4936_v2  ;;  %v7357_v5 = vld [vmem:[#allocation40_spill] sm:$0xff] }
 0x2f5   :  { %7336 = vst [vmem:[#allocation65_spill] sm:$0xff] %v5766_v3  ;;  %7340 = vst [vmem:[#allocation69_spill] sm:$0xff] %v5778_v51  ;;  %v5790_v40 = vmul.f32 %v5072_v35, %v7343_v19  ;;  %v7351_v19 = vsub.f32 %v4505_v44, %v4936_v2 }
 0x2f6   :  { %7346 = vst [vmem:[#allocation75_spill] sm:$0xff] %v5796_v17  ;;  %v5802_v52 = vmul.f32 %v5072_v35, %v7347_v7  ;;  %7350 = vst [vmem:[#allocation79_spill] sm:$0xff] %v5808_v59  ;;  %v5820_v38 = vmul.f32 %v5072_v35, %v7353_v61  ;;  %v7355_v7 = vsub.f32 %v4519_v33, %v4936_v2  ;;  %v7363_v61 = vld [vmem:[#allocation44_spill] sm:$0xff] }
 0x2f7   :  { %7344 = vst [vmem:[#allocation73_spill] sm:$0xff] %v5790_v40  ;;  %v5814_v27 = vmul.f32 %v5072_v35, %v7351_v19  ;;  %v7358_v59 = vsub.f32 %v7357_v5, %v4936_v2  ;;  %v7360_v19 = vld [vmem:[#allocation42_spill] sm:$0xff]  ;;  %v7542_v40 = vld [vmem:[#allocation83_spill] sm:$0xff] }
 0x2f8   :  { %7348 = vst [vmem:[#allocation77_spill] sm:$0xff] %v5802_v52  ;;  %7354 = vst [vmem:[#allocation85_spill] sm:$0xff] %v5820_v38  ;;  %v5826_v6 = vmul.f32 %v5072_v35, %v7355_v7  ;;  %v7364_v38 = vsub.f32 %v7363_v61, %v4936_v2  ;;  %v7366_v7 = vld [vmem:[#allocation46_spill] sm:$0xff] }
 0x2f9   :  { %7352 = vst [vmem:[#allocation81_spill] sm:$0xff] %v5814_v27  ;;  %v5832_v44 = vmul.f32 %v5072_v35, %v7358_v59  ;;  %v7361_v27 = vsub.f32 %v7360_v19, %v4936_v2  ;;  %v7369_v59 = vld [vmem:[#allocation48_spill] sm:$0xff] }
 0x2fa   :  { %7356 = vst [vmem:[#allocation95_spill] sm:$0xff] %v5826_v6  ;;  %v5844_v33 = vmul.f32 %v5072_v35, %v7364_v38  ;;  %v7367_v6 = vsub.f32 %v7366_v7, %v4936_v2  ;;  %v7375_v38 = vld [vmem:[#allocation52_spill] sm:$0xff] }
 0x2fb   :  { %7359 = vst [vmem:[#allocation40_spill] sm:$0xff] %v5832_v44  ;;  %v5838_v54 = vmul.f32 %v5072_v35, %v7361_v27  ;;  %v7370_v44 = vsub.f32 %v7369_v59, %v4936_v2  ;;  %v7372_v27 = vld [vmem:[#allocation50_spill] sm:$0xff] }
 0x2fc   :  { %7365 = vst [vmem:[#allocation44_spill] sm:$0xff] %v5844_v33  ;;  %v5850_v5 = vmul.f32 %v5072_v35, %v7367_v6  ;;  %v7376_v33 = vsub.f32 %v7375_v38, %v4936_v2  ;;  %v7378_v6 = vld [vmem:[#allocation54_spill] sm:$0xff] }
 0x2fd   :  { %7362 = vst [vmem:[#allocation42_spill] sm:$0xff] %v5838_v54  ;;  %v5856_v19 = vmul.f32 %v5072_v35, %v7370_v44  ;;  %v7373_v54 = vsub.f32 %v7372_v27, %v4936_v2  ;;  %v7381_v44 = vld [vmem:[#allocation56_spill] sm:$0xff] }
 0x2fe   :  { %7368 = vst [vmem:[#allocation46_spill] sm:$0xff] %v5850_v5  ;;  %v5868_v7 = vmul.f32 %v5072_v35, %v7376_v33  ;;  %v7379_v5 = vsub.f32 %v7378_v6, %v4936_v2  ;;  %v7387_v33 = vld [vmem:[#allocation60_spill] sm:$0xff] }
 0x2ff   :  { %7371 = vst [vmem:[#allocation48_spill] sm:$0xff] %v5856_v19  ;;  %v5862_v61 = vmul.f32 %v5072_v35, %v7373_v54  ;;  %v7382_v19 = vsub.f32 %v7381_v44, %v4936_v2  ;;  %v7384_v54 = vld [vmem:[#allocation58_spill] sm:$0xff] }
 0x300   :  { %7377 = vst [vmem:[#allocation52_spill] sm:$0xff] %v5868_v7  ;;  %v5874_v59 = vmul.f32 %v5072_v35, %v7379_v5  ;;  %v7388_v7 = vsub.f32 %v7387_v33, %v4936_v2  ;;  %v7390_v5 = vld [vmem:[#allocation62_spill] sm:$0xff] }
 0x301   :  { %7374 = vst [vmem:[#allocation50_spill] sm:$0xff] %v5862_v61  ;;  %v5880_v27 = vmul.f32 %v5072_v35, %v7382_v19  ;;  %v7385_v61 = vsub.f32 %v7384_v54, %v4936_v2  ;;  %v7393_v19 = vld [vmem:[#allocation64_spill] sm:$0xff] }
 0x302   :  { %7380 = vst [vmem:[#allocation54_spill] sm:$0xff] %v5874_v59  ;;  %v5892_v6 = vmul.f32 %v5072_v35, %v7388_v7  ;;  %v7391_v59 = vsub.f32 %v7390_v5, %v4936_v2  ;;  %v7399_v7 = vld [vmem:[#allocation68_spill] sm:$0xff] }
 0x303   :  { %7383 = vst [vmem:[#allocation56_spill] sm:$0xff] %v5880_v27  ;;  %v5886_v38 = vmul.f32 %v5072_v35, %v7385_v61  ;;  %v7394_v27 = vsub.f32 %v7393_v19, %v4936_v2  ;;  %v7396_v61 = vld [vmem:[#allocation66_spill] sm:$0xff] }
 0x304   :  { %7389 = vst [vmem:[#allocation60_spill] sm:$0xff] %v5892_v6  ;;  %v5898_v44 = vmul.f32 %v5072_v35, %v7391_v59  ;;  %v7400_v6 = vsub.f32 %v7399_v7, %v4936_v2  ;;  %v7402_v59 = vld [vmem:[#allocation70_spill] sm:$0xff] }
 0x305   :  { %7386 = vst [vmem:[#allocation58_spill] sm:$0xff] %v5886_v38  ;;  %v5904_v54 = vmul.f32 %v5072_v35, %v7394_v27  ;;  %v7397_v38 = vsub.f32 %v7396_v61, %v4936_v2  ;;  %v7405_v27 = vld [vmem:[#allocation72_spill] sm:$0xff] }
 0x306   :  { %7392 = vst [vmem:[#allocation62_spill] sm:$0xff] %v5898_v44  ;;  %v5916_v5 = vmul.f32 %v5072_v35, %v7400_v6  ;;  %v7403_v44 = vsub.f32 %v7402_v59, %v4936_v2  ;;  %v7411_v6 = vld [vmem:[#allocation76_spill] sm:$0xff] }
 0x307   :  { %7395 = vst [vmem:[#allocation64_spill] sm:$0xff] %v5904_v54  ;;  %v5910_v33 = vmul.f32 %v5072_v35, %v7397_v38  ;;  %v7406_v54 = vsub.f32 %v7405_v27, %v4936_v2  ;;  %v7408_v38 = vld [vmem:[#allocation74_spill] sm:$0xff] }
 0x308   :  { %7401 = vst [vmem:[#allocation68_spill] sm:$0xff] %v5916_v5  ;;  %v5922_v19 = vmul.f32 %v5072_v35, %v7403_v44  ;;  %v7412_v5 = vsub.f32 %v7411_v6, %v4936_v2  ;;  %v7414_v44 = vld [vmem:[#allocation78_spill] sm:$0xff] }
 0x309   :  { %7398 = vst [vmem:[#allocation66_spill] sm:$0xff] %v5910_v33  ;;  %v5928_v61 = vmul.f32 %v5072_v35, %v7406_v54  ;;  %v7409_v33 = vsub.f32 %v7408_v38, %v4936_v2  ;;  %v7417_v54 = vld [vmem:[#allocation80_spill] sm:$0xff] }
 0x30a   :  { %7404 = vst [vmem:[#allocation70_spill] sm:$0xff] %v5922_v19  ;;  %v5940_v59 = vmul.f32 %v5072_v35, %v7412_v5  ;;  %v7415_v19 = vsub.f32 %v7414_v44, %v4936_v2  ;;  %v7423_v5 = vsub.f32 %v7115_v9, %v4936_v2 }
 0x30b   :  { %7407 = vst [vmem:[#allocation72_spill] sm:$0xff] %v5928_v61  ;;  %v5934_v7 = vmul.f32 %v5072_v35, %v7409_v33  ;;  %v7418_v61 = vsub.f32 %v7417_v54, %v4936_v2  ;;  %v7420_v33 = vld [vmem:[#allocation82_spill] sm:$0xff] }
 0x30c   :  { %7413 = vst [vmem:[#allocation76_spill] sm:$0xff] %v5940_v59  ;;  %v5946_v27 = vmul.f32 %v5072_v35, %v7415_v19  ;;  %v5964_v44 = vmul.f32 %v5072_v35, %v7423_v5  ;;  %v7425_v19 = vsub.f32 %v7116_v13, %v4936_v2  ;;  %v7431_v5 = vsub.f32 %v7119_v16, %v4936_v2  ;;  %v7539_v59 = vld [vmem:[#allocation7_spill] sm:$0xff] }
 0x30d   :  { %7410 = vst [vmem:[#allocation74_spill] sm:$0xff] %v5934_v7  ;;  %v5952_v38 = vmul.f32 %v5072_v35, %v7418_v61  ;;  %v7421_v7 = vsub.f32 %v7420_v33, %v4936_v2  ;;  %v7427_v61 = vsub.f32 %v7117_v48, %v4936_v2  ;;  %v7540_v51 = vmax.f32 %v7539_v59, 0.0 }
 0x30e   :  { %7416 = vst [vmem:[#allocation78_spill] sm:$0xff] %v5946_v27  ;;  %7424 = vst [vmem:[#allocation101_spill] sm:$0xff] %v5964_v44  ;;  %v5970_v54 = vmul.f32 %v5072_v35, %v7425_v19  ;;  %v5988_v13 = vmul.f32 %v5072_v35, %v7431_v5  ;;  %v7433_v19 = vld [vmem:[#allocation94_spill] sm:$0xff]  ;;  %v7441_v5 = vsub.f32 %v7031_v57, %v4936_v2  ;;  %v7446_v44 = vld [vmem:[#allocation21_spill] sm:$0xff]  ;;  %v7555_v59 = vmax.f32 %v7554_v0, 0.0 }
 0x30f   :  { %7419 = vst [vmem:[#allocation80_spill] sm:$0xff] %v5952_v38  ;;  %v5958_v6 = vmul.f32 %v5072_v35, %v7421_v7  ;;  %v5976_v33 = vmul.f32 %v5072_v35, %v7427_v61  ;;  %v7429_v7 = vsub.f32 %v7118_v22, %v4936_v2  ;;  %v7436_v61 = vsub.f32 %v7121_v56, %v4936_v2  ;;  %v7487_v56 = vld [vmem:[#allocation34_spill] sm:$0xff]  ;;  %v7492_v27 = vld [vmem:[#allocation39_spill] sm:$0xff]  ;;  %v7493_v57 = vld [vmem:[#allocation41_spill] sm:$0xff] }
 0x310   :  { %7426 = vst [vmem:[#allocation102_spill] sm:$0xff] %v5970_v54  ;;  %7432 = vst [vmem:[#allocation105_spill] sm:$0xff] %v5988_v13  ;;  %v7434_v54 = vsub.f32 %v7433_v19, %v4936_v2  ;;  %v6012_v19 = vmul.f32 %v5072_v35, %v7441_v5  ;;  %v7536_v38 = vmax.f32 %v7535_v45, 0.0  ;;  %v7541_v5 = vmax.f32 %v7446_v44, 0.0  ;;  %v7544_v13 = vld [vmem:[#allocation87_spill] sm:$0xff] }
 0x311   :  { %7422 = vst [vmem:[#allocation82_spill] sm:$0xff] %v5958_v6  ;;  %7428 = vst [vmem:[#allocation103_spill] sm:$0xff] %v5976_v33  ;;  %v5982_v9 = vmul.f32 %v5072_v35, %v7429_v7  ;;  %v6000_v22 = vmul.f32 %v5072_v35, %v7436_v61  ;;  %v7438_v7 = vld [vmem:[#allocation98_spill] sm:$0xff]  ;;  %v7488_v61 = vld [vmem:[#allocation35_spill] sm:$0xff]  ;;  %v7534_v6 = vmax.f32 %v7533_v28, 0.0  ;;  %v7545_v52 = vmax.f32 %v7544_v13, 0.0 }
 0x312   :  { %v5994_v48 = vmul.f32 %v5072_v35, %v7434_v54  ;;  %7442 = vst [vmem:[#allocation107_spill] sm:$0xff] %v6012_v19  ;;  %v7485_v54 = vld [vmem:[#allocation32_spill] sm:$0xff]  ;;  %v7495_v19 = vld [vmem:[#allocation45_spill] sm:$0xff]  ;;  %v7549_v28 = vmax.f32 %v7548_v11, 0.0  ;;  %v7551_v45 = vmax.f32 %v7550_v32, 0.0 }
 0x313   :  { %7430 = vst [vmem:[#allocation104_spill] sm:$0xff] %v5982_v9  ;;  %7437 = vst [vmem:[#allocation106_spill] sm:$0xff] %v6000_v22  ;;  %v7439_v9 = vsub.f32 %v7438_v7, %v4936_v2  ;;  %v7490_v7 = vld [vmem:[#allocation37_spill] sm:$0xff]  ;;  %v3022_v3 = vpack.c.bf16 %v7536_v38, %v7534_v6 }
 0x314   :  { %7435 = vst [vmem:[#allocation94_spill] sm:$0xff] %v5994_v48  ;;  %v7543_v48 = vmax.f32 %v7542_v40, 0.0  ;;  %v7546_v33 = vld [vmem:[#allocation89_spill] sm:$0xff]  ;;  %v3042_v38 = vpack.c.bf16 %v7551_v45, %v7549_v28  ;;  %v7559_v40 = vmax.f32 %v7558_v34, 0.0  ;;  %v7564_v34 = vld [vmem:[#allocation92_spill] sm:$0xff] }
 0x315   :  { %v6006_v16 = vmul.f32 %v5072_v35, %v7439_v9  ;;  %v7494_v35 = vld [vmem:[#allocation43_spill] sm:$0xff]  ;;  %v7497_v9 = vld [vmem:[#allocation49_spill] sm:$0xff]  ;;  %v7547_v58 = vmax.f32 %v7546_v33, 0.0  ;;  %v7563_v33 = vmax.f32 %v7562_v23, 0.0  ;;  %3023 = vst [vmem:[%s6619_s2] sm:$0xff] %v3022_v3   ;;  %v7565_v0 = vmax.f32 %v7564_v34, 0.0  ;;  %v7566_v23 = vld [vmem:[#allocation96_spill] sm:$0xff] }
 0x316   :  { %v3032_v17 = vpack.c.bf16 %v7543_v48, %v7541_v5  ;;  %v7552_v6 = vld [vmem:[#allocation97_spill] sm:$0xff]  ;;  %v7560_v5 = vld [vmem:[#allocation88_spill] sm:$0xff]  ;;  %v7567_v11 = vmax.f32 %v7566_v23, 0.0  ;;  %3357 = vst [vmem:[%s6619_s2 + $0x20] sm:$0xff] %v3042_v38   ;;  %v7586_v38 = vld [vmem:[#allocation14_spill] sm:$0xff] }
 0x317   :  { %7440 = vst [vmem:[#allocation98_spill] sm:$0xff] %v6006_v16  ;;  %v7537_v16 = vld [vmem:[#allocation3_spill] sm:$0xff]  ;;  %v3037_v22 = vpack.c.bf16 %v7547_v58, %v7545_v52  ;;  %v7561_v13 = vmax.f32 %v7560_v5, 0.0  ;;  %v7568_v52 = vld [vmem:[#allocation4_spill] sm:$0xff]  ;;  %v7570_v3 = vld [vmem:[#allocation5_spill] sm:$0xff] }
 0x318   :  { %v7538_v26 = vmax.f32 %v7537_v16, 0.0  ;;  %v7553_v16 = vmax.f32 %v7552_v6, 0.0  ;;  %3355 = vst [vmem:[%s6619_s2 + $0x10] sm:$0xff] %v3032_v17   ;;  %v3062_v32 = vpack.c.bf16 %v7567_v11, %v7565_v0  ;;  %v7569_v28 = vmax.f32 %v7568_v52, 0.0  ;;  %v7576_v17 = vld [vmem:[#allocation9_spill] sm:$0xff]  ;;  %v7578_v5 = vld [vmem:[#allocation10_spill] sm:$0xff] }
 0x319   :  { %v3057_v58 = vpack.c.bf16 %v7563_v33, %v7561_v13  ;;  %3356 = vst [vmem:[%s6619_s2 + $0x18] sm:$0xff] %v3037_v22   ;;  %v7571_v45 = vmax.f32 %v7570_v3, 0.0  ;;  %v7579_v13 = vmax.f32 %v7578_v5, 0.0  ;;  %v7580_v33 = vld [vmem:[#allocation11_spill] sm:$0xff]  ;;  %v7582_v0 = vld [vmem:[#allocation12_spill] sm:$0xff]  ;;  %v7584_v52 = vld [vmem:[#allocation13_spill] sm:$0xff] }
 0x31a   :  { %v3027_v2 = vpack.c.bf16 %v7540_v51, %v7538_v26  ;;  %v3047_v26 = vpack.c.bf16 %v7555_v59, %v7553_v16  ;;  %v7556_v51 = vld [vmem:[#allocation84_spill] sm:$0xff]  ;;  %v7572_v16 = vld [vmem:[#allocation6_spill] sm:$0xff]  ;;  %v7581_v34 = vmax.f32 %v7580_v33, 0.0  ;;  %v7583_v23 = vmax.f32 %v7582_v0, 0.0  ;;  %3361 = vst [vmem:[%s6619_s2 + $0x40] sm:$0xff] %v3062_v32   ;;  %v7602_v32 = vld [vmem:[#allocation23_spill] sm:$0xff] }
 0x31b   :  { %v7557_v44 = vmax.f32 %v7556_v51, 0.0  ;;  %v3067_v6 = vpack.c.bf16 %v7571_v45, %v7569_v28  ;;  %v7574_v59 = vld [vmem:[#allocation8_spill] sm:$0xff]  ;;  %3360 = vst [vmem:[%s6619_s2 + $0x38] sm:$0xff] %v3057_v58   ;;  %v7585_v28 = vmax.f32 %v7584_v52, 0.0  ;;  %v7587_v3 = vmax.f32 %v7586_v38, 0.0  ;;  %v7600_v52 = vld [vmem:[#allocation22_spill] sm:$0xff] }
 0x31c   :  { %3354 = vst [vmem:[%s6619_s2 + $0x8] sm:$0xff] %v3027_v2   ;;  %v7573_v2 = vmax.f32 %v7572_v16, 0.0  ;;  %v7575_v51 = vmax.f32 %v7574_v59, 0.0  ;;  %3358 = vst [vmem:[%s6619_s2 + $0x28] sm:$0xff] %v3047_v26   ;;  %v3082_v11 = vpack.c.bf16 %v7583_v23, %v7581_v34  ;;  %v7588_v16 = vld [vmem:[#allocation15_spill] sm:$0xff]  ;;  %v7598_v34 = vld [vmem:[#allocation20_spill] sm:$0xff] }
 0x31d   :  { %v3052_v48 = vpack.c.bf16 %v7559_v40, %v7557_v44  ;;  %v7577_v40 = vmax.f32 %v7576_v17, 0.0  ;;  %v3087_v45 = vpack.c.bf16 %v7587_v3, %v7585_v28  ;;  %v7589_v26 = vmax.f32 %v7588_v16, 0.0  ;;  %3362 = vst [vmem:[%s6619_s2 + $0x48] sm:$0xff] %v3067_v6   ;;  %v7604_v16 = vld [vmem:[#allocation24_spill] sm:$0xff] }
 0x31e   :  { %v3072_v44 = vpack.c.bf16 %v7575_v51, %v7573_v2  ;;  %v7590_v2 = vld [vmem:[#allocation16_spill] sm:$0xff]  ;;  %v7599_v0 = vmax.f32 %v7598_v34, 0.0  ;;  %v7601_v28 = vmax.f32 %v7600_v52, 0.0  ;;  %v7603_v38 = vmax.f32 %v7602_v32, 0.0  ;;  %3365 = vst [vmem:[%s6619_s2 + $0x60] sm:$0xff] %v3082_v11   ;;  %v7616_v52 = vld [vmem:[#allocation30_spill] sm:$0xff] }
 0x31f   :  { %v3077_v22 = vpack.c.bf16 %v7579_v13, %v7577_v40  ;;  %3359 = vst [vmem:[%s6619_s2 + $0x30] sm:$0xff] %v3052_v48   ;;  %v7591_v59 = vmax.f32 %v7590_v2, 0.0  ;;  %v7592_v48 = vld [vmem:[#allocation17_spill] sm:$0xff]  ;;  %v7594_v40 = vld [vmem:[#allocation18_spill] sm:$0xff]  ;;  %v7596_v13 = vld [vmem:[#allocation19_spill] sm:$0xff]  ;;  %v7605_v6 = vmax.f32 %v7604_v16, 0.0 }
 0x320   :  { %v7593_v17 = vmax.f32 %v7592_v48, 0.0  ;;  %v7595_v5 = vmax.f32 %v7594_v40, 0.0  ;;  %3363 = vst [vmem:[%s6619_s2 + $0x50] sm:$0xff] %v3072_v44   ;;  %v7597_v33 = vmax.f32 %v7596_v13, 0.0  ;;  %v3107_v3 = vpack.c.bf16 %v7603_v38, %v7601_v28  ;;  %v7608_v44 = vld [vmem:[#allocation26_spill] sm:$0xff]  ;;  %3366 = vst [vmem:[%s6619_s2 + $0x68] sm:$0xff] %v3087_v45  }
 0x321   :  { %v3092_v51 = vpack.c.bf16 %v7591_v59, %v7589_v26  ;;  %3364 = vst [vmem:[%s6619_s2 + $0x58] sm:$0xff] %v3077_v22   ;;  %v7606_v26 = vld [vmem:[#allocation25_spill] sm:$0xff]  ;;  %v7609_v48 = vmax.f32 %v7608_v44, 0.0  ;;  %v7617_v28 = vmax.f32 %v7616_v52, 0.0  ;;  %v7618_v11 = vld [vmem:[#allocation31_spill] sm:$0xff]  ;;  %v7620_v45 = vmax.f32 %v7485_v54, 0.0 }
 0x322   :  { %v3097_v58 = vpack.c.bf16 %v7595_v5, %v7593_v17  ;;  %v3102_v23 = vpack.c.bf16 %v7599_v0, %v7597_v33  ;;  %v7607_v2 = vmax.f32 %v7606_v26, 0.0  ;;  %v7610_v17 = vld [vmem:[#allocation27_spill] sm:$0xff]  ;;  %v7612_v5 = vld [vmem:[#allocation28_spill] sm:$0xff]  ;;  %v7614_v33 = vld [vmem:[#allocation29_spill] sm:$0xff]  ;;  %v7619_v32 = vmax.f32 %v7618_v11, 0.0  ;;  %3370 = vst [vmem:[%s6619_s2 + $0x88] sm:$0xff] %v3107_v3  }
 0x323   :  { %v7611_v40 = vmax.f32 %v7610_v17, 0.0  ;;  %3367 = vst [vmem:[%s6619_s2 + $0x70] sm:$0xff] %v3092_v51   ;;  %v7613_v13 = vmax.f32 %v7612_v5, 0.0  ;;  %v7615_v34 = vmax.f32 %v7614_v33, 0.0  ;;  %v7621_v16 = vld [vmem:[#allocation33_spill] sm:$0xff]  ;;  %v7623_v51 = vmax.f32 %v7487_v56, 0.0 }
 0x324   :  { %v3112_v59 = vpack.c.bf16 %v7607_v2, %v7605_v6  ;;  %3368 = vst [vmem:[%s6619_s2 + $0x78] sm:$0xff] %v3097_v58   ;;  %v3127_v38 = vpack.c.bf16 %v7619_v32, %v7617_v28  ;;  %v7622_v6 = vmax.f32 %v7621_v16, 0.0  ;;  %v7624_v2 = vmax.f32 %v7488_v61, 0.0  ;;  %3369 = vst [vmem:[%s6619_s2 + $0x80] sm:$0xff] %v3102_v23   ;;  %v7627_v44 = vld [vmem:[#allocation38_spill] sm:$0xff] }
 0x325   :  { %v3117_v22 = vpack.c.bf16 %v7611_v40, %v7609_v48  ;;  %v3122_v0 = vpack.c.bf16 %v7615_v34, %v7613_v13  ;;  %v7625_v54 = vmax.f32 %v7489_v25, 0.0  ;;  %v7626_v56 = vmax.f32 %v7490_v7, 0.0 }
 0x326   :  { %v3132_v26 = vpack.c.bf16 %v7622_v6, %v7620_v45  ;;  %v3137_v58 = vpack.c.bf16 %v7624_v2, %v7623_v51  ;;  %3371 = vst [vmem:[%s6619_s2 + $0x90] sm:$0xff] %v3112_v59   ;;  %v7628_v48 = vmax.f32 %v7627_v44, 0.0  ;;  %v7629_v23 = vmax.f32 %v7492_v27, 0.0  ;;  %3374 = vst [vmem:[%s6619_s2 + $0xa8] sm:$0xff] %v3127_v38  }
 0x327   :  { %3372 = vst [vmem:[%s6619_s2 + $0x98] sm:$0xff] %v3117_v22   ;;  %v3142_v61 = vpack.c.bf16 %v7626_v56, %v7625_v54  ;;  %v7630_v3 = vmax.f32 %v7493_v57, 0.0  ;;  %v7631_v40 = vmax.f32 %v7494_v35, 0.0  ;;  %v7632_v59 = vmax.f32 %v7495_v19, 0.0  ;;  %3373 = vst [vmem:[%s6619_s2 + $0xa0] sm:$0xff] %v3122_v0   ;;  %v7665_v54 = vld [vmem:[#allocation53_spill] sm:$0xff] }
 0x328   :  { %v3147_v17 = vpack.c.bf16 %v7629_v23, %v7628_v48  ;;  %v7633_v13 = vmax.f32 %v5544_v47, 0.0  ;;  %3375 = vst [vmem:[%s6619_s2 + $0xb0] sm:$0xff] %v3132_v26   ;;  %3376 = vst [vmem:[%s6619_s2 + $0xb8] sm:$0xff] %v3137_v58   ;;  %v7634_v25 = vmax.f32 %v7496_v4, 0.0  ;;  %v7635_v47 = vmax.f32 %v5556_v18, 0.0  ;;  %v7673_v23 = vld [vmem:[#allocation61_spill] sm:$0xff] }
 0x329   :  { %v3152_v5 = vpack.c.bf16 %v7631_v40, %v7630_v3  ;;  %v7636_v19 = vmax.f32 %v5562_v31, 0.0  ;;  %v7637_v7 = vmax.f32 %v5568_v36, 0.0  ;;  %v7638_v35 = vmax.f32 %v5574_v1, 0.0  ;;  %3377 = vst [vmem:[%s6619_s2 + $0xc0] sm:$0xff] %v3142_v61   ;;  %v7667_v61 = vld [vmem:[#allocation55_spill] sm:$0xff] }
 0x32a   :  { %v3157_v22 = vpack.c.bf16 %v7633_v13, %v7632_v59  ;;  %v3162_v27 = vpack.c.bf16 %v7635_v47, %v7634_v25  ;;  %v7639_v33 = vmax.f32 %v7497_v9, 0.0  ;;  %v7640_v0 = vmax.f32 %v5586_v55, 0.0  ;;  %3378 = vst [vmem:[%s6619_s2 + $0xc8] sm:$0xff] %v3147_v17   ;;  %v7675_v3 = vld [vmem:[#allocation63_spill] sm:$0xff]  ;;  %v7677_v59 = vld [vmem:[#allocation65_spill] sm:$0xff] }
 0x32b   :  { %v3167_v57 = vpack.c.bf16 %v7637_v7, %v7636_v19  ;;  %v7641_v52 = vmax.f32 %v5592_v39, 0.0  ;;  %3379 = vst [vmem:[%s6619_s2 + $0xd0] sm:$0xff] %v3152_v5   ;;  %v7642_v4 = vmax.f32 %v5598_v24, 0.0  ;;  %v7643_v18 = vmax.f32 %v5604_v62, 0.0  ;;  %v7683_v7 = vld [vmem:[#allocation71_spill] sm:$0xff] }
 0x32c   :  { %v3172_v34 = vpack.c.bf16 %v7639_v33, %v7638_v35  ;;  %3380 = vst [vmem:[%s6619_s2 + $0xd8] sm:$0xff] %v3157_v22   ;;  %v7644_v36 = vmax.f32 %v5610_v15, 0.0  ;;  %v7645_v1 = vmax.f32 %v5616_v41, 0.0  ;;  %v7646_v39 = vmax.f32 %v5622_v43, 0.0  ;;  %3381 = vst [vmem:[%s6619_s2 + $0xe0] sm:$0xff] %v3162_v27   ;;  %v7679_v22 = vld [vmem:[#allocation67_spill] sm:$0xff] }
 0x32d   :  { %v3177_v28 = vpack.c.bf16 %v7641_v52, %v7640_v0  ;;  %v3182_v31 = vpack.c.bf16 %v7643_v18, %v7642_v4  ;;  %v7647_v9 = vmax.f32 %v5628_v12, 0.0  ;;  %v7648_v32 = vmax.f32 %v5634_v49, 0.0  ;;  %3382 = vst [vmem:[%s6619_s2 + $0xe8] sm:$0xff] %v3167_v57   ;;  %v7681_v27 = vld [vmem:[#allocation69_spill] sm:$0xff]  ;;  %v7687_v0 = vld [vmem:[#allocation75_spill] sm:$0xff] }
 0x32e   :  { %v3187_v55 = vpack.c.bf16 %v7645_v1, %v7644_v36  ;;  %v7649_v38 = vmax.f32 %v5640_v14, 0.0  ;;  %3383 = vst [vmem:[%s6619_s2 + $0xf0] sm:$0xff] %v3172_v34   ;;  %v7650_v24 = vmax.f32 %v5646_v21, 0.0  ;;  %v7651_v62 = vmax.f32 %v5652_v30, 0.0  ;;  %v7685_v33 = vld [vmem:[#allocation73_spill] sm:$0xff] }
 0x32f   :  { %v3192_v11 = vpack.c.bf16 %v7647_v9, %v7646_v39  ;;  %3384 = vst [vmem:[%s6619_s2 + $0xf8] sm:$0xff] %v3177_v28   ;;  %v7652_v41 = vmax.f32 %v5658_v37, 0.0  ;;  %v7653_v43 = vmax.f32 %v5664_v46, 0.0  ;;  %v7654_v49 = vmax.f32 %v5670_v53, 0.0  ;;  %3385 = vst [vmem:[%s6619_s2 + $0x100] sm:$0xff] %v3182_v31   ;;  %v7689_v4 = vld [vmem:[#allocation77_spill] sm:$0xff] }
 0x330   :  { %v3197_v45 = vpack.c.bf16 %v7649_v38, %v7648_v32  ;;  %v3202_v15 = vpack.c.bf16 %v7651_v62, %v7650_v24  ;;  %v7655_v14 = vmax.f32 %v5676_v63, 0.0  ;;  %v7656_v6 = vmax.f32 %v5682_v8, 0.0  ;;  %3386 = vst [vmem:[%s6619_s2 + $0x108] sm:$0xff] %v3187_v55   ;;  %v7691_v31 = vld [vmem:[#allocation79_spill] sm:$0xff]  ;;  %v7693_v55 = vld [vmem:[#allocation81_spill] sm:$0xff]  ;;  %v7699_v24 = vld [vmem:[#allocation40_spill] sm:$0xff] }
 0x331   :  { %v3207_v12 = vpack.c.bf16 %v7653_v43, %v7652_v41  ;;  %v7657_v26 = vmax.f32 %v5688_v20, 0.0  ;;  %3387 = vst [vmem:[%s6619_s2 + $0x110] sm:$0xff] %v3192_v11   ;;  %v7658_v21 = vmax.f32 %v5694_v29, 0.0  ;;  %v7659_v30 = vmax.f32 %v5700_v42, 0.0  ;;  %v7663_v20 = vld [vmem:[#allocation51_spill] sm:$0xff]  ;;  %v7669_v29 = vld [vmem:[#allocation57_spill] sm:$0xff] }
 0x332   :  { %v3212_v16 = vpack.c.bf16 %v7655_v14, %v7654_v49  ;;  %3388 = vst [vmem:[%s6619_s2 + $0x118] sm:$0xff] %v3197_v45   ;;  %v7660_v46 = vmax.f32 %v5706_v50, 0.0  ;;  %v7661_v53 = vmax.f32 %v5712_v60, 0.0  ;;  %v7662_v8 = vmax.f32 %v5718_v10, 0.0  ;;  %3389 = vst [vmem:[%s6619_s2 + $0x120] sm:$0xff] %v3202_v15   ;;  %v7671_v50 = vld [vmem:[#allocation59_spill] sm:$0xff] }
 0x333   :  { %v3217_v51 = vpack.c.bf16 %v7657_v26, %v7656_v6  ;;  %v3222_v37 = vpack.c.bf16 %v7659_v30, %v7658_v21  ;;  %v7664_v2 = vmax.f32 %v7663_v20, 0.0  ;;  %v7666_v56 = vmax.f32 %v7665_v54, 0.0  ;;  %3390 = vst [vmem:[%s6619_s2 + $0x128] sm:$0xff] %v3207_v12   ;;  %v7695_v9 = vld [vmem:[#allocation85_spill] sm:$0xff]  ;;  %v7697_v38 = vld [vmem:[#allocation95_spill] sm:$0xff]  ;;  %v7701_v41 = vld [vmem:[#allocation42_spill] sm:$0xff] }
 0x334   :  { %v3227_v63 = vpack.c.bf16 %v7661_v53, %v7660_v46  ;;  %v7668_v44 = vmax.f32 %v7667_v61, 0.0  ;;  %3391 = vst [vmem:[%s6619_s2 + $0x130] sm:$0xff] %v3212_v16   ;;  %v7670_v42 = vmax.f32 %v7669_v29, 0.0  ;;  %v7672_v60 = vmax.f32 %v7671_v50, 0.0  ;;  %v7703_v12 = vld [vmem:[#allocation44_spill] sm:$0xff]  ;;  %v7705_v16 = vld [vmem:[#allocation46_spill] sm:$0xff] }
 0x335   :  { %v3232_v58 = vpack.c.bf16 %v7664_v2, %v7662_v8  ;;  %3392 = vst [vmem:[%s6619_s2 + $0x138] sm:$0xff] %v3217_v51   ;;  %v7674_v17 = vmax.f32 %v7673_v23, 0.0  ;;  %v7676_v40 = vmax.f32 %v7675_v3, 0.0  ;;  %v7678_v13 = vmax.f32 %v7677_v59, 0.0  ;;  %3393 = vst [vmem:[%s6619_s2 + $0x140] sm:$0xff] %v3222_v37   ;;  %v7707_v26 = vld [vmem:[#allocation48_spill] sm:$0xff] }
 0x336   :  { %v3237_v48 = vpack.c.bf16 %v7668_v44, %v7666_v56  ;;  %v3242_v10 = vpack.c.bf16 %v7672_v60, %v7670_v42  ;;  %v7680_v25 = vmax.f32 %v7679_v22, 0.0  ;;  %v7682_v19 = vmax.f32 %v7681_v27, 0.0  ;;  %3394 = vst [vmem:[%s6619_s2 + $0x148] sm:$0xff] %v3227_v63   ;;  %v7709_v30 = vld [vmem:[#allocation50_spill] sm:$0xff]  ;;  %v7711_v46 = vld [vmem:[#allocation52_spill] sm:$0xff] }
 0x337   :  { %v3247_v5 = vpack.c.bf16 %v7676_v40, %v7674_v17  ;;  %v7684_v57 = vmax.f32 %v7683_v7, 0.0  ;;  %3395 = vst [vmem:[%s6619_s2 + $0x150] sm:$0xff] %v3232_v58   ;;  %v7686_v34 = vmax.f32 %v7685_v33, 0.0  ;;  %v7688_v52 = vmax.f32 %v7687_v0, 0.0  ;;  %v7713_v8 = vld [vmem:[#allocation54_spill] sm:$0xff]  ;;  %v7715_v2 = vld [vmem:[#allocation56_spill] sm:$0xff] }
 0x338   :  { %v3252_v47 = vpack.c.bf16 %v7680_v25, %v7678_v13  ;;  %3396 = vst [vmem:[%s6619_s2 + $0x158] sm:$0xff] %v3237_v48   ;;  %v7690_v18 = vmax.f32 %v7689_v4, 0.0  ;;  %v7692_v36 = vmax.f32 %v7691_v31, 0.0  ;;  %v7694_v39 = vmax.f32 %v7693_v55, 0.0  ;;  %3397 = vst [vmem:[%s6619_s2 + $0x160] sm:$0xff] %v3242_v10   ;;  %v7717_v56 = vld [vmem:[#allocation58_spill] sm:$0xff] }
 0x339   :  { %v3257_v35 = vpack.c.bf16 %v7684_v57, %v7682_v19  ;;  %v3262_v28 = vpack.c.bf16 %v7688_v52, %v7686_v34  ;;  %v7696_v11 = vmax.f32 %v7695_v9, 0.0  ;;  %v7698_v45 = vmax.f32 %v7697_v38, 0.0  ;;  %3398 = vst [vmem:[%s6619_s2 + $0x168] sm:$0xff] %v3247_v5   ;;  %v7719_v44 = vld [vmem:[#allocation60_spill] sm:$0xff]  ;;  %v7721_v42 = vld [vmem:[#allocation62_spill] sm:$0xff] }
 0x33a   :  { %v3267_v1 = vpack.c.bf16 %v7692_v36, %v7690_v18  ;;  %v7700_v62 = vmax.f32 %v7699_v24, 0.0  ;;  %3399 = vst [vmem:[%s6619_s2 + $0x170] sm:$0xff] %v3252_v47   ;;  %v7702_v43 = vmax.f32 %v7701_v41, 0.0  ;;  %v7704_v49 = vmax.f32 %v7703_v12, 0.0  ;;  %v7723_v60 = vld [vmem:[#allocation64_spill] sm:$0xff]  ;;  %v7725_v17 = vld [vmem:[#allocation66_spill] sm:$0xff] }
 0x33b   :  { %v3272_v32 = vpack.c.bf16 %v7696_v11, %v7694_v39  ;;  %3400 = vst [vmem:[%s6619_s2 + $0x178] sm:$0xff] %v3257_v35   ;;  %v7706_v6 = vmax.f32 %v7705_v16, 0.0  ;;  %v7708_v51 = vmax.f32 %v7707_v26, 0.0  ;;  %v7710_v37 = vmax.f32 %v7709_v30, 0.0  ;;  %3401 = vst [vmem:[%s6619_s2 + $0x180] sm:$0xff] %v3262_v28   ;;  %v7727_v40 = vld [vmem:[#allocation68_spill] sm:$0xff] }
 0x33c   :  { %v3277_v15 = vpack.c.bf16 %v7700_v62, %v7698_v45  ;;  %v3282_v14 = vpack.c.bf16 %v7704_v49, %v7702_v43  ;;  %v7712_v53 = vmax.f32 %v7711_v46, 0.0  ;;  %v7714_v20 = vmax.f32 %v7713_v8, 0.0  ;;  %3402 = vst [vmem:[%s6619_s2 + $0x188] sm:$0xff] %v3267_v1   ;;  %v7729_v13 = vld [vmem:[#allocation70_spill] sm:$0xff]  ;;  %v7731_v25 = vld [vmem:[#allocation72_spill] sm:$0xff]  ;;  %v7743_v36 = vld [vmem:[#allocation101_spill] sm:$0xff] }
 0x33d   :  { %v3287_v21 = vpack.c.bf16 %v7708_v51, %v7706_v6  ;;  %v7716_v58 = vmax.f32 %v7715_v2, 0.0  ;;  %3403 = vst [vmem:[%s6619_s2 + $0x190] sm:$0xff] %v3272_v32   ;;  %v7718_v61 = vmax.f32 %v7717_v56, 0.0  ;;  %v7720_v48 = vmax.f32 %v7719_v44, 0.0  ;;  %v7733_v19 = vld [vmem:[#allocation74_spill] sm:$0xff]  ;;  %v7735_v57 = vld [vmem:[#allocation76_spill] sm:$0xff] }
 0x33e   :  { %v3292_v63 = vpack.c.bf16 %v7712_v53, %v7710_v37  ;;  %3404 = vst [vmem:[%s6619_s2 + $0x198] sm:$0xff] %v3277_v15   ;;  %v7722_v50 = vmax.f32 %v7721_v42, 0.0  ;;  %v7724_v10 = vmax.f32 %v7723_v60, 0.0  ;;  %v7726_v3 = vmax.f32 %v7725_v17, 0.0  ;;  %3405 = vst [vmem:[%s6619_s2 + $0x1a0] sm:$0xff] %v3282_v14   ;;  %v7737_v34 = vld [vmem:[#allocation78_spill] sm:$0xff] }
 0x33f   :  { %v3297_v54 = vpack.c.bf16 %v7716_v58, %v7714_v20  ;;  %v3302_v29 = vpack.c.bf16 %v7720_v48, %v7718_v61  ;;  %v7728_v5 = vmax.f32 %v7727_v40, 0.0  ;;  %v7730_v22 = vmax.f32 %v7729_v13, 0.0  ;;  %3406 = vst [vmem:[%s6619_s2 + $0x1a8] sm:$0xff] %v3287_v21   ;;  %v7739_v52 = vld [vmem:[#allocation80_spill] sm:$0xff]  ;;  %v7741_v18 = vld [vmem:[#allocation82_spill] sm:$0xff]  ;;  %v7747_v11 = vld [vmem:[#allocation103_spill] sm:$0xff] }
 0x340   :  { %v3307_v23 = vpack.c.bf16 %v7724_v10, %v7722_v50  ;;  %v7732_v47 = vmax.f32 %v7731_v25, 0.0  ;;  %3407 = vst [vmem:[%s6619_s2 + $0x1b0] sm:$0xff] %v3292_v63   ;;  %v7734_v7 = vmax.f32 %v7733_v19, 0.0  ;;  %v7736_v35 = vmax.f32 %v7735_v57, 0.0  ;;  %v7745_v39 = vld [vmem:[#allocation102_spill] sm:$0xff]  ;;  %v7749_v45 = vld [vmem:[#allocation104_spill] sm:$0xff] }
 0x341   :  { %v3312_v59 = vpack.c.bf16 %v7728_v5, %v7726_v3  ;;  %3408 = vst [vmem:[%s6619_s2 + $0x1b8] sm:$0xff] %v3297_v54   ;;  %v7738_v0 = vmax.f32 %v7737_v34, 0.0  ;;  %v7740_v28 = vmax.f32 %v7739_v52, 0.0  ;;  %v7742_v31 = vmax.f32 %v7741_v18, 0.0  ;;  %3409 = vst [vmem:[%s6619_s2 + $0x1c0] sm:$0xff] %v3302_v29   ;;  %v7751_v62 = vld [vmem:[#allocation105_spill] sm:$0xff] }
 0x342   :  { %v3317_v27 = vpack.c.bf16 %v7732_v47, %v7730_v22  ;;  %v3322_v33 = vpack.c.bf16 %v7736_v35, %v7734_v7  ;;  %v7744_v1 = vmax.f32 %v7743_v36, 0.0  ;;  %v7746_v9 = vmax.f32 %v7745_v39, 0.0  ;;  %3410 = vst [vmem:[%s6619_s2 + $0x1c8] sm:$0xff] %v3307_v23   ;;  %v7753_v43 = vld [vmem:[#allocation94_spill] sm:$0xff]  ;;  %v7759_v51 = vld [vmem:[#allocation107_spill] sm:$0xff] }
 0x343   :  { %v3327_v4 = vpack.c.bf16 %v7740_v28, %v7738_v0  ;;  %v7748_v32 = vmax.f32 %v7747_v11, 0.0  ;;  %3411 = vst [vmem:[%s6619_s2 + $0x1d0] sm:$0xff] %v3312_v59   ;;  %v7750_v24 = vmax.f32 %v7749_v45, 0.0  ;;  %v7752_v15 = vmax.f32 %v7751_v62, 0.0  ;;  %v7755_v49 = vld [vmem:[#allocation106_spill] sm:$0xff] }
 0x344   :  { %v3332_v55 = vpack.c.bf16 %v7744_v1, %v7742_v31  ;;  %3412 = vst [vmem:[%s6619_s2 + $0x1d8] sm:$0xff] %v3317_v27   ;;  %v7754_v12 = vmax.f32 %v7753_v43, 0.0  ;;  %v7756_v14 = vmax.f32 %v7755_v49, 0.0  ;;  %v7757_v6 = vld [vmem:[#allocation98_spill] sm:$0xff]  ;;  %v7760_v21 = vmax.f32 %v7759_v51, 0.0  ;;  %3413 = vst [vmem:[%s6619_s2 + $0x1e0] sm:$0xff] %v3322_v33  }
 0x345   :  { %v3337_v38 = vpack.c.bf16 %v7748_v32, %v7746_v9  ;;  %v3342_v41 = vpack.c.bf16 %v7752_v15, %v7750_v24  ;;  %v7758_v26 = vmax.f32 %v7757_v6, 0.0  ;;  %3414 = vst [vmem:[%s6619_s2 + $0x1e8] sm:$0xff] %v3327_v4  }
 0x346   :  { %v3347_v16 = vpack.c.bf16 %v7756_v14, %v7754_v12  ;;  %3415 = vst [vmem:[%s6619_s2 + $0x1f0] sm:$0xff] %v3332_v55  }
 0x347   :  { %v3352_v30 = vpack.c.bf16 %v7760_v21, %v7758_v26  ;;  %3416 = vst [vmem:[%s6619_s2 + $0x1f8] sm:$0xff] %v3337_v38   ;;  %3417 = vst [vmem:[%s6619_s2 + $0x200] sm:$0xff] %v3342_v41  }
 0x348   :  { %3418 = vst [vmem:[%s6619_s2 + $0x208] sm:$0xff] %v3347_v16  }
 0x349   :  { %3419 = vst [vmem:[%s6619_s2 + $0x210] sm:$0xff] %v3352_v30  }

// kernel: conv3_forward.5
= control target key start
LH: loop header
LB: loop body
LE: loop exit
PB: predicated region body
PF: predicated region fallthrough
CT: control target
= control target key end

     0   :  { %s1419_s1 = inlined_call_operand.vmem [shape: bf16[128,128], index: 1, kind: input, shape index: {}]   ;;  %s1420_s0 = inlined_call_operand.vmem [shape: bf16[256,128], index: 0, kind: input, shape index: {}]   ;;  %s1421_s2 = inlined_call_operand.vmem [shape: bf16[256,128], index: 2, kind: output, shape index: {}]  }
   0x1   :  { %v1009_v0 = vld [vmem:[%s1419_s1] sm:$0xff]   ;;  %v1010_v1 = vld [vmem:[%s1419_s1 + $0x8] sm:$0xff]   ;;  %v1011_v2 = vld [vmem:[%s1419_s1 + $0x10] sm:$0xff]  }
   0x2   :  { %945 = vmatprep.subr.bf16.mxu0 %v1009_v0  ;;  %993 = vmatprep.subr.bf16.mxu1 %v1009_v0  ;;  %v1012_v3 = vld [vmem:[%s1419_s1 + $0x18] sm:$0xff]   ;;  %v1017_v4 = vld [vmem:[%s1420_s0] sm:$0xff]   ;;  %v1014_v6 = vld [vmem:[%s1419_s1 + $0x28] sm:$0xff]  }
   0x3   :  { %946 = vmatpush3.bf16.msra.mxu0 %v1009_v0  ;;  %1001 = vmatpush3.bf16.msra.mxu1 %v1009_v0  ;;  %v1013_v5 = vld [vmem:[%s1419_s1 + $0x20] sm:$0xff]   ;;  %v1015_v8 = vld [vmem:[%s1419_s1 + $0x30] sm:$0xff]   ;;  %v1016_v9 = vld [vmem:[%s1419_s1 + $0x38] sm:$0xff]  }
   0x4   :  { %947 = vmatprep.subr.bf16.mxu0 %v1010_v1  ;;  %994 = vmatprep.subr.bf16.mxu1 %v1010_v1  ;;  %v1025_v7 = vld [vmem:[%s1420_s0 + $0x40] sm:$0xff]   ;;  %v1018_v10 = vld [vmem:[%s1420_s0 + $0x8] sm:$0xff]   ;;  %v1019_v12 = vld [vmem:[%s1420_s0 + $0x10] sm:$0xff]  }
   0x5   :  { %961 = vmatprep.mubr.bf16.mxu0 %v1017_v4  ;;  %977 = vmatprep.mubr.bf16.mxu1 %v1025_v7  ;;  %v1026_v11 = vld [vmem:[%s1420_s0 + $0x48] sm:$0xff]   ;;  %v1027_v13 = vld [vmem:[%s1420_s0 + $0x50] sm:$0xff]   ;;  %v1020_v14 = vld [vmem:[%s1420_s0 + $0x18] sm:$0xff]  }
   0x6   :  { %v1028_v15 = vld [vmem:[%s1420_s0 + $0x58] sm:$0xff]   ;;  %v1021_v16 = vld [vmem:[%s1420_s0 + $0x20] sm:$0xff]   ;;  %v1022_v18 = vld [vmem:[%s1420_s0 + $0x28] sm:$0xff]  }
   0x7   :  { %948 = vmatpush3.bf16.msra.mxu0 %v1010_v1  ;;  %1002 = vmatpush3.bf16.msra.mxu1 %v1010_v1  ;;  %v1029_v17 = vld [vmem:[%s1420_s0 + $0x60] sm:$0xff]   ;;  %v1030_v19 = vld [vmem:[%s1420_s0 + $0x68] sm:$0xff]   ;;  %v1023_v20 = vld [vmem:[%s1420_s0 + $0x30] sm:$0xff]  }
   0x8   :  { %949 = vmatprep.subr.bf16.mxu0 %v1011_v2  ;;  %995 = vmatprep.subr.bf16.mxu1 %v1011_v2  ;;  %v1031_v21 = vld [vmem:[%s1420_s0 + $0x70] sm:$0xff]   ;;  %v1024_v22 = vld [vmem:[%s1420_s0 + $0x38] sm:$0xff]  }
   0x9   :  { %v1032_v23 = vld [vmem:[%s1420_s0 + $0x78] sm:$0xff]  }
   0xb   :  { %950 = vmatpush3.bf16.msra.mxu0 %v1011_v2  ;;  %1003 = vmatpush3.bf16.msra.mxu1 %v1011_v2 }
   0xc   :  { %951 = vmatprep.subr.bf16.mxu0 %v1012_v3  ;;  %996 = vmatprep.subr.bf16.mxu1 %v1012_v3 }
   0xf   :  { %952 = vmatpush3.bf16.msra.mxu0 %v1012_v3  ;;  %1004 = vmatpush3.bf16.msra.mxu1 %v1012_v3 }
  0x10   :  { %953 = vmatprep.subr.bf16.mxu0 %v1013_v5  ;;  %997 = vmatprep.subr.bf16.mxu1 %v1013_v5 }
  0x13   :  { %954 = vmatpush3.bf16.msra.mxu0 %v1013_v5  ;;  %1005 = vmatpush3.bf16.msra.mxu1 %v1013_v5 }
  0x14   :  { %955 = vmatprep.subr.bf16.mxu0 %v1014_v6  ;;  %998 = vmatprep.subr.bf16.mxu1 %v1014_v6 }
  0x17   :  { %956 = vmatpush3.bf16.msra.mxu0 %v1014_v6  ;;  %1006 = vmatpush3.bf16.msra.mxu1 %v1014_v6 }
  0x18   :  { %957 = vmatprep.subr.bf16.mxu0 %v1015_v8  ;;  %999 = vmatprep.subr.bf16.mxu1 %v1015_v8 }
  0x1b   :  { %958 = vmatpush3.bf16.msra.mxu0 %v1015_v8  ;;  %1007 = vmatpush3.bf16.msra.mxu1 %v1015_v8 }
  0x1c   :  { %959 = vmatprep.subr.bf16.mxu0 %v1016_v9  ;;  %1000 = vmatprep.subr.bf16.mxu1 %v1016_v9 }
  0x1f   :  { %960 = vmatpush3.bf16.msra.mxu0 %v1016_v9  ;;  %1008 = vmatpush3.bf16.msra.mxu1 %v1016_v9 }
  0x22   :  { %962 = vmatmul.mubr.bf16.vlgmr.msra.gmra.mrb[0].mxu0 %v1018_v10  ;;  %978 = vmatmul.mubr.bf16.vlgmr.msra.gmra.mrb[0].mxu1 %v1026_v11 }
  0x23   :  { %965 = vmatprep.mubr.bf16.mxu0 %v1019_v12  ;;  %981 = vmatprep.mubr.bf16.mxu1 %v1027_v13 }
  0x2a   :  { %966 = vmatmul.mubr.bf16.gmra.mrb[4].mxu0 %v1020_v14  ;;  %982 = vmatmul.mubr.bf16.gmra.mrb[4].mxu1 %v1028_v15 }
  0x2b   :  { %969 = vmatprep.mubr.bf16.mxu0 %v1021_v16  ;;  %985 = vmatprep.mubr.bf16.mxu1 %v1029_v17 }
  0x32   :  { %970 = vmatmul.mubr.bf16.gmra.mrb[8].mxu0 %v1022_v18  ;;  %986 = vmatmul.mubr.bf16.gmra.mrb[8].mxu1 %v1030_v19 }
  0x33   :  { %973 = vmatprep.mubr.bf16.mxu0 %v1023_v20  ;;  %989 = vmatprep.mubr.bf16.mxu1 %v1031_v21 }
  0x3a   :  { %974 = vmatmul.mubr.bf16.gmra.mrb[12].mxu0 %v1024_v22  ;;  %990 = vmatmul.mubr.bf16.gmra.mrb[12].mxu1 %v1032_v23 }
  0xf5   :  { %v1122_v24 = vpop.f32.mrb[0].mxu0  ;;  %v1124_v25 = vpop.f32.mrb[0].mxu1 }
  0xf6   :  { %v1126_v26 = vpop.f32.mrb[1].mxu0  ;;  %v1128_v27 = vpop.f32.mrb[1].mxu1  ;;  %v405_v35 = vmul.f32 %v1122_v24, %v1122_v24 }
  0xf7   :  { %v1130_v28 = vpop.f32.mrb[2].mxu0  ;;  %v1132_v29 = vpop.f32.mrb[2].mxu1  ;;  %v403_v32 = vmul.f32 %v1126_v26, %v1126_v26 }
  0xf8   :  { %v1134_v30 = vpop.f32.mrb[3].mxu0  ;;  %v1136_v31 = vpop.f32.mrb[3].mxu1  ;;  %v406_v38 = vmul.f32 %v1130_v28, %v1130_v28 }
  0xf9   :  { %v365_v33 = vadd.f32 %v1134_v30, %v1126_v26  ;;  %v404_v34 = vmul.f32 %v1134_v30, %v1134_v30 }
  0xfb   :  { %v366_v36 = vadd.f32 %v1122_v24, %v365_v33  ;;  %v435_v37 = vadd.f32 %v404_v34, %v403_v32 }
  0xfd   :  { %v436_v39 = vadd.f32 %v435_v37, %v405_v35  ;;  %v1149_v40 = vpop.f32.mrb[4].mxu0  ;;  %v367_v41 = vadd.f32 %v1130_v28, %v366_v36  ;;  %v1152_v42 = vpop.f32.mrb[4].mxu1 }
  0xfe   :  { %v1154_v43 = vpop.f32.mrb[5].mxu0  ;;  %v1156_v44 = vpop.f32.mrb[5].mxu1  ;;  %v409_v55 = vmul.f32 %v1149_v40, %v1149_v40 }
  0xff   :  { %v368_v45 = vadd.f32 %v367_v41, %v1154_v43  ;;  %v407_v46 = vmul.f32 %v1154_v43, %v1154_v43  ;;  %v437_v47 = vadd.f32 %v436_v39, %v406_v38  ;;  %v1161_v48 = vpop.f32.mrb[6].mxu0  ;;  %v1163_v49 = vpop.f32.mrb[6].mxu1 }
 0x100   :  { %v1165_v50 = vpop.f32.mrb[7].mxu0  ;;  %v1167_v51 = vpop.f32.mrb[7].mxu1  ;;  %v410_v58 = vmul.f32 %v1161_v48, %v1161_v48 }
 0x101   :  { %v438_v52 = vadd.f32 %v437_v47, %v407_v46  ;;  %v369_v53 = vadd.f32 %v368_v45, %v1165_v50  ;;  %v408_v54 = vmul.f32 %v1165_v50, %v1165_v50 }
 0x103   :  { %v370_v56 = vadd.f32 %v1149_v40, %v369_v53  ;;  %v439_v57 = vadd.f32 %v438_v52, %v408_v54  ;;  %v419_v53 = vmul.f32 %v1128_v27, %v1128_v27 }
 0x105   :  { %v440_v59 = vadd.f32 %v439_v57, %v409_v55  ;;  %v1177_v60 = vpop.f32.mrb[8].mxu0  ;;  %v371_v61 = vadd.f32 %v1161_v48, %v370_v56  ;;  %v1180_v62 = vpop.f32.mrb[8].mxu1 }
 0x106   :  { %v1182_v63 = vpop.f32.mrb[9].mxu0  ;;  %v1184_v0 = vpop.f32.mrb[9].mxu1  ;;  %v413_v11 = vmul.f32 %v1177_v60, %v1177_v60 }
 0x107   :  { %v372_v1 = vadd.f32 %v371_v61, %v1182_v63  ;;  %v411_v2 = vmul.f32 %v1182_v63, %v1182_v63  ;;  %v441_v3 = vadd.f32 %v440_v59, %v410_v58  ;;  %v1189_v4 = vpop.f32.mrb[10].mxu0  ;;  %v1191_v5 = vpop.f32.mrb[10].mxu1  ;;  %v420_v58 = vmul.f32 %v1136_v31, %v1136_v31 }
 0x108   :  { %v1193_v6 = vpop.f32.mrb[11].mxu0  ;;  %v1195_v7 = vpop.f32.mrb[11].mxu1  ;;  %v414_v14 = vmul.f32 %v1189_v4, %v1189_v4  ;;  %v421_v59 = vmul.f32 %v1124_v25, %v1124_v25 }
 0x109   :  { %v442_v8 = vadd.f32 %v441_v3, %v411_v2  ;;  %v373_v9 = vadd.f32 %v372_v1, %v1193_v6  ;;  %v412_v10 = vmul.f32 %v1193_v6, %v1193_v6  ;;  %v422_v2 = vmul.f32 %v1132_v29, %v1132_v29 }
 0x10b   :  { %v374_v12 = vadd.f32 %v1177_v60, %v373_v9  ;;  %v443_v13 = vadd.f32 %v442_v8, %v412_v10  ;;  %v423_v9 = vmul.f32 %v1156_v44, %v1156_v44 }
 0x10d   :  { %v444_v15 = vadd.f32 %v443_v13, %v413_v11  ;;  %v1205_v16 = vpop.f32.mrb[12].mxu0  ;;  %v375_v17 = vadd.f32 %v1189_v4, %v374_v12  ;;  %v1208_v18 = vpop.f32.mrb[12].mxu1 }
 0x10e   :  { %v1210_v19 = vpop.f32.mrb[13].mxu0  ;;  %v1212_v20 = vpop.f32.mrb[13].mxu1  ;;  %v417_v39 = vmul.f32 %v1205_v16, %v1205_v16 }
 0x10f   :  { %v376_v21 = vadd.f32 %v375_v17, %v1210_v19  ;;  %v415_v22 = vmul.f32 %v1210_v19, %v1210_v19  ;;  %v445_v23 = vadd.f32 %v444_v15, %v414_v14  ;;  %v1217_v32 = vpop.f32.mrb[14].mxu0  ;;  %v1219_v33 = vpop.f32.mrb[14].mxu1  ;;  %v424_v14 = vmul.f32 %v1167_v51, %v1167_v51 }
 0x110   :  { %v1221_v34 = vpop.f32.mrb[15].mxu0  ;;  %v1223_v35 = vpop.f32.mrb[15].mxu1  ;;  %v418_v46 = vmul.f32 %v1217_v32, %v1217_v32  ;;  %v425_v15 = vmul.f32 %v1152_v42, %v1152_v42 }
 0x111   :  { %v446_v36 = vadd.f32 %v445_v23, %v415_v22  ;;  %v377_v37 = vadd.f32 %v376_v21, %v1221_v34  ;;  %v416_v38 = vmul.f32 %v1221_v34, %v1221_v34  ;;  %v426_v22 = vmul.f32 %v1163_v49, %v1163_v49 }
 0x113   :  { %v378_v41 = vadd.f32 %v1205_v16, %v377_v37  ;;  %v447_v45 = vadd.f32 %v446_v36, %v416_v38  ;;  %v427_v37 = vmul.f32 %v1184_v0, %v1184_v0 }
 0x115   :  { %v448_v47 = vadd.f32 %v447_v45, %v417_v39  ;;  %v379_v52 = vadd.f32 %v1217_v32, %v378_v41 }
 0x117   :  { %v380_v54 = vadd.f32 %v379_v52, %v1128_v27  ;;  %v449_v55 = vadd.f32 %v448_v47, %v418_v46  ;;  %v428_v46 = vmul.f32 %v1195_v7, %v1195_v7  ;;  %v429_v47 = vmul.f32 %v1180_v62, %v1180_v62 }
 0x119   :  { %v450_v56 = vadd.f32 %v449_v55, %v419_v53  ;;  %v381_v57 = vadd.f32 %v380_v54, %v1136_v31  ;;  %v430_v54 = vmul.f32 %v1191_v5, %v1191_v5 }
 0x11b   :  { %v382_v61 = vadd.f32 %v1124_v25, %v381_v57  ;;  %v451_v1 = vadd.f32 %v450_v56, %v420_v58  ;;  %v431_v57 = vmul.f32 %v1212_v20, %v1212_v20 }
 0x11d   :  { %v452_v3 = vadd.f32 %v451_v1, %v421_v59  ;;  %v383_v8 = vadd.f32 %v1132_v29, %v382_v61 }
 0x11f   :  { %v384_v10 = vadd.f32 %v383_v8, %v1156_v44  ;;  %v453_v11 = vadd.f32 %v452_v3, %v422_v2  ;;  %v432_v2 = vmul.f32 %v1223_v35, %v1223_v35  ;;  %v433_v3 = vmul.f32 %v1208_v18, %v1208_v18 }
 0x121   :  { %v454_v12 = vadd.f32 %v453_v11, %v423_v9  ;;  %v385_v13 = vadd.f32 %v384_v10, %v1167_v51  ;;  %v434_v10 = vmul.f32 %v1219_v33, %v1219_v33 }
 0x123   :  { %v386_v17 = vadd.f32 %v1152_v42, %v385_v13  ;;  %v455_v21 = vadd.f32 %v454_v12, %v424_v14 }
 0x125   :  { %v456_v23 = vadd.f32 %v455_v21, %v425_v15  ;;  %v387_v36 = vadd.f32 %v1163_v49, %v386_v17 }
 0x127   :  { %v388_v38 = vadd.f32 %v387_v36, %v1184_v0  ;;  %v457_v39 = vadd.f32 %v456_v23, %v426_v22 }
 0x129   :  { %v458_v41 = vadd.f32 %v457_v39, %v427_v37  ;;  %v389_v45 = vadd.f32 %v388_v38, %v1195_v7 }
 0x12b   :  { %v390_v52 = vadd.f32 %v1180_v62, %v389_v45  ;;  %v459_v53 = vadd.f32 %v458_v41, %v428_v46 }
 0x12d   :  { %v460_v55 = vadd.f32 %v459_v53, %v429_v47  ;;  %v391_v56 = vadd.f32 %v1191_v5, %v390_v52 }
 0x12f   :  { %v392_v58 = vadd.f32 %v391_v56, %v1212_v20  ;;  %v461_v59 = vadd.f32 %v460_v55, %v430_v54 }
 0x131   :  { %v462_v61 = vadd.f32 %v461_v59, %v431_v57  ;;  %v393_v1 = vadd.f32 %v392_v58, %v1223_v35 }
 0x133   :  { %v394_v8 = vadd.f32 %v1208_v18, %v393_v1  ;;  %v463_v9 = vadd.f32 %v462_v61, %v432_v2 }
 0x135   :  { %v395_v11 = vadd.f32 %v1219_v33, %v394_v8  ;;  %v464_v12 = vadd.f32 %v463_v9, %v433_v3 }
 0x137   :  { %v396_v13 = vrot.slane %v395_v11, 4  ;;  %v465_v14 = vadd.f32 %v464_v12, %v434_v10 }
 0x139   :  { %v397_v15 = vadd.f32 %v396_v13, %v395_v11  ;;  %v466_v17 = vrot.slane %v465_v14, 4 }
 0x13b   :  { %v398_v21 = vrot.slane %v397_v15, 2  ;;  %v467_v22 = vadd.f32 %v466_v17, %v465_v14 }
 0x13d   :  { %v399_v23 = vadd.f32 %v398_v21, %v397_v15  ;;  %v468_v36 = vrot.slane %v467_v22, 2 }
 0x13f   :  { %v400_v37 = vrot.slane %v399_v23, 1  ;;  %v469_v38 = vadd.f32 %v468_v36, %v467_v22 }
 0x141   :  { %v401_v39 = vadd.f32 %v400_v37, %v399_v23  ;;  %v470_v41 = vrot.slane %v469_v38, 1 }
 0x143   :  { %v1282_v45 = vmul.f32 0.004132231, %v401_v39  ;;  %v471_v46 = vadd.f32 %v470_v41, %v469_v38 }
 0x145   :  { %v472_v47 = vmul.f32 0.004132231, %v471_v46  ;;  %v473_v52 = vmul.f32 %v1282_v45, %v1282_v45  ;;  %v478_v53 = vsub.f32 %v1126_v26, %v1282_v45  ;;  %v479_v54 = vsub.f32 %v1134_v30, %v1282_v45 }
 0x146   :  { %v480_v55 = vsub.f32 %v1122_v24, %v1282_v45  ;;  %v481_v56 = vsub.f32 %v1130_v28, %v1282_v45  ;;  %v482_v57 = vsub.f32 %v1154_v43, %v1282_v45  ;;  %v483_v58 = vsub.f32 %v1165_v50, %v1282_v45 }
 0x147   :  { %v474_v59 = vsub.f32 %v472_v47, %v473_v52  ;;  %v484_v61 = vsub.f32 %v1149_v40, %v1282_v45  ;;  %v485_v26 = vsub.f32 %v1161_v48, %v1282_v45  ;;  %v486_v30 = vsub.f32 %v1182_v63, %v1282_v45 }
 0x148   :  { %v487_v24 = vsub.f32 %v1193_v6, %v1282_v45  ;;  %v488_v28 = vsub.f32 %v1177_v60, %v1282_v45  ;;  %v489_v43 = vsub.f32 %v1189_v4, %v1282_v45  ;;  %v490_v50 = vsub.f32 %v1210_v19, %v1282_v45 }
 0x149   :  { %v475_v1 = vmax.f32 %v474_v59, 0.0  ;;  %v491_v40 = vsub.f32 %v1221_v34, %v1282_v45  ;;  %v492_v48 = vsub.f32 %v1205_v16, %v1282_v45  ;;  %v493_v63 = vsub.f32 %v1217_v32, %v1282_v45 }
 0x14a   :  { %v494_v6 = vsub.f32 %v1128_v27, %v1282_v45  ;;  %v495_v60 = vsub.f32 %v1136_v31, %v1282_v45  ;;  %v496_v4 = vsub.f32 %v1124_v25, %v1282_v45  ;;  %v497_v19 = vsub.f32 %v1132_v29, %v1282_v45 }
 0x14b   :  { %v476_v2 = vadd.f32 1e-05, %v475_v1  ;;  %v498_v34 = vsub.f32 %v1156_v44, %v1282_v45  ;;  %v499_v16 = vsub.f32 %v1167_v51, %v1282_v45  ;;  %v500_v32 = vsub.f32 %v1152_v42, %v1282_v45 }
 0x14c   :  { %v501_v27 = vsub.f32 %v1163_v49, %v1282_v45  ;;  %v502_v31 = vsub.f32 %v1184_v0, %v1282_v45  ;;  %v503_v25 = vsub.f32 %v1195_v7, %v1282_v45  ;;  %v504_v29 = vsub.f32 %v1180_v62, %v1282_v45 }
 0x14d   :  { %1033 = vrsqrt.f32 %v476_v2  ;;  %v505_v44 = vsub.f32 %v1191_v5, %v1282_v45  ;;  %v506_v51 = vsub.f32 %v1212_v20, %v1282_v45  ;;  %v507_v42 = vsub.f32 %v1223_v35, %v1282_v45 }
 0x14e   :  { %v508_v49 = vsub.f32 %v1208_v18, %v1282_v45  ;;  %v509_v0 = vsub.f32 %v1219_v33, %v1282_v45 }
 0x157   :  { %v1034_v7 = vpop.eup %1033 }
 0x158   :  { %v1350_v3 = vmul.f32 %v1034_v7, %v478_v53  ;;  %v1352_v62 = vmul.f32 %v1034_v7, %v479_v54  ;;  %v1354_v8 = vmul.f32 %v1034_v7, %v480_v55  ;;  %v1356_v5 = vmul.f32 %v1034_v7, %v481_v56 }
 0x159   :  { %v1358_v9 = vmul.f32 %v1034_v7, %v482_v57  ;;  %v1360_v20 = vmul.f32 %v1034_v7, %v483_v58  ;;  %v1362_v35 = vmul.f32 %v1034_v7, %v484_v61  ;;  %v517_v10 = vmul.f32 %v1034_v7, %v485_v26 }
 0x15a   :  { %v518_v18 = vmul.f32 %v1034_v7, %v486_v30  ;;  %v519_v11 = vmul.f32 %v1034_v7, %v487_v24  ;;  %v520_v12 = vmul.f32 %v1034_v7, %v488_v28  ;;  %v521_v33 = vmul.f32 %v1034_v7, %v489_v43 }
 0x15b   :  { %v522_v13 = vmul.f32 %v1034_v7, %v490_v50  ;;  %v523_v14 = vmul.f32 %v1034_v7, %v491_v40  ;;  %v524_v15 = vmul.f32 %v1034_v7, %v492_v48  ;;  %v525_v17 = vmul.f32 %v1034_v7, %v493_v63 }
 0x15c   :  { %v526_v21 = vmul.f32 %v1034_v7, %v494_v6  ;;  %v527_v22 = vmul.f32 %v1034_v7, %v495_v60  ;;  %v528_v23 = vmul.f32 %v1034_v7, %v496_v4  ;;  %v529_v36 = vmul.f32 %v1034_v7, %v497_v19 }
 0x15d   :  { %v530_v37 = vmul.f32 %v1034_v7, %v498_v34  ;;  %v531_v38 = vmul.f32 %v1034_v7, %v499_v16  ;;  %v532_v39 = vmul.f32 %v1034_v7, %v500_v32  ;;  %v533_v41 = vmul.f32 %v1034_v7, %v501_v27 }
 0x15e   :  { %v534_v45 = vmul.f32 %v1034_v7, %v502_v31  ;;  %v535_v46 = vmul.f32 %v1034_v7, %v503_v25  ;;  %v536_v47 = vmul.f32 %v1034_v7, %v504_v29  ;;  %v537_v52 = vmul.f32 %v1034_v7, %v505_v44 }
 0x15f   :  { %v538_v53 = vmul.f32 %v1034_v7, %v506_v51  ;;  %v539_v54 = vmul.f32 %v1034_v7, %v507_v42  ;;  %v540_v55 = vmul.f32 %v1034_v7, %v508_v49  ;;  %v541_v56 = vmul.f32 %v1034_v7, %v509_v0 }
 0x160   :  { %v542_v57 = vmax.f32 %v1350_v3, 0.0  ;;  %v543_v58 = vmax.f32 %v1352_v62, 0.0  ;;  %v544_v59 = vmax.f32 %v1354_v8, 0.0  ;;  %v545_v61 = vmax.f32 %v1356_v5, 0.0 }
 0x161   :  { %v546_v26 = vmax.f32 %v1358_v9, 0.0  ;;  %v547_v30 = vmax.f32 %v1360_v20, 0.0  ;;  %v548_v24 = vmax.f32 %v1362_v35, 0.0  ;;  %v549_v28 = vmax.f32 %v517_v10, 0.0 }
 0x162   :  { %v550_v43 = vmax.f32 %v518_v18, 0.0  ;;  %v551_v50 = vmax.f32 %v519_v11, 0.0  ;;  %v552_v1 = vmax.f32 %v520_v12, 0.0  ;;  %v553_v40 = vmax.f32 %v521_v33, 0.0 }
 0x163   :  { %v554_v48 = vmax.f32 %v522_v13, 0.0  ;;  %v555_v63 = vmax.f32 %v523_v14, 0.0  ;;  %v556_v6 = vmax.f32 %v524_v15, 0.0  ;;  %v557_v60 = vmax.f32 %v525_v17, 0.0 }
 0x164   :  { %v558_v4 = vmax.f32 %v526_v21, 0.0  ;;  %v559_v19 = vmax.f32 %v527_v22, 0.0  ;;  %v560_v2 = vmax.f32 %v528_v23, 0.0  ;;  %v561_v34 = vmax.f32 %v529_v36, 0.0 }
 0x165   :  { %v562_v16 = vmax.f32 %v530_v37, 0.0  ;;  %v563_v32 = vmax.f32 %v531_v38, 0.0  ;;  %v564_v27 = vmax.f32 %v532_v39, 0.0  ;;  %v565_v31 = vmax.f32 %v533_v41, 0.0 }
 0x166   :  { %v566_v25 = vmax.f32 %v534_v45, 0.0  ;;  %v567_v29 = vmax.f32 %v535_v46, 0.0  ;;  %v568_v44 = vmax.f32 %v536_v47, 0.0  ;;  %v569_v51 = vmax.f32 %v537_v52, 0.0 }
 0x167   :  { %v570_v42 = vmax.f32 %v538_v53, 0.0  ;;  %v571_v49 = vmax.f32 %v539_v54, 0.0  ;;  %v572_v0 = vmax.f32 %v540_v55, 0.0  ;;  %v573_v7 = vmax.f32 %v541_v56, 0.0 }
 0x168   :  { %v829_v3 = vpack.c.bf16 %v543_v58, %v542_v57  ;;  %v834_v62 = vpack.c.bf16 %v545_v61, %v544_v59  ;;  %v839_v8 = vpack.c.bf16 %v547_v30, %v546_v26  ;;  %v844_v5 = vpack.c.bf16 %v549_v28, %v548_v24 }
 0x169   :  { %v849_v9 = vpack.c.bf16 %v551_v50, %v550_v43  ;;  %v854_v20 = vpack.c.bf16 %v553_v40, %v552_v1  ;;  %v859_v35 = vpack.c.bf16 %v555_v63, %v554_v48  ;;  %v864_v10 = vpack.c.bf16 %v557_v60, %v556_v6 }
 0x16a   :  { %830 = vst [vmem:[%s1421_s2] sm:$0xff] %v829_v3   ;;  %906 = vst [vmem:[%s1421_s2 + $0x8] sm:$0xff] %v834_v62   ;;  %v869_v18 = vpack.c.bf16 %v559_v19, %v558_v4  ;;  %v874_v11 = vpack.c.bf16 %v561_v34, %v560_v2  ;;  %v879_v12 = vpack.c.bf16 %v563_v32, %v562_v16 }
 0x16b   :  { %907 = vst [vmem:[%s1421_s2 + $0x10] sm:$0xff] %v839_v8   ;;  %908 = vst [vmem:[%s1421_s2 + $0x18] sm:$0xff] %v844_v5   ;;  %v884_v33 = vpack.c.bf16 %v565_v31, %v564_v27  ;;  %v889_v13 = vpack.c.bf16 %v567_v29, %v566_v25  ;;  %v894_v14 = vpack.c.bf16 %v569_v51, %v568_v44 }
 0x16c   :  { %909 = vst [vmem:[%s1421_s2 + $0x20] sm:$0xff] %v849_v9   ;;  %910 = vst [vmem:[%s1421_s2 + $0x28] sm:$0xff] %v854_v20   ;;  %v899_v15 = vpack.c.bf16 %v571_v49, %v570_v42  ;;  %v904_v17 = vpack.c.bf16 %v573_v7, %v572_v0 }
 0x16d   :  { %911 = vst [vmem:[%s1421_s2 + $0x30] sm:$0xff] %v859_v35   ;;  %912 = vst [vmem:[%s1421_s2 + $0x38] sm:$0xff] %v864_v10  }
 0x16e   :  { %913 = vst [vmem:[%s1421_s2 + $0x40] sm:$0xff] %v869_v18   ;;  %914 = vst [vmem:[%s1421_s2 + $0x48] sm:$0xff] %v874_v11  }
 0x16f   :  { %915 = vst [vmem:[%s1421_s2 + $0x50] sm:$0xff] %v879_v12   ;;  %916 = vst [vmem:[%s1421_s2 + $0x58] sm:$0xff] %v884_v33  }
 0x170   :  { %917 = vst [vmem:[%s1421_s2 + $0x60] sm:$0xff] %v889_v13   ;;  %918 = vst [vmem:[%s1421_s2 + $0x68] sm:$0xff] %v894_v14  }
 0x171   :  { %919 = vst [vmem:[%s1421_s2 + $0x70] sm:$0xff] %v899_v15   ;;  %920 = vst [vmem:[%s1421_s2 + $0x78] sm:$0xff] %v904_v17  }

// kernel: conv3_forward.6
= control target key start
LH: loop header
LB: loop body
LE: loop exit
PB: predicated region body
PF: predicated region fallthrough
CT: control target
= control target key end

     0   :  { %s634_s1 = inlined_call_operand.vmem [shape: bf16[256,128], index: 1, kind: input, shape index: {}]   ;;  %s635_s0 = inlined_call_operand.vmem [shape: bf16[64,256], index: 0, kind: input, shape index: {}]   ;;  %s636_s2 = inlined_call_operand.vmem [shape: bf16[64,128], index: 2, kind: output, shape index: {}]  }
   0x1   :  { %v481_v0 = vld [vmem:[%s634_s1 + $0x40] sm:$0xff]   ;;  %v483_v2 = vld [vmem:[%s634_s1 + $0x48] sm:$0xff]   ;;  %v485_v4 = vld [vmem:[%s634_s1 + $0x50] sm:$0xff]  }
   0x2   :  { %v482_v1 = vld [vmem:[%s634_s1] sm:$0xff]   ;;  %425 = vmatprep.subr.bf16.mxu0 %v481_v0  ;;  %465 = vmatprep.subr.bf16.mxu1 %v481_v0  ;;  %v484_v3 = vld [vmem:[%s634_s1 + $0x8] sm:$0xff]   ;;  %v486_v5 = vld [vmem:[%s634_s1 + $0x10] sm:$0xff]  }
   0x3   :  { %426 = vmatpush3.bf16.msra.mxu0 %v482_v1  ;;  %473 = vmatpush3.bf16.msra.mxu1 %v482_v1  ;;  %v487_v6 = vld [vmem:[%s634_s1 + $0x58] sm:$0xff]   ;;  %v489_v8 = vld [vmem:[%s634_s1 + $0x60] sm:$0xff]   ;;  %v491_v10 = vld [vmem:[%s634_s1 + $0x68] sm:$0xff]  }
   0x4   :  { %427 = vmatprep.subr.bf16.mxu0 %v483_v2  ;;  %466 = vmatprep.subr.bf16.mxu1 %v483_v2  ;;  %v488_v7 = vld [vmem:[%s634_s1 + $0x18] sm:$0xff]   ;;  %v490_v9 = vld [vmem:[%s634_s1 + $0x20] sm:$0xff]   ;;  %v492_v13 = vld [vmem:[%s634_s1 + $0x28] sm:$0xff]  }
   0x5   :  { %v499_v11 = vld [vmem:[%s635_s0 + $0x4] ss:$8 sps:$4 sm:$0xff]   ;;  %v493_v14 = vld [vmem:[%s634_s1 + $0x70] sm:$0xff]   ;;  %v495_v16 = vld [vmem:[%s634_s1 + $0x78] sm:$0xff]  }
   0x6   :  { %v502_v12 = vld [vmem:[%s635_s0 + $0x24] ss:$8 sps:$4 sm:$0xff]   ;;  %220 = vmatprep.mubr.bf16.mxu0 %v499_v11  ;;  %v494_v15 = vld [vmem:[%s634_s1 + $0x30] sm:$0xff]   ;;  %v496_v17 = vld [vmem:[%s634_s1 + $0x38] sm:$0xff]  }
   0x7   :  { %428 = vmatpush3.bf16.msra.mxu0 %v484_v3  ;;  %474 = vmatpush3.bf16.msra.mxu1 %v484_v3  ;;  %v497_v18 = vld [vmem:[%s635_s0] ss:$8 sps:$4 sm:$0xff]   ;;  %v503_v20 = vld [vmem:[%s635_s0 + $0x14] ss:$8 sps:$4 sm:$0xff]   ;;  %v505_v22 = vld [vmem:[%s635_s0 + $0x10] ss:$8 sps:$4 sm:$0xff]  }
   0x8   :  { %429 = vmatprep.subr.bf16.mxu0 %v485_v4  ;;  %467 = vmatprep.subr.bf16.mxu1 %v485_v4  ;;  %v500_v19 = vld [vmem:[%s635_s0 + $0x20] ss:$8 sps:$4 sm:$0xff]   ;;  %v506_v21 = vld [vmem:[%s635_s0 + $0x34] ss:$8 sps:$4 sm:$0xff]   ;;  %v508_v23 = vld [vmem:[%s635_s0 + $0x30] ss:$8 sps:$4 sm:$0xff]  }
   0x9   :  { %236 = vmatprep.mubr.bf16.mxu1 %v502_v12 }
   0xb   :  { %430 = vmatpush3.bf16.msra.mxu0 %v486_v5  ;;  %475 = vmatpush3.bf16.msra.mxu1 %v486_v5 }
   0xc   :  { %431 = vmatprep.subr.bf16.mxu0 %v487_v6  ;;  %468 = vmatprep.subr.bf16.mxu1 %v487_v6 }
   0xf   :  { %432 = vmatpush3.bf16.msra.mxu0 %v488_v7  ;;  %476 = vmatpush3.bf16.msra.mxu1 %v488_v7 }
  0x10   :  { %433 = vmatprep.subr.bf16.mxu0 %v489_v8  ;;  %469 = vmatprep.subr.bf16.mxu1 %v489_v8 }
  0x13   :  { %434 = vmatpush3.bf16.msra.mxu0 %v490_v9  ;;  %477 = vmatpush3.bf16.msra.mxu1 %v490_v9 }
  0x14   :  { %435 = vmatprep.subr.bf16.mxu0 %v491_v10  ;;  %470 = vmatprep.subr.bf16.mxu1 %v491_v10 }
  0x17   :  { %436 = vmatpush3.bf16.msra.mxu0 %v492_v13  ;;  %478 = vmatpush3.bf16.msra.mxu1 %v492_v13 }
  0x18   :  { %437 = vmatprep.subr.bf16.mxu0 %v493_v14  ;;  %471 = vmatprep.subr.bf16.mxu1 %v493_v14 }
  0x1b   :  { %438 = vmatpush3.bf16.msra.mxu0 %v494_v15  ;;  %479 = vmatpush3.bf16.msra.mxu1 %v494_v15 }
  0x1c   :  { %439 = vmatprep.subr.bf16.mxu0 %v495_v16  ;;  %472 = vmatprep.subr.bf16.mxu1 %v495_v16 }
  0x1f   :  { %440 = vmatpush3.bf16.msra.mxu0 %v496_v17  ;;  %480 = vmatpush3.bf16.msra.mxu1 %v496_v17 }
  0x22   :  { %221 = vmatmul.mubr.bf16.vlgmr.msra.gmra.mrb[0].mxu0 %v497_v18  ;;  %237 = vmatmul.mubr.bf16.vlgmr.msra.gmra.mrb[0].mxu1 %v500_v19 }
  0x23   :  { %228 = vmatprep.mubr.bf16.mxu0 %v503_v20  ;;  %244 = vmatprep.mubr.bf16.mxu1 %v506_v21 }
  0x2a   :  { %229 = vmatmul.mubr.bf16.gmra.mrb[4].mxu0 %v505_v22  ;;  %245 = vmatmul.mubr.bf16.gmra.mrb[4].mxu1 %v508_v23 }
  0xf5   :  { %v441_v24 = vpop.f32.mrb[0].mxu0  ;;  %v453_v25 = vpop.f32.mrb[0].mxu1 }
  0xf6   :  { %v442_v26 = vpop.f32.mrb[1].mxu0  ;;  %v454_v27 = vpop.f32.mrb[1].mxu1 }
  0xf7   :  { %v598_v28 = vadd.f32 %v442_v26, %v441_v24  ;;  %v444_v29 = vpop.f32.mrb[2].mxu0  ;;  %v600_v30 = vadd.f32 %v454_v27, %v453_v25  ;;  %v456_v31 = vpop.f32.mrb[2].mxu1 }
  0xf8   :  { %v445_v32 = vpop.f32.mrb[3].mxu0  ;;  %v457_v33 = vpop.f32.mrb[3].mxu1 }
  0xf9   :  { %v602_v34 = vadd.f32 %v445_v32, %v444_v29  ;;  %v604_v35 = vadd.f32 %v457_v33, %v456_v31  ;;  %v267_v36 = vmul.f32 %v598_v28, %v598_v28  ;;  %v271_v57 = vmul.f32 %v600_v30, %v600_v30 }
  0xfb   :  { %v253_v37 = vadd.f32 %v602_v34, %v598_v28  ;;  %v268_v38 = vmul.f32 %v602_v34, %v602_v34  ;;  %v272_v60 = vmul.f32 %v604_v35, %v604_v35 }
  0xfd   :  { %v275_v39 = vadd.f32 %v268_v38, %v267_v36  ;;  %v447_v40 = vpop.f32.mrb[4].mxu0  ;;  %v459_v41 = vpop.f32.mrb[4].mxu1 }
  0xfe   :  { %v448_v42 = vpop.f32.mrb[5].mxu0  ;;  %v460_v43 = vpop.f32.mrb[5].mxu1 }
  0xff   :  { %v449_v44 = vadd.f32 %v448_v42, %v447_v40  ;;  %v450_v45 = vpop.f32.mrb[6].mxu0  ;;  %v461_v46 = vadd.f32 %v460_v43, %v459_v41  ;;  %v462_v47 = vpop.f32.mrb[6].mxu1 }
 0x100   :  { %v451_v48 = vpop.f32.mrb[7].mxu0  ;;  %v463_v49 = vpop.f32.mrb[7].mxu1 }
 0x101   :  { %v254_v50 = vadd.f32 %v449_v44, %v253_v37  ;;  %v269_v51 = vmul.f32 %v449_v44, %v449_v44  ;;  %v452_v52 = vadd.f32 %v451_v48, %v450_v45  ;;  %v464_v53 = vadd.f32 %v463_v49, %v462_v47 }
 0x102   :  { %v273_v63 = vmul.f32 %v461_v46, %v461_v46 }
 0x103   :  { %v276_v54 = vadd.f32 %v275_v39, %v269_v51  ;;  %v255_v55 = vadd.f32 %v452_v52, %v254_v50  ;;  %v270_v56 = vmul.f32 %v452_v52, %v452_v52  ;;  %v274_v4 = vmul.f32 %v464_v53, %v464_v53 }
 0x105   :  { %v256_v58 = vadd.f32 %v600_v30, %v255_v55  ;;  %v277_v59 = vadd.f32 %v276_v54, %v270_v56 }
 0x107   :  { %v278_v61 = vadd.f32 %v277_v59, %v271_v57  ;;  %v257_v62 = vadd.f32 %v604_v35, %v256_v58 }
 0x109   :  { %v258_v0 = vadd.f32 %v461_v46, %v257_v62  ;;  %v279_v1 = vadd.f32 %v278_v61, %v272_v60 }
 0x10b   :  { %v280_v2 = vadd.f32 %v279_v1, %v273_v63  ;;  %v259_v3 = vadd.f32 %v464_v53, %v258_v0 }
 0x10d   :  { %v260_v5 = vrot.slane %v259_v3, 4  ;;  %v281_v6 = vadd.f32 %v280_v2, %v274_v4 }
 0x10f   :  { %v261_v7 = vadd.f32 %v260_v5, %v259_v3  ;;  %v282_v8 = vrot.slane %v281_v6, 4 }
 0x111   :  { %v262_v9 = vrot.slane %v261_v7, 2  ;;  %v283_v10 = vadd.f32 %v282_v8, %v281_v6 }
 0x113   :  { %v263_v11 = vadd.f32 %v262_v9, %v261_v7  ;;  %v284_v12 = vrot.slane %v283_v10, 2 }
 0x115   :  { %v264_v13 = vrot.slane %v263_v11, 1  ;;  %v285_v14 = vadd.f32 %v284_v12, %v283_v10 }
 0x117   :  { %v265_v15 = vadd.f32 %v264_v13, %v263_v11  ;;  %v286_v16 = vrot.slane %v285_v14, 1 }
 0x119   :  { %v266_v17 = vmul.f32 0.02, %v265_v15  ;;  %v287_v18 = vadd.f32 %v286_v16, %v285_v14 }
 0x11b   :  { %v288_v19 = vmul.f32 0.02, %v287_v18  ;;  %v289_v20 = vmul.f32 %v266_v17, %v266_v17  ;;  %v294_v21 = vsub.f32 %v598_v28, %v266_v17  ;;  %v295_v22 = vsub.f32 %v602_v34, %v266_v17 }
 0x11c   :  { %v296_v23 = vsub.f32 %v449_v44, %v266_v17  ;;  %v297_v24 = vsub.f32 %v452_v52, %v266_v17  ;;  %v298_v25 = vsub.f32 %v600_v30, %v266_v17  ;;  %v299_v26 = vsub.f32 %v604_v35, %v266_v17 }
 0x11d   :  { %v290_v27 = vsub.f32 %v288_v19, %v289_v20  ;;  %v300_v29 = vsub.f32 %v461_v46, %v266_v17  ;;  %v301_v31 = vsub.f32 %v464_v53, %v266_v17 }
 0x11f   :  { %v291_v32 = vmax.f32 %v290_v27, 0.0 }
 0x121   :  { %v292_v33 = vadd.f32 1e-05, %v291_v32 }
 0x123   :  { %509 = vrsqrt.f32 %v292_v33 }
 0x12d   :  { %v510_v36 = vpop.eup %509 }
 0x12e   :  { %v302_v37 = vmul.f32 %v510_v36, %v294_v21  ;;  %v303_v38 = vmul.f32 %v510_v36, %v295_v22  ;;  %v304_v39 = vmul.f32 %v510_v36, %v296_v23  ;;  %v305_v40 = vmul.f32 %v510_v36, %v297_v24 }
 0x12f   :  { %v306_v28 = vmul.f32 %v510_v36, %v298_v25  ;;  %v307_v41 = vmul.f32 %v510_v36, %v299_v26  ;;  %v308_v34 = vmul.f32 %v510_v36, %v300_v29  ;;  %v309_v42 = vmul.f32 %v510_v36, %v301_v31 }
 0x130   :  { %v310_v43 = vmax.f32 %v302_v37, 0.0  ;;  %v311_v44 = vmax.f32 %v303_v38, 0.0  ;;  %v312_v30 = vmax.f32 %v304_v39, 0.0  ;;  %v313_v45 = vmax.f32 %v305_v40, 0.0 }
 0x131   :  { %v314_v35 = vmax.f32 %v306_v28, 0.0  ;;  %v315_v47 = vmax.f32 %v307_v41, 0.0  ;;  %v316_v46 = vmax.f32 %v308_v34, 0.0  ;;  %v317_v48 = vmax.f32 %v309_v42, 0.0 }
 0x132   :  { %v405_v49 = vpack.c.bf16 %v311_v44, %v310_v43  ;;  %v410_v50 = vpack.c.bf16 %v313_v45, %v312_v30 }
 0x133   :  { %v415_v51 = vpack.c.bf16 %v315_v47, %v314_v35  ;;  %v420_v52 = vpack.c.bf16 %v317_v48, %v316_v46 }
 0x134   :  { %406 = vst [vmem:[%s636_s2] sm:$0xff] %v405_v49   ;;  %422 = vst [vmem:[%s636_s2 + $0x8] sm:$0xff] %v410_v50  }
 0x135   :  { %423 = vst [vmem:[%s636_s2 + $0x10] sm:$0xff] %v415_v51   ;;  %424 = vst [vmem:[%s636_s2 + $0x18] sm:$0xff] %v420_v52  }

// kernel: conv3_forward.7
= control target key start
LH: loop header
LB: loop body
LE: loop exit
PB: predicated region body
PF: predicated region fallthrough
CT: control target
= control target key end

     0   :  { %vm4640_vm0 = vcmask 392192   ;;  %vm9071_vm1 = vmmov 0   ;;  %s11869_s1 = inlined_call_operand.vmem [shape: bf16[1200,1280], index: 1, kind: input, shape index: {}]   ;;  %s11870_s0 = inlined_call_operand.vmem [shape: bf16[16,1200], index: 0, kind: input, shape index: {}]   ;;  %s11871_s2 = inlined_call_operand.vmem [shape: f32[1,1280], index: 2, kind: input, shape index: {}]   ;;  %s11872_s3 = inlined_call_operand.vmem [shape: bf16[1280,128], index: 3, kind: input, shape index: {}]   ;;  %s11873_s4 = inlined_call_operand.vmem [shape: f32[1,128], index: 4, kind: input, shape index: {}]   ;;  %s11874_s5 = inlined_call_operand.vmem [shape: bf16[128,128], index: 5, kind: input, shape index: {}]   ;;  %s11875_s6 = inlined_call_operand.vmem [shape: f32[1,128], index: 6, kind: input, shape index: {}]   ;;  %s11876_s7 = inlined_call_operand.vmem [shape: f32[16,128], index: 7, kind: output, shape index: {}]  }
   0x1   :  { %v7818_v0 = vld [vmem:[%s11869_s1 + $0x4] ss:$40 sps:$4 sm:$0xff]   ;;  %v7822_v2 = vld [vmem:[%s11869_s1] ss:$40 sps:$4 sm:$0xff]   ;;  %v7824_v4 = vld [vmem:[%s11869_s1 + $0x54] ss:$40 sps:$4 sm:$0xff]  }
   0x2   :  { %v7820_v1 = vld [vmem:[%s11869_s1 + $0x504] ss:$40 sps:$4 sm:$0xff]   ;;  %4644 = vmatprep.subr.bf16.mxu1 %v7818_v0  ;;  %v7823_v3 = vld [vmem:[%s11869_s1 + $0x500] ss:$40 sps:$4 sm:$0xff]   ;;  %v7826_v5 = vld [vmem:[%s11869_s1 + $0x554] ss:$40 sps:$4 sm:$0xff]  }
   0x3   :  { %4687 = vmatprep.subr.bf16.mxu0 %v7820_v1  ;;  %4645 = vmatpush1.bf16.msra.mxu1 %v7822_v2  ;;  %v7828_v6 = vld [vmem:[%s11869_s1 + $0x50] ss:$40 sps:$4 sm:$0xff]   ;;  %v7830_v8 = vld [vmem:[%s11869_s1 + $0xa4] ss:$40 sps:$4 sm:$0xff]   ;;  %v7834_v10 = vld [vmem:[%s11869_s1 + $0xa0] ss:$40 sps:$4 sm:$0xff]  }
   0x4   :  { %4688 = vmatpush1.bf16.msra.mxu0 %v7823_v3  ;;  %4646 = vmatprep.subr.bf16.mxu1 %v7824_v4  ;;  %v7829_v7 = vld [vmem:[%s11869_s1 + $0x550] ss:$40 sps:$4 sm:$0xff]   ;;  %v7832_v9 = vld [vmem:[%s11869_s1 + $0x5a4] ss:$40 sps:$4 sm:$0xff]   ;;  %v7835_v11 = vld [vmem:[%s11869_s1 + $0x5a0] ss:$40 sps:$4 sm:$0xff]  }
   0x5   :  { %4689 = vmatprep.subr.bf16.mxu0 %v7826_v5  ;;  %v7836_v12 = vld [vmem:[%s11869_s1 + $0xf4] ss:$40 sps:$4 sm:$0xff]   ;;  %v7840_v14 = vld [vmem:[%s11869_s1 + $0xf0] ss:$40 sps:$4 sm:$0xff]   ;;  %v7842_v16 = vld [vmem:[%s11869_s1 + $0x144] ss:$40 sps:$4 sm:$0xff]  }
   0x6   :  { %v7838_v13 = vld [vmem:[%s11869_s1 + $0x5f4] ss:$40 sps:$4 sm:$0xff]   ;;  %v7841_v15 = vld [vmem:[%s11869_s1 + $0x5f0] ss:$40 sps:$4 sm:$0xff]   ;;  %v7844_v17 = vld [vmem:[%s11869_s1 + $0x644] ss:$40 sps:$4 sm:$0xff]  }
   0x7   :  { %4647 = vmatpush1.bf16.msra.mxu1 %v7828_v6  ;;  %v7846_v18 = vld [vmem:[%s11869_s1 + $0x140] ss:$40 sps:$4 sm:$0xff]   ;;  %v7848_v20 = vld [vmem:[%s11869_s1 + $0x194] ss:$40 sps:$4 sm:$0xff]   ;;  %v7852_v22 = vld [vmem:[%s11869_s1 + $0x190] ss:$40 sps:$4 sm:$0xff]  }
   0x8   :  { %4690 = vmatpush1.bf16.msra.mxu0 %v7829_v7  ;;  %4648 = vmatprep.subr.bf16.mxu1 %v7830_v8  ;;  %v7847_v19 = vld [vmem:[%s11869_s1 + $0x640] ss:$40 sps:$4 sm:$0xff]   ;;  %v7850_v21 = vld [vmem:[%s11869_s1 + $0x694] ss:$40 sps:$4 sm:$0xff]   ;;  %v7853_v23 = vld [vmem:[%s11869_s1 + $0x690] ss:$40 sps:$4 sm:$0xff]  }
   0x9   :  { %4691 = vmatprep.subr.bf16.mxu0 %v7832_v9  ;;  %v7854_v24 = vld [vmem:[%s11869_s1 + $0x1e4] ss:$40 sps:$4 sm:$0xff]   ;;  %v7858_v26 = vld [vmem:[%s11869_s1 + $0x1e0] ss:$40 sps:$4 sm:$0xff]   ;;  %v7860_v28 = vld [vmem:[%s11869_s1 + $0x234] ss:$40 sps:$4 sm:$0xff]  }
   0xa   :  { %v7856_v25 = vld [vmem:[%s11869_s1 + $0x6e4] ss:$40 sps:$4 sm:$0xff]   ;;  %v7859_v27 = vld [vmem:[%s11869_s1 + $0x6e0] ss:$40 sps:$4 sm:$0xff]   ;;  %v7862_v29 = vld [vmem:[%s11869_s1 + $0x734] ss:$40 sps:$4 sm:$0xff]  }
   0xb   :  { %4649 = vmatpush1.bf16.msra.mxu1 %v7834_v10  ;;  %v7864_v30 = vld [vmem:[%s11869_s1 + $0x230] ss:$40 sps:$4 sm:$0xff]   ;;  %v7866_v32 = vld [vmem:[%s11869_s1 + $0x284] ss:$40 sps:$4 sm:$0xff]   ;;  %v7870_v34 = vld [vmem:[%s11869_s1 + $0x280] ss:$40 sps:$4 sm:$0xff]  }
   0xc   :  { %4692 = vmatpush1.bf16.msra.mxu0 %v7835_v11  ;;  %4650 = vmatprep.subr.bf16.mxu1 %v7836_v12  ;;  %v7865_v31 = vld [vmem:[%s11869_s1 + $0x730] ss:$40 sps:$4 sm:$0xff]   ;;  %v7868_v33 = vld [vmem:[%s11869_s1 + $0x784] ss:$40 sps:$4 sm:$0xff]   ;;  %v7871_v35 = vld [vmem:[%s11869_s1 + $0x780] ss:$40 sps:$4 sm:$0xff]  }
   0xd   :  { %4693 = vmatprep.subr.bf16.mxu0 %v7838_v13  ;;  %v7872_v36 = vld [vmem:[%s11869_s1 + $0x2d4] ss:$40 sps:$4 sm:$0xff]   ;;  %v7876_v38 = vld [vmem:[%s11869_s1 + $0x2d0] ss:$40 sps:$4 sm:$0xff]   ;;  %v7878_v40 = vld [vmem:[%s11869_s1 + $0x324] ss:$40 sps:$4 sm:$0xff]  }
   0xe   :  { %v7874_v37 = vld [vmem:[%s11869_s1 + $0x7d4] ss:$40 sps:$4 sm:$0xff]   ;;  %v7877_v39 = vld [vmem:[%s11869_s1 + $0x7d0] ss:$40 sps:$4 sm:$0xff]   ;;  %v7880_v41 = vld [vmem:[%s11869_s1 + $0x824] ss:$40 sps:$4 sm:$0xff]  }
   0xf   :  { %4651 = vmatpush1.bf16.msra.mxu1 %v7840_v14  ;;  %v7882_v42 = vld [vmem:[%s11869_s1 + $0x320] ss:$40 sps:$4 sm:$0xff]   ;;  %v7884_v44 = vld [vmem:[%s11869_s1 + $0x374] ss:$40 sps:$4 sm:$0xff]   ;;  %v7888_v46 = vld [vmem:[%s11869_s1 + $0x370] ss:$40 sps:$4 sm:$0xff]  }
  0x10   :  { %4694 = vmatpush1.bf16.msra.mxu0 %v7841_v15  ;;  %4652 = vmatprep.subr.bf16.mxu1 %v7842_v16  ;;  %v7883_v43 = vld [vmem:[%s11869_s1 + $0x820] ss:$40 sps:$4 sm:$0xff]   ;;  %v7886_v45 = vld [vmem:[%s11869_s1 + $0x874] ss:$40 sps:$4 sm:$0xff]   ;;  %v7889_v47 = vld [vmem:[%s11869_s1 + $0x870] ss:$40 sps:$4 sm:$0xff]  }
  0x11   :  { %4695 = vmatprep.subr.bf16.mxu0 %v7844_v17  ;;  %v7914_v48 = vld [vmem:[%s11870_s0 + $0x4] ss:$40 sps:$4 sm:$0xff]   ;;  %v7894_v52 = vld [vmem:[%s11869_s1 + $0x3c0] ss:$40 sps:$4 sm:$0xff]   ;;  %v7896_v54 = vld [vmem:[%s11869_s1 + $0x414] ss:$40 sps:$4 sm:$0xff]  }
  0x12   :  { %v9262_v49 = vld [vmem:[%s11870_s0 + $0xc] ss:$40 sps:$4 sm:$0xff]   ;;  %4676 = vmatprep.mubr.bf16.mxu1 %v7914_v48  ;;  %v7895_v53 = vld [vmem:[%s11869_s1 + $0x8c0] ss:$40 sps:$4 sm:$0xff]   ;;  %v7900_v56 = vld [vmem:[%s11869_s1 + $0x410] ss:$40 sps:$4 sm:$0xff]  }
  0x13   :  { %4653 = vmatpush1.bf16.msra.mxu1 %v7846_v18  ;;  %v7890_v50 = vld [vmem:[%s11869_s1 + $0x3c4] ss:$40 sps:$4 sm:$0xff]   ;;  %4719 = vmatprep.mubr.bf16.mxu0 %v9262_v49  ;;  %v7898_v55 = vld [vmem:[%s11869_s1 + $0x914] ss:$40 sps:$4 sm:$0xff]   ;;  %v7901_v57 = vld [vmem:[%s11869_s1 + $0x910] ss:$40 sps:$4 sm:$0xff]  }
  0x14   :  { %4696 = vmatpush1.bf16.msra.mxu0 %v7847_v19  ;;  %4654 = vmatprep.subr.bf16.mxu1 %v7848_v20  ;;  %v7892_v51 = vld [vmem:[%s11869_s1 + $0x8c4] ss:$40 sps:$4 sm:$0xff]   ;;  %v7906_v60 = vld [vmem:[%s11869_s1 + $0x460] ss:$40 sps:$4 sm:$0xff]   ;;  %v7908_v62 = vld [vmem:[%s11869_s1 + $0x4b4] ss:$40 sps:$4 sm:$0xff]  }
  0x15   :  { %4697 = vmatprep.subr.bf16.mxu0 %v7850_v21  ;;  %v7902_v58 = vld [vmem:[%s11869_s1 + $0x464] ss:$40 sps:$4 sm:$0xff]   ;;  %v7907_v61 = vld [vmem:[%s11869_s1 + $0x960] ss:$40 sps:$4 sm:$0xff]   ;;  %v7910_v63 = vld [vmem:[%s11869_s1 + $0x9b4] ss:$40 sps:$4 sm:$0xff]  }
  0x16   :  { %v7904_v59 = vld [vmem:[%s11869_s1 + $0x964] ss:$40 sps:$4 sm:$0xff]   ;;  %v7912_v0 = vld [vmem:[%s11869_s1 + $0x4b0] ss:$40 sps:$4 sm:$0xff]   ;;  %v7918_v4 = vld [vmem:[%s11869_s1 + $0xa00] ss:$40 sps:$4 sm:$0xff]  }
  0x17   :  { %4655 = vmatpush1.bf16.msra.mxu1 %v7852_v22  ;;  %v7913_v1 = vld [vmem:[%s11869_s1 + $0x9b0] ss:$40 sps:$4 sm:$0xff]   ;;  %v7920_v2 = vld [vmem:[%s11869_s1 + $0xa04] ss:$40 sps:$4 sm:$0xff]   ;;  %v9328_v6 = vld [vmem:[%s11870_s0] ss:$40 sps:$4 sm:$0xff]  }
  0x18   :  { %4698 = vmatpush1.bf16.msra.mxu0 %v7853_v23  ;;  %4656 = vmatprep.subr.bf16.mxu1 %v7854_v24  ;;  %v7923_v3 = vld [vmem:[%s11869_s1 + $0xc] ss:$40 sps:$4 sm:$0xff]   ;;  %v7921_v5 = vld [vmem:[%s11869_s1 + $0x8] ss:$40 sps:$4 sm:$0xff]   ;;  %v7931_v9 = vld [vmem:[%s11869_s1 + $0x5c] ss:$40 sps:$4 sm:$0xff]  }
  0x19   :  { %4699 = vmatprep.subr.bf16.mxu0 %v7856_v25  ;;  %v9333_v7 = vld [vmem:[%s11870_s0 + $0x8] ss:$40 sps:$4 sm:$0xff]   ;;  %v7928_v8 = vld [vmem:[%s11869_s1 + $0xa54] ss:$40 sps:$4 sm:$0xff]   ;;  %v7929_v11 = vld [vmem:[%s11869_s1 + $0x58] ss:$40 sps:$4 sm:$0xff]  }
  0x1a   :  { %v7926_v10 = vld [vmem:[%s11869_s1 + $0xa50] ss:$40 sps:$4 sm:$0xff]   ;;  %v7934_v12 = vld [vmem:[%s11869_s1 + $0xaa4] ss:$40 sps:$4 sm:$0xff]   ;;  %v7932_v14 = vld [vmem:[%s11869_s1 + $0xaa0] ss:$40 sps:$4 sm:$0xff]  }
  0x1b   :  { %4657 = vmatpush1.bf16.msra.mxu1 %v7858_v26  ;;  %v7937_v13 = vld [vmem:[%s11869_s1 + $0xac] ss:$40 sps:$4 sm:$0xff]   ;;  %v7935_v15 = vld [vmem:[%s11869_s1 + $0xa8] ss:$40 sps:$4 sm:$0xff]   ;;  %v7943_v17 = vld [vmem:[%s11869_s1 + $0xfc] ss:$40 sps:$4 sm:$0xff]  }
  0x1c   :  { %4700 = vmatpush1.bf16.msra.mxu0 %v7859_v27  ;;  %4658 = vmatprep.subr.bf16.mxu1 %v7860_v28  ;;  %v7940_v16 = vld [vmem:[%s11869_s1 + $0xaf4] ss:$40 sps:$4 sm:$0xff]   ;;  %v7938_v18 = vld [vmem:[%s11869_s1 + $0xaf0] ss:$40 sps:$4 sm:$0xff]   ;;  %v7946_v20 = vld [vmem:[%s11869_s1 + $0xb44] ss:$40 sps:$4 sm:$0xff]  }
  0x1d   :  { %4701 = vmatprep.subr.bf16.mxu0 %v7862_v29  ;;  %v7941_v19 = vld [vmem:[%s11869_s1 + $0xf8] ss:$40 sps:$4 sm:$0xff]   ;;  %v7949_v21 = vld [vmem:[%s11869_s1 + $0x14c] ss:$40 sps:$4 sm:$0xff]   ;;  %v7947_v23 = vld [vmem:[%s11869_s1 + $0x148] ss:$40 sps:$4 sm:$0xff]  }
  0x1e   :  { %v7944_v22 = vld [vmem:[%s11869_s1 + $0xb40] ss:$40 sps:$4 sm:$0xff]   ;;  %v7952_v24 = vld [vmem:[%s11869_s1 + $0xb94] ss:$40 sps:$4 sm:$0xff]   ;;  %v7950_v26 = vld [vmem:[%s11869_s1 + $0xb90] ss:$40 sps:$4 sm:$0xff]  }
  0x1f   :  { %4659 = vmatpush1.bf16.msra.mxu1 %v7864_v30  ;;  %v7955_v25 = vld [vmem:[%s11869_s1 + $0x19c] ss:$40 sps:$4 sm:$0xff]   ;;  %v7953_v27 = vld [vmem:[%s11869_s1 + $0x198] ss:$40 sps:$4 sm:$0xff]   ;;  %v7961_v29 = vld [vmem:[%s11869_s1 + $0x1ec] ss:$40 sps:$4 sm:$0xff]  }
  0x20   :  { %4702 = vmatpush1.bf16.msra.mxu0 %v7865_v31  ;;  %4660 = vmatprep.subr.bf16.mxu1 %v7866_v32  ;;  %v7958_v28 = vld [vmem:[%s11869_s1 + $0xbe4] ss:$40 sps:$4 sm:$0xff]   ;;  %v7956_v30 = vld [vmem:[%s11869_s1 + $0xbe0] ss:$40 sps:$4 sm:$0xff]   ;;  %v7964_v32 = vld [vmem:[%s11869_s1 + $0xc34] ss:$40 sps:$4 sm:$0xff]  }
  0x21   :  { %4703 = vmatprep.subr.bf16.mxu0 %v7868_v33  ;;  %v7959_v31 = vld [vmem:[%s11869_s1 + $0x1e8] ss:$40 sps:$4 sm:$0xff]   ;;  %v9415_v33 = vld [vmem:[%s11870_s0 + $0x14] ss:$40 sps:$4 sm:$0xff]  }
  0x23   :  { %4661 = vmatpush1.bf16.msra.mxu1 %v7870_v34  ;;  %v7967_v34 = vld [vmem:[%s11869_s1 + $0x23c] ss:$40 sps:$4 sm:$0xff]  }
  0x24   :  { %4704 = vmatpush1.bf16.msra.mxu0 %v7871_v35  ;;  %4662 = vmatprep.subr.bf16.mxu1 %v7872_v36  ;;  %v7962_v35 = vld [vmem:[%s11869_s1 + $0xc30] ss:$40 sps:$4 sm:$0xff]  }
  0x25   :  { %4705 = vmatprep.subr.bf16.mxu0 %v7874_v37  ;;  %v7965_v36 = vld [vmem:[%s11869_s1 + $0x238] ss:$40 sps:$4 sm:$0xff]   ;;  %v7970_v37 = vld [vmem:[%s11869_s1 + $0xc84] ss:$40 sps:$4 sm:$0xff]  }
  0x27   :  { %4663 = vmatpush1.bf16.msra.mxu1 %v7876_v38  ;;  %v7973_v38 = vld [vmem:[%s11869_s1 + $0x28c] ss:$40 sps:$4 sm:$0xff]  }
  0x28   :  { %4706 = vmatpush1.bf16.msra.mxu0 %v7877_v39  ;;  %4664 = vmatprep.subr.bf16.mxu1 %v7878_v40  ;;  %v7968_v39 = vld [vmem:[%s11869_s1 + $0xc80] ss:$40 sps:$4 sm:$0xff]  }
  0x29   :  { %4707 = vmatprep.subr.bf16.mxu0 %v7880_v41  ;;  %v7971_v40 = vld [vmem:[%s11869_s1 + $0x288] ss:$40 sps:$4 sm:$0xff]   ;;  %v7976_v41 = vld [vmem:[%s11869_s1 + $0xcd4] ss:$40 sps:$4 sm:$0xff]  }
  0x2b   :  { %4665 = vmatpush1.bf16.msra.mxu1 %v7882_v42  ;;  %v7979_v42 = vld [vmem:[%s11869_s1 + $0x2dc] ss:$40 sps:$4 sm:$0xff]  }
  0x2c   :  { %4708 = vmatpush1.bf16.msra.mxu0 %v7883_v43  ;;  %4666 = vmatprep.subr.bf16.mxu1 %v7884_v44  ;;  %v7974_v43 = vld [vmem:[%s11869_s1 + $0xcd0] ss:$40 sps:$4 sm:$0xff]  }
  0x2d   :  { %4709 = vmatprep.subr.bf16.mxu0 %v7886_v45  ;;  %v7977_v44 = vld [vmem:[%s11869_s1 + $0x2d8] ss:$40 sps:$4 sm:$0xff]   ;;  %v7982_v45 = vld [vmem:[%s11869_s1 + $0xd24] ss:$40 sps:$4 sm:$0xff]  }
  0x2f   :  { %4667 = vmatpush1.bf16.msra.mxu1 %v7888_v46  ;;  %v7985_v46 = vld [vmem:[%s11869_s1 + $0x32c] ss:$40 sps:$4 sm:$0xff]  }
  0x30   :  { %4710 = vmatpush1.bf16.msra.mxu0 %v7889_v47  ;;  %4668 = vmatprep.subr.bf16.mxu1 %v7890_v50  ;;  %v7980_v47 = vld [vmem:[%s11869_s1 + $0xd20] ss:$40 sps:$4 sm:$0xff]   ;;  %v7988_v50 = vld [vmem:[%s11869_s1 + $0xd74] ss:$40 sps:$4 sm:$0xff]  }
  0x31   :  { %4711 = vmatprep.subr.bf16.mxu0 %v7892_v51  ;;  %v7991_v51 = vld [vmem:[%s11869_s1 + $0x37c] ss:$40 sps:$4 sm:$0xff]  }
  0x33   :  { %4669 = vmatpush1.bf16.msra.mxu1 %v7894_v52  ;;  %v7986_v52 = vld [vmem:[%s11869_s1 + $0xd70] ss:$40 sps:$4 sm:$0xff]  }
  0x34   :  { %4712 = vmatpush1.bf16.msra.mxu0 %v7895_v53  ;;  %4670 = vmatprep.subr.bf16.mxu1 %v7896_v54  ;;  %v7989_v53 = vld [vmem:[%s11869_s1 + $0x378] ss:$40 sps:$4 sm:$0xff]   ;;  %v7994_v54 = vld [vmem:[%s11869_s1 + $0xdc4] ss:$40 sps:$4 sm:$0xff]  }
  0x35   :  { %4713 = vmatprep.subr.bf16.mxu0 %v7898_v55  ;;  %v7997_v55 = vld [vmem:[%s11869_s1 + $0x3cc] ss:$40 sps:$4 sm:$0xff]  }
  0x37   :  { %4671 = vmatpush1.bf16.msra.mxu1 %v7900_v56  ;;  %v7992_v56 = vld [vmem:[%s11869_s1 + $0xdc0] ss:$40 sps:$4 sm:$0xff]  }
  0x38   :  { %4714 = vmatpush1.bf16.msra.mxu0 %v7901_v57  ;;  %4672 = vmatprep.subr.bf16.mxu1 %v7902_v58  ;;  %v7995_v57 = vld [vmem:[%s11869_s1 + $0x3c8] ss:$40 sps:$4 sm:$0xff]   ;;  %v8000_v58 = vld [vmem:[%s11869_s1 + $0xe14] ss:$40 sps:$4 sm:$0xff]  }
  0x39   :  { %4715 = vmatprep.subr.bf16.mxu0 %v7904_v59  ;;  %v8003_v59 = vld [vmem:[%s11869_s1 + $0x41c] ss:$40 sps:$4 sm:$0xff]  }
  0x3b   :  { %4673 = vmatpush1.bf16.msra.mxu1 %v7906_v60  ;;  %v7998_v60 = vld [vmem:[%s11869_s1 + $0xe10] ss:$40 sps:$4 sm:$0xff]  }
  0x3c   :  { %4716 = vmatpush1.bf16.msra.mxu0 %v7907_v61  ;;  %4674 = vmatprep.subr.bf16.mxu1 %v7908_v62  ;;  %v8001_v61 = vld [vmem:[%s11869_s1 + $0x418] ss:$40 sps:$4 sm:$0xff]   ;;  %v8006_v62 = vld [vmem:[%s11869_s1 + $0xe64] ss:$40 sps:$4 sm:$0xff]  }
  0x3d   :  { %4717 = vmatprep.subr.bf16.mxu0 %v7910_v63  ;;  %v8009_v63 = vld [vmem:[%s11869_s1 + $0x46c] ss:$40 sps:$4 sm:$0xff]  }
  0x3f   :  { %4675 = vmatpush1.bf16.msra.mxu1 %v7912_v0  ;;  %v8004_v0 = vld [vmem:[%s11869_s1 + $0xe60] ss:$40 sps:$4 sm:$0xff]  }
  0x40   :  { %4718 = vmatpush1.bf16.msra.mxu0 %v7913_v1  ;;  %4859 = vmatprep.subr.bf16.mxu1 %v7923_v3  ;;  %v8007_v1 = vld [vmem:[%s11869_s1 + $0x468] ss:$40 sps:$4 sm:$0xff]   ;;  %v8015_v3 = vld [vmem:[%s11869_s1 + $0x4bc] ss:$40 sps:$4 sm:$0xff]  }
  0x41   :  { %4730 = vmatprep.subr.bf16.mxu0 %v7920_v2  ;;  %v8012_v2 = vld [vmem:[%s11869_s1 + $0xeb4] ss:$40 sps:$4 sm:$0xff]  }
  0x42   :  { %4677 = vmatmul.mubr.bf16.vlgmr.msra.gmra.mrb[0].mxu1 %v9328_v6 }
  0x43   :  { %4720 = vmatmul.mubr.bf16.vlgmr.msra.gmra.mrb[0].mxu0 %v9333_v7  ;;  %4860 = vmatpush1.bf16.msra.mxu1 %v7921_v5  ;;  %v8013_v5 = vld [vmem:[%s11869_s1 + $0x4b8] ss:$40 sps:$4 sm:$0xff]  }
  0x44   :  { %4731 = vmatpush1.bf16.msra.mxu0 %v7918_v4  ;;  %4861 = vmatprep.subr.bf16.mxu1 %v7931_v9  ;;  %v8010_v4 = vld [vmem:[%s11869_s1 + $0xeb0] ss:$40 sps:$4 sm:$0xff]   ;;  %v8023_v9 = vld [vmem:[%s11869_s1 + $0x50c] ss:$40 sps:$4 sm:$0xff]  }
  0x45   :  { %4732 = vmatprep.subr.bf16.mxu0 %v7928_v8  ;;  %4891 = vmatprep.mubr.bf16.mxu1 %v7914_v48  ;;  %v7983_v48 = vld [vmem:[%s11869_s1 + $0x328] ss:$40 sps:$4 sm:$0xff]   ;;  %v8020_v8 = vld [vmem:[%s11869_s1 + $0xf04] ss:$40 sps:$4 sm:$0xff]  }
  0x46   :  { %4762 = vmatprep.mubr.bf16.mxu0 %v9415_v33 }
  0x47   :  { %4862 = vmatpush1.bf16.msra.mxu1 %v7929_v11  ;;  %v8021_v11 = vld [vmem:[%s11869_s1 + $0x508] ss:$40 sps:$4 sm:$0xff]  }
  0x48   :  { %4733 = vmatpush1.bf16.msra.mxu0 %v7926_v10  ;;  %4863 = vmatprep.subr.bf16.mxu1 %v7937_v13  ;;  %v8018_v10 = vld [vmem:[%s11869_s1 + $0xf00] ss:$40 sps:$4 sm:$0xff]   ;;  %v8027_v13 = vld [vmem:[%s11869_s1 + $0xf54] ss:$40 sps:$4 sm:$0xff]  }
  0x49   :  { %4734 = vmatprep.subr.bf16.mxu0 %v7934_v12  ;;  %v9538_v12 = vld [vmem:[%s11870_s0 + $0x10] ss:$40 sps:$4 sm:$0xff]  }
  0x4b   :  { %4864 = vmatpush1.bf16.msra.mxu1 %v7935_v15  ;;  %v8025_v15 = vld [vmem:[%s11869_s1 + $0xf50] ss:$40 sps:$4 sm:$0xff]  }
  0x4c   :  { %4735 = vmatpush1.bf16.msra.mxu0 %v7932_v14  ;;  %4865 = vmatprep.subr.bf16.mxu1 %v7943_v17  ;;  %v8030_v14 = vld [vmem:[%s11869_s1 + $0x55c] ss:$40 sps:$4 sm:$0xff]  }
  0x4d   :  { %4736 = vmatprep.subr.bf16.mxu0 %v7940_v16  ;;  %v8028_v16 = vld [vmem:[%s11869_s1 + $0x558] ss:$40 sps:$4 sm:$0xff]   ;;  %v8033_v17 = vld [vmem:[%s11869_s1 + $0xfa4] ss:$40 sps:$4 sm:$0xff]  }
  0x4f   :  { %4866 = vmatpush1.bf16.msra.mxu1 %v7941_v19  ;;  %v8031_v19 = vld [vmem:[%s11869_s1 + $0xfa0] ss:$40 sps:$4 sm:$0xff]  }
  0x50   :  { %4737 = vmatpush1.bf16.msra.mxu0 %v7938_v18  ;;  %4867 = vmatprep.subr.bf16.mxu1 %v7949_v21  ;;  %v9560_v18 = vld [vmem:[%s11870_s0 + $0x1c] ss:$40 sps:$4 sm:$0xff]  }
  0x51   :  { %4738 = vmatprep.subr.bf16.mxu0 %v7946_v20  ;;  %v8034_v20 = vld [vmem:[%s11869_s1 + $0x5a8] ss:$40 sps:$4 sm:$0xff]   ;;  %v8039_v21 = vld [vmem:[%s11869_s1 + $0xff4] ss:$40 sps:$4 sm:$0xff]  }
  0x53   :  { %4868 = vmatpush1.bf16.msra.mxu1 %v7947_v23  ;;  %v8040_v23 = vld [vmem:[%s11869_s1 + $0x5f8] ss:$40 sps:$4 sm:$0xff]  }
  0x54   :  { %4739 = vmatpush1.bf16.msra.mxu0 %v7944_v22  ;;  %4869 = vmatprep.subr.bf16.mxu1 %v7955_v25  ;;  %v8037_v22 = vld [vmem:[%s11869_s1 + $0xff0] ss:$40 sps:$4 sm:$0xff]   ;;  %v8048_v25 = vld [vmem:[%s11869_s1 + $0x64c] ss:$40 sps:$4 sm:$0xff]  }
  0x55   :  { %4740 = vmatprep.subr.bf16.mxu0 %v7952_v24  ;;  %v8045_v24 = vld [vmem:[%s11869_s1 + $0x1044] ss:$40 sps:$4 sm:$0xff]  }
  0x57   :  { %4870 = vmatpush1.bf16.msra.mxu1 %v7953_v27  ;;  %v8046_v27 = vld [vmem:[%s11869_s1 + $0x648] ss:$40 sps:$4 sm:$0xff]  }
  0x58   :  { %4741 = vmatpush1.bf16.msra.mxu0 %v7950_v26  ;;  %4871 = vmatprep.subr.bf16.mxu1 %v7961_v29  ;;  %v8043_v26 = vld [vmem:[%s11869_s1 + $0x1040] ss:$40 sps:$4 sm:$0xff]   ;;  %v8054_v29 = vld [vmem:[%s11869_s1 + $0x69c] ss:$40 sps:$4 sm:$0xff]  }
  0x59   :  { %4742 = vmatprep.subr.bf16.mxu0 %v7958_v28  ;;  %v8051_v28 = vld [vmem:[%s11869_s1 + $0x1094] ss:$40 sps:$4 sm:$0xff]  }
  0x5b   :  { %4872 = vmatpush1.bf16.msra.mxu1 %v7959_v31  ;;  %v8052_v31 = vld [vmem:[%s11869_s1 + $0x698] ss:$40 sps:$4 sm:$0xff]  }
  0x5c   :  { %4743 = vmatpush1.bf16.msra.mxu0 %v7956_v30  ;;  %4873 = vmatprep.subr.bf16.mxu1 %v7967_v34  ;;  %v8049_v30 = vld [vmem:[%s11869_s1 + $0x1090] ss:$40 sps:$4 sm:$0xff]   ;;  %v8060_v34 = vld [vmem:[%s11869_s1 + $0x6ec] ss:$40 sps:$4 sm:$0xff]  }
  0x5d   :  { %4744 = vmatprep.subr.bf16.mxu0 %v7964_v32  ;;  %v8057_v32 = vld [vmem:[%s11869_s1 + $0x10e4] ss:$40 sps:$4 sm:$0xff]  }
  0x5f   :  { %4874 = vmatpush1.bf16.msra.mxu1 %v7965_v36  ;;  %v8058_v36 = vld [vmem:[%s11869_s1 + $0x6e8] ss:$40 sps:$4 sm:$0xff]  }
  0x60   :  { %4745 = vmatpush1.bf16.msra.mxu0 %v7962_v35  ;;  %4875 = vmatprep.subr.bf16.mxu1 %v7973_v38  ;;  %v8055_v35 = vld [vmem:[%s11869_s1 + $0x10e0] ss:$40 sps:$4 sm:$0xff]   ;;  %v8066_v38 = vld [vmem:[%s11869_s1 + $0x73c] ss:$40 sps:$4 sm:$0xff]  }
  0x61   :  { %4746 = vmatprep.subr.bf16.mxu0 %v7970_v37  ;;  %v8063_v37 = vld [vmem:[%s11869_s1 + $0x1134] ss:$40 sps:$4 sm:$0xff]  }
  0x63   :  { %4876 = vmatpush1.bf16.msra.mxu1 %v7971_v40  ;;  %v8064_v40 = vld [vmem:[%s11869_s1 + $0x738] ss:$40 sps:$4 sm:$0xff]  }
  0x64   :  { %4747 = vmatpush1.bf16.msra.mxu0 %v7968_v39  ;;  %4877 = vmatprep.subr.bf16.mxu1 %v7979_v42  ;;  %v8061_v39 = vld [vmem:[%s11869_s1 + $0x1130] ss:$40 sps:$4 sm:$0xff]   ;;  %v8072_v42 = vld [vmem:[%s11869_s1 + $0x78c] ss:$40 sps:$4 sm:$0xff]  }
  0x65   :  { %4748 = vmatprep.subr.bf16.mxu0 %v7976_v41  ;;  %v8069_v41 = vld [vmem:[%s11869_s1 + $0x1184] ss:$40 sps:$4 sm:$0xff]  }
  0x67   :  { %4878 = vmatpush1.bf16.msra.mxu1 %v7977_v44  ;;  %v8070_v44 = vld [vmem:[%s11869_s1 + $0x788] ss:$40 sps:$4 sm:$0xff]  }
  0x68   :  { %4749 = vmatpush1.bf16.msra.mxu0 %v7974_v43  ;;  %4879 = vmatprep.subr.bf16.mxu1 %v7985_v46  ;;  %v8067_v43 = vld [vmem:[%s11869_s1 + $0x1180] ss:$40 sps:$4 sm:$0xff]   ;;  %v8078_v46 = vld [vmem:[%s11869_s1 + $0x7dc] ss:$40 sps:$4 sm:$0xff]  }
  0x69   :  { %4750 = vmatprep.subr.bf16.mxu0 %v7982_v45  ;;  %v8075_v45 = vld [vmem:[%s11869_s1 + $0x11d4] ss:$40 sps:$4 sm:$0xff]  }
  0x6b   :  { %4880 = vmatpush1.bf16.msra.mxu1 %v7983_v48  ;;  %v8076_v48 = vld [vmem:[%s11869_s1 + $0x7d8] ss:$40 sps:$4 sm:$0xff]  }
  0x6c   :  { %4751 = vmatpush1.bf16.msra.mxu0 %v7980_v47  ;;  %4881 = vmatprep.subr.bf16.mxu1 %v7991_v51  ;;  %v8073_v47 = vld [vmem:[%s11869_s1 + $0x11d0] ss:$40 sps:$4 sm:$0xff]   ;;  %v8084_v51 = vld [vmem:[%s11869_s1 + $0x82c] ss:$40 sps:$4 sm:$0xff]  }
  0x6d   :  { %4752 = vmatprep.subr.bf16.mxu0 %v7988_v50  ;;  %v8081_v50 = vld [vmem:[%s11869_s1 + $0x1224] ss:$40 sps:$4 sm:$0xff]  }
  0x6f   :  { %4882 = vmatpush1.bf16.msra.mxu1 %v7989_v53  ;;  %v8082_v53 = vld [vmem:[%s11869_s1 + $0x828] ss:$40 sps:$4 sm:$0xff]  }
  0x70   :  { %4753 = vmatpush1.bf16.msra.mxu0 %v7986_v52  ;;  %4883 = vmatprep.subr.bf16.mxu1 %v7997_v55  ;;  %v8079_v52 = vld [vmem:[%s11869_s1 + $0x1220] ss:$40 sps:$4 sm:$0xff]   ;;  %v8090_v55 = vld [vmem:[%s11869_s1 + $0x87c] ss:$40 sps:$4 sm:$0xff]  }
  0x71   :  { %4754 = vmatprep.subr.bf16.mxu0 %v7994_v54  ;;  %v8087_v54 = vld [vmem:[%s11869_s1 + $0x1274] ss:$40 sps:$4 sm:$0xff]  }
  0x73   :  { %4884 = vmatpush1.bf16.msra.mxu1 %v7995_v57  ;;  %v8088_v57 = vld [vmem:[%s11869_s1 + $0x878] ss:$40 sps:$4 sm:$0xff]  }
  0x74   :  { %4755 = vmatpush1.bf16.msra.mxu0 %v7992_v56  ;;  %4885 = vmatprep.subr.bf16.mxu1 %v8003_v59  ;;  %v8085_v56 = vld [vmem:[%s11869_s1 + $0x1270] ss:$40 sps:$4 sm:$0xff]   ;;  %v8096_v59 = vld [vmem:[%s11869_s1 + $0x8cc] ss:$40 sps:$4 sm:$0xff]  }
  0x75   :  { %4756 = vmatprep.subr.bf16.mxu0 %v8000_v58  ;;  %v8093_v58 = vld [vmem:[%s11869_s1 + $0x12c4] ss:$40 sps:$4 sm:$0xff]  }
  0x77   :  { %4886 = vmatpush1.bf16.msra.mxu1 %v8001_v61  ;;  %v8094_v61 = vld [vmem:[%s11869_s1 + $0x8c8] ss:$40 sps:$4 sm:$0xff]  }
  0x78   :  { %4757 = vmatpush1.bf16.msra.mxu0 %v7998_v60  ;;  %4887 = vmatprep.subr.bf16.mxu1 %v8009_v63  ;;  %v8091_v60 = vld [vmem:[%s11869_s1 + $0x12c0] ss:$40 sps:$4 sm:$0xff]   ;;  %v8102_v63 = vld [vmem:[%s11869_s1 + $0x91c] ss:$40 sps:$4 sm:$0xff]  }
  0x79   :  { %4758 = vmatprep.subr.bf16.mxu0 %v8006_v62  ;;  %v8099_v62 = vld [vmem:[%s11869_s1 + $0x1314] ss:$40 sps:$4 sm:$0xff]  }
  0x7b   :  { %4888 = vmatpush1.bf16.msra.mxu1 %v8007_v1  ;;  %v8100_v1 = vld [vmem:[%s11869_s1 + $0x918] ss:$40 sps:$4 sm:$0xff]  }
  0x7c   :  { %4759 = vmatpush1.bf16.msra.mxu0 %v8004_v0  ;;  %4889 = vmatprep.subr.bf16.mxu1 %v8015_v3  ;;  %v8097_v0 = vld [vmem:[%s11869_s1 + $0x1310] ss:$40 sps:$4 sm:$0xff]   ;;  %v8108_v3 = vld [vmem:[%s11869_s1 + $0x96c] ss:$40 sps:$4 sm:$0xff]  }
  0x7d   :  { %4760 = vmatprep.subr.bf16.mxu0 %v8012_v2  ;;  %v8105_v2 = vld [vmem:[%s11869_s1 + $0x1364] ss:$40 sps:$4 sm:$0xff]  }
  0x7f   :  { %4890 = vmatpush1.bf16.msra.mxu1 %v8013_v5  ;;  %v8106_v5 = vld [vmem:[%s11869_s1 + $0x968] ss:$40 sps:$4 sm:$0xff]  }
  0x80   :  { %4761 = vmatpush1.bf16.msra.mxu0 %v8010_v4  ;;  %4902 = vmatprep.subr.bf16.mxu1 %v8023_v9  ;;  %v8103_v4 = vld [vmem:[%s11869_s1 + $0x1360] ss:$40 sps:$4 sm:$0xff]   ;;  %v8114_v9 = vld [vmem:[%s11869_s1 + $0x9bc] ss:$40 sps:$4 sm:$0xff]  }
  0x81   :  { %4773 = vmatprep.subr.bf16.mxu0 %v8020_v8  ;;  %v8111_v8 = vld [vmem:[%s11869_s1 + $0x13b4] ss:$40 sps:$4 sm:$0xff]  }
  0x82   :  { %4892 = vmatmul.mubr.bf16.vlgmr.msra.gmra.mrb[4].mxu1 %v9328_v6  ;;  %v8036_v6 = vld [vmem:[%s11869_s1 + $0x5ac] ss:$40 sps:$4 sm:$0xff]  }
  0x83   :  { %4763 = vmatmul.mubr.bf16.vlgmr.msra.gmra.mrb[0].mxu0 %v9538_v12  ;;  %4903 = vmatpush1.bf16.msra.mxu1 %v8021_v11  ;;  %v8112_v11 = vld [vmem:[%s11869_s1 + $0x9b8] ss:$40 sps:$4 sm:$0xff]  }
  0x84   :  { %4774 = vmatpush1.bf16.msra.mxu0 %v8018_v10  ;;  %4904 = vmatprep.subr.bf16.mxu1 %v8030_v14  ;;  %v8109_v10 = vld [vmem:[%s11869_s1 + $0x13b0] ss:$40 sps:$4 sm:$0xff]   ;;  %v8122_v14 = vld [vmem:[%s11869_s1 + $0xa0c] ss:$40 sps:$4 sm:$0xff]  }
  0x85   :  { %4775 = vmatprep.subr.bf16.mxu0 %v8027_v13  ;;  %4805 = vmatprep.mubr.bf16.mxu0 %v9560_v18  ;;  %v8119_v13 = vld [vmem:[%s11869_s1 + $0x1404] ss:$40 sps:$4 sm:$0xff]  }
  0x86   :  { %4934 = vmatprep.mubr.bf16.mxu1 %v9262_v49  ;;  %v8042_v49 = vld [vmem:[%s11869_s1 + $0x5fc] ss:$40 sps:$4 sm:$0xff]  }
  0x87   :  { %4905 = vmatpush1.bf16.msra.mxu1 %v8028_v16  ;;  %v8120_v16 = vld [vmem:[%s11869_s1 + $0xa08] ss:$40 sps:$4 sm:$0xff]  }
  0x88   :  { %4776 = vmatpush1.bf16.msra.mxu0 %v8025_v15  ;;  %4906 = vmatprep.subr.bf16.mxu1 %v8036_v6  ;;  %v8117_v15 = vld [vmem:[%s11869_s1 + $0x1400] ss:$40 sps:$4 sm:$0xff]   ;;  %v8126_v6 = vld [vmem:[%s11869_s1 + $0x1454] ss:$40 sps:$4 sm:$0xff]  }
  0x89   :  { %4777 = vmatprep.subr.bf16.mxu0 %v8033_v17  ;;  %v9744_v17 = vld [vmem:[%s11870_s0 + $0x18] ss:$40 sps:$4 sm:$0xff]  }
  0x8b   :  { %4907 = vmatpush1.bf16.msra.mxu1 %v8034_v20  ;;  %v9755_v20 = vld [vmem:[%s11870_s0 + $0x24] ss:$40 sps:$4 sm:$0xff]  }
  0x8c   :  { %4778 = vmatpush1.bf16.msra.mxu0 %v8031_v19  ;;  %4908 = vmatprep.subr.bf16.mxu1 %v8042_v49  ;;  %v8129_v19 = vld [vmem:[%s11869_s1 + $0xa5c] ss:$40 sps:$4 sm:$0xff]   ;;  %v8127_v49 = vld [vmem:[%s11869_s1 + $0xa58] ss:$40 sps:$4 sm:$0xff]  }
  0x8d   :  { %4779 = vmatprep.subr.bf16.mxu0 %v8039_v21  ;;  %v8124_v21 = vld [vmem:[%s11869_s1 + $0x1450] ss:$40 sps:$4 sm:$0xff]  }
  0x8f   :  { %4909 = vmatpush1.bf16.msra.mxu1 %v8040_v23  ;;  %v8130_v23 = vld [vmem:[%s11869_s1 + $0x14a0] ss:$40 sps:$4 sm:$0xff]  }
  0x90   :  { %4780 = vmatpush1.bf16.msra.mxu0 %v8037_v22  ;;  %4910 = vmatprep.subr.bf16.mxu1 %v8048_v25  ;;  %v8132_v22 = vld [vmem:[%s11869_s1 + $0x14a4] ss:$40 sps:$4 sm:$0xff]   ;;  %v8138_v25 = vld [vmem:[%s11869_s1 + $0x14f4] ss:$40 sps:$4 sm:$0xff]  }
  0x91   :  { %4781 = vmatprep.subr.bf16.mxu0 %v8045_v24  ;;  %v8133_v24 = vld [vmem:[%s11869_s1 + $0xaa8] ss:$40 sps:$4 sm:$0xff]  }
  0x93   :  { %4911 = vmatpush1.bf16.msra.mxu1 %v8046_v27  ;;  %v8139_v27 = vld [vmem:[%s11869_s1 + $0xaf8] ss:$40 sps:$4 sm:$0xff]  }
  0x94   :  { %4782 = vmatpush1.bf16.msra.mxu0 %v8043_v26  ;;  %4912 = vmatprep.subr.bf16.mxu1 %v8054_v29  ;;  %v8136_v26 = vld [vmem:[%s11869_s1 + $0x14f0] ss:$40 sps:$4 sm:$0xff]   ;;  %v8147_v29 = vld [vmem:[%s11869_s1 + $0xb4c] ss:$40 sps:$4 sm:$0xff]  }
  0x95   :  { %4783 = vmatprep.subr.bf16.mxu0 %v8051_v28  ;;  %v8144_v28 = vld [vmem:[%s11869_s1 + $0x1544] ss:$40 sps:$4 sm:$0xff]  }
  0x97   :  { %4913 = vmatpush1.bf16.msra.mxu1 %v8052_v31  ;;  %v8145_v31 = vld [vmem:[%s11869_s1 + $0xb48] ss:$40 sps:$4 sm:$0xff]  }
  0x98   :  { %4784 = vmatpush1.bf16.msra.mxu0 %v8049_v30  ;;  %4914 = vmatprep.subr.bf16.mxu1 %v8060_v34  ;;  %v8142_v30 = vld [vmem:[%s11869_s1 + $0x1540] ss:$40 sps:$4 sm:$0xff]   ;;  %v8153_v34 = vld [vmem:[%s11869_s1 + $0xb9c] ss:$40 sps:$4 sm:$0xff]  }
  0x99   :  { %4785 = vmatprep.subr.bf16.mxu0 %v8057_v32  ;;  %v8150_v32 = vld [vmem:[%s11869_s1 + $0x1594] ss:$40 sps:$4 sm:$0xff]  }
  0x9b   :  { %4915 = vmatpush1.bf16.msra.mxu1 %v8058_v36  ;;  %v8151_v36 = vld [vmem:[%s11869_s1 + $0xb98] ss:$40 sps:$4 sm:$0xff]  }
  0x9c   :  { %4786 = vmatpush1.bf16.msra.mxu0 %v8055_v35  ;;  %4916 = vmatprep.subr.bf16.mxu1 %v8066_v38  ;;  %v8148_v35 = vld [vmem:[%s11869_s1 + $0x1590] ss:$40 sps:$4 sm:$0xff]   ;;  %v8159_v38 = vld [vmem:[%s11869_s1 + $0xbec] ss:$40 sps:$4 sm:$0xff]  }
  0x9d   :  { %4787 = vmatprep.subr.bf16.mxu0 %v8063_v37  ;;  %v8156_v37 = vld [vmem:[%s11869_s1 + $0x15e4] ss:$40 sps:$4 sm:$0xff]  }
  0x9f   :  { %4917 = vmatpush1.bf16.msra.mxu1 %v8064_v40  ;;  %v8157_v40 = vld [vmem:[%s11869_s1 + $0xbe8] ss:$40 sps:$4 sm:$0xff]  }
  0xa0   :  { %4788 = vmatpush1.bf16.msra.mxu0 %v8061_v39  ;;  %4918 = vmatprep.subr.bf16.mxu1 %v8072_v42  ;;  %v8154_v39 = vld [vmem:[%s11869_s1 + $0x15e0] ss:$40 sps:$4 sm:$0xff]   ;;  %v8165_v42 = vld [vmem:[%s11869_s1 + $0xc3c] ss:$40 sps:$4 sm:$0xff]  }
  0xa1   :  { %4789 = vmatprep.subr.bf16.mxu0 %v8069_v41  ;;  %v8162_v41 = vld [vmem:[%s11869_s1 + $0x1634] ss:$40 sps:$4 sm:$0xff]  }
  0xa3   :  { %4919 = vmatpush1.bf16.msra.mxu1 %v8070_v44  ;;  %v8163_v44 = vld [vmem:[%s11869_s1 + $0xc38] ss:$40 sps:$4 sm:$0xff]  }
  0xa4   :  { %4790 = vmatpush1.bf16.msra.mxu0 %v8067_v43  ;;  %4920 = vmatprep.subr.bf16.mxu1 %v8078_v46  ;;  %v8160_v43 = vld [vmem:[%s11869_s1 + $0x1630] ss:$40 sps:$4 sm:$0xff]   ;;  %v8171_v46 = vld [vmem:[%s11869_s1 + $0xc8c] ss:$40 sps:$4 sm:$0xff]  }
  0xa5   :  { %4791 = vmatprep.subr.bf16.mxu0 %v8075_v45  ;;  %v8168_v45 = vld [vmem:[%s11869_s1 + $0x1684] ss:$40 sps:$4 sm:$0xff]  }
  0xa7   :  { %4921 = vmatpush1.bf16.msra.mxu1 %v8076_v48  ;;  %v8169_v48 = vld [vmem:[%s11869_s1 + $0xc88] ss:$40 sps:$4 sm:$0xff]  }
  0xa8   :  { %4792 = vmatpush1.bf16.msra.mxu0 %v8073_v47  ;;  %4922 = vmatprep.subr.bf16.mxu1 %v8084_v51  ;;  %v8166_v47 = vld [vmem:[%s11869_s1 + $0x1680] ss:$40 sps:$4 sm:$0xff]   ;;  %v8177_v51 = vld [vmem:[%s11869_s1 + $0xcdc] ss:$40 sps:$4 sm:$0xff]  }
  0xa9   :  { %4793 = vmatprep.subr.bf16.mxu0 %v8081_v50  ;;  %v8174_v50 = vld [vmem:[%s11869_s1 + $0x16d4] ss:$40 sps:$4 sm:$0xff]  }
  0xab   :  { %4923 = vmatpush1.bf16.msra.mxu1 %v8082_v53  ;;  %v8175_v53 = vld [vmem:[%s11869_s1 + $0xcd8] ss:$40 sps:$4 sm:$0xff]  }
  0xac   :  { %4794 = vmatpush1.bf16.msra.mxu0 %v8079_v52  ;;  %4924 = vmatprep.subr.bf16.mxu1 %v8090_v55  ;;  %v8172_v52 = vld [vmem:[%s11869_s1 + $0x16d0] ss:$40 sps:$4 sm:$0xff]   ;;  %v8183_v55 = vld [vmem:[%s11869_s1 + $0xd2c] ss:$40 sps:$4 sm:$0xff]  }
  0xad   :  { %4795 = vmatprep.subr.bf16.mxu0 %v8087_v54  ;;  %v8180_v54 = vld [vmem:[%s11869_s1 + $0x1724] ss:$40 sps:$4 sm:$0xff]  }
  0xaf   :  { %4925 = vmatpush1.bf16.msra.mxu1 %v8088_v57  ;;  %v8181_v57 = vld [vmem:[%s11869_s1 + $0xd28] ss:$40 sps:$4 sm:$0xff]  }
  0xb0   :  { %4796 = vmatpush1.bf16.msra.mxu0 %v8085_v56  ;;  %4926 = vmatprep.subr.bf16.mxu1 %v8096_v59  ;;  %v8178_v56 = vld [vmem:[%s11869_s1 + $0x1720] ss:$40 sps:$4 sm:$0xff]   ;;  %v8192_v59 = vld [vmem:[%s11869_s1 + $0x14] ss:$40 sps:$4 sm:$0xff]  }
  0xb1   :  { %4797 = vmatprep.subr.bf16.mxu0 %v8093_v58  ;;  %v8189_v58 = vld [vmem:[%s11869_s1 + $0xd7c] ss:$40 sps:$4 sm:$0xff]  }
  0xb3   :  { %4927 = vmatpush1.bf16.msra.mxu1 %v8094_v61  ;;  %v8187_v61 = vld [vmem:[%s11869_s1 + $0xd78] ss:$40 sps:$4 sm:$0xff]  }
  0xb4   :  { %4798 = vmatpush1.bf16.msra.mxu0 %v8091_v60  ;;  %4928 = vmatprep.subr.bf16.mxu1 %v8102_v63  ;;  %v8186_v60 = vld [vmem:[%s11870_s0 + $0x20] ss:$40 sps:$4 sm:$0xff]   ;;  %v8195_v63 = vld [vmem:[%s11869_s1 + $0xdcc] ss:$40 sps:$4 sm:$0xff]  }
  0xb5   :  { %4799 = vmatprep.subr.bf16.mxu0 %v8099_v62  ;;  %v8190_v62 = vld [vmem:[%s11869_s1 + $0x10] ss:$40 sps:$4 sm:$0xff]  }
  0xb7   :  { %4929 = vmatpush1.bf16.msra.mxu1 %v8100_v1  ;;  %v8193_v1 = vld [vmem:[%s11869_s1 + $0xdc8] ss:$40 sps:$4 sm:$0xff]  }
  0xb8   :  { %4800 = vmatpush1.bf16.msra.mxu0 %v8097_v0  ;;  %4930 = vmatprep.subr.bf16.mxu1 %v8108_v3  ;;  %v8198_v0 = vld [vmem:[%s11869_s1 + $0x64] ss:$40 sps:$4 sm:$0xff]  }
  0xb9   :  { %4801 = vmatprep.subr.bf16.mxu0 %v8105_v2  ;;  %v8196_v2 = vld [vmem:[%s11869_s1 + $0x60] ss:$40 sps:$4 sm:$0xff]   ;;  %v8201_v3 = vld [vmem:[%s11869_s1 + $0xe1c] ss:$40 sps:$4 sm:$0xff]  }
  0xbb   :  { %4931 = vmatpush1.bf16.msra.mxu1 %v8106_v5  ;;  %v9912_v5 = vld [vmem:[%s11870_s0 + $0x4] ss:$40 sps:$4 sm:$0xff]  }
  0xbc   :  { %4802 = vmatpush1.bf16.msra.mxu0 %v8103_v4  ;;  %4932 = vmatprep.subr.bf16.mxu1 %v8114_v9  ;;  %v8204_v4 = vld [vmem:[%s11869_s1 + $0xb4] ss:$40 sps:$4 sm:$0xff]   ;;  %v8202_v9 = vld [vmem:[%s11869_s1 + $0xb0] ss:$40 sps:$4 sm:$0xff]  }
  0xbd   :  { %4803 = vmatprep.subr.bf16.mxu0 %v8111_v8  ;;  %v8199_v8 = vld [vmem:[%s11869_s1 + $0xe18] ss:$40 sps:$4 sm:$0xff]  }
  0xbf   :  { %4933 = vmatpush1.bf16.msra.mxu1 %v8112_v11  ;;  %v8210_v11 = vld [vmem:[%s11869_s1 + $0x104] ss:$40 sps:$4 sm:$0xff]  }
  0xc0   :  { %4804 = vmatpush1.bf16.msra.mxu0 %v8109_v10  ;;  %4945 = vmatprep.subr.bf16.mxu1 %v8122_v14  ;;  %v8207_v10 = vld [vmem:[%s11869_s1 + $0xe6c] ss:$40 sps:$4 sm:$0xff]   ;;  %v8208_v14 = vld [vmem:[%s11869_s1 + $0x100] ss:$40 sps:$4 sm:$0xff]  }
  0xc1   :  { %4816 = vmatprep.subr.bf16.mxu0 %v8119_v13  ;;  %v8205_v13 = vld [vmem:[%s11869_s1 + $0xe68] ss:$40 sps:$4 sm:$0xff]  }
  0xc2   :  { %4935 = vmatmul.mubr.bf16.vlgmr.msra.gmra.mrb[4].mxu1 %v9333_v7  ;;  %v8135_v7 = vld [vmem:[%s11869_s1 + $0xaac] ss:$40 sps:$4 sm:$0xff]  }
  0xc3   :  { %4806 = vmatmul.mubr.bf16.vlgmr.msra.gmra.mrb[0].mxu0 %v9744_v17  ;;  %4946 = vmatpush1.bf16.msra.mxu1 %v8120_v16  ;;  %v8216_v16 = vld [vmem:[%s11869_s1 + $0x154] ss:$40 sps:$4 sm:$0xff]  }
  0xc4   :  { %4817 = vmatpush1.bf16.msra.mxu0 %v8117_v15  ;;  %4947 = vmatprep.subr.bf16.mxu1 %v8129_v19  ;;  %v8213_v15 = vld [vmem:[%s11869_s1 + $0xebc] ss:$40 sps:$4 sm:$0xff]   ;;  %v8214_v19 = vld [vmem:[%s11869_s1 + $0x150] ss:$40 sps:$4 sm:$0xff]  }
  0xc5   :  { %4818 = vmatprep.subr.bf16.mxu0 %v8126_v6  ;;  %7482 = vmatprep.mubr.msk.bf16.mxu0 %vm4640_vm0, %v9755_v20  ;;  %v8211_v6 = vld [vmem:[%s11869_s1 + $0xeb8] ss:$40 sps:$4 sm:$0xff]  }
  0xc6   :  { %4977 = vmatprep.mubr.bf16.mxu1 %v9415_v33  ;;  %v8141_v33 = vld [vmem:[%s11869_s1 + $0xafc] ss:$40 sps:$4 sm:$0xff]  }
  0xc7   :  { %4948 = vmatpush1.bf16.msra.mxu1 %v8127_v49  ;;  %v8222_v49 = vld [vmem:[%s11869_s1 + $0x1a4] ss:$40 sps:$4 sm:$0xff]  }
  0xc8   :  { %4819 = vmatpush1.bf16.msra.mxu0 %v8124_v21  ;;  %4949 = vmatprep.subr.bf16.mxu1 %v8135_v7  ;;  %v8219_v21 = vld [vmem:[%s11869_s1 + $0xf0c] ss:$40 sps:$4 sm:$0xff]   ;;  %v8220_v7 = vld [vmem:[%s11869_s1 + $0x1a0] ss:$40 sps:$4 sm:$0xff]  }
  0xc9   :  { %4820 = vmatprep.subr.bf16.mxu0 %v8132_v22  ;;  %v8217_v22 = vld [vmem:[%s11869_s1 + $0xf08] ss:$40 sps:$4 sm:$0xff]  }
  0xcb   :  { %4950 = vmatpush1.bf16.msra.mxu1 %v8133_v24  ;;  %v8228_v24 = vld [vmem:[%s11869_s1 + $0x1f4] ss:$40 sps:$4 sm:$0xff]  }
  0xcc   :  { %4821 = vmatpush1.bf16.msra.mxu0 %v8130_v23  ;;  %4951 = vmatprep.subr.bf16.mxu1 %v8141_v33  ;;  %v8225_v23 = vld [vmem:[%s11869_s1 + $0xf5c] ss:$40 sps:$4 sm:$0xff]   ;;  %v8226_v33 = vld [vmem:[%s11869_s1 + $0x1f0] ss:$40 sps:$4 sm:$0xff]  }
  0xcd   :  { %4822 = vmatprep.subr.bf16.mxu0 %v8138_v25  ;;  %v8223_v25 = vld [vmem:[%s11869_s1 + $0xf58] ss:$40 sps:$4 sm:$0xff]  }
  0xcf   :  { %4952 = vmatpush1.bf16.msra.mxu1 %v8139_v27  ;;  %v8229_v27 = vld [vmem:[%s11869_s1 + $0xfa8] ss:$40 sps:$4 sm:$0xff]  }
  0xd0   :  { %4823 = vmatpush1.bf16.msra.mxu0 %v8136_v26  ;;  %4953 = vmatprep.subr.bf16.mxu1 %v8147_v29  ;;  %v8231_v26 = vld [vmem:[%s11869_s1 + $0xfac] ss:$40 sps:$4 sm:$0xff]   ;;  %v8237_v29 = vld [vmem:[%s11869_s1 + $0xffc] ss:$40 sps:$4 sm:$0xff]  }
  0xd1   :  { %4824 = vmatprep.subr.bf16.mxu0 %v8144_v28  ;;  %v8232_v28 = vld [vmem:[%s11869_s1 + $0x240] ss:$40 sps:$4 sm:$0xff]  }
  0xd3   :  { %4954 = vmatpush1.bf16.msra.mxu1 %v8145_v31  ;;  %v8238_v31 = vld [vmem:[%s11869_s1 + $0x290] ss:$40 sps:$4 sm:$0xff]  }
  0xd4   :  { %4825 = vmatpush1.bf16.msra.mxu0 %v8142_v30  ;;  %4955 = vmatprep.subr.bf16.mxu1 %v8153_v34  ;;  %v8235_v30 = vld [vmem:[%s11869_s1 + $0xff8] ss:$40 sps:$4 sm:$0xff]   ;;  %v8246_v34 = vld [vmem:[%s11869_s1 + $0x2e4] ss:$40 sps:$4 sm:$0xff]  }
  0xd5   :  { %4826 = vmatprep.subr.bf16.mxu0 %v8150_v32  ;;  %v8243_v32 = vld [vmem:[%s11869_s1 + $0x104c] ss:$40 sps:$4 sm:$0xff]  }
  0xd7   :  { %4956 = vmatpush1.bf16.msra.mxu1 %v8151_v36  ;;  %v8244_v36 = vld [vmem:[%s11869_s1 + $0x2e0] ss:$40 sps:$4 sm:$0xff]  }
  0xd8   :  { %4827 = vmatpush1.bf16.msra.mxu0 %v8148_v35  ;;  %4957 = vmatprep.subr.bf16.mxu1 %v8159_v38  ;;  %v8241_v35 = vld [vmem:[%s11869_s1 + $0x1048] ss:$40 sps:$4 sm:$0xff]   ;;  %v8252_v38 = vld [vmem:[%s11869_s1 + $0x334] ss:$40 sps:$4 sm:$0xff]  }
  0xd9   :  { %4828 = vmatprep.subr.bf16.mxu0 %v8156_v37  ;;  %v8249_v37 = vld [vmem:[%s11869_s1 + $0x109c] ss:$40 sps:$4 sm:$0xff]  }
  0xdb   :  { %4958 = vmatpush1.bf16.msra.mxu1 %v8157_v40  ;;  %v8250_v40 = vld [vmem:[%s11869_s1 + $0x330] ss:$40 sps:$4 sm:$0xff]  }
  0xdc   :  { %4829 = vmatpush1.bf16.msra.mxu0 %v8154_v39  ;;  %4959 = vmatprep.subr.bf16.mxu1 %v8165_v42  ;;  %v8247_v39 = vld [vmem:[%s11869_s1 + $0x1098] ss:$40 sps:$4 sm:$0xff]   ;;  %v8258_v42 = vld [vmem:[%s11869_s1 + $0x384] ss:$40 sps:$4 sm:$0xff]  }
  0xdd   :  { %4830 = vmatprep.subr.bf16.mxu0 %v8162_v41  ;;  %v8255_v41 = vld [vmem:[%s11869_s1 + $0x10ec] ss:$40 sps:$4 sm:$0xff]  }
  0xdf   :  { %4960 = vmatpush1.bf16.msra.mxu1 %v8163_v44  ;;  %v8256_v44 = vld [vmem:[%s11869_s1 + $0x380] ss:$40 sps:$4 sm:$0xff]  }
  0xe0   :  { %4831 = vmatpush1.bf16.msra.mxu0 %v8160_v43  ;;  %4961 = vmatprep.subr.bf16.mxu1 %v8171_v46  ;;  %v8253_v43 = vld [vmem:[%s11869_s1 + $0x10e8] ss:$40 sps:$4 sm:$0xff]   ;;  %v8264_v46 = vld [vmem:[%s11869_s1 + $0x3d4] ss:$40 sps:$4 sm:$0xff]  }
  0xe1   :  { %4832 = vmatprep.subr.bf16.mxu0 %v8168_v45  ;;  %v8261_v45 = vld [vmem:[%s11869_s1 + $0x113c] ss:$40 sps:$4 sm:$0xff]  }
  0xe3   :  { %4962 = vmatpush1.bf16.msra.mxu1 %v8169_v48  ;;  %v8262_v48 = vld [vmem:[%s11869_s1 + $0x3d0] ss:$40 sps:$4 sm:$0xff]  }
  0xe4   :  { %4833 = vmatpush1.bf16.msra.mxu0 %v8166_v47  ;;  %4963 = vmatprep.subr.bf16.mxu1 %v8177_v51  ;;  %v8259_v47 = vld [vmem:[%s11869_s1 + $0x1138] ss:$40 sps:$4 sm:$0xff]   ;;  %v8270_v51 = vld [vmem:[%s11869_s1 + $0x424] ss:$40 sps:$4 sm:$0xff]  }
  0xe5   :  { %4834 = vmatprep.subr.bf16.mxu0 %v8174_v50  ;;  %v8267_v50 = vld [vmem:[%s11869_s1 + $0x118c] ss:$40 sps:$4 sm:$0xff]  }
  0xe7   :  { %4964 = vmatpush1.bf16.msra.mxu1 %v8175_v53  ;;  %v8268_v53 = vld [vmem:[%s11869_s1 + $0x420] ss:$40 sps:$4 sm:$0xff]  }
  0xe8   :  { %4835 = vmatpush1.bf16.msra.mxu0 %v8172_v52  ;;  %4965 = vmatprep.subr.bf16.mxu1 %v8183_v55  ;;  %v8265_v52 = vld [vmem:[%s11869_s1 + $0x1188] ss:$40 sps:$4 sm:$0xff]   ;;  %v8273_v55 = vld [vmem:[%s11869_s1 + $0x11dc] ss:$40 sps:$4 sm:$0xff]  }
  0xe9   :  { %4836 = vmatprep.subr.bf16.mxu0 %v8180_v54 }
  0xeb   :  { %4966 = vmatpush1.bf16.msra.mxu1 %v8181_v57 }
  0xec   :  { %4837 = vmatpush1.bf16.msra.mxu0 %v8178_v56  ;;  %4967 = vmatprep.subr.bf16.mxu1 %v8189_v58  ;;  %v8276_v56 = vld [vmem:[%s11869_s1 + $0x474] ss:$40 sps:$4 sm:$0xff]  }
  0xed   :  { %5074 = vmatprep.subr.bf16.mxu0 %v8192_v59 }
  0xef   :  { %4849 = vmatmul.mubr.bf16.vlgmr.msra.gmra.mrb[0].mxu0 %v8186_v60  ;;  %4968 = vmatpush1.bf16.msra.mxu1 %v8187_v61  ;;  %v8271_v60 = vld [vmem:[%s11869_s1 + $0x11d8] ss:$40 sps:$4 sm:$0xff]  }
  0xf0   :  { %5075 = vmatpush1.bf16.msra.mxu0 %v8190_v62  ;;  %4969 = vmatprep.subr.bf16.mxu1 %v8195_v63  ;;  %v8274_v61 = vld [vmem:[%s11869_s1 + $0x470] ss:$40 sps:$4 sm:$0xff]   ;;  %v8279_v62 = vld [vmem:[%s11869_s1 + $0x122c] ss:$40 sps:$4 sm:$0xff]  }
  0xf1   :  { %5076 = vmatprep.subr.bf16.mxu0 %v8198_v0  ;;  %5106 = vmatprep.mubr.bf16.mxu0 %v9912_v5  ;;  %v8282_v63 = vld [vmem:[%s11869_s1 + $0x4c4] ss:$40 sps:$4 sm:$0xff]   ;;  %v8277_v0 = vld [vmem:[%s11869_s1 + $0x1228] ss:$40 sps:$4 sm:$0xff]  }
  0xf3   :  { %4970 = vmatpush1.bf16.msra.mxu1 %v8193_v1  ;;  %v8280_v1 = vld [vmem:[%s11869_s1 + $0x4c0] ss:$40 sps:$4 sm:$0xff]  }
  0xf4   :  { %5077 = vmatpush1.bf16.msra.mxu0 %v8196_v2  ;;  %4971 = vmatprep.subr.bf16.mxu1 %v8201_v3  ;;  %v8285_v2 = vld [vmem:[%s11869_s1 + $0x127c] ss:$40 sps:$4 sm:$0xff]  }
  0xf5   :  { %5078 = vmatprep.subr.bf16.mxu0 %v8204_v4  ;;  %v8288_v3 = vld [vmem:[%s11869_s1 + $0x514] ss:$40 sps:$4 sm:$0xff]   ;;  %v8283_v4 = vld [vmem:[%s11869_s1 + $0x1278] ss:$40 sps:$4 sm:$0xff]  }
  0xf7   :  { %4972 = vmatpush1.bf16.msra.mxu1 %v8199_v8  ;;  %v8286_v8 = vld [vmem:[%s11869_s1 + $0x510] ss:$40 sps:$4 sm:$0xff]  }
  0xf8   :  { %5079 = vmatpush1.bf16.msra.mxu0 %v8202_v9  ;;  %4973 = vmatprep.subr.bf16.mxu1 %v8207_v10  ;;  %v8291_v9 = vld [vmem:[%s11869_s1 + $0x12cc] ss:$40 sps:$4 sm:$0xff]  }
  0xf9   :  { %5080 = vmatprep.subr.bf16.mxu0 %v8210_v11  ;;  %v8294_v10 = vld [vmem:[%s11869_s1 + $0x564] ss:$40 sps:$4 sm:$0xff]   ;;  %v9047_v11 = vld [vmem:[%s11870_s0] ss:$40 sps:$4 sm:$0xff]  }
  0xfb   :  { %4974 = vmatpush1.bf16.msra.mxu1 %v8205_v13  ;;  %v8289_v13 = vld [vmem:[%s11869_s1 + $0x12c8] ss:$40 sps:$4 sm:$0xff]  }
  0xfc   :  { %5081 = vmatpush1.bf16.msra.mxu0 %v8208_v14  ;;  %4975 = vmatprep.subr.bf16.mxu1 %v8213_v15  ;;  %v8292_v14 = vld [vmem:[%s11869_s1 + $0x560] ss:$40 sps:$4 sm:$0xff]   ;;  %v8297_v15 = vld [vmem:[%s11869_s1 + $0x131c] ss:$40 sps:$4 sm:$0xff]  }
  0xfd   :  { %5082 = vmatprep.subr.bf16.mxu0 %v8216_v16  ;;  %v8300_v16 = vld [vmem:[%s11869_s1 + $0x5b4] ss:$40 sps:$4 sm:$0xff]  }
  0xff   :  { %4976 = vmatpush1.bf16.msra.mxu1 %v8211_v6  ;;  %v9048_v6 = vld [vmem:[%s11870_s0 + $0xc] ss:$40 sps:$4 sm:$0xff]  }
 0x100   :  { %5083 = vmatpush1.bf16.msra.mxu0 %v8214_v19  ;;  %4988 = vmatprep.subr.bf16.mxu1 %v8219_v21  ;;  %v8295_v19 = vld [vmem:[%s11869_s1 + $0x1318] ss:$40 sps:$4 sm:$0xff]  }
 0x101   :  { %5084 = vmatprep.subr.bf16.mxu0 %v8222_v49  ;;  %v8298_v21 = vld [vmem:[%s11869_s1 + $0x5b0] ss:$40 sps:$4 sm:$0xff]   ;;  %v8303_v49 = vld [vmem:[%s11869_s1 + $0x136c] ss:$40 sps:$4 sm:$0xff]  }
 0x102   :  { %4978 = vmatmul.mubr.bf16.vlgmr.msra.gmra.mrb[4].mxu1 %v9538_v12  ;;  %v8234_v12 = vld [vmem:[%s11869_s1 + $0x244] ss:$40 sps:$4 sm:$0xff]  }
 0x103   :  { %4989 = vmatpush1.bf16.msra.mxu1 %v8217_v22  ;;  %5020 = vmatprep.mubr.bf16.mxu1 %v9560_v18  ;;  %v8240_v18 = vld [vmem:[%s11869_s1 + $0x294] ss:$40 sps:$4 sm:$0xff]   ;;  %v8306_v22 = vld [vmem:[%s11869_s1 + $0x604] ss:$40 sps:$4 sm:$0xff]  }
 0x104   :  { %5085 = vmatpush1.bf16.msra.mxu0 %v8220_v7  ;;  %4990 = vmatprep.subr.bf16.mxu1 %v8225_v23  ;;  %v8301_v7 = vld [vmem:[%s11869_s1 + $0x1368] ss:$40 sps:$4 sm:$0xff]  }
 0x105   :  { %5086 = vmatprep.subr.bf16.mxu0 %v8228_v24  ;;  %v8304_v23 = vld [vmem:[%s11869_s1 + $0x600] ss:$40 sps:$4 sm:$0xff]   ;;  %v8309_v24 = vld [vmem:[%s11869_s1 + $0x13bc] ss:$40 sps:$4 sm:$0xff]  }
 0x107   :  { %4991 = vmatpush1.bf16.msra.mxu1 %v8223_v25  ;;  %v8312_v25 = vld [vmem:[%s11869_s1 + $0x654] ss:$40 sps:$4 sm:$0xff]  }
 0x108   :  { %5087 = vmatpush1.bf16.msra.mxu0 %v8226_v33  ;;  %4992 = vmatprep.subr.bf16.mxu1 %v8231_v26  ;;  %v8307_v33 = vld [vmem:[%s11869_s1 + $0x13b8] ss:$40 sps:$4 sm:$0xff]  }
 0x109   :  { %5088 = vmatprep.subr.bf16.mxu0 %v8234_v12  ;;  %v8310_v26 = vld [vmem:[%s11869_s1 + $0x650] ss:$40 sps:$4 sm:$0xff]   ;;  %v8315_v12 = vld [vmem:[%s11869_s1 + $0x140c] ss:$40 sps:$4 sm:$0xff]  }
 0x10b   :  { %4993 = vmatpush1.bf16.msra.mxu1 %v8229_v27  ;;  %v8318_v27 = vld [vmem:[%s11869_s1 + $0x6a4] ss:$40 sps:$4 sm:$0xff]  }
 0x10c   :  { %5089 = vmatpush1.bf16.msra.mxu0 %v8232_v28  ;;  %4994 = vmatprep.subr.bf16.mxu1 %v8237_v29  ;;  %v8313_v28 = vld [vmem:[%s11869_s1 + $0x1408] ss:$40 sps:$4 sm:$0xff]  }
 0x10d   :  { %5090 = vmatprep.subr.bf16.mxu0 %v8240_v18  ;;  %v8316_v29 = vld [vmem:[%s11869_s1 + $0x6a0] ss:$40 sps:$4 sm:$0xff]   ;;  %v8321_v18 = vld [vmem:[%s11869_s1 + $0x145c] ss:$40 sps:$4 sm:$0xff]  }
 0x10f   :  { %4995 = vmatpush1.bf16.msra.mxu1 %v8235_v30  ;;  %v8324_v30 = vld [vmem:[%s11869_s1 + $0x6f4] ss:$40 sps:$4 sm:$0xff]  }
 0x110   :  { %5091 = vmatpush1.bf16.msra.mxu0 %v8238_v31  ;;  %4996 = vmatprep.subr.bf16.mxu1 %v8243_v32  ;;  %v8319_v31 = vld [vmem:[%s11869_s1 + $0x1458] ss:$40 sps:$4 sm:$0xff]  }
 0x111   :  { %5092 = vmatprep.subr.bf16.mxu0 %v8246_v34  ;;  %v8322_v32 = vld [vmem:[%s11869_s1 + $0x6f0] ss:$40 sps:$4 sm:$0xff]   ;;  %v8327_v34 = vld [vmem:[%s11869_s1 + $0x14ac] ss:$40 sps:$4 sm:$0xff]  }
 0x113   :  { %4997 = vmatpush1.bf16.msra.mxu1 %v8241_v35  ;;  %v8330_v35 = vld [vmem:[%s11869_s1 + $0x744] ss:$40 sps:$4 sm:$0xff]  }
 0x114   :  { %5093 = vmatpush1.bf16.msra.mxu0 %v8244_v36  ;;  %4998 = vmatprep.subr.bf16.mxu1 %v8249_v37  ;;  %v8325_v36 = vld [vmem:[%s11869_s1 + $0x14a8] ss:$40 sps:$4 sm:$0xff]   ;;  %v8333_v37 = vld [vmem:[%s11869_s1 + $0x14fc] ss:$40 sps:$4 sm:$0xff]  }
 0x115   :  { %5094 = vmatprep.subr.bf16.mxu0 %v8252_v38  ;;  %v10055_v54 = vpop.f32.mrb[0].mxu1  ;;  %v8336_v38 = vld [vmem:[%s11869_s1 + $0x794] ss:$40 sps:$4 sm:$0xff]  }
 0x116   :  { %v10063_v57 = vpop.f32.mrb[1].mxu1 }
 0x117   :  { %4999 = vmatpush1.bf16.msra.mxu1 %v8247_v39  ;;  %v10065_v58 = vpop.f32.mrb[2].mxu1  ;;  %v8331_v39 = vld [vmem:[%s11869_s1 + $0x14f8] ss:$40 sps:$4 sm:$0xff]  }
 0x118   :  { %5095 = vmatpush1.bf16.msra.mxu0 %v8250_v40  ;;  %5000 = vmatprep.subr.bf16.mxu1 %v8255_v41  ;;  %v10067_v59 = vpop.f32.mrb[3].mxu1  ;;  %v8339_v40 = vld [vmem:[%s11869_s1 + $0x154c] ss:$40 sps:$4 sm:$0xff]  }
 0x119   :  { %5096 = vmatprep.subr.bf16.mxu0 %v8258_v42  ;;  %v8342_v41 = vld [vmem:[%s11869_s1 + $0x7e4] ss:$40 sps:$4 sm:$0xff]   ;;  %v8337_v42 = vld [vmem:[%s11869_s1 + $0x1548] ss:$40 sps:$4 sm:$0xff]  }
 0x11b   :  { %5001 = vmatpush1.bf16.msra.mxu1 %v8253_v43  ;;  %v8340_v43 = vld [vmem:[%s11869_s1 + $0x7e0] ss:$40 sps:$4 sm:$0xff]  }
 0x11c   :  { %5097 = vmatpush1.bf16.msra.mxu0 %v8256_v44  ;;  %5002 = vmatprep.subr.bf16.mxu1 %v8261_v45  ;;  %v8345_v44 = vld [vmem:[%s11869_s1 + $0x159c] ss:$40 sps:$4 sm:$0xff]  }
 0x11d   :  { %5098 = vmatprep.subr.bf16.mxu0 %v8264_v46  ;;  %v8348_v45 = vld [vmem:[%s11869_s1 + $0x834] ss:$40 sps:$4 sm:$0xff]   ;;  %v8343_v46 = vld [vmem:[%s11869_s1 + $0x1598] ss:$40 sps:$4 sm:$0xff]  }
 0x11f   :  { %5003 = vmatpush1.bf16.msra.mxu1 %v8259_v47  ;;  %v8346_v47 = vld [vmem:[%s11869_s1 + $0x830] ss:$40 sps:$4 sm:$0xff]  }
 0x120   :  { %5099 = vmatpush1.bf16.msra.mxu0 %v8262_v48  ;;  %5004 = vmatprep.subr.bf16.mxu1 %v8267_v50  ;;  %v8351_v48 = vld [vmem:[%s11869_s1 + $0x15ec] ss:$40 sps:$4 sm:$0xff]  }
 0x121   :  { %5100 = vmatprep.subr.bf16.mxu0 %v8270_v51  ;;  %v8354_v50 = vld [vmem:[%s11869_s1 + $0x884] ss:$40 sps:$4 sm:$0xff]   ;;  %v8349_v51 = vld [vmem:[%s11869_s1 + $0x15e8] ss:$40 sps:$4 sm:$0xff]  }
 0x123   :  { %5005 = vmatpush1.bf16.msra.mxu1 %v8265_v52  ;;  %v8352_v52 = vld [vmem:[%s11869_s1 + $0x880] ss:$40 sps:$4 sm:$0xff]  }
 0x124   :  { %5101 = vmatpush1.bf16.msra.mxu0 %v8268_v53  ;;  %5006 = vmatprep.subr.bf16.mxu1 %v8273_v55  ;;  %v8357_v53 = vld [vmem:[%s11869_s1 + $0x163c] ss:$40 sps:$4 sm:$0xff]  }
 0x125   :  { %5102 = vmatprep.subr.bf16.mxu0 %v8276_v56  ;;  %v8360_v55 = vld [vmem:[%s11869_s1 + $0x8d4] ss:$40 sps:$4 sm:$0xff]   ;;  %v8355_v56 = vld [vmem:[%s11869_s1 + $0x1638] ss:$40 sps:$4 sm:$0xff]  }
 0x127   :  { %5007 = vmatpush1.bf16.msra.mxu1 %v8271_v60  ;;  %v8358_v60 = vld [vmem:[%s11869_s1 + $0x8d0] ss:$40 sps:$4 sm:$0xff]  }
 0x128   :  { %5103 = vmatpush1.bf16.msra.mxu0 %v8274_v61  ;;  %5008 = vmatprep.subr.bf16.mxu1 %v8279_v62  ;;  %v8363_v61 = vld [vmem:[%s11869_s1 + $0x168c] ss:$40 sps:$4 sm:$0xff]  }
 0x129   :  { %5104 = vmatprep.subr.bf16.mxu0 %v8282_v63  ;;  %v8366_v62 = vld [vmem:[%s11869_s1 + $0x924] ss:$40 sps:$4 sm:$0xff]   ;;  %v8361_v63 = vld [vmem:[%s11869_s1 + $0x1688] ss:$40 sps:$4 sm:$0xff]  }
 0x12b   :  { %5009 = vmatpush1.bf16.msra.mxu1 %v8277_v0  ;;  %v8364_v0 = vld [vmem:[%s11869_s1 + $0x920] ss:$40 sps:$4 sm:$0xff]  }
 0x12c   :  { %5105 = vmatpush1.bf16.msra.mxu0 %v8280_v1  ;;  %5010 = vmatprep.subr.bf16.mxu1 %v8285_v2  ;;  %v8369_v1 = vld [vmem:[%s11869_s1 + $0x16dc] ss:$40 sps:$4 sm:$0xff]  }
 0x12d   :  { %5117 = vmatprep.subr.bf16.mxu0 %v8288_v3  ;;  %v8372_v2 = vld [vmem:[%s11869_s1 + $0x974] ss:$40 sps:$4 sm:$0xff]   ;;  %v8367_v3 = vld [vmem:[%s11869_s1 + $0x16d8] ss:$40 sps:$4 sm:$0xff]  }
 0x12f   :  { %5107 = vmatmul.mubr.bf16.vlgmr.msra.gmra.mrb[4].mxu0 %v9047_v11  ;;  %5011 = vmatpush1.bf16.msra.mxu1 %v8283_v4  ;;  %v8370_v4 = vld [vmem:[%s11869_s1 + $0x970] ss:$40 sps:$4 sm:$0xff]   ;;  %v8376_v11 = vld [vmem:[%s11869_s1 + $0x9c0] ss:$40 sps:$4 sm:$0xff]  }
 0x130   :  { %5118 = vmatpush1.bf16.msra.mxu0 %v8286_v8  ;;  %5012 = vmatprep.subr.bf16.mxu1 %v8291_v9  ;;  %v8375_v8 = vld [vmem:[%s11869_s1 + $0x172c] ss:$40 sps:$4 sm:$0xff]  }
 0x131   :  { %5119 = vmatprep.subr.bf16.mxu0 %v8294_v10  ;;  %5149 = vmatprep.mubr.bf16.mxu0 %v9048_v6  ;;  %v8378_v9 = vld [vmem:[%s11869_s1 + $0x9c4] ss:$40 sps:$4 sm:$0xff]   ;;  %v8373_v10 = vld [vmem:[%s11869_s1 + $0x1728] ss:$40 sps:$4 sm:$0xff]  }
 0x132   :  { %v8387_v6 = vld [vmem:[%s11869_s1 + $0xa64] ss:$40 sps:$4 sm:$0xff]  }
 0x133   :  { %5013 = vmatpush1.bf16.msra.mxu1 %v8289_v13  ;;  %v8381_v13 = vld [vmem:[%s11869_s1 + $0xa14] ss:$40 sps:$4 sm:$0xff]  }
 0x134   :  { %5120 = vmatpush1.bf16.msra.mxu0 %v8292_v14  ;;  %5014 = vmatprep.subr.bf16.mxu1 %v8297_v15  ;;  %v8384_v14 = vld [vmem:[%s11869_s1 + $0x1c] ss:$40 sps:$4 sm:$0xff]   ;;  %v8379_v15 = vld [vmem:[%s11869_s1 + $0xa10] ss:$40 sps:$4 sm:$0xff]  }
 0x135   :  { %5121 = vmatprep.subr.bf16.mxu0 %v8300_v16  ;;  %v8382_v16 = vld [vmem:[%s11869_s1 + $0x18] ss:$40 sps:$4 sm:$0xff]  }
 0x137   :  { %5015 = vmatpush1.bf16.msra.mxu1 %v8295_v19  ;;  %v8390_v19 = vld [vmem:[%s11869_s1 + $0x6c] ss:$40 sps:$4 sm:$0xff]  }
 0x138   :  { %5122 = vmatpush1.bf16.msra.mxu0 %v8298_v21  ;;  %5016 = vmatprep.subr.bf16.mxu1 %v8303_v49  ;;  %v9049_v21 = vld [vmem:[%s11870_s0 + $0x20] ss:$40 sps:$4 sm:$0xff]  }
 0x139   :  { %5123 = vmatprep.subr.bf16.mxu0 %v8306_v22  ;;  %v10312_v49 = vld [vmem:[%s11870_s0 + $0x8] ss:$40 sps:$4 sm:$0xff]  }
 0x13a   :  { %v8385_v22 = vld [vmem:[%s11869_s1 + $0xa60] ss:$40 sps:$4 sm:$0xff]  }
 0x13b   :  { %5017 = vmatpush1.bf16.msra.mxu1 %v8301_v7  ;;  %v8388_v7 = vld [vmem:[%s11869_s1 + $0x68] ss:$40 sps:$4 sm:$0xff]  }
 0x13c   :  { %5124 = vmatpush1.bf16.msra.mxu0 %v8304_v23  ;;  %5018 = vmatprep.subr.bf16.mxu1 %v8309_v24  ;;  %v8393_v23 = vld [vmem:[%s11869_s1 + $0xab4] ss:$40 sps:$4 sm:$0xff]  }
 0x13d   :  { %5125 = vmatprep.subr.bf16.mxu0 %v8312_v25  ;;  %v8396_v24 = vld [vmem:[%s11869_s1 + $0xbc] ss:$40 sps:$4 sm:$0xff]  }
 0x13e   :  { %v10330_v25 = vld [vmem:[%s11870_s0 + $0x14] ss:$40 sps:$4 sm:$0xff]  }
 0x13f   :  { %5019 = vmatpush1.bf16.msra.mxu1 %v8307_v33  ;;  %v8391_v33 = vld [vmem:[%s11869_s1 + $0xab0] ss:$40 sps:$4 sm:$0xff]  }
 0x140   :  { %5126 = vmatpush1.bf16.msra.mxu0 %v8310_v26  ;;  %5031 = vmatprep.subr.bf16.mxu1 %v8315_v12  ;;  %v8394_v26 = vld [vmem:[%s11869_s1 + $0xb8] ss:$40 sps:$4 sm:$0xff]   ;;  %v8399_v12 = vld [vmem:[%s11869_s1 + $0xb04] ss:$40 sps:$4 sm:$0xff]  }
 0x141   :  { %5127 = vmatprep.subr.bf16.mxu0 %v8318_v27  ;;  %v8397_v27 = vld [vmem:[%s11869_s1 + $0xb00] ss:$40 sps:$4 sm:$0xff]  }
 0x142   :  { %5021 = vmatmul.mubr.bf16.vlgmr.msra.gmra.mrb[4].mxu1 %v9744_v17  ;;  %v8328_v17 = vld [vmem:[%s11869_s1 + $0x740] ss:$40 sps:$4 sm:$0xff]  }
 0x143   :  { %5032 = vmatpush1.bf16.msra.mxu1 %v8313_v28  ;;  %7483 = vmatprep.mubr.msk.bf16.mxu1 %vm4640_vm0, %v9755_v20  ;;  %v8334_v20 = vld [vmem:[%s11869_s1 + $0x790] ss:$40 sps:$4 sm:$0xff]  }
 0x144   :  { %5128 = vmatpush1.bf16.msra.mxu0 %v8316_v29  ;;  %5033 = vmatprep.subr.bf16.mxu1 %v8321_v18  ;;  %v8400_v28 = vld [vmem:[%s11869_s1 + $0x108] ss:$40 sps:$4 sm:$0xff]   ;;  %v8405_v29 = vld [vmem:[%s11869_s1 + $0xb54] ss:$40 sps:$4 sm:$0xff]  }
 0x145   :  { %5129 = vmatprep.subr.bf16.mxu0 %v8324_v30  ;;  %v8408_v18 = vld [vmem:[%s11869_s1 + $0x15c] ss:$40 sps:$4 sm:$0xff]   ;;  %v8403_v30 = vld [vmem:[%s11869_s1 + $0xb50] ss:$40 sps:$4 sm:$0xff]  }
 0x147   :  { %5034 = vmatpush1.bf16.msra.mxu1 %v8319_v31  ;;  %v8406_v31 = vld [vmem:[%s11869_s1 + $0x158] ss:$40 sps:$4 sm:$0xff]  }
 0x148   :  { %5130 = vmatpush1.bf16.msra.mxu0 %v8322_v32  ;;  %5035 = vmatprep.subr.bf16.mxu1 %v8327_v34  ;;  %v8411_v32 = vld [vmem:[%s11869_s1 + $0xba4] ss:$40 sps:$4 sm:$0xff]  }
 0x149   :  { %5131 = vmatprep.subr.bf16.mxu0 %v8330_v35  ;;  %v8414_v34 = vld [vmem:[%s11869_s1 + $0x1ac] ss:$40 sps:$4 sm:$0xff]   ;;  %v8409_v35 = vld [vmem:[%s11869_s1 + $0xba0] ss:$40 sps:$4 sm:$0xff]  }
 0x14b   :  { %5036 = vmatpush1.bf16.msra.mxu1 %v8325_v36  ;;  %v8412_v36 = vld [vmem:[%s11869_s1 + $0x1a8] ss:$40 sps:$4 sm:$0xff]  }
 0x14c   :  { %5132 = vmatpush1.bf16.msra.mxu0 %v8328_v17  ;;  %5037 = vmatprep.subr.bf16.mxu1 %v8333_v37  ;;  %v8417_v17 = vld [vmem:[%s11869_s1 + $0xbf4] ss:$40 sps:$4 sm:$0xff]  }
 0x14d   :  { %5133 = vmatprep.subr.bf16.mxu0 %v8336_v38  ;;  %v8420_v37 = vld [vmem:[%s11869_s1 + $0x1fc] ss:$40 sps:$4 sm:$0xff]   ;;  %v8415_v38 = vld [vmem:[%s11869_s1 + $0xbf0] ss:$40 sps:$4 sm:$0xff]  }
 0x14f   :  { %5038 = vmatpush1.bf16.msra.mxu1 %v8331_v39  ;;  %v8418_v39 = vld [vmem:[%s11869_s1 + $0x1f8] ss:$40 sps:$4 sm:$0xff]  }
 0x150   :  { %5134 = vmatpush1.bf16.msra.mxu0 %v8334_v20  ;;  %5039 = vmatprep.subr.bf16.mxu1 %v8339_v40  ;;  %v8423_v20 = vld [vmem:[%s11869_s1 + $0xc44] ss:$40 sps:$4 sm:$0xff]  }
 0x151   :  { %5135 = vmatprep.subr.bf16.mxu0 %v8342_v41  ;;  %v8426_v40 = vld [vmem:[%s11869_s1 + $0x24c] ss:$40 sps:$4 sm:$0xff]   ;;  %v8421_v41 = vld [vmem:[%s11869_s1 + $0xc40] ss:$40 sps:$4 sm:$0xff]  }
 0x153   :  { %5040 = vmatpush1.bf16.msra.mxu1 %v8337_v42  ;;  %v8424_v42 = vld [vmem:[%s11869_s1 + $0x248] ss:$40 sps:$4 sm:$0xff]  }
 0x154   :  { %5136 = vmatpush1.bf16.msra.mxu0 %v8340_v43  ;;  %5041 = vmatprep.subr.bf16.mxu1 %v8345_v44  ;;  %v8429_v43 = vld [vmem:[%s11869_s1 + $0xc94] ss:$40 sps:$4 sm:$0xff]  }
 0x155   :  { %5137 = vmatprep.subr.bf16.mxu0 %v8348_v45  ;;  %v8432_v44 = vld [vmem:[%s11869_s1 + $0x29c] ss:$40 sps:$4 sm:$0xff]   ;;  %v8427_v45 = vld [vmem:[%s11869_s1 + $0xc90] ss:$40 sps:$4 sm:$0xff]  }
 0x157   :  { %5042 = vmatpush1.bf16.msra.mxu1 %v8343_v46  ;;  %v8430_v46 = vld [vmem:[%s11869_s1 + $0x298] ss:$40 sps:$4 sm:$0xff]  }
 0x158   :  { %5138 = vmatpush1.bf16.msra.mxu0 %v8346_v47  ;;  %5043 = vmatprep.subr.bf16.mxu1 %v8351_v48  ;;  %v8435_v47 = vld [vmem:[%s11869_s1 + $0xce4] ss:$40 sps:$4 sm:$0xff]  }
 0x159   :  { %5139 = vmatprep.subr.bf16.mxu0 %v8354_v50  ;;  %v8438_v48 = vld [vmem:[%s11869_s1 + $0x2ec] ss:$40 sps:$4 sm:$0xff]   ;;  %v8433_v50 = vld [vmem:[%s11869_s1 + $0xce0] ss:$40 sps:$4 sm:$0xff]  }
 0x15b   :  { %5044 = vmatpush1.bf16.msra.mxu1 %v8349_v51  ;;  %v8436_v51 = vld [vmem:[%s11869_s1 + $0x2e8] ss:$40 sps:$4 sm:$0xff]  }
 0x15c   :  { %5140 = vmatpush1.bf16.msra.mxu0 %v8352_v52  ;;  %5045 = vmatprep.subr.bf16.mxu1 %v8357_v53  ;;  %v8441_v52 = vld [vmem:[%s11869_s1 + $0xd34] ss:$40 sps:$4 sm:$0xff]  }
 0x15d   :  { %5141 = vmatprep.subr.bf16.mxu0 %v8360_v55  ;;  %v8444_v53 = vld [vmem:[%s11869_s1 + $0x33c] ss:$40 sps:$4 sm:$0xff]   ;;  %v8439_v55 = vld [vmem:[%s11869_s1 + $0xd30] ss:$40 sps:$4 sm:$0xff]  }
 0x15f   :  { %5046 = vmatpush1.bf16.msra.mxu1 %v8355_v56  ;;  %v8442_v56 = vld [vmem:[%s11869_s1 + $0x338] ss:$40 sps:$4 sm:$0xff]  }
 0x160   :  { %5142 = vmatpush1.bf16.msra.mxu0 %v8358_v60  ;;  %5047 = vmatprep.subr.bf16.mxu1 %v8363_v61  ;;  %v8447_v60 = vld [vmem:[%s11869_s1 + $0xd84] ss:$40 sps:$4 sm:$0xff]  }
 0x161   :  { %5143 = vmatprep.subr.bf16.mxu0 %v8366_v62  ;;  %v8450_v61 = vld [vmem:[%s11869_s1 + $0x38c] ss:$40 sps:$4 sm:$0xff]   ;;  %v8445_v62 = vld [vmem:[%s11869_s1 + $0xd80] ss:$40 sps:$4 sm:$0xff]  }
 0x163   :  { %5048 = vmatpush1.bf16.msra.mxu1 %v8361_v63  ;;  %v8448_v63 = vld [vmem:[%s11869_s1 + $0x388] ss:$40 sps:$4 sm:$0xff]  }
 0x164   :  { %5144 = vmatpush1.bf16.msra.mxu0 %v8364_v0  ;;  %5049 = vmatprep.subr.bf16.mxu1 %v8369_v1  ;;  %v8453_v0 = vld [vmem:[%s11869_s1 + $0xdd4] ss:$40 sps:$4 sm:$0xff]  }
 0x165   :  { %5145 = vmatprep.subr.bf16.mxu0 %v8372_v2  ;;  %v8456_v1 = vld [vmem:[%s11869_s1 + $0x3dc] ss:$40 sps:$4 sm:$0xff]   ;;  %v8451_v2 = vld [vmem:[%s11869_s1 + $0xdd0] ss:$40 sps:$4 sm:$0xff]  }
 0x167   :  { %5050 = vmatpush1.bf16.msra.mxu1 %v8367_v3  ;;  %v8454_v3 = vld [vmem:[%s11869_s1 + $0x3d8] ss:$40 sps:$4 sm:$0xff]  }
 0x168   :  { %5146 = vmatpush1.bf16.msra.mxu0 %v8370_v4  ;;  %5051 = vmatprep.subr.bf16.mxu1 %v8375_v8  ;;  %v8459_v4 = vld [vmem:[%s11869_s1 + $0xe24] ss:$40 sps:$4 sm:$0xff]  }
 0x169   :  { %5147 = vmatprep.subr.bf16.mxu0 %v8378_v9  ;;  %v8462_v8 = vld [vmem:[%s11869_s1 + $0x42c] ss:$40 sps:$4 sm:$0xff]   ;;  %v8457_v9 = vld [vmem:[%s11869_s1 + $0xe20] ss:$40 sps:$4 sm:$0xff]  }
 0x16b   :  { %5052 = vmatpush1.bf16.msra.mxu1 %v8373_v10  ;;  %v8460_v10 = vld [vmem:[%s11869_s1 + $0x428] ss:$40 sps:$4 sm:$0xff]  }
 0x16c   :  { %5148 = vmatpush1.bf16.msra.mxu0 %v8376_v11  ;;  %5289 = vmatprep.subr.bf16.mxu1 %v8384_v14  ;;  %v8465_v11 = vld [vmem:[%s11869_s1 + $0xe74] ss:$40 sps:$4 sm:$0xff]   ;;  %v8463_v14 = vld [vmem:[%s11869_s1 + $0xe70] ss:$40 sps:$4 sm:$0xff]  }
 0x16d   :  { %5160 = vmatprep.subr.bf16.mxu0 %v8381_v13  ;;  %v8468_v13 = vld [vmem:[%s11869_s1 + $0x47c] ss:$40 sps:$4 sm:$0xff]  }
 0x16e   :  { %5064 = vmatmul.mubr.bf16.vlgmr.msra.gmra.mrb[4].mxu1 %v9049_v21  ;;  %v8472_v21 = vld [vmem:[%s11869_s1 + $0x4c8] ss:$40 sps:$4 sm:$0xff]  }
 0x16f   :  { %5150 = vmatmul.mubr.bf16.vlgmr.msra.gmra.mrb[4].mxu0 %v10312_v49  ;;  %5290 = vmatpush1.bf16.msra.mxu1 %v8382_v16  ;;  %v8471_v16 = vld [vmem:[%s11869_s1 + $0xec4] ss:$40 sps:$4 sm:$0xff]  }
 0x170   :  { %5161 = vmatpush1.bf16.msra.mxu0 %v8379_v15  ;;  %5291 = vmatprep.subr.bf16.mxu1 %v8390_v19  ;;  %v8466_v15 = vld [vmem:[%s11869_s1 + $0x478] ss:$40 sps:$4 sm:$0xff]  }
 0x171   :  { %5162 = vmatprep.subr.bf16.mxu0 %v8387_v6  ;;  %5192 = vmatprep.mubr.bf16.mxu0 %v10330_v25  ;;  %v8474_v6 = vld [vmem:[%s11869_s1 + $0x4cc] ss:$40 sps:$4 sm:$0xff]   ;;  %v8469_v19 = vld [vmem:[%s11869_s1 + $0xec0] ss:$40 sps:$4 sm:$0xff]  }
 0x172   :  { %5321 = vmatprep.mubr.bf16.mxu1 %v9912_v5  ;;  %v8402_v5 = vld [vmem:[%s11869_s1 + $0x10c] ss:$40 sps:$4 sm:$0xff]  }
 0x173   :  { %5292 = vmatpush1.bf16.msra.mxu1 %v8388_v7  ;;  %v8480_v7 = vld [vmem:[%s11869_s1 + $0x51c] ss:$40 sps:$4 sm:$0xff]  }
 0x174   :  { %5163 = vmatpush1.bf16.msra.mxu0 %v8385_v22  ;;  %5293 = vmatprep.subr.bf16.mxu1 %v8396_v24  ;;  %v8477_v22 = vld [vmem:[%s11869_s1 + $0xf14] ss:$40 sps:$4 sm:$0xff]   ;;  %v8478_v24 = vld [vmem:[%s11869_s1 + $0x518] ss:$40 sps:$4 sm:$0xff]  }
 0x175   :  { %5164 = vmatprep.subr.bf16.mxu0 %v8393_v23  ;;  %v8475_v23 = vld [vmem:[%s11869_s1 + $0xf10] ss:$40 sps:$4 sm:$0xff]  }
 0x177   :  { %5294 = vmatpush1.bf16.msra.mxu1 %v8394_v26  ;;  %v8486_v26 = vld [vmem:[%s11869_s1 + $0x56c] ss:$40 sps:$4 sm:$0xff]  }
 0x178   :  { %5165 = vmatpush1.bf16.msra.mxu0 %v8391_v33  ;;  %5295 = vmatprep.subr.bf16.mxu1 %v8402_v5  ;;  %v8483_v33 = vld [vmem:[%s11869_s1 + $0xf64] ss:$40 sps:$4 sm:$0xff]   ;;  %v9053_v5 = vld [vmem:[%s11870_s0] ss:$40 sps:$4 sm:$0xff]  }
 0x179   :  { %5166 = vmatprep.subr.bf16.mxu0 %v8399_v12  ;;  %v10517_v12 = vld [vmem:[%s11870_s0 + $0x10] ss:$40 sps:$4 sm:$0xff]  }
 0x17b   :  { %5296 = vmatpush1.bf16.msra.mxu1 %v8400_v28  ;;  %v8484_v28 = vld [vmem:[%s11869_s1 + $0x568] ss:$40 sps:$4 sm:$0xff]  }
 0x17c   :  { %5167 = vmatpush1.bf16.msra.mxu0 %v8397_v27  ;;  %5297 = vmatprep.subr.bf16.mxu1 %v8408_v18  ;;  %v8481_v27 = vld [vmem:[%s11869_s1 + $0xf60] ss:$40 sps:$4 sm:$0xff]   ;;  %v8489_v18 = vld [vmem:[%s11869_s1 + $0xfb4] ss:$40 sps:$4 sm:$0xff]  }
 0x17d   :  { %5168 = vmatprep.subr.bf16.mxu0 %v8405_v29  ;;  %v791_v29 = vlaneseq }
 0x17f   :  { %5298 = vmatpush1.bf16.msra.mxu1 %v8406_v31  ;;  %v10538_v31 = vld [vmem:[%s11870_s0 + $0x1c] ss:$40 sps:$4 sm:$0xff]  }
 0x180   :  { %5169 = vmatpush1.bf16.msra.mxu0 %v8403_v30  ;;  %5299 = vmatprep.subr.bf16.mxu1 %v8414_v34  ;;  %v8492_v30 = vld [vmem:[%s11869_s1 + $0x5bc] ss:$40 sps:$4 sm:$0xff]   ;;  %v8487_v34 = vld [vmem:[%s11869_s1 + $0xfb0] ss:$40 sps:$4 sm:$0xff]  }
 0x181   :  { %5170 = vmatprep.subr.bf16.mxu0 %v8411_v32  ;;  %v9055_v32 = vld [vmem:[%s11870_s0 + $0xc] ss:$40 sps:$4 sm:$0xff]  }
 0x183   :  { %5300 = vmatpush1.bf16.msra.mxu1 %v8412_v36  ;;  %v10550_v36 = vshrl.u32 %v791_v29, 7  ;;  %v8535_v29 = vld [vmem:[%s11869_s1 + $0x1230] ss:$40 sps:$4 sm:$0xff]  }
 0x184   :  { %5171 = vmatpush1.bf16.msra.mxu0 %v8409_v35  ;;  %5301 = vmatprep.subr.bf16.mxu1 %v8420_v37  ;;  %v8490_v35 = vld [vmem:[%s11869_s1 + $0x5b8] ss:$40 sps:$4 sm:$0xff]   ;;  %v8498_v37 = vld [vmem:[%s11869_s1 + $0x60c] ss:$40 sps:$4 sm:$0xff]  }
 0x185   :  { %5172 = vmatprep.subr.bf16.mxu0 %v8417_v17  ;;  %v8495_v17 = vld [vmem:[%s11869_s1 + $0x1004] ss:$40 sps:$4 sm:$0xff]  }
 0x187   :  { %5302 = vmatpush1.bf16.msra.mxu1 %v8418_v39  ;;  %v8493_v39 = vld [vmem:[%s11869_s1 + $0x1000] ss:$40 sps:$4 sm:$0xff]  }
 0x188   :  { %5173 = vmatpush1.bf16.msra.mxu0 %v8415_v38  ;;  %5303 = vmatprep.subr.bf16.mxu1 %v8426_v40  ;;  %v10561_v38 = vld [vmem:[%s11871_s2] sm:$0xff]  ;;  %v793_v40 = vsub.s32 0, %v10550_v36 }
 0x189   :  { %5174 = vmatprep.subr.bf16.mxu0 %v8423_v20  ;;  %v8496_v20 = vld [vmem:[%s11869_s1 + $0x608] ss:$40 sps:$4 sm:$0xff]  }
 0x18b   :  { %5304 = vmatpush1.bf16.msra.mxu1 %v8424_v42  ;;  %v8504_v42 = vld [vmem:[%s11869_s1 + $0x65c] ss:$40 sps:$4 sm:$0xff]  }
 0x18c   :  { %5175 = vmatpush1.bf16.msra.mxu0 %v8421_v41  ;;  %5305 = vmatprep.subr.bf16.mxu1 %v8432_v44  ;;  %v8501_v41 = vld [vmem:[%s11869_s1 + $0x1054] ss:$40 sps:$4 sm:$0xff]   ;;  %v8499_v44 = vld [vmem:[%s11869_s1 + $0x1050] ss:$40 sps:$4 sm:$0xff]  }
 0x18d   :  { %5176 = vmatprep.subr.bf16.mxu0 %v8429_v43  ;;  %v797_v43 = vsub.s32 1, %v10550_v36 }
 0x18f   :  { %5306 = vmatpush1.bf16.msra.mxu1 %v8430_v46  ;;  %v794_v46 = vrot.slane %v10561_v38, %v793_v40 }
 0x190   :  { %5177 = vmatpush1.bf16.msra.mxu0 %v8427_v45  ;;  %5307 = vmatprep.subr.bf16.mxu1 %v8438_v48  ;;  %v8502_v45 = vld [vmem:[%s11869_s1 + $0x658] ss:$40 sps:$4 sm:$0xff]   ;;  %v8510_v48 = vld [vmem:[%s11869_s1 + $0x6ac] ss:$40 sps:$4 sm:$0xff]  }
 0x191   :  { %5178 = vmatprep.subr.bf16.mxu0 %v8435_v47  ;;  %v8507_v47 = vld [vmem:[%s11869_s1 + $0x10a4] ss:$40 sps:$4 sm:$0xff]  }
 0x193   :  { %5308 = vmatpush1.bf16.msra.mxu1 %v8436_v51  ;;  %v8505_v51 = vld [vmem:[%s11869_s1 + $0x10a0] ss:$40 sps:$4 sm:$0xff]  }
 0x194   :  { %5179 = vmatpush1.bf16.msra.mxu0 %v8433_v50  ;;  %5309 = vmatprep.subr.bf16.mxu1 %v8444_v53  ;;  %v798_v50 = vrot.slane %v10561_v38, %v797_v43  ;;  %v4679_v53 = vadd.f32 %v10055_v54, %v794_v46 }
 0x195   :  { %5180 = vmatprep.subr.bf16.mxu0 %v8441_v52  ;;  %v8508_v52 = vld [vmem:[%s11869_s1 + $0x6a8] ss:$40 sps:$4 sm:$0xff]  }
 0x197   :  { %5310 = vmatpush1.bf16.msra.mxu1 %v8442_v56  ;;  %v8516_v56 = vld [vmem:[%s11869_s1 + $0x6fc] ss:$40 sps:$4 sm:$0xff]  }
 0x198   :  { %5181 = vmatpush1.bf16.msra.mxu0 %v8439_v55  ;;  %5311 = vmatprep.subr.bf16.mxu1 %v8450_v61  ;;  %v8513_v55 = vld [vmem:[%s11869_s1 + $0x10f4] ss:$40 sps:$4 sm:$0xff]  }
 0x199   :  { %5182 = vmatprep.subr.bf16.mxu0 %v8447_v60  ;;  %v4681_v60 = vadd.f32 %v10063_v57, %v798_v50 }
 0x19b   :  { %5312 = vmatpush1.bf16.msra.mxu1 %v8448_v63 }
 0x19c   :  { %5183 = vmatpush1.bf16.msra.mxu0 %v8445_v62  ;;  %5313 = vmatprep.subr.bf16.mxu1 %v8456_v1  ;;  %v4683_v62 = vadd.f32 %v10065_v58, %v794_v46  ;;  %v4685_v1 = vadd.f32 %v10067_v59, %v798_v50  ;;  %v8519_v58 = vld [vmem:[%s11869_s1 + $0x1144] ss:$40 sps:$4 sm:$0xff]   ;;  %v8561_v46 = vld [vmem:[%s11869_s1 + $0x1374] ss:$40 sps:$4 sm:$0xff]   ;;  %v8562_v50 = vld [vmem:[%s11869_s1 + $0x978] ss:$40 sps:$4 sm:$0xff]  }
 0x19d   :  { %5184 = vmatprep.subr.bf16.mxu0 %v8453_v0  ;;  %v8522_v59 = vld [vmem:[%s11869_s1 + $0x74c] ss:$40 sps:$4 sm:$0xff]  }
 0x19f   :  { %5314 = vmatpush1.bf16.msra.mxu1 %v8454_v3  ;;  %v8511_v3 = vld [vmem:[%s11869_s1 + $0x10f0] ss:$40 sps:$4 sm:$0xff]  }
 0x1a0   :  { %5185 = vmatpush1.bf16.msra.mxu0 %v8451_v2  ;;  %5315 = vmatprep.subr.bf16.mxu1 %v8462_v8 }
 0x1a1   :  { %5186 = vmatprep.subr.bf16.mxu0 %v8459_v4  ;;  %v8514_v4 = vld [vmem:[%s11869_s1 + $0x6f8] ss:$40 sps:$4 sm:$0xff]  }
 0x1a3   :  { %5316 = vmatpush1.bf16.msra.mxu1 %v8460_v10 }
 0x1a4   :  { %5187 = vmatpush1.bf16.msra.mxu0 %v8457_v9  ;;  %5317 = vmatprep.subr.bf16.mxu1 %v8468_v13 }
 0x1a5   :  { %5188 = vmatprep.subr.bf16.mxu0 %v8465_v11 }
 0x1a7   :  { %5318 = vmatpush1.bf16.msra.mxu1 %v8466_v15  ;;  %v8517_v15 = vld [vmem:[%s11869_s1 + $0x1140] ss:$40 sps:$4 sm:$0xff]  }
 0x1a8   :  { %5189 = vmatpush1.bf16.msra.mxu0 %v8463_v14  ;;  %5319 = vmatprep.subr.bf16.mxu1 %v8474_v6 }
 0x1a9   :  { %5190 = vmatprep.subr.bf16.mxu0 %v8471_v16  ;;  %v8520_v16 = vld [vmem:[%s11869_s1 + $0x748] ss:$40 sps:$4 sm:$0xff]  }
 0x1ab   :  { %5320 = vmatpush1.bf16.msra.mxu1 %v8472_v21  ;;  %v8528_v21 = vld [vmem:[%s11869_s1 + $0x79c] ss:$40 sps:$4 sm:$0xff]  }
 0x1ac   :  { %5191 = vmatpush1.bf16.msra.mxu0 %v8469_v19  ;;  %5332 = vmatprep.subr.bf16.mxu1 %v8480_v7  ;;  %v8525_v19 = vld [vmem:[%s11869_s1 + $0x1194] ss:$40 sps:$4 sm:$0xff]   ;;  %v8523_v7 = vld [vmem:[%s11869_s1 + $0x1190] ss:$40 sps:$4 sm:$0xff]  }
 0x1ad   :  { %5203 = vmatprep.subr.bf16.mxu0 %v8477_v22 }
 0x1ae   :  { %5322 = vmatmul.mubr.bf16.vlgmr.msra.gmra.mrb[8].mxu1 %v9053_v5  ;;  %v8532_v5 = vld [vmem:[%s11869_s1 + $0x7e8] ss:$40 sps:$4 sm:$0xff]  }
 0x1af   :  { %5193 = vmatmul.mubr.bf16.vlgmr.msra.gmra.mrb[4].mxu0 %v10517_v12  ;;  %5333 = vmatpush1.bf16.msra.mxu1 %v8478_v24  ;;  %v8531_v24 = vld [vmem:[%s11869_s1 + $0x11e4] ss:$40 sps:$4 sm:$0xff]  }
 0x1b0   :  { %5204 = vmatpush1.bf16.msra.mxu0 %v8475_v23  ;;  %5334 = vmatprep.subr.bf16.mxu1 %v8486_v26  ;;  %v8526_v23 = vld [vmem:[%s11869_s1 + $0x798] ss:$40 sps:$4 sm:$0xff]  }
 0x1b1   :  { %5205 = vmatprep.subr.bf16.mxu0 %v8483_v33  ;;  %5235 = vmatprep.mubr.bf16.mxu0 %v10538_v31  ;;  %v8534_v33 = vld [vmem:[%s11869_s1 + $0x7ec] ss:$40 sps:$4 sm:$0xff]   ;;  %v8529_v26 = vld [vmem:[%s11869_s1 + $0x11e0] ss:$40 sps:$4 sm:$0xff]  }
 0x1b2   :  { %5364 = vmatprep.mubr.bf16.mxu1 %v9055_v32  ;;  %v8546_v32 = vld [vmem:[%s11869_s1 + $0x88c] ss:$40 sps:$4 sm:$0xff]  }
 0x1b3   :  { %5335 = vmatpush1.bf16.msra.mxu1 %v8484_v28  ;;  %v8540_v28 = vld [vmem:[%s11869_s1 + $0x83c] ss:$40 sps:$4 sm:$0xff]  }
 0x1b4   :  { %5206 = vmatpush1.bf16.msra.mxu0 %v8481_v27  ;;  %5336 = vmatprep.subr.bf16.mxu1 %v8492_v30  ;;  %v8537_v27 = vld [vmem:[%s11869_s1 + $0x1234] ss:$40 sps:$4 sm:$0xff]   ;;  %v8543_v30 = vld [vmem:[%s11869_s1 + $0x1284] ss:$40 sps:$4 sm:$0xff]  }
 0x1b5   :  { %5207 = vmatprep.subr.bf16.mxu0 %v8489_v18  ;;  %v8538_v18 = vld [vmem:[%s11869_s1 + $0x838] ss:$40 sps:$4 sm:$0xff]  }
 0x1b7   :  { %5337 = vmatpush1.bf16.msra.mxu1 %v8490_v35  ;;  %v8544_v35 = vld [vmem:[%s11869_s1 + $0x888] ss:$40 sps:$4 sm:$0xff]  }
 0x1b8   :  { %5208 = vmatpush1.bf16.msra.mxu0 %v8487_v34  ;;  %5338 = vmatprep.subr.bf16.mxu1 %v8498_v37  ;;  %v8541_v34 = vld [vmem:[%s11869_s1 + $0x1280] ss:$40 sps:$4 sm:$0xff]   ;;  %v8552_v37 = vld [vmem:[%s11869_s1 + $0x8dc] ss:$40 sps:$4 sm:$0xff]  }
 0x1b9   :  { %5209 = vmatprep.subr.bf16.mxu0 %v8495_v17  ;;  %v8549_v17 = vld [vmem:[%s11869_s1 + $0x12d4] ss:$40 sps:$4 sm:$0xff]  }
 0x1bb   :  { %5339 = vmatpush1.bf16.msra.mxu1 %v8496_v20  ;;  %v8550_v20 = vld [vmem:[%s11869_s1 + $0x8d8] ss:$40 sps:$4 sm:$0xff]  }
 0x1bc   :  { %5210 = vmatpush1.bf16.msra.mxu0 %v8493_v39  ;;  %5340 = vmatprep.subr.bf16.mxu1 %v8504_v42  ;;  %v8547_v39 = vld [vmem:[%s11869_s1 + $0x12d0] ss:$40 sps:$4 sm:$0xff]   ;;  %v8558_v42 = vld [vmem:[%s11869_s1 + $0x92c] ss:$40 sps:$4 sm:$0xff]  }
 0x1bd   :  { %5211 = vmatprep.subr.bf16.mxu0 %v8501_v41  ;;  %v8555_v41 = vld [vmem:[%s11869_s1 + $0x1324] ss:$40 sps:$4 sm:$0xff]  }
 0x1bf   :  { %5341 = vmatpush1.bf16.msra.mxu1 %v8502_v45  ;;  %v8556_v45 = vld [vmem:[%s11869_s1 + $0x928] ss:$40 sps:$4 sm:$0xff]  }
 0x1c0   :  { %5212 = vmatpush1.bf16.msra.mxu0 %v8499_v44  ;;  %5342 = vmatprep.subr.bf16.mxu1 %v8510_v48  ;;  %v8553_v44 = vld [vmem:[%s11869_s1 + $0x1320] ss:$40 sps:$4 sm:$0xff]   ;;  %v8559_v48 = vld [vmem:[%s11869_s1 + $0x1370] ss:$40 sps:$4 sm:$0xff]  }
 0x1c1   :  { %5213 = vmatprep.subr.bf16.mxu0 %v8507_v47  ;;  %v8564_v47 = vld [vmem:[%s11869_s1 + $0x97c] ss:$40 sps:$4 sm:$0xff]  }
 0x1c2   :  { %v4850_v61 = vpop.f32.mrb[0].mxu0 }
 0x1c3   :  { %v7717_v63 = vadd.f32 %v4850_v61, %v4679_v53  ;;  %v4852_v0 = vpop.f32.mrb[1].mxu0  ;;  %5343 = vmatpush1.bf16.msra.mxu1 %v8508_v52  ;;  %v8570_v52 = vld [vmem:[%s11869_s1 + $0x9cc] ss:$40 sps:$4 sm:$0xff]   ;;  %v8565_v53 = vld [vmem:[%s11869_s1 + $0x13c0] ss:$40 sps:$4 sm:$0xff]  }
 0x1c4   :  { %v7719_v54 = vadd.f32 %v4852_v0, %v4681_v60  ;;  %v4854_v2 = vpop.f32.mrb[2].mxu0  ;;  %5214 = vmatpush1.bf16.msra.mxu0 %v8505_v51  ;;  %5344 = vmatprep.subr.bf16.mxu1 %v8516_v56  ;;  %v8567_v51 = vld [vmem:[%s11869_s1 + $0x13c4] ss:$40 sps:$4 sm:$0xff]   ;;  %v8573_v56 = vld [vmem:[%s11869_s1 + $0x1414] ss:$40 sps:$4 sm:$0xff]  }
 0x1c5   :  { %v7721_v57 = vadd.f32 %v4854_v2, %v4683_v62  ;;  %v4856_v8 = vpop.f32.mrb[3].mxu0  ;;  %5215 = vmatprep.subr.bf16.mxu0 %v8513_v55  ;;  %v5719_v10 = vmax.f32 %v7717_v63, 0.0  ;;  %v8568_v55 = vld [vmem:[%s11869_s1 + $0x9c8] ss:$40 sps:$4 sm:$0xff]   ;;  %v8576_v60 = vld [vmem:[%s11869_s1 + $0xa1c] ss:$40 sps:$4 sm:$0xff]  }
 0x1c6   :  { %v7723_v9 = vadd.f32 %v4856_v8, %v4685_v1  ;;  %v5720_v13 = vmax.f32 %v7719_v54, 0.0  ;;  %v8571_v61 = vld [vmem:[%s11869_s1 + $0x1410] ss:$40 sps:$4 sm:$0xff]   ;;  %v8579_v63 = vld [vmem:[%s11869_s1 + $0x1464] ss:$40 sps:$4 sm:$0xff]  }
 0x1c7   :  { %v5729_v11 = vmax.f32 %v7721_v57, 0.0  ;;  %5345 = vmatpush1.bf16.msra.mxu1 %v8514_v4  ;;  %v8574_v62 = vld [vmem:[%s11869_s1 + $0xa18] ss:$40 sps:$4 sm:$0xff]   ;;  %v8582_v0 = vld [vmem:[%s11869_s1 + $0xa6c] ss:$40 sps:$4 sm:$0xff]  }
 0x1c8   :  { %v5730_v14 = vmax.f32 %v7723_v9, 0.0  ;;  %5216 = vmatpush1.bf16.msra.mxu0 %v8511_v3  ;;  %5346 = vmatprep.subr.bf16.mxu1 %v8522_v59  ;;  %v10750_v1 = vld [vmem:[%s11870_s0 + $0x18] ss:$40 sps:$4 sm:$0xff]   ;;  %v8580_v2 = vld [vmem:[%s11869_s1 + $0xa68] ss:$40 sps:$4 sm:$0xff]  }
 0x1c9   :  { %v10629_v6 = vpack.c.bf16 %v5729_v11, %v5719_v10  ;;  %5217 = vmatprep.subr.bf16.mxu0 %v8519_v58  ;;  %v8577_v54 = vld [vmem:[%s11869_s1 + $0x1460] ss:$40 sps:$4 sm:$0xff]   ;;  %v8585_v3 = vld [vmem:[%s11869_s1 + $0x14b4] ss:$40 sps:$4 sm:$0xff]   ;;  %v10769_v4 = vld [vmem:[%s11870_s0 + $0x24] ss:$40 sps:$4 sm:$0xff]  }
 0x1ca   :  { %v10637_v22 = vpack.c.bf16 %v5730_v14, %v5720_v13  ;;  %v8583_v57 = vld [vmem:[%s11869_s1 + $0x14b0] ss:$40 sps:$4 sm:$0xff]   ;;  %v8591_v58 = vld [vmem:[%s11869_s1 + $0x1504] ss:$40 sps:$4 sm:$0xff]   ;;  %v8589_v59 = vld [vmem:[%s11869_s1 + $0x1500] ss:$40 sps:$4 sm:$0xff]  }
 0x1cb   :  { %5347 = vmatpush1.bf16.msra.mxu1 %v8520_v16  ;;  %v8586_v8 = vld [vmem:[%s11869_s1 + $0xab8] ss:$40 sps:$4 sm:$0xff]   ;;  %v8592_v9 = vld [vmem:[%s11869_s1 + $0xb08] ss:$40 sps:$4 sm:$0xff]   ;;  %v8597_v10 = vld [vmem:[%s11869_s1 + $0x1554] ss:$40 sps:$4 sm:$0xff]  }
 0x1cc   :  { %5218 = vmatpush1.bf16.msra.mxu0 %v8517_v15  ;;  %5348 = vmatprep.subr.bf16.mxu1 %v8528_v21  ;;  %v8600_v11 = vld [vmem:[%s11869_s1 + $0xb5c] ss:$40 sps:$4 sm:$0xff]   ;;  %v8595_v13 = vld [vmem:[%s11869_s1 + $0x1550] ss:$40 sps:$4 sm:$0xff]   ;;  %v8606_v16 = vld [vmem:[%s11869_s1 + $0xbac] ss:$40 sps:$4 sm:$0xff]  }
 0x1cd   :  { %5219 = vmatprep.subr.bf16.mxu0 %v8525_v19  ;;  %v8598_v14 = vld [vmem:[%s11869_s1 + $0xb58] ss:$40 sps:$4 sm:$0xff]   ;;  %v8603_v15 = vld [vmem:[%s11869_s1 + $0x15a4] ss:$40 sps:$4 sm:$0xff]   ;;  %v8604_v21 = vld [vmem:[%s11869_s1 + $0xba8] ss:$40 sps:$4 sm:$0xff]  }
 0x1ce   :  { %v8601_v19 = vld [vmem:[%s11869_s1 + $0x15a0] ss:$40 sps:$4 sm:$0xff]  }
 0x1cf   :  { %5349 = vmatpush1.bf16.msra.mxu1 %v8526_v23  ;;  %v8612_v23 = vld [vmem:[%s11869_s1 + $0xbfc] ss:$40 sps:$4 sm:$0xff]  }
 0x1d0   :  { %5220 = vmatpush1.bf16.msra.mxu0 %v8523_v7  ;;  %5350 = vmatprep.subr.bf16.mxu1 %v8534_v33  ;;  %v8609_v7 = vld [vmem:[%s11869_s1 + $0x15f4] ss:$40 sps:$4 sm:$0xff]   ;;  %v8610_v33 = vld [vmem:[%s11869_s1 + $0xbf8] ss:$40 sps:$4 sm:$0xff]  }
 0x1d1   :  { %5221 = vmatprep.subr.bf16.mxu0 %v8531_v24  ;;  %v8607_v24 = vld [vmem:[%s11869_s1 + $0x15f0] ss:$40 sps:$4 sm:$0xff]  }
 0x1d3   :  { %5351 = vmatpush1.bf16.msra.mxu1 %v8532_v5  ;;  %v8618_v5 = vld [vmem:[%s11869_s1 + $0xc4c] ss:$40 sps:$4 sm:$0xff]  }
 0x1d4   :  { %5222 = vmatpush1.bf16.msra.mxu0 %v8529_v26  ;;  %5352 = vmatprep.subr.bf16.mxu1 %v8540_v28  ;;  %v8615_v26 = vld [vmem:[%s11869_s1 + $0x1644] ss:$40 sps:$4 sm:$0xff]   ;;  %v8616_v28 = vld [vmem:[%s11869_s1 + $0xc48] ss:$40 sps:$4 sm:$0xff]  }
 0x1d5   :  { %5223 = vmatprep.subr.bf16.mxu0 %v8537_v27  ;;  %v8613_v27 = vld [vmem:[%s11869_s1 + $0x1640] ss:$40 sps:$4 sm:$0xff]  }
 0x1d7   :  { %5353 = vmatpush1.bf16.msra.mxu1 %v8538_v18  ;;  %v8624_v18 = vld [vmem:[%s11869_s1 + $0xc9c] ss:$40 sps:$4 sm:$0xff]  }
 0x1d8   :  { %5224 = vmatpush1.bf16.msra.mxu0 %v8535_v29  ;;  %5354 = vmatprep.subr.bf16.mxu1 %v8546_v32  ;;  %v8621_v29 = vld [vmem:[%s11869_s1 + $0x1694] ss:$40 sps:$4 sm:$0xff]   ;;  %v8622_v32 = vld [vmem:[%s11869_s1 + $0xc98] ss:$40 sps:$4 sm:$0xff]  }
 0x1d9   :  { %5225 = vmatprep.subr.bf16.mxu0 %v8543_v30  ;;  %v8619_v30 = vld [vmem:[%s11869_s1 + $0x1690] ss:$40 sps:$4 sm:$0xff]  }
 0x1db   :  { %5355 = vmatpush1.bf16.msra.mxu1 %v8544_v35  ;;  %v8630_v35 = vld [vmem:[%s11869_s1 + $0xcec] ss:$40 sps:$4 sm:$0xff]  }
 0x1dc   :  { %5226 = vmatpush1.bf16.msra.mxu0 %v8541_v34  ;;  %5356 = vmatprep.subr.bf16.mxu1 %v8552_v37  ;;  %v8627_v34 = vld [vmem:[%s11869_s1 + $0x16e4] ss:$40 sps:$4 sm:$0xff]   ;;  %v8628_v37 = vld [vmem:[%s11869_s1 + $0xce8] ss:$40 sps:$4 sm:$0xff]  }
 0x1dd   :  { %5227 = vmatprep.subr.bf16.mxu0 %v8549_v17  ;;  %v8625_v17 = vld [vmem:[%s11869_s1 + $0x16e0] ss:$40 sps:$4 sm:$0xff]  }
 0x1df   :  { %5357 = vmatpush1.bf16.msra.mxu1 %v8550_v20  ;;  %v8636_v20 = vld [vmem:[%s11869_s1 + $0xd3c] ss:$40 sps:$4 sm:$0xff]  }
 0x1e0   :  { %5228 = vmatpush1.bf16.msra.mxu0 %v8547_v39  ;;  %5358 = vmatprep.subr.bf16.mxu1 %v8558_v42  ;;  %v8633_v39 = vld [vmem:[%s11869_s1 + $0x1734] ss:$40 sps:$4 sm:$0xff]   ;;  %v8634_v42 = vld [vmem:[%s11869_s1 + $0xd38] ss:$40 sps:$4 sm:$0xff]  }
 0x1e1   :  { %5229 = vmatprep.subr.bf16.mxu0 %v8555_v41  ;;  %v8631_v41 = vld [vmem:[%s11869_s1 + $0x1730] ss:$40 sps:$4 sm:$0xff]  }
 0x1e3   :  { %5359 = vmatpush1.bf16.msra.mxu1 %v8556_v45  ;;  %v8642_v45 = vld [vmem:[%s11869_s1 + $0x24] ss:$40 sps:$4 sm:$0xff]  }
 0x1e4   :  { %5230 = vmatpush1.bf16.msra.mxu0 %v8553_v44  ;;  %5360 = vmatprep.subr.bf16.mxu1 %v8564_v47  ;;  %v8639_v44 = vld [vmem:[%s11869_s1 + $0xd8c] ss:$40 sps:$4 sm:$0xff]   ;;  %v8640_v47 = vld [vmem:[%s11869_s1 + $0x20] ss:$40 sps:$4 sm:$0xff]  }
 0x1e5   :  { %5231 = vmatprep.subr.bf16.mxu0 %v8561_v46  ;;  %v8637_v46 = vld [vmem:[%s11869_s1 + $0xd88] ss:$40 sps:$4 sm:$0xff]  }
 0x1e7   :  { %5361 = vmatpush1.bf16.msra.mxu1 %v8562_v50  ;;  %v8648_v50 = vld [vmem:[%s11869_s1 + $0x74] ss:$40 sps:$4 sm:$0xff]  }
 0x1e8   :  { %5232 = vmatpush1.bf16.msra.mxu0 %v8559_v48  ;;  %5362 = vmatprep.subr.bf16.mxu1 %v8570_v52  ;;  %v8645_v48 = vld [vmem:[%s11869_s1 + $0xddc] ss:$40 sps:$4 sm:$0xff]   ;;  %v10900_v52 = vld [vmem:[%s11870_s0 + $0x20] ss:$40 sps:$4 sm:$0xff]  }
 0x1e9   :  { %5233 = vmatprep.subr.bf16.mxu0 %v8567_v51  ;;  %v8643_v51 = vld [vmem:[%s11869_s1 + $0xdd8] ss:$40 sps:$4 sm:$0xff]  }
 0x1eb   :  { %5363 = vmatpush1.bf16.msra.mxu1 %v8568_v55  ;;  %v8651_v55 = vld [vmem:[%s11869_s1 + $0xe2c] ss:$40 sps:$4 sm:$0xff]  }
 0x1ec   :  { %5234 = vmatpush1.bf16.msra.mxu0 %v8565_v53  ;;  %5375 = vmatprep.subr.bf16.mxu1 %v8576_v60  ;;  %v8646_v53 = vld [vmem:[%s11869_s1 + $0x70] ss:$40 sps:$4 sm:$0xff]   ;;  %v9059_v60 = vld [vmem:[%s11870_s0 + $0x4] ss:$40 sps:$4 sm:$0xff]  }
 0x1ed   :  { %5246 = vmatprep.subr.bf16.mxu0 %v8573_v56  ;;  %v8654_v56 = vld [vmem:[%s11869_s1 + $0xc4] ss:$40 sps:$4 sm:$0xff]  }
 0x1ee   :  { %5365 = vmatmul.mubr.bf16.vlgmr.msra.gmra.mrb[8].mxu1 %v10312_v49  ;;  %v8588_v49 = vld [vmem:[%s11869_s1 + $0xabc] ss:$40 sps:$4 sm:$0xff]  }
 0x1ef   :  { %5236 = vmatmul.mubr.bf16.vlgmr.msra.gmra.mrb[4].mxu0 %v10750_v1  ;;  %5376 = vmatpush1.bf16.msra.mxu1 %v8574_v62  ;;  %v8652_v62 = vld [vmem:[%s11869_s1 + $0xc0] ss:$40 sps:$4 sm:$0xff]  }
 0x1f0   :  { %5247 = vmatpush1.bf16.msra.mxu0 %v8571_v61  ;;  %5377 = vmatprep.subr.bf16.mxu1 %v8582_v0  ;;  %v8649_v61 = vld [vmem:[%s11869_s1 + $0xe28] ss:$40 sps:$4 sm:$0xff]   ;;  %v8660_v0 = vld [vmem:[%s11869_s1 + $0x114] ss:$40 sps:$4 sm:$0xff]  }
 0x1f1   :  { %5248 = vmatprep.subr.bf16.mxu0 %v8579_v63  ;;  %7484 = vmatprep.mubr.msk.bf16.mxu0 %vm4640_vm0, %v10769_v4  ;;  %v8657_v63 = vld [vmem:[%s11869_s1 + $0xe7c] ss:$40 sps:$4 sm:$0xff]  }
 0x1f2   :  { %5407 = vmatprep.mubr.bf16.mxu1 %v10330_v25  ;;  %v8594_v25 = vld [vmem:[%s11869_s1 + $0xb0c] ss:$40 sps:$4 sm:$0xff]  }
 0x1f3   :  { %5378 = vmatpush1.bf16.msra.mxu1 %v8580_v2  ;;  %v8658_v2 = vld [vmem:[%s11869_s1 + $0x110] ss:$40 sps:$4 sm:$0xff]  }
 0x1f4   :  { %5249 = vmatpush1.bf16.msra.mxu0 %v8577_v54  ;;  %5379 = vmatprep.subr.bf16.mxu1 %v8588_v49  ;;  %v8655_v54 = vld [vmem:[%s11869_s1 + $0xe78] ss:$40 sps:$4 sm:$0xff]   ;;  %v8666_v49 = vld [vmem:[%s11869_s1 + $0x164] ss:$40 sps:$4 sm:$0xff]  }
 0x1f5   :  { %5250 = vmatprep.subr.bf16.mxu0 %v8585_v3  ;;  %v8663_v3 = vld [vmem:[%s11869_s1 + $0xecc] ss:$40 sps:$4 sm:$0xff]  }
 0x1f7   :  { %5380 = vmatpush1.bf16.msra.mxu1 %v8586_v8  ;;  %v8664_v8 = vld [vmem:[%s11869_s1 + $0x160] ss:$40 sps:$4 sm:$0xff]  }
 0x1f8   :  { %5251 = vmatpush1.bf16.msra.mxu0 %v8583_v57  ;;  %5381 = vmatprep.subr.bf16.mxu1 %v8594_v25  ;;  %v8661_v57 = vld [vmem:[%s11869_s1 + $0xec8] ss:$40 sps:$4 sm:$0xff]   ;;  %v8672_v25 = vld [vmem:[%s11869_s1 + $0x1b4] ss:$40 sps:$4 sm:$0xff]  }
 0x1f9   :  { %5252 = vmatprep.subr.bf16.mxu0 %v8591_v58  ;;  %v8669_v58 = vld [vmem:[%s11869_s1 + $0xf1c] ss:$40 sps:$4 sm:$0xff]  }
 0x1fb   :  { %5382 = vmatpush1.bf16.msra.mxu1 %v8592_v9  ;;  %v8670_v9 = vld [vmem:[%s11869_s1 + $0x1b0] ss:$40 sps:$4 sm:$0xff]  }
 0x1fc   :  { %5253 = vmatpush1.bf16.msra.mxu0 %v8589_v59  ;;  %5383 = vmatprep.subr.bf16.mxu1 %v8600_v11  ;;  %v8667_v59 = vld [vmem:[%s11869_s1 + $0xf18] ss:$40 sps:$4 sm:$0xff]   ;;  %v8678_v11 = vld [vmem:[%s11869_s1 + $0x204] ss:$40 sps:$4 sm:$0xff]  }
 0x1fd   :  { %5254 = vmatprep.subr.bf16.mxu0 %v8597_v10  ;;  %v8675_v10 = vld [vmem:[%s11869_s1 + $0xf6c] ss:$40 sps:$4 sm:$0xff]  }
 0x1ff   :  { %5384 = vmatpush1.bf16.msra.mxu1 %v8598_v14  ;;  %v8676_v14 = vld [vmem:[%s11869_s1 + $0x200] ss:$40 sps:$4 sm:$0xff]  }
 0x200   :  { %5255 = vmatpush1.bf16.msra.mxu0 %v8595_v13  ;;  %5385 = vmatprep.subr.bf16.mxu1 %v8606_v16  ;;  %v8673_v13 = vld [vmem:[%s11869_s1 + $0xf68] ss:$40 sps:$4 sm:$0xff]   ;;  %v8679_v16 = vld [vmem:[%s11869_s1 + $0xfb8] ss:$40 sps:$4 sm:$0xff]  }
 0x201   :  { %5256 = vmatprep.subr.bf16.mxu0 %v8603_v15  ;;  %v8681_v15 = vld [vmem:[%s11869_s1 + $0xfbc] ss:$40 sps:$4 sm:$0xff]  }
 0x203   :  { %5386 = vmatpush1.bf16.msra.mxu1 %v8604_v21  ;;  %v8687_v21 = vld [vmem:[%s11869_s1 + $0x100c] ss:$40 sps:$4 sm:$0xff]  }
 0x204   :  { %5257 = vmatpush1.bf16.msra.mxu0 %v8601_v19  ;;  %5387 = vmatprep.subr.bf16.mxu1 %v8612_v23  ;;  %v8682_v19 = vld [vmem:[%s11869_s1 + $0x250] ss:$40 sps:$4 sm:$0xff]   ;;  %v8688_v23 = vld [vmem:[%s11869_s1 + $0x2a0] ss:$40 sps:$4 sm:$0xff]  }
 0x205   :  { %5258 = vmatprep.subr.bf16.mxu0 %v8609_v7  ;;  %v8685_v7 = vld [vmem:[%s11869_s1 + $0x1008] ss:$40 sps:$4 sm:$0xff]  }
 0x207   :  { %5388 = vmatpush1.bf16.msra.mxu1 %v8610_v33  ;;  %v8696_v33 = vld [vmem:[%s11869_s1 + $0x2f4] ss:$40 sps:$4 sm:$0xff]  }
 0x208   :  { %5259 = vmatpush1.bf16.msra.mxu0 %v8607_v24  ;;  %5389 = vmatprep.subr.bf16.mxu1 %v8618_v5  ;;  %v8693_v24 = vld [vmem:[%s11869_s1 + $0x105c] ss:$40 sps:$4 sm:$0xff]   ;;  %v8694_v5 = vld [vmem:[%s11869_s1 + $0x2f0] ss:$40 sps:$4 sm:$0xff]  }
 0x209   :  { %5260 = vmatprep.subr.bf16.mxu0 %v8615_v26  ;;  %v8691_v26 = vld [vmem:[%s11869_s1 + $0x1058] ss:$40 sps:$4 sm:$0xff]  }
 0x20b   :  { %5390 = vmatpush1.bf16.msra.mxu1 %v8616_v28  ;;  %v805_v28 = vsub.s32 3, %v10550_v36 }
 0x20c   :  { %5261 = vmatpush1.bf16.msra.mxu0 %v8613_v27  ;;  %5391 = vmatprep.subr.bf16.mxu1 %v8624_v18  ;;  %v801_v27 = vsub.s32 2, %v10550_v36  ;;  %v8702_v18 = vld [vmem:[%s11869_s1 + $0x344] ss:$40 sps:$4 sm:$0xff]  }
 0x20d   :  { %5262 = vmatprep.subr.bf16.mxu0 %v8621_v29  ;;  %v8699_v29 = vld [vmem:[%s11869_s1 + $0x10ac] ss:$40 sps:$4 sm:$0xff]  }
 0x20f   :  { %5392 = vmatpush1.bf16.msra.mxu1 %v8622_v32  ;;  %v8697_v32 = vld [vmem:[%s11869_s1 + $0x10a8] ss:$40 sps:$4 sm:$0xff]  }
 0x210   :  { %5263 = vmatpush1.bf16.msra.mxu0 %v8619_v30  ;;  %5393 = vmatprep.subr.bf16.mxu1 %v8630_v35  ;;  %v802_v30 = vrot.slane %v10561_v38, %v801_v27  ;;  %v8700_v35 = vld [vmem:[%s11869_s1 + $0x340] ss:$40 sps:$4 sm:$0xff]   ;;  %v8753_v27 = vld [vmem:[%s11869_s1 + $0x137c] ss:$40 sps:$4 sm:$0xff]  }
 0x211   :  { %5264 = vmatprep.subr.bf16.mxu0 %v8627_v34  ;;  %v806_v34 = vrot.slane %v10561_v38, %v805_v28  ;;  %v8756_v28 = vld [vmem:[%s11869_s1 + $0x614] ss:$40 sps:$4 sm:$0xff]  }
 0x213   :  { %5394 = vmatpush1.bf16.msra.mxu1 %v8628_v37  ;;  %v8708_v37 = vld [vmem:[%s11869_s1 + $0x394] ss:$40 sps:$4 sm:$0xff]  }
 0x214   :  { %5265 = vmatpush1.bf16.msra.mxu0 %v8625_v17  ;;  %5395 = vmatprep.subr.bf16.mxu1 %v8636_v20  ;;  %v8705_v17 = vld [vmem:[%s11869_s1 + $0x10fc] ss:$40 sps:$4 sm:$0xff]   ;;  %v8703_v20 = vld [vmem:[%s11869_s1 + $0x10f8] ss:$40 sps:$4 sm:$0xff]  }
 0x215   :  { %5266 = vmatprep.subr.bf16.mxu0 %v8633_v39 }
 0x217   :  { %5396 = vmatpush1.bf16.msra.mxu1 %v8634_v42 }
 0x218   :  { %5267 = vmatpush1.bf16.msra.mxu0 %v8631_v41  ;;  %5397 = vmatprep.subr.bf16.mxu1 %v8639_v44 }
 0x219   :  { %5504 = vmatprep.subr.bf16.mxu0 %v8642_v45  ;;  %v8706_v45 = vld [vmem:[%s11869_s1 + $0x390] ss:$40 sps:$4 sm:$0xff]  }
 0x21b   :  { %5279 = vmatmul.mubr.bf16.vlgmr.msra.gmra.mrb[4].mxu0 %v10900_v52  ;;  %5398 = vmatpush1.bf16.msra.mxu1 %v8637_v46  ;;  %v8711_v46 = vld [vmem:[%s11869_s1 + $0x114c] ss:$40 sps:$4 sm:$0xff]  }
 0x21c   :  { %5505 = vmatpush1.bf16.msra.mxu0 %v8640_v47  ;;  %5399 = vmatprep.subr.bf16.mxu1 %v8645_v48 }
 0x21d   :  { %5506 = vmatprep.subr.bf16.mxu0 %v8648_v50  ;;  %5536 = vmatprep.mubr.bf16.mxu0 %v9059_v60  ;;  %v8714_v50 = vld [vmem:[%s11869_s1 + $0x3e4] ss:$40 sps:$4 sm:$0xff]  }
 0x21f   :  { %5400 = vmatpush1.bf16.msra.mxu1 %v8643_v51 }
 0x220   :  { %5507 = vmatpush1.bf16.msra.mxu0 %v8646_v53  ;;  %5401 = vmatprep.subr.bf16.mxu1 %v8651_v55  ;;  %v8709_v53 = vld [vmem:[%s11869_s1 + $0x1148] ss:$40 sps:$4 sm:$0xff]  }
 0x221   :  { %5508 = vmatprep.subr.bf16.mxu0 %v8654_v56 }
 0x223   :  { %5402 = vmatpush1.bf16.msra.mxu1 %v8649_v61 }
 0x224   :  { %5509 = vmatpush1.bf16.msra.mxu0 %v8652_v62  ;;  %5403 = vmatprep.subr.bf16.mxu1 %v8657_v63  ;;  %v8712_v62 = vld [vmem:[%s11869_s1 + $0x3e0] ss:$40 sps:$4 sm:$0xff]   ;;  %v8717_v63 = vld [vmem:[%s11869_s1 + $0x119c] ss:$40 sps:$4 sm:$0xff]  }
 0x225   :  { %5510 = vmatprep.subr.bf16.mxu0 %v8660_v0 }
 0x227   :  { %5404 = vmatpush1.bf16.msra.mxu1 %v8655_v54  ;;  %v8720_v54 = vld [vmem:[%s11869_s1 + $0x434] ss:$40 sps:$4 sm:$0xff]  }
 0x228   :  { %5511 = vmatpush1.bf16.msra.mxu0 %v8658_v2  ;;  %5405 = vmatprep.subr.bf16.mxu1 %v8663_v3  ;;  %v8715_v3 = vld [vmem:[%s11869_s1 + $0x1198] ss:$40 sps:$4 sm:$0xff]  }
 0x229   :  { %5512 = vmatprep.subr.bf16.mxu0 %v8666_v49  ;;  %v8718_v49 = vld [vmem:[%s11869_s1 + $0x430] ss:$40 sps:$4 sm:$0xff]  }
 0x22b   :  { %5406 = vmatpush1.bf16.msra.mxu1 %v8661_v57  ;;  %v8723_v57 = vld [vmem:[%s11869_s1 + $0x11ec] ss:$40 sps:$4 sm:$0xff]  }
 0x22c   :  { %5513 = vmatpush1.bf16.msra.mxu0 %v8664_v8  ;;  %5418 = vmatprep.subr.bf16.mxu1 %v8669_v58  ;;  %v8726_v8 = vld [vmem:[%s11869_s1 + $0x484] ss:$40 sps:$4 sm:$0xff]   ;;  %v8721_v58 = vld [vmem:[%s11869_s1 + $0x11e8] ss:$40 sps:$4 sm:$0xff]  }
 0x22d   :  { %5514 = vmatprep.subr.bf16.mxu0 %v8672_v25  ;;  %v8724_v25 = vld [vmem:[%s11869_s1 + $0x480] ss:$40 sps:$4 sm:$0xff]  }
 0x22e   :  { %5408 = vmatmul.mubr.bf16.vlgmr.msra.gmra.mrb[8].mxu1 %v10517_v12  ;;  %v8684_v12 = vld [vmem:[%s11869_s1 + $0x254] ss:$40 sps:$4 sm:$0xff]  }
 0x22f   :  { %5419 = vmatpush1.bf16.msra.mxu1 %v8667_v59  ;;  %5450 = vmatprep.mubr.bf16.mxu1 %v10538_v31  ;;  %v8690_v31 = vld [vmem:[%s11869_s1 + $0x2a4] ss:$40 sps:$4 sm:$0xff]  }
 0x230   :  { %5515 = vmatpush1.bf16.msra.mxu0 %v8670_v9  ;;  %5420 = vmatprep.subr.bf16.mxu1 %v8675_v10  ;;  %v8729_v59 = vld [vmem:[%s11869_s1 + $0x123c] ss:$40 sps:$4 sm:$0xff]   ;;  %v8727_v10 = vld [vmem:[%s11869_s1 + $0x1238] ss:$40 sps:$4 sm:$0xff]  }
 0x231   :  { %5516 = vmatprep.subr.bf16.mxu0 %v8678_v11  ;;  %v8732_v9 = vld [vmem:[%s11869_s1 + $0x4d4] ss:$40 sps:$4 sm:$0xff]   ;;  %v8730_v11 = vld [vmem:[%s11869_s1 + $0x4d0] ss:$40 sps:$4 sm:$0xff]  }
 0x233   :  { %5421 = vmatpush1.bf16.msra.mxu1 %v8673_v13  ;;  %v8735_v13 = vld [vmem:[%s11869_s1 + $0x128c] ss:$40 sps:$4 sm:$0xff]  }
 0x234   :  { %5517 = vmatpush1.bf16.msra.mxu0 %v8676_v14  ;;  %5422 = vmatprep.subr.bf16.mxu1 %v8681_v15  ;;  %v8738_v14 = vld [vmem:[%s11869_s1 + $0x524] ss:$40 sps:$4 sm:$0xff]   ;;  %v8733_v15 = vld [vmem:[%s11869_s1 + $0x1288] ss:$40 sps:$4 sm:$0xff]  }
 0x235   :  { %5518 = vmatprep.subr.bf16.mxu0 %v8684_v12  ;;  %v8736_v12 = vld [vmem:[%s11869_s1 + $0x520] ss:$40 sps:$4 sm:$0xff]  }
 0x237   :  { %5423 = vmatpush1.bf16.msra.mxu1 %v8679_v16  ;;  %v8741_v16 = vld [vmem:[%s11869_s1 + $0x12dc] ss:$40 sps:$4 sm:$0xff]  }
 0x238   :  { %5519 = vmatpush1.bf16.msra.mxu0 %v8682_v19  ;;  %5424 = vmatprep.subr.bf16.mxu1 %v8687_v21  ;;  %v8744_v19 = vld [vmem:[%s11869_s1 + $0x574] ss:$40 sps:$4 sm:$0xff]   ;;  %v9060_v21 = vld [vmem:[%s11870_s0] ss:$40 sps:$4 sm:$0xff]  }
 0x239   :  { %5520 = vmatprep.subr.bf16.mxu0 %v8690_v31  ;;  %v8739_v31 = vld [vmem:[%s11869_s1 + $0x12d8] ss:$40 sps:$4 sm:$0xff]  }
 0x23b   :  { %5425 = vmatpush1.bf16.msra.mxu1 %v8685_v7  ;;  %v8742_v7 = vld [vmem:[%s11869_s1 + $0x570] ss:$40 sps:$4 sm:$0xff]  }
 0x23c   :  { %5521 = vmatpush1.bf16.msra.mxu0 %v8688_v23  ;;  %5426 = vmatprep.subr.bf16.mxu1 %v8693_v24  ;;  %v8747_v23 = vld [vmem:[%s11869_s1 + $0x132c] ss:$40 sps:$4 sm:$0xff]  }
 0x23d   :  { %5522 = vmatprep.subr.bf16.mxu0 %v8696_v33  ;;  %v8750_v24 = vld [vmem:[%s11869_s1 + $0x5c4] ss:$40 sps:$4 sm:$0xff]  }
 0x23e   :  { %v9061_v33 = vld [vmem:[%s11870_s0 + $0xc] ss:$40 sps:$4 sm:$0xff]  }
 0x23f   :  { %5427 = vmatpush1.bf16.msra.mxu1 %v8691_v26  ;;  %v8745_v26 = vld [vmem:[%s11869_s1 + $0x1328] ss:$40 sps:$4 sm:$0xff]  }
 0x240   :  { %5523 = vmatpush1.bf16.msra.mxu0 %v8694_v5  ;;  %5428 = vmatprep.subr.bf16.mxu1 %v8699_v29  ;;  %v8748_v5 = vld [vmem:[%s11869_s1 + $0x5c0] ss:$40 sps:$4 sm:$0xff]  }
 0x241   :  { %5524 = vmatprep.subr.bf16.mxu0 %v8702_v18  ;;  %v5065_v39 = vpop.f32.mrb[4].mxu1  ;;  %v8751_v29 = vld [vmem:[%s11869_s1 + $0x1378] ss:$40 sps:$4 sm:$0xff]  }
 0x242   :  { %v7724_v38 = vadd.f32 %v5065_v39, %v802_v30  ;;  %v5067_v41 = vpop.f32.mrb[5].mxu1  ;;  %v8754_v18 = vld [vmem:[%s11869_s1 + $0x610] ss:$40 sps:$4 sm:$0xff]  }
 0x243   :  { %v7725_v42 = vadd.f32 %v5067_v41, %v806_v34  ;;  %v5069_v44 = vpop.f32.mrb[6].mxu1  ;;  %5429 = vmatpush1.bf16.msra.mxu1 %v8697_v32  ;;  %v8762_v32 = vld [vmem:[%s11869_s1 + $0x664] ss:$40 sps:$4 sm:$0xff]   ;;  %v8763_v39 = vld [vmem:[%s11869_s1 + $0x1418] ss:$40 sps:$4 sm:$0xff]  }
 0x244   :  { %5525 = vmatpush1.bf16.msra.mxu0 %v8700_v35  ;;  %v7726_v47 = vadd.f32 %v5069_v44, %v802_v30  ;;  %v5071_v48 = vpop.f32.mrb[7].mxu1  ;;  %5430 = vmatprep.subr.bf16.mxu1 %v8705_v17  ;;  %v5721_v55 = vmax.f32 %v7724_v38, 0.0  ;;  %v8759_v30 = vld [vmem:[%s11869_s1 + $0x13cc] ss:$40 sps:$4 sm:$0xff]   ;;  %v8760_v35 = vld [vmem:[%s11869_s1 + $0x660] ss:$40 sps:$4 sm:$0xff]  }
 0x245   :  { %5526 = vmatprep.subr.bf16.mxu0 %v8708_v37  ;;  %v7727_v51 = vadd.f32 %v5071_v48, %v806_v34  ;;  %v5722_v60 = vmax.f32 %v7725_v42, 0.0  ;;  %v8757_v34 = vld [vmem:[%s11869_s1 + $0x13c8] ss:$40 sps:$4 sm:$0xff]   ;;  %v8765_v17 = vld [vmem:[%s11869_s1 + $0x141c] ss:$40 sps:$4 sm:$0xff]  }
 0x246   :  { %v5731_v56 = vmax.f32 %v7726_v47, 0.0  ;;  %v8768_v37 = vld [vmem:[%s11869_s1 + $0x6b4] ss:$40 sps:$4 sm:$0xff]   ;;  %v8774_v41 = vld [vmem:[%s11869_s1 + $0x704] ss:$40 sps:$4 sm:$0xff]  }
 0x247   :  { %v5732_v61 = vmax.f32 %v7727_v51, 0.0  ;;  %5431 = vmatpush1.bf16.msra.mxu1 %v8703_v20  ;;  %v8766_v20 = vld [vmem:[%s11869_s1 + $0x6b0] ss:$40 sps:$4 sm:$0xff]   ;;  %v8771_v38 = vld [vmem:[%s11869_s1 + $0x146c] ss:$40 sps:$4 sm:$0xff]  }
 0x248   :  { %5527 = vmatpush1.bf16.msra.mxu0 %v8706_v45  ;;  %v11050_v0 = vpack.c.bf16 %v5731_v56, %v5721_v55  ;;  %5432 = vmatprep.subr.bf16.mxu1 %v8711_v46  ;;  %v8769_v42 = vld [vmem:[%s11869_s1 + $0x1468] ss:$40 sps:$4 sm:$0xff]   ;;  %v8777_v45 = vld [vmem:[%s11869_s1 + $0x14bc] ss:$40 sps:$4 sm:$0xff]   ;;  %v8775_v46 = vld [vmem:[%s11869_s1 + $0x14b8] ss:$40 sps:$4 sm:$0xff]  }
 0x249   :  { %5528 = vmatprep.subr.bf16.mxu0 %v8714_v50  ;;  %v11055_v2 = vpack.c.bf16 %v5732_v61, %v5722_v60  ;;  %v8772_v44 = vld [vmem:[%s11869_s1 + $0x700] ss:$40 sps:$4 sm:$0xff]   ;;  %v8778_v47 = vld [vmem:[%s11869_s1 + $0x750] ss:$40 sps:$4 sm:$0xff]   ;;  %v8783_v48 = vld [vmem:[%s11869_s1 + $0x150c] ss:$40 sps:$4 sm:$0xff]  }
 0x24a   :  { %v8781_v50 = vld [vmem:[%s11869_s1 + $0x1508] ss:$40 sps:$4 sm:$0xff]   ;;  %v8792_v55 = vld [vmem:[%s11869_s1 + $0x7f4] ss:$40 sps:$4 sm:$0xff]   ;;  %v8787_v56 = vld [vmem:[%s11869_s1 + $0x1558] ss:$40 sps:$4 sm:$0xff]  }
 0x24b   :  { %5433 = vmatpush1.bf16.msra.mxu1 %v8709_v53  ;;  %v8784_v51 = vld [vmem:[%s11869_s1 + $0x7a0] ss:$40 sps:$4 sm:$0xff]   ;;  %v8789_v53 = vld [vmem:[%s11869_s1 + $0x155c] ss:$40 sps:$4 sm:$0xff]   ;;  %v8790_v60 = vld [vmem:[%s11869_s1 + $0x7f0] ss:$40 sps:$4 sm:$0xff]  }
 0x24c   :  { %5529 = vmatpush1.bf16.msra.mxu0 %v8712_v62  ;;  %5434 = vmatprep.subr.bf16.mxu1 %v8717_v63  ;;  %v8795_v61 = vld [vmem:[%s11869_s1 + $0x15ac] ss:$40 sps:$4 sm:$0xff]   ;;  %v8793_v63 = vld [vmem:[%s11869_s1 + $0x15a8] ss:$40 sps:$4 sm:$0xff]  }
 0x24d   :  { %5530 = vmatprep.subr.bf16.mxu0 %v8720_v54  ;;  %v8798_v62 = vld [vmem:[%s11869_s1 + $0x844] ss:$40 sps:$4 sm:$0xff]   ;;  %v8796_v54 = vld [vmem:[%s11869_s1 + $0x840] ss:$40 sps:$4 sm:$0xff]  }
 0x24f   :  { %5435 = vmatpush1.bf16.msra.mxu1 %v8715_v3  ;;  %v8801_v3 = vld [vmem:[%s11869_s1 + $0x15fc] ss:$40 sps:$4 sm:$0xff]  }
 0x250   :  { %5531 = vmatpush1.bf16.msra.mxu0 %v8718_v49  ;;  %5436 = vmatprep.subr.bf16.mxu1 %v8723_v57  ;;  %v8804_v49 = vld [vmem:[%s11869_s1 + $0x894] ss:$40 sps:$4 sm:$0xff]   ;;  %v8799_v57 = vld [vmem:[%s11869_s1 + $0x15f8] ss:$40 sps:$4 sm:$0xff]  }
 0x251   :  { %5532 = vmatprep.subr.bf16.mxu0 %v8726_v8  ;;  %v8802_v8 = vld [vmem:[%s11869_s1 + $0x890] ss:$40 sps:$4 sm:$0xff]  }
 0x253   :  { %5437 = vmatpush1.bf16.msra.mxu1 %v8721_v58  ;;  %v8807_v58 = vld [vmem:[%s11869_s1 + $0x164c] ss:$40 sps:$4 sm:$0xff]  }
 0x254   :  { %5533 = vmatpush1.bf16.msra.mxu0 %v8724_v25  ;;  %5438 = vmatprep.subr.bf16.mxu1 %v8729_v59  ;;  %v8810_v25 = vld [vmem:[%s11869_s1 + $0x8e4] ss:$40 sps:$4 sm:$0xff]   ;;  %v8805_v59 = vld [vmem:[%s11869_s1 + $0x1648] ss:$40 sps:$4 sm:$0xff]  }
 0x255   :  { %5534 = vmatprep.subr.bf16.mxu0 %v8732_v9  ;;  %v8808_v9 = vld [vmem:[%s11869_s1 + $0x8e0] ss:$40 sps:$4 sm:$0xff]  }
 0x257   :  { %5439 = vmatpush1.bf16.msra.mxu1 %v8727_v10  ;;  %v8813_v10 = vld [vmem:[%s11869_s1 + $0x169c] ss:$40 sps:$4 sm:$0xff]  }
 0x258   :  { %5535 = vmatpush1.bf16.msra.mxu0 %v8730_v11  ;;  %5440 = vmatprep.subr.bf16.mxu1 %v8735_v13  ;;  %v8816_v11 = vld [vmem:[%s11869_s1 + $0x934] ss:$40 sps:$4 sm:$0xff]   ;;  %v8811_v13 = vld [vmem:[%s11869_s1 + $0x1698] ss:$40 sps:$4 sm:$0xff]  }
 0x259   :  { %5547 = vmatprep.subr.bf16.mxu0 %v8738_v14  ;;  %v8814_v14 = vld [vmem:[%s11869_s1 + $0x930] ss:$40 sps:$4 sm:$0xff]  }
 0x25b   :  { %5537 = vmatmul.mubr.bf16.vlgmr.msra.gmra.mrb[8].mxu0 %v9060_v21  ;;  %5441 = vmatpush1.bf16.msra.mxu1 %v8733_v15  ;;  %v8819_v15 = vld [vmem:[%s11869_s1 + $0x16ec] ss:$40 sps:$4 sm:$0xff]   ;;  %v8825_v21 = vld [vmem:[%s11869_s1 + $0x173c] ss:$40 sps:$4 sm:$0xff]  }
 0x25c   :  { %5548 = vmatpush1.bf16.msra.mxu0 %v8736_v12  ;;  %5442 = vmatprep.subr.bf16.mxu1 %v8741_v16  ;;  %v8822_v12 = vld [vmem:[%s11869_s1 + $0x984] ss:$40 sps:$4 sm:$0xff]   ;;  %v8817_v16 = vld [vmem:[%s11869_s1 + $0x16e8] ss:$40 sps:$4 sm:$0xff]  }
 0x25d   :  { %5549 = vmatprep.subr.bf16.mxu0 %v8744_v19  ;;  %5579 = vmatprep.mubr.bf16.mxu0 %v9061_v33  ;;  %v8820_v19 = vld [vmem:[%s11869_s1 + $0x980] ss:$40 sps:$4 sm:$0xff]  }
 0x25e   :  { %v8832_v33 = vld [vmem:[%s11872_s3 + $0x40] sm:$0xff]  }
 0x25f   :  { %5443 = vmatpush1.bf16.msra.mxu1 %v8739_v31  ;;  %v8828_v31 = vld [vmem:[%s11869_s1 + $0x9d4] ss:$40 sps:$4 sm:$0xff]  }
 0x260   :  { %5550 = vmatpush1.bf16.msra.mxu0 %v8742_v7  ;;  %5444 = vmatprep.subr.bf16.mxu1 %v8747_v23  ;;  %v8823_v7 = vld [vmem:[%s11869_s1 + $0x1738] ss:$40 sps:$4 sm:$0xff]  }
 0x261   :  { %5551 = vmatprep.subr.bf16.mxu0 %v8750_v24  ;;  %v8826_v23 = vld [vmem:[%s11869_s1 + $0x9d0] ss:$40 sps:$4 sm:$0xff]   ;;  %v8831_v24 = vld [vmem:[%s11869_s1 + $0xa24] ss:$40 sps:$4 sm:$0xff]  }
 0x263   :  { %5445 = vmatpush1.bf16.msra.mxu1 %v8745_v26  ;;  %v8829_v26 = vld [vmem:[%s11869_s1 + $0xa20] ss:$40 sps:$4 sm:$0xff]  }
 0x264   :  { %5552 = vmatpush1.bf16.msra.mxu0 %v8748_v5  ;;  %5446 = vmatprep.subr.bf16.mxu1 %v8753_v27  ;;  %v8833_v5 = vld [vmem:[%s11872_s3] sm:$0xff]   ;;  %v8836_v27 = vld [vmem:[%s11869_s1 + $0xa74] ss:$40 sps:$4 sm:$0xff]  }
 0x265   :  { %5553 = vmatprep.subr.bf16.mxu0 %v8756_v28  ;;  %v8837_v28 = vld [vmem:[%s11872_s3 + $0x48] sm:$0xff]  }
 0x267   :  { %5447 = vmatpush1.bf16.msra.mxu1 %v8751_v29  ;;  %v9062_v29 = vld [vmem:[%s11870_s0 + $0x8] ss:$40 sps:$4 sm:$0xff]  }
 0x268   :  { %5554 = vmatpush1.bf16.msra.mxu0 %v8754_v18  ;;  %5448 = vmatprep.subr.bf16.mxu1 %v8759_v30  ;;  %v8834_v18 = vld [vmem:[%s11869_s1 + $0xa70] ss:$40 sps:$4 sm:$0xff]   ;;  %v8838_v30 = vld [vmem:[%s11872_s3 + $0x8] sm:$0xff]  }
 0x269   :  { %5555 = vmatprep.subr.bf16.mxu0 %v8762_v32  ;;  %v8842_v32 = vld [vmem:[%s11872_s3 + $0x50] sm:$0xff]  }
 0x26b   :  { %5449 = vmatpush1.bf16.msra.mxu1 %v8757_v34  ;;  %v9063_v34 = vld [vmem:[%s11870_s0 + $0x14] ss:$40 sps:$4 sm:$0xff]  }
 0x26c   :  { %5556 = vmatpush1.bf16.msra.mxu0 %v8760_v35  ;;  %5461 = vmatprep.subr.bf16.mxu1 %v8765_v17  ;;  %v8843_v35 = vld [vmem:[%s11872_s3 + $0x10] sm:$0xff]  }
 0x26d   :  { %5557 = vmatprep.subr.bf16.mxu0 %v8768_v37  ;;  %v8846_v17 = vld [vmem:[%s11869_s1 + $0xb14] ss:$40 sps:$4 sm:$0xff]  }
 0x26e   :  { %5451 = vmatmul.mubr.bf16.vlgmr.msra.gmra.mrb[8].mxu1 %v10750_v1  ;;  %v8780_v1 = vld [vmem:[%s11869_s1 + $0x754] ss:$40 sps:$4 sm:$0xff]  }
 0x26f   :  { %5462 = vmatpush1.bf16.msra.mxu1 %v8763_v39  ;;  %7485 = vmatprep.mubr.msk.bf16.mxu1 %vm4640_vm0, %v10769_v4  ;;  %v8786_v4 = vld [vmem:[%s11869_s1 + $0x7a4] ss:$40 sps:$4 sm:$0xff]   ;;  %v8847_v37 = vld [vmem:[%s11872_s3 + $0x58] sm:$0xff]  }
 0x270   :  { %5558 = vmatpush1.bf16.msra.mxu0 %v8766_v20  ;;  %5463 = vmatprep.subr.bf16.mxu1 %v8771_v38  ;;  %v8844_v39 = vld [vmem:[%s11869_s1 + $0xb10] ss:$40 sps:$4 sm:$0xff]   ;;  %v8851_v38 = vld [vmem:[%s11869_s1 + $0xb64] ss:$40 sps:$4 sm:$0xff]  }
 0x271   :  { %5559 = vmatprep.subr.bf16.mxu0 %v8774_v41  ;;  %v8848_v20 = vld [vmem:[%s11872_s3 + $0x18] sm:$0xff]   ;;  %v8852_v41 = vld [vmem:[%s11872_s3 + $0x60] sm:$0xff]  }
 0x273   :  { %5464 = vmatpush1.bf16.msra.mxu1 %v8769_v42  ;;  %v8849_v42 = vld [vmem:[%s11869_s1 + $0xb60] ss:$40 sps:$4 sm:$0xff]  }
 0x274   :  { %5560 = vmatpush1.bf16.msra.mxu0 %v8772_v44  ;;  %5465 = vmatprep.subr.bf16.mxu1 %v8777_v45  ;;  %v8853_v44 = vld [vmem:[%s11872_s3 + $0x20] sm:$0xff]   ;;  %v8856_v45 = vld [vmem:[%s11869_s1 + $0xbb4] ss:$40 sps:$4 sm:$0xff]  }
 0x275   :  { %5561 = vmatprep.subr.bf16.mxu0 %v8780_v1  ;;  %v8857_v1 = vld [vmem:[%s11872_s3 + $0x68] sm:$0xff]  }
 0x277   :  { %5466 = vmatpush1.bf16.msra.mxu1 %v8775_v46  ;;  %v8854_v46 = vld [vmem:[%s11869_s1 + $0xbb0] ss:$40 sps:$4 sm:$0xff]  }
 0x278   :  { %5562 = vmatpush1.bf16.msra.mxu0 %v8778_v47  ;;  %5467 = vmatprep.subr.bf16.mxu1 %v8783_v48  ;;  %v8858_v47 = vld [vmem:[%s11872_s3 + $0x28] sm:$0xff]  }
 0x279   :  { %5563 = vmatprep.subr.bf16.mxu0 %v8786_v4  ;;  %v8861_v48 = vld [vmem:[%s11869_s1 + $0xc04] ss:$40 sps:$4 sm:$0xff]   ;;  %v8862_v4 = vld [vmem:[%s11872_s3 + $0x70] sm:$0xff]  }
 0x27b   :  { %5468 = vmatpush1.bf16.msra.mxu1 %v8781_v50  ;;  %v8859_v50 = vld [vmem:[%s11869_s1 + $0xc00] ss:$40 sps:$4 sm:$0xff]  }
 0x27c   :  { %5564 = vmatpush1.bf16.msra.mxu0 %v8784_v51  ;;  %5469 = vmatprep.subr.bf16.mxu1 %v8789_v53  ;;  %v8863_v51 = vld [vmem:[%s11872_s3 + $0x30] sm:$0xff]  }
 0x27d   :  { %5565 = vmatprep.subr.bf16.mxu0 %v8792_v55  ;;  %v8866_v53 = vld [vmem:[%s11869_s1 + $0xc54] ss:$40 sps:$4 sm:$0xff]  }
 0x27e   :  { %v8867_v55 = vld [vmem:[%s11872_s3 + $0x78] sm:$0xff]  }
 0x27f   :  { %5470 = vmatpush1.bf16.msra.mxu1 %v8787_v56  ;;  %v8864_v56 = vld [vmem:[%s11869_s1 + $0xc50] ss:$40 sps:$4 sm:$0xff]  }
 0x280   :  { %5566 = vmatpush1.bf16.msra.mxu0 %v8790_v60  ;;  %5471 = vmatprep.subr.bf16.mxu1 %v8795_v61  ;;  %v8868_v60 = vld [vmem:[%s11872_s3 + $0x38] sm:$0xff]   ;;  %v8871_v61 = vld [vmem:[%s11869_s1 + $0xca4] ss:$40 sps:$4 sm:$0xff]  }
 0x281   :  { %5567 = vmatprep.subr.bf16.mxu0 %v8798_v62  ;;  %v8872_v62 = vld [vmem:[%s11872_s3 + $0xc0] sm:$0xff]  }
 0x283   :  { %5472 = vmatpush1.bf16.msra.mxu1 %v8793_v63  ;;  %v8869_v63 = vld [vmem:[%s11869_s1 + $0xca0] ss:$40 sps:$4 sm:$0xff]  }
 0x284   :  { %5568 = vmatpush1.bf16.msra.mxu0 %v8796_v54  ;;  %5473 = vmatprep.subr.bf16.mxu1 %v8801_v3  ;;  %v8873_v54 = vld [vmem:[%s11872_s3 + $0x80] sm:$0xff]   ;;  %v8876_v3 = vld [vmem:[%s11869_s1 + $0xcf4] ss:$40 sps:$4 sm:$0xff]  }
 0x285   :  { %5569 = vmatprep.subr.bf16.mxu0 %v8804_v49  ;;  %v8877_v49 = vld [vmem:[%s11872_s3 + $0xc8] sm:$0xff]  }
 0x287   :  { %5474 = vmatpush1.bf16.msra.mxu1 %v8799_v57  ;;  %v8874_v57 = vld [vmem:[%s11869_s1 + $0xcf0] ss:$40 sps:$4 sm:$0xff]  }
 0x288   :  { %5570 = vmatpush1.bf16.msra.mxu0 %v8802_v8  ;;  %5475 = vmatprep.subr.bf16.mxu1 %v8807_v58  ;;  %v8878_v8 = vld [vmem:[%s11872_s3 + $0x88] sm:$0xff]  }
 0x289   :  { %5571 = vmatprep.subr.bf16.mxu0 %v8810_v25  ;;  %v8881_v58 = vld [vmem:[%s11869_s1 + $0xd44] ss:$40 sps:$4 sm:$0xff]   ;;  %v8879_v25 = vld [vmem:[%s11869_s1 + $0xd40] ss:$40 sps:$4 sm:$0xff]  }
 0x28b   :  { %5476 = vmatpush1.bf16.msra.mxu1 %v8805_v59  ;;  %v8886_v59 = vld [vmem:[%s11869_s1 + $0xd94] ss:$40 sps:$4 sm:$0xff]  }
 0x28c   :  { %5572 = vmatpush1.bf16.msra.mxu0 %v8808_v9  ;;  %5477 = vmatprep.subr.bf16.mxu1 %v8813_v10  ;;  %v8887_v9 = vld [vmem:[%s11872_s3 + $0xd8] sm:$0xff]  }
 0x28d   :  { %5573 = vmatprep.subr.bf16.mxu0 %v8816_v11  ;;  %v8884_v10 = vld [vmem:[%s11869_s1 + $0xd90] ss:$40 sps:$4 sm:$0xff]  }
 0x28e   :  { %v8888_v11 = vld [vmem:[%s11872_s3 + $0x98] sm:$0xff]  }
 0x28f   :  { %5478 = vmatpush1.bf16.msra.mxu1 %v8811_v13  ;;  %v8891_v13 = vld [vmem:[%s11869_s1 + $0xde4] ss:$40 sps:$4 sm:$0xff]  }
 0x290   :  { %5574 = vmatpush1.bf16.msra.mxu0 %v8814_v14  ;;  %5479 = vmatprep.subr.bf16.mxu1 %v8819_v15  ;;  %v8892_v14 = vld [vmem:[%s11872_s3 + $0xe0] sm:$0xff]  }
 0x291   :  { %5575 = vmatprep.subr.bf16.mxu0 %v8822_v12  ;;  %v8889_v15 = vld [vmem:[%s11869_s1 + $0xde0] ss:$40 sps:$4 sm:$0xff]  }
 0x292   :  { %v8893_v12 = vld [vmem:[%s11872_s3 + $0xa0] sm:$0xff]  }
 0x293   :  { %5480 = vmatpush1.bf16.msra.mxu1 %v8817_v16  ;;  %v8896_v16 = vld [vmem:[%s11869_s1 + $0xe34] ss:$40 sps:$4 sm:$0xff]  }
 0x294   :  { %5576 = vmatpush1.bf16.msra.mxu0 %v8820_v19  ;;  %5481 = vmatprep.subr.bf16.mxu1 %v8825_v21  ;;  %v8897_v19 = vld [vmem:[%s11872_s3 + $0xe8] sm:$0xff]   ;;  %v8894_v21 = vld [vmem:[%s11869_s1 + $0xe30] ss:$40 sps:$4 sm:$0xff]  }
 0x295   :  { %5577 = vmatprep.subr.bf16.mxu0 %v8828_v31  ;;  %v8898_v31 = vld [vmem:[%s11872_s3 + $0xa8] sm:$0xff]  }
 0x297   :  { %5482 = vmatpush1.bf16.msra.mxu1 %v8823_v7  ;;  %v8901_v7 = vld [vmem:[%s11869_s1 + $0xe84] ss:$40 sps:$4 sm:$0xff]  }
 0x298   :  { %5578 = vmatpush1.bf16.msra.mxu0 %v8826_v23  ;;  %7577 = vmatprep.subr.bf16.mxu1 %v8832_v33  ;;  %v8902_v23 = vld [vmem:[%s11872_s3 + $0xf0] sm:$0xff]  }
 0x299   :  { %5590 = vmatprep.subr.bf16.mxu0 %v8831_v24  ;;  %v8899_v24 = vld [vmem:[%s11869_s1 + $0xe80] ss:$40 sps:$4 sm:$0xff]   ;;  %v8903_v33 = vld [vmem:[%s11872_s3 + $0xb0] sm:$0xff]  }
 0x29a   :  { %5494 = vmatmul.mubr.bf16.vlgmr.msra.gmra.mrb[8].mxu1 %v10900_v52  ;;  %v8841_v52 = vld [vmem:[%s11869_s1 + $0xac4] ss:$40 sps:$4 sm:$0xff]  }
 0x29b   :  { %5580 = vmatmul.mubr.bf16.vlgmr.msra.gmra.mrb[8].mxu0 %v9062_v29  ;;  %7578 = vmatpush3.bf16.msra.mxu1 %v8833_v5  ;;  %v8907_v5 = vld [vmem:[%s11872_s3 + $0xf8] sm:$0xff]   ;;  %v8911_v29 = vld [vmem:[%s11869_s1 + $0xf24] ss:$40 sps:$4 sm:$0xff]  }
 0x29c   :  { %5591 = vmatpush1.bf16.msra.mxu0 %v8829_v26  ;;  %6428 = vmatprep.mubr.bf16.mxu1 %v10637_v22  ;;  %v8839_v22 = vld [vmem:[%s11869_s1 + $0xac0] ss:$40 sps:$4 sm:$0xff]   ;;  %v8906_v26 = vld [vmem:[%s11869_s1 + $0xed4] ss:$40 sps:$4 sm:$0xff]  }
 0x29d   :  { %5592 = vmatprep.subr.bf16.mxu0 %v8836_v27  ;;  %7579 = vmatprep.subr.bf16.mxu1 %v8837_v28  ;;  %v8904_v27 = vld [vmem:[%s11869_s1 + $0xed0] ss:$40 sps:$4 sm:$0xff]  }
 0x29e   :  { %5622 = vmatprep.mubr.bf16.mxu0 %v9063_v34  ;;  %v8908_v28 = vld [vmem:[%s11872_s3 + $0xb8] sm:$0xff]   ;;  %v8917_v34 = vld [vmem:[%s11872_s3 + $0x148] sm:$0xff]  }
 0x29f   :  { %7580 = vmatpush3.bf16.msra.mxu1 %v8838_v30  ;;  %v8909_v30 = vld [vmem:[%s11869_s1 + $0xf20] ss:$40 sps:$4 sm:$0xff]  }
 0x2a0   :  { %5593 = vmatpush1.bf16.msra.mxu0 %v8834_v18  ;;  %7581 = vmatprep.subr.bf16.mxu1 %v8842_v32  ;;  %v8912_v18 = vld [vmem:[%s11872_s3 + $0x140] sm:$0xff]   ;;  %v8916_v32 = vld [vmem:[%s11869_s1 + $0xf74] ss:$40 sps:$4 sm:$0xff]  }
 0x2a1   :  { %5594 = vmatprep.subr.bf16.mxu0 %v8841_v52  ;;  %v8913_v52 = vld [vmem:[%s11872_s3 + $0x100] sm:$0xff]  }
 0x2a3   :  { %7582 = vmatpush3.bf16.msra.mxu1 %v8843_v35  ;;  %v8914_v35 = vld [vmem:[%s11869_s1 + $0xf70] ss:$40 sps:$4 sm:$0xff]  }
 0x2a4   :  { %5595 = vmatpush1.bf16.msra.mxu0 %v8839_v22  ;;  %7583 = vmatprep.subr.bf16.mxu1 %v8847_v37  ;;  %v9064_v22 = vld [vmem:[%s11870_s0 + $0x10] ss:$40 sps:$4 sm:$0xff]  }
 0x2a5   :  { %5596 = vmatprep.subr.bf16.mxu0 %v8846_v17  ;;  %v8918_v17 = vld [vmem:[%s11872_s3 + $0x108] sm:$0xff]   ;;  %v8922_v37 = vld [vmem:[%s11872_s3 + $0x150] sm:$0xff]  }
 0x2a7   :  { %7584 = vmatpush3.bf16.msra.mxu1 %v8848_v20  ;;  %v8919_v20 = vld [vmem:[%s11869_s1 + $0xfc0] ss:$40 sps:$4 sm:$0xff]  }
 0x2a8   :  { %5597 = vmatpush1.bf16.msra.mxu0 %v8844_v39  ;;  %7585 = vmatprep.subr.bf16.mxu1 %v8852_v41  ;;  %v9065_v39 = vld [vmem:[%s11870_s0 + $0x1c] ss:$40 sps:$4 sm:$0xff]  }
 0x2a9   :  { %5598 = vmatprep.subr.bf16.mxu0 %v8851_v38  ;;  %v8923_v38 = vld [vmem:[%s11872_s3 + $0x110] sm:$0xff]  }
 0x2aa   :  { %v8926_v41 = vld [vmem:[%s11869_s1 + $0x1014] ss:$40 sps:$4 sm:$0xff]  }
 0x2ab   :  { %7586 = vmatpush3.bf16.msra.mxu1 %v8853_v44  ;;  %v8924_v44 = vld [vmem:[%s11869_s1 + $0x1010] ss:$40 sps:$4 sm:$0xff]  }
 0x2ac   :  { %5599 = vmatpush1.bf16.msra.mxu0 %v8849_v42  ;;  %7587 = vmatprep.subr.bf16.mxu1 %v8857_v1  ;;  %v8927_v42 = vld [vmem:[%s11872_s3 + $0x158] sm:$0xff]   ;;  %v8931_v1 = vld [vmem:[%s11869_s1 + $0x1064] ss:$40 sps:$4 sm:$0xff]  }
 0x2ad   :  { %5600 = vmatprep.subr.bf16.mxu0 %v8856_v45  ;;  %v8928_v45 = vld [vmem:[%s11872_s3 + $0x118] sm:$0xff]  }
 0x2af   :  { %7588 = vmatpush3.bf16.msra.mxu1 %v8858_v47  ;;  %v809_v47 = vsub.s32 4, %v10550_v36 }
 0x2b0   :  { %5601 = vmatpush1.bf16.msra.mxu0 %v8854_v46  ;;  %7589 = vmatprep.subr.bf16.mxu1 %v8862_v4  ;;  %v8932_v46 = vld [vmem:[%s11872_s3 + $0x160] sm:$0xff]  }
 0x2b1   :  { %5602 = vmatprep.subr.bf16.mxu0 %v8861_v48  ;;  %v8929_v48 = vld [vmem:[%s11869_s1 + $0x1060] ss:$40 sps:$4 sm:$0xff]  }
 0x2b2   :  { %v8933_v4 = vld [vmem:[%s11872_s3 + $0x120] sm:$0xff]  }
 0x2b3   :  { %7590 = vmatpush3.bf16.msra.mxu1 %v8863_v51  ;;  %v8936_v51 = vld [vmem:[%s11869_s1 + $0x10b4] ss:$40 sps:$4 sm:$0xff]  }
 0x2b4   :  { %5603 = vmatpush1.bf16.msra.mxu0 %v8859_v50  ;;  %7591 = vmatprep.subr.bf16.mxu1 %v8867_v55  ;;  %v813_v50 = vsub.s32 5, %v10550_v36  ;;  %v11568_v55 = vld [vmem:[%s11871_s2] sm:$0xff] }
 0x2b5   :  { %5604 = vmatprep.subr.bf16.mxu0 %v8866_v53  ;;  %v8937_v53 = vld [vmem:[%s11872_s3 + $0x168] sm:$0xff]  }
 0x2b7   :  { %7592 = vmatpush3.bf16.msra.mxu1 %v8868_v60  ;;  %v814_v60 = vrot.slane %v11568_v55, %v813_v50  ;;  %v9021_v50 = vld [vmem:[%s11872_s3 + $0x1b8] sm:$0xff]  }
 0x2b8   :  { %5605 = vmatpush1.bf16.msra.mxu0 %v8864_v56  ;;  %7599 = vmatprep.subr.bf16.mxu1 %v8872_v62  ;;  %v810_v56 = vrot.slane %v11568_v55, %v809_v47  ;;  %v8938_v62 = vld [vmem:[%s11872_s3 + $0x128] sm:$0xff]   ;;  %v8972_v47 = vld [vmem:[%s11869_s1 + $0x13d4] ss:$40 sps:$4 sm:$0xff]  }
 0x2b9   :  { %5606 = vmatprep.subr.bf16.mxu0 %v8871_v61  ;;  %v8934_v61 = vld [vmem:[%s11869_s1 + $0x10b0] ss:$40 sps:$4 sm:$0xff]  }
 0x2ba   :  { %6429 = vmatmul.mubr.bf16.vlgmr.msra.gmra.mrb[12].mxu1 %v10629_v6  ;;  %v8882_v6 = vld [vmem:[%s11872_s3 + $0xd0] sm:$0xff]  }
 0x2bb   :  { %7600 = vmatpush3.bf16.msra.mxu1 %v8873_v54  ;;  %6469 = vmatprep.mubr.bf16.mxu1 %v11055_v2  ;;  %v8883_v2 = vld [vmem:[%s11872_s3 + $0x90] sm:$0xff]  }
 0x2bc   :  { %5607 = vmatpush1.bf16.msra.mxu0 %v8869_v63  ;;  %7601 = vmatprep.subr.bf16.mxu1 %v8877_v49  ;;  %v8941_v63 = vld [vmem:[%s11869_s1 + $0x1104] ss:$40 sps:$4 sm:$0xff]   ;;  %v8942_v54 = vld [vmem:[%s11872_s3 + $0x170] sm:$0xff]  }
 0x2bd   :  { %5608 = vmatprep.subr.bf16.mxu0 %v8876_v3 }
 0x2bf   :  { %7602 = vmatpush3.bf16.msra.mxu1 %v8878_v8 }
 0x2c0   :  { %5609 = vmatpush1.bf16.msra.mxu0 %v8874_v57  ;;  %7603 = vmatprep.subr.bf16.mxu1 %v8882_v6  ;;  %v8939_v6 = vld [vmem:[%s11869_s1 + $0x1100] ss:$40 sps:$4 sm:$0xff]  }
 0x2c1   :  { %5610 = vmatprep.subr.bf16.mxu0 %v8881_v58 }
 0x2c3   :  { %7604 = vmatpush3.bf16.msra.mxu1 %v8883_v2 }
 0x2c4   :  { %5611 = vmatpush1.bf16.msra.mxu0 %v8879_v25  ;;  %7605 = vmatprep.subr.bf16.mxu1 %v8887_v9  ;;  %v8943_v25 = vld [vmem:[%s11872_s3 + $0x130] sm:$0xff]  }
 0x2c5   :  { %5612 = vmatprep.subr.bf16.mxu0 %v8886_v59  ;;  %v8946_v9 = vld [vmem:[%s11869_s1 + $0x1154] ss:$40 sps:$4 sm:$0xff]  }
 0x2c7   :  { %7606 = vmatpush3.bf16.msra.mxu1 %v8888_v11 }
 0x2c8   :  { %5613 = vmatpush1.bf16.msra.mxu0 %v8884_v10  ;;  %7607 = vmatprep.subr.bf16.mxu1 %v8892_v14  ;;  %v8947_v10 = vld [vmem:[%s11872_s3 + $0x178] sm:$0xff]  }
 0x2c9   :  { %5614 = vmatprep.subr.bf16.mxu0 %v8891_v13 }
 0x2cb   :  { %7608 = vmatpush3.bf16.msra.mxu1 %v8893_v12 }
 0x2cc   :  { %5615 = vmatpush1.bf16.msra.mxu0 %v8889_v15  ;;  %7609 = vmatprep.subr.bf16.mxu1 %v8897_v19  ;;  %v8948_v19 = vld [vmem:[%s11872_s3 + $0x138] sm:$0xff]  }
 0x2cd   :  { %5616 = vmatprep.subr.bf16.mxu0 %v8896_v16  ;;  %v8944_v16 = vld [vmem:[%s11869_s1 + $0x1150] ss:$40 sps:$4 sm:$0xff]  }
 0x2cf   :  { %7610 = vmatpush3.bf16.msra.mxu1 %v8898_v31  ;;  %v8951_v31 = vld [vmem:[%s11869_s1 + $0x11a4] ss:$40 sps:$4 sm:$0xff]  }
 0x2d0   :  { %5617 = vmatpush1.bf16.msra.mxu0 %v8894_v21  ;;  %7611 = vmatprep.subr.bf16.mxu1 %v8902_v23  ;;  %v9006_v23 = vld [vmem:[%s11872_s3 + $0x1c0] sm:$0xff]  }
 0x2d1   :  { %5618 = vmatprep.subr.bf16.mxu0 %v8901_v7 }
 0x2d3   :  { %7612 = vmatpush3.bf16.msra.mxu1 %v8903_v33  ;;  %v9007_v33 = vld [vmem:[%s11872_s3 + $0x180] sm:$0xff]  }
 0x2d4   :  { %5619 = vmatpush1.bf16.msra.mxu0 %v8899_v24  ;;  %7613 = vmatprep.subr.bf16.mxu1 %v8907_v5  ;;  %v8949_v24 = vld [vmem:[%s11869_s1 + $0x11a0] ss:$40 sps:$4 sm:$0xff]  }
 0x2d5   :  { %5620 = vmatprep.subr.bf16.mxu0 %v8906_v26  ;;  %v8954_v26 = vld [vmem:[%s11869_s1 + $0x11f4] ss:$40 sps:$4 sm:$0xff]   ;;  %v9008_v5 = vld [vmem:[%s11872_s3 + $0x1c8] sm:$0xff]  }
 0x2d7   :  { %7614 = vmatpush3.bf16.msra.mxu1 %v8908_v28  ;;  %v9009_v28 = vld [vmem:[%s11872_s3 + $0x188] sm:$0xff]  }
 0x2d8   :  { %5621 = vmatpush1.bf16.msra.mxu0 %v8904_v27  ;;  %7621 = vmatprep.subr.bf16.mxu1 %v8912_v18  ;;  %v8952_v27 = vld [vmem:[%s11869_s1 + $0x11f0] ss:$40 sps:$4 sm:$0xff]  }
 0x2d9   :  { %5633 = vmatprep.subr.bf16.mxu0 %v8911_v29  ;;  %v8957_v29 = vld [vmem:[%s11869_s1 + $0x1244] ss:$40 sps:$4 sm:$0xff]   ;;  %v9010_v18 = vld [vmem:[%s11872_s3 + $0x1d0] sm:$0xff]  }
 0x2da   :  { %6470 = vmatmul.mubr.bf16.vlgmr.msra.gmra.mrb[16].mxu1 %v11050_v0  ;;  %v8921_v0 = vld [vmem:[%s11869_s1 + $0xfc4] ss:$40 sps:$4 sm:$0xff]  }
 0x2db   :  { %5623 = vmatmul.mubr.bf16.vlgmr.msra.gmra.mrb[8].mxu0 %v9064_v22  ;;  %7622 = vmatpush3.bf16.msra.mxu1 %v8913_v52  ;;  %v9011_v52 = vld [vmem:[%s11872_s3 + $0x190] sm:$0xff]  }
 0x2dc   :  { %5634 = vmatpush1.bf16.msra.mxu0 %v8909_v30  ;;  %7623 = vmatprep.subr.bf16.mxu1 %v8917_v34  ;;  %v8955_v30 = vld [vmem:[%s11869_s1 + $0x1240] ss:$40 sps:$4 sm:$0xff]   ;;  %v9012_v34 = vld [vmem:[%s11872_s3 + $0x1d8] sm:$0xff]  }
 0x2dd   :  { %5635 = vmatprep.subr.bf16.mxu0 %v8916_v32  ;;  %5665 = vmatprep.mubr.bf16.mxu0 %v9065_v39  ;;  %v8960_v32 = vld [vmem:[%s11869_s1 + $0x1294] ss:$40 sps:$4 sm:$0xff]   ;;  %v8958_v22 = vld [vmem:[%s11869_s1 + $0x1290] ss:$40 sps:$4 sm:$0xff]   ;;  %v9015_v39 = vld [vmem:[%s11872_s3 + $0x1a0] sm:$0xff]  }
 0x2df   :  { %7624 = vmatpush3.bf16.msra.mxu1 %v8918_v17  ;;  %v8963_v17 = vld [vmem:[%s11869_s1 + $0x12e4] ss:$40 sps:$4 sm:$0xff]  }
 0x2e0   :  { %5636 = vmatpush1.bf16.msra.mxu0 %v8914_v35  ;;  %7625 = vmatprep.subr.bf16.mxu1 %v8922_v37  ;;  %v9013_v35 = vld [vmem:[%s11872_s3 + $0x198] sm:$0xff]   ;;  %v8961_v37 = vld [vmem:[%s11869_s1 + $0x12e0] ss:$40 sps:$4 sm:$0xff]  }
 0x2e1   :  { %5637 = vmatprep.subr.bf16.mxu0 %v8921_v0  ;;  %v9014_v0 = vld [vmem:[%s11872_s3 + $0x1e0] sm:$0xff]  }
 0x2e3   :  { %7626 = vmatpush3.bf16.msra.mxu1 %v8923_v38  ;;  %v9016_v38 = vld [vmem:[%s11872_s3 + $0x1e8] sm:$0xff]  }
 0x2e4   :  { %5638 = vmatpush1.bf16.msra.mxu0 %v8919_v20  ;;  %7627 = vmatprep.subr.bf16.mxu1 %v8927_v42  ;;  %v8966_v20 = vld [vmem:[%s11869_s1 + $0x1334] ss:$40 sps:$4 sm:$0xff]   ;;  %v9017_v42 = vld [vmem:[%s11872_s3 + $0x1a8] sm:$0xff]  }
 0x2e5   :  { %5639 = vmatprep.subr.bf16.mxu0 %v8926_v41  ;;  %v8964_v41 = vld [vmem:[%s11869_s1 + $0x1330] ss:$40 sps:$4 sm:$0xff]  }
 0x2e7   :  { %7628 = vmatpush3.bf16.msra.mxu1 %v8928_v45  ;;  %v9018_v45 = vld [vmem:[%s11872_s3 + $0x1f0] sm:$0xff]  }
 0x2e8   :  { %5640 = vmatpush1.bf16.msra.mxu0 %v8924_v44  ;;  %7629 = vmatprep.subr.bf16.mxu1 %v8932_v46  ;;  %v8969_v44 = vld [vmem:[%s11869_s1 + $0x1384] ss:$40 sps:$4 sm:$0xff]   ;;  %v9019_v46 = vld [vmem:[%s11872_s3 + $0x1b0] sm:$0xff]  }
 0x2e9   :  { %5641 = vmatprep.subr.bf16.mxu0 %v8931_v1  ;;  %v8967_v1 = vld [vmem:[%s11869_s1 + $0x1380] ss:$40 sps:$4 sm:$0xff]  }
 0x2eb   :  { %7630 = vmatpush3.bf16.msra.mxu1 %v8933_v4  ;;  %v8970_v4 = vld [vmem:[%s11869_s1 + $0x13d0] ss:$40 sps:$4 sm:$0xff]  }
 0x2ec   :  { %5642 = vmatpush1.bf16.msra.mxu0 %v8929_v48  ;;  %7631 = vmatprep.subr.bf16.mxu1 %v8937_v53  ;;  %v9020_v48 = vld [vmem:[%s11872_s3 + $0x1f8] sm:$0xff]   ;;  %v8973_v53 = vld [vmem:[%s11869_s1 + $0x1420] ss:$40 sps:$4 sm:$0xff]  }
 0x2ed   :  { %5643 = vmatprep.subr.bf16.mxu0 %v8936_v51  ;;  %v8975_v51 = vld [vmem:[%s11869_s1 + $0x1424] ss:$40 sps:$4 sm:$0xff]  }
 0x2ee   :  { %v5280_v3 = vpop.f32.mrb[4].mxu0 }
 0x2ef   :  { %v7728_v49 = vadd.f32 %v5280_v3, %v810_v56  ;;  %v5282_v57 = vpop.f32.mrb[5].mxu0  ;;  %7632 = vmatpush3.bf16.msra.mxu1 %v8938_v62  ;;  %v9068_v62 = vld [vmem:[%s11870_s0 + $0x24] ss:$40 sps:$4 sm:$0xff]   ;;  %v8984_v3 = vld [vmem:[%s11869_s1 + $0x1514] ss:$40 sps:$4 sm:$0xff]  }
 0x2f0   :  { %v7729_v8 = vadd.f32 %v5282_v57, %v814_v60  ;;  %v5284_v58 = vpop.f32.mrb[6].mxu0  ;;  %5644 = vmatpush1.bf16.msra.mxu0 %v8934_v61  ;;  %7633 = vmatprep.subr.bf16.mxu1 %v8942_v54  ;;  %v8976_v61 = vld [vmem:[%s11869_s1 + $0x1470] ss:$40 sps:$4 sm:$0xff]   ;;  %v8979_v54 = vld [vmem:[%s11869_s1 + $0x14c0] ss:$40 sps:$4 sm:$0xff]  }
 0x2f1   :  { %v7730_v2 = vadd.f32 %v5284_v58, %v810_v56  ;;  %v5286_v59 = vpop.f32.mrb[7].mxu0  ;;  %5645 = vmatprep.subr.bf16.mxu0 %v8941_v63  ;;  %v5723_v13 = vmax.f32 %v7728_v49, 0.0  ;;  %v8978_v56 = vld [vmem:[%s11869_s1 + $0x1474] ss:$40 sps:$4 sm:$0xff]   ;;  %v8981_v63 = vld [vmem:[%s11869_s1 + $0x14c4] ss:$40 sps:$4 sm:$0xff]  }
 0x2f2   :  { %v7731_v11 = vadd.f32 %v5286_v59, %v814_v60  ;;  %v5724_v15 = vmax.f32 %v7729_v8, 0.0  ;;  %v9067_v60 = vld [vmem:[%s11870_s0 + $0x18] ss:$40 sps:$4 sm:$0xff]   ;;  %v8987_v57 = vld [vmem:[%s11869_s1 + $0x1564] ss:$40 sps:$4 sm:$0xff]  }
 0x2f3   :  { %v5733_v14 = vmax.f32 %v7730_v2, 0.0  ;;  %7634 = vmatpush3.bf16.msra.mxu1 %v8943_v25  ;;  %v8982_v49 = vld [vmem:[%s11869_s1 + $0x1510] ss:$40 sps:$4 sm:$0xff]   ;;  %v8985_v8 = vld [vmem:[%s11869_s1 + $0x1560] ss:$40 sps:$4 sm:$0xff]  }
 0x2f4   :  { %v5734_v12 = vmax.f32 %v7731_v11, 0.0  ;;  %5646 = vmatpush1.bf16.msra.mxu0 %v8939_v6  ;;  %7635 = vmatprep.subr.bf16.mxu1 %v8947_v10  ;;  %v8990_v58 = vld [vmem:[%s11869_s1 + $0x15b4] ss:$40 sps:$4 sm:$0xff]   ;;  %v8988_v6 = vld [vmem:[%s11869_s1 + $0x15b0] ss:$40 sps:$4 sm:$0xff]  }
 0x2f5   :  { %v5743_v21 = vpack.c.bf16 %v5733_v14, %v5723_v13  ;;  %5647 = vmatprep.subr.bf16.mxu0 %v8946_v9  ;;  %v8993_v25 = vld [vmem:[%s11869_s1 + $0x1604] ss:$40 sps:$4 sm:$0xff]   ;;  %v8991_v2 = vld [vmem:[%s11869_s1 + $0x1600] ss:$40 sps:$4 sm:$0xff]   ;;  %v8996_v59 = vld [vmem:[%s11869_s1 + $0x1654] ss:$40 sps:$4 sm:$0xff]  }
 0x2f6   :  { %v5744_v7 = vpack.c.bf16 %v5734_v12, %v5724_v15  ;;  %v8994_v9 = vld [vmem:[%s11869_s1 + $0x1650] ss:$40 sps:$4 sm:$0xff]   ;;  %v8999_v10 = vld [vmem:[%s11869_s1 + $0x16a4] ss:$40 sps:$4 sm:$0xff]   ;;  %v8997_v11 = vld [vmem:[%s11869_s1 + $0x16a0] ss:$40 sps:$4 sm:$0xff]  }
 0x2f7   :  { %7636 = vmatpush3.bf16.msra.mxu1 %v8948_v19  ;;  %v9002_v13 = vld [vmem:[%s11869_s1 + $0x16f4] ss:$40 sps:$4 sm:$0xff]   ;;  %v9000_v14 = vld [vmem:[%s11869_s1 + $0x16f0] ss:$40 sps:$4 sm:$0xff]   ;;  %v9005_v15 = vld [vmem:[%s11869_s1 + $0x1744] ss:$40 sps:$4 sm:$0xff]  }
 0x2f8   :  { %5648 = vmatpush1.bf16.msra.mxu0 %v8944_v16  ;;  %6510 = vmatprep.mubr.bf16.mxu1 %v5744_v7  ;;  %v9003_v12 = vld [vmem:[%s11869_s1 + $0x1740] ss:$40 sps:$4 sm:$0xff]  }
 0x2f9   :  { %5649 = vmatprep.subr.bf16.mxu0 %v8951_v31  ;;  %7643 = vmatprep.subr.bf16.mxu1 %v9006_v23  ;;  %v9069_v16 = vld [vmem:[%s11870_s0 + $0x20] ss:$40 sps:$4 sm:$0xff]   ;;  %v821_v31 = vsub.s32 7, %v10550_v36 }
 0x2fa   :  { %6511 = vmatmul.mubr.bf16.vlgmr.msra.gmra.mrb[20].mxu1 %v5743_v21  ;;  %v9022_v19 = vld [vmem:[%s11872_s3 + $0x240] sm:$0xff]   ;;  %v817_v21 = vsub.s32 6, %v10550_v36  ;;  %v9039_v36 = vld [vmem:[%s11874_s5 + $0x8] sm:$0xff]  }
 0x2fb   :  { %7644 = vmatpush3.bf16.msra.mxu1 %v9007_v33  ;;  %v822_v23 = vrot.slane %v11568_v55, %v821_v31 }
 0x2fc   :  { %5650 = vmatpush1.bf16.msra.mxu0 %v8949_v24  ;;  %7645 = vmatprep.subr.bf16.mxu1 %v9008_v5  ;;  %v818_v7 = vrot.slane %v11568_v55, %v817_v21  ;;  %v9024_v55 = vld [vmem:[%s11872_s3 + $0x248] sm:$0xff]  }
 0x2fd   :  { %5651 = vmatprep.subr.bf16.mxu0 %v8954_v26 }
 0x2ff   :  { %7646 = vmatpush3.bf16.msra.mxu1 %v9009_v28 }
 0x300   :  { %5652 = vmatpush1.bf16.msra.mxu0 %v8952_v27  ;;  %7647 = vmatprep.subr.bf16.mxu1 %v9010_v18 }
 0x301   :  { %5653 = vmatprep.subr.bf16.mxu0 %v8957_v29 }
 0x303   :  { %7648 = vmatpush3.bf16.msra.mxu1 %v9011_v52 }
 0x304   :  { %5654 = vmatpush1.bf16.msra.mxu0 %v8955_v30  ;;  %7649 = vmatprep.subr.bf16.mxu1 %v9012_v34 }
 0x305   :  { %5655 = vmatprep.subr.bf16.mxu0 %v8960_v32 }
 0x307   :  { %7650 = vmatpush3.bf16.msra.mxu1 %v9013_v35 }
 0x308   :  { %5656 = vmatpush1.bf16.msra.mxu0 %v8958_v22  ;;  %7651 = vmatprep.subr.bf16.mxu1 %v9014_v0  ;;  %v9025_v0 = vld [vmem:[%s11872_s3 + $0x208] sm:$0xff]  }
 0x309   :  { %5657 = vmatprep.subr.bf16.mxu0 %v8963_v17  ;;  %v9023_v17 = vld [vmem:[%s11872_s3 + $0x200] sm:$0xff]  }
 0x30b   :  { %7652 = vmatpush3.bf16.msra.mxu1 %v9015_v39  ;;  %v9027_v39 = vld [vmem:[%s11872_s3 + $0x210] sm:$0xff]  }
 0x30c   :  { %5658 = vmatpush1.bf16.msra.mxu0 %v8961_v37  ;;  %7653 = vmatprep.subr.bf16.mxu1 %v9016_v38  ;;  %v9026_v37 = vld [vmem:[%s11872_s3 + $0x250] sm:$0xff]   ;;  %v9029_v38 = vld [vmem:[%s11872_s3 + $0x218] sm:$0xff]  }
 0x30d   :  { %5659 = vmatprep.subr.bf16.mxu0 %v8966_v20  ;;  %v9028_v20 = vld [vmem:[%s11872_s3 + $0x258] sm:$0xff]  }
 0x30f   :  { %7654 = vmatpush3.bf16.msra.mxu1 %v9017_v42  ;;  %v9031_v42 = vld [vmem:[%s11872_s3 + $0x220] sm:$0xff]  }
 0x310   :  { %5660 = vmatpush1.bf16.msra.mxu0 %v8964_v41  ;;  %7655 = vmatprep.subr.bf16.mxu1 %v9018_v45  ;;  %v9030_v41 = vld [vmem:[%s11872_s3 + $0x260] sm:$0xff]  }
 0x311   :  { %5661 = vmatprep.subr.bf16.mxu0 %v8969_v44  ;;  %v9032_v44 = vld [vmem:[%s11872_s3 + $0x268] sm:$0xff]  }
 0x313   :  { %7656 = vmatpush3.bf16.msra.mxu1 %v9019_v46 }
 0x314   :  { %5662 = vmatpush1.bf16.msra.mxu0 %v8967_v1  ;;  %7657 = vmatprep.subr.bf16.mxu1 %v9020_v48 }
 0x315   :  { %5663 = vmatprep.subr.bf16.mxu0 %v8972_v47 }
 0x317   :  { %7658 = vmatpush3.bf16.msra.mxu1 %v9021_v50  ;;  %v9033_v50 = vld [vmem:[%s11872_s3 + $0x228] sm:$0xff]  }
 0x318   :  { %5664 = vmatpush1.bf16.msra.mxu0 %v8970_v4  ;;  %7665 = vmatprep.subr.bf16.mxu1 %v9022_v19 }
 0x319   :  { %5676 = vmatprep.subr.bf16.mxu0 %v8975_v51  ;;  %v9034_v51 = vld [vmem:[%s11872_s3 + $0x270] sm:$0xff]  }
 0x31b   :  { %5666 = vmatmul.mubr.bf16.vlgmr.msra.gmra.mrb[8].mxu0 %v9067_v60  ;;  %v9037_v60 = vld [vmem:[%s11872_s3 + $0x238] sm:$0xff]  }
 0x31c   :  { %5677 = vmatpush1.bf16.msra.mxu0 %v8973_v53  ;;  %7486 = vmatprep.mubr.msk.bf16.mxu0 %vm4640_vm0, %v9068_v62  ;;  %v9035_v53 = vld [vmem:[%s11872_s3 + $0x230] sm:$0xff]  }
 0x31d   :  { %5678 = vmatprep.subr.bf16.mxu0 %v8978_v56  ;;  %v9036_v56 = vld [vmem:[%s11872_s3 + $0x278] sm:$0xff]  }
 0x320   :  { %5679 = vmatpush1.bf16.msra.mxu0 %v8976_v61  ;;  %v7487_v61 = vld [vmem:[%s11873_s4] ss:$0 sm:$0xff] }
 0x321   :  { %5680 = vmatprep.subr.bf16.mxu0 %v8981_v63 }
 0x324   :  { %5681 = vmatpush1.bf16.msra.mxu0 %v8979_v54 }
 0x325   :  { %5682 = vmatprep.subr.bf16.mxu0 %v8984_v3 }
 0x328   :  { %5683 = vmatpush1.bf16.msra.mxu0 %v8982_v49 }
 0x329   :  { %5684 = vmatprep.subr.bf16.mxu0 %v8987_v57 }
 0x32c   :  { %5685 = vmatpush1.bf16.msra.mxu0 %v8985_v8 }
 0x32d   :  { %5686 = vmatprep.subr.bf16.mxu0 %v8990_v58 }
 0x330   :  { %5687 = vmatpush1.bf16.msra.mxu0 %v8988_v6 }
 0x331   :  { %5688 = vmatprep.subr.bf16.mxu0 %v8993_v25 }
 0x334   :  { %5689 = vmatpush1.bf16.msra.mxu0 %v8991_v2 }
 0x335   :  { %5690 = vmatprep.subr.bf16.mxu0 %v8996_v59 }
 0x338   :  { %5691 = vmatpush1.bf16.msra.mxu0 %v8994_v9 }
 0x339   :  { %5692 = vmatprep.subr.bf16.mxu0 %v8999_v10 }
 0x33c   :  { %5693 = vmatpush1.bf16.msra.mxu0 %v8997_v11 }
 0x33d   :  { %5694 = vmatprep.subr.bf16.mxu0 %v9002_v13 }
 0x340   :  { %5695 = vmatpush1.bf16.msra.mxu0 %v9000_v14 }
 0x341   :  { %5696 = vmatprep.subr.bf16.mxu0 %v9005_v15  ;;  %v9070_v15 = vmov 0.0  }
 0x344   :  { %5697 = vmatpush1.bf16.msra.mxu0 %v9003_v12 }
 0x347   :  { %5709 = vmatmul.mubr.bf16.vlgmr.msra.gmra.mrb[8].mxu0 %v9069_v16  ;;  %v788_v16 = vld [vmem:[%s11871_s2 + $0x8] sm:$0x3] }
 0x348   :  { %v826_v19 = vrot.slane %v788_v16, %v793_v40  ;;  %v830_v21 = vrot.slane %v788_v16, %v797_v43  ;;  %v9038_v40 = vld [vmem:[%s11874_s5] sm:$0xff]   ;;  %v9040_v43 = vld [vmem:[%s11874_s5 + $0x10] sm:$0xff]  }
 0x36d   :  { %v5495_v24 = vpop.f32.mrb[8].mxu1 }
 0x36e   :  { %v7732_v33 = vadd.f32 %v5495_v24, %v818_v7  ;;  %v5497_v26 = vpop.f32.mrb[9].mxu1 }
 0x36f   :  { %v7733_v5 = vadd.f32 %v5497_v26, %v822_v23  ;;  %v5499_v27 = vpop.f32.mrb[10].mxu1 }
 0x370   :  { %v7734_v28 = vadd.f32 %v5499_v27, %v818_v7  ;;  %v5501_v29 = vpop.f32.mrb[11].mxu1  ;;  %v5725_v30 = vmax.f32 %v7732_v33, 0.0 }
 0x371   :  { %v7735_v18 = vadd.f32 %v5501_v29, %v822_v23  ;;  %v5726_v32 = vmax.f32 %v7733_v5, 0.0 }
 0x372   :  { %v5735_v52 = vmax.f32 %v7734_v28, 0.0 }
 0x373   :  { %v5736_v34 = vmax.f32 %v7735_v18, 0.0 }
 0x374   :  { %v5745_v22 = vpack.c.bf16 %v5735_v52, %v5725_v30 }
 0x375   :  { %v5746_v35 = vpack.c.bf16 %v5736_v34, %v5726_v32  ;;  %v9041_v34 = vld [vmem:[%s11874_s5 + $0x18] sm:$0xff]  }
 0x377   :  { %6551 = vmatprep.mubr.bf16.mxu1 %v5746_v35 }
 0x378   :  { %6552 = vmatmul.mubr.bf16.vlgmr.msra.gmra.mrb[24].mxu1 %v5745_v22  ;;  %v9042_v22 = vld [vmem:[%s11874_s5 + $0x20] sm:$0xff]  }
 0x379   :  { %7666 = vmatpush3.bf16.msra.mxu1 %v9023_v17 }
 0x37a   :  { %7667 = vmatprep.subr.bf16.mxu1 %v9024_v55 }
 0x37d   :  { %7668 = vmatpush3.bf16.msra.mxu1 %v9025_v0 }
 0x37e   :  { %7669 = vmatprep.subr.bf16.mxu1 %v9026_v37 }
 0x381   :  { %7670 = vmatpush3.bf16.msra.mxu1 %v9027_v39 }
 0x382   :  { %7671 = vmatprep.subr.bf16.mxu1 %v9028_v20 }
 0x385   :  { %7672 = vmatpush3.bf16.msra.mxu1 %v9029_v38 }
 0x386   :  { %7673 = vmatprep.subr.bf16.mxu1 %v9030_v41  ;;  %v9043_v41 = vld [vmem:[%s11874_s5 + $0x28] sm:$0xff]  }
 0x389   :  { %7674 = vmatpush3.bf16.msra.mxu1 %v9031_v42  ;;  %v9044_v42 = vld [vmem:[%s11874_s5 + $0x30] sm:$0xff]  }
 0x38a   :  { %7675 = vmatprep.subr.bf16.mxu1 %v9032_v44  ;;  %v9045_v44 = vld [vmem:[%s11874_s5 + $0x38] sm:$0xff]  }
 0x38d   :  { %v7593_v45 = vpop.f32.mrb[12].mxu1  ;;  %7676 = vmatpush3.bf16.msra.mxu1 %v9033_v50 }
 0x38e   :  { %v7594_v1 = vpop.f32.mrb[13].mxu1  ;;  %7677 = vmatprep.subr.bf16.mxu1 %v9034_v51 }
 0x38f   :  { %v7595_v46 = vadd.f32 %v7594_v1, %v7593_v45  ;;  %v7596_v47 = vpop.f32.mrb[14].mxu1 }
 0x390   :  { %v7597_v48 = vpop.f32.mrb[15].mxu1 }
 0x391   :  { %v7598_v4 = vadd.f32 %v7597_v48, %v7596_v47  ;;  %7678 = vmatpush3.bf16.msra.mxu1 %v9035_v53  ;;  %v6431_v54 = vadd.f32 %v7595_v46, %v7487_v61 }
 0x392   :  { %7679 = vmatprep.subr.bf16.mxu1 %v9036_v56 }
 0x393   :  { %v6434_v8 = vadd.f32 %v7598_v4, %v7487_v61  ;;  %v7568_v61 = vld [vmem:[%s11875_s6] ss:$0 sm:$0xff] }
 0x395   :  { %7680 = vmatpush3.bf16.msra.mxu1 %v9037_v60 }
 0x396   :  { %7696 = vmatprep.subr.bf16.mxu1 %v9070_v15 }
 0x3ad   :  { %v7615_v62 = vpop.f32.mrb[16].mxu1 }
 0x3ae   :  { %v7616_v63 = vpop.f32.mrb[17].mxu1 }
 0x3af   :  { %v7617_v3 = vadd.f32 %v7616_v63, %v7615_v62  ;;  %v7618_v49 = vpop.f32.mrb[18].mxu1 }
 0x3b0   :  { %v7619_v57 = vpop.f32.mrb[19].mxu1 }
 0x3b1   :  { %v6472_v58 = vadd.f32 %v7617_v3, %v6431_v54  ;;  %v7620_v6 = vadd.f32 %v7619_v57, %v7618_v49 }
 0x3b3   :  { %v6475_v25 = vadd.f32 %v7620_v6, %v6434_v8 }
 0x3cd   :  { %v7637_v2 = vpop.f32.mrb[20].mxu1 }
 0x3ce   :  { %v7638_v59 = vpop.f32.mrb[21].mxu1 }
 0x3cf   :  { %v7639_v9 = vadd.f32 %v7638_v59, %v7637_v2  ;;  %v7640_v10 = vpop.f32.mrb[22].mxu1 }
 0x3d0   :  { %v7641_v11 = vpop.f32.mrb[23].mxu1 }
 0x3d1   :  { %v6513_v13 = vadd.f32 %v7639_v9, %v6472_v58  ;;  %v7642_v14 = vadd.f32 %v7641_v11, %v7640_v10 }
 0x3d3   :  { %v6516_v12 = vadd.f32 %v7642_v14, %v6475_v25 }
 0x41a   :  { %v5710_v31 = vpop.f32.mrb[8].mxu0 }
 0x41b   :  { %v7736_v7 = vadd.f32 %v5710_v31, %v826_v19  ;;  %v5712_v23 = vpop.f32.mrb[9].mxu0 }
 0x41c   :  { %v7737_v24 = vadd.f32 %v5712_v23, %v830_v21  ;;  %v5714_v33 = vpop.f32.mrb[10].mxu0 }
 0x41d   :  { %v7738_v26 = vadd.f32 %v5714_v33, %v826_v19  ;;  %v5716_v5 = vpop.f32.mrb[11].mxu0  ;;  %v5727_v28 = vmax.f32 %v7736_v7, 0.0 }
 0x41e   :  { %v7739_v27 = vadd.f32 %v5716_v5, %v830_v21  ;;  %v5728_v18 = vmax.f32 %v7737_v24, 0.0 }
 0x41f   :  { %v5737_v29 = vmax.f32 %v7738_v26, 0.0 }
 0x420   :  { %v5738_v30 = vmax.f32 %v7739_v27, 0.0 }
 0x421   :  { %v5747_v52 = vpack.c.bf16 %v5737_v29, %v5727_v28 }
 0x422   :  { %v5748_v32 = vpack.c.bf16 %v5738_v30, %v5728_v18 }
 0x424   :  { %6592 = vmatprep.mubr.bf16.mxu1 %v5748_v32 }
 0x425   :  { %6593 = vmatmul.mubr.bf16.vlgmr.msra.gmra.mrb[28].mxu1 %v5747_v52 }
 0x426   :  { %7697 = vmatpush3.bf16.msra.mxu1 %v9038_v40  ;;  %7712 = vmatprep.mubr.msk.bf16.mxu1 %vm9071_vm1, %v9070_v15 }
 0x427   :  { %7698 = vmatprep.subr.bf16.mxu1 %v9070_v15 }
 0x42a   :  { %7699 = vmatpush3.bf16.msra.mxu1 %v9039_v36 }
 0x42b   :  { %7700 = vmatprep.subr.bf16.mxu1 %v9070_v15 }
 0x42e   :  { %7701 = vmatpush3.bf16.msra.mxu1 %v9040_v43 }
 0x42f   :  { %7702 = vmatprep.subr.bf16.mxu1 %v9070_v15 }
 0x432   :  { %7703 = vmatpush3.bf16.msra.mxu1 %v9041_v34 }
 0x433   :  { %7704 = vmatprep.subr.bf16.mxu1 %v9070_v15 }
 0x436   :  { %7705 = vmatpush3.bf16.msra.mxu1 %v9042_v22 }
 0x437   :  { %7706 = vmatprep.subr.bf16.mxu1 %v9070_v15 }
 0x43a   :  { %7707 = vmatpush3.bf16.msra.mxu1 %v9043_v41 }
 0x43b   :  { %7708 = vmatprep.subr.bf16.mxu1 %v9070_v15 }
 0x43e   :  { %7709 = vmatpush3.bf16.msra.mxu1 %v9044_v42 }
 0x43f   :  { %7710 = vmatprep.subr.bf16.mxu1 %v9070_v15 }
 0x442   :  { %7711 = vmatpush3.bf16.msra.mxu1 %v9045_v44 }
 0x44b   :  { %v7659_v35 = vpop.f32.mrb[24].mxu1 }
 0x44c   :  { %v7660_v17 = vpop.f32.mrb[25].mxu1 }
 0x44d   :  { %v7661_v55 = vadd.f32 %v7660_v17, %v7659_v35  ;;  %v7662_v0 = vpop.f32.mrb[26].mxu1 }
 0x44e   :  { %v7663_v37 = vpop.f32.mrb[27].mxu1 }
 0x44f   :  { %v6554_v39 = vadd.f32 %v7661_v55, %v6513_v13  ;;  %v7664_v20 = vadd.f32 %v7663_v37, %v7662_v0 }
 0x451   :  { %v6557_v38 = vadd.f32 %v7664_v20, %v6516_v12 }
 0x4f8   :  { %v7681_v45 = vpop.f32.mrb[28].mxu1 }
 0x4f9   :  { %v7682_v1 = vpop.f32.mrb[29].mxu1 }
 0x4fa   :  { %v7683_v46 = vadd.f32 %v7682_v1, %v7681_v45  ;;  %v7684_v47 = vpop.f32.mrb[30].mxu1 }
 0x4fb   :  { %v7685_v48 = vpop.f32.mrb[31].mxu1 }
 0x4fc   :  { %v6595_v4 = vadd.f32 %v7683_v46, %v6554_v39  ;;  %v7686_v50 = vadd.f32 %v7685_v48, %v7684_v47 }
 0x4fe   :  { %v6598_v51 = vadd.f32 %v7686_v50, %v6557_v38  ;;  %v6601_v53 = vmax.f32 %v6595_v4, 0.0 }
 0x500   :  { %v6602_v56 = vmax.f32 %v6598_v51, 0.0 }
 0x502   :  { %v6603_v60 = vpack.c.bf16 %v6602_v56, %v6601_v53 }
 0x504   :  { %7713 = vmatmul.mubr.bf16.vlgmr.msra.gmra.mrb[32].mxu1 %v6603_v60 }
 0x5d7   :  { %v6709_v62 = vpop.f32.mrb[32].mxu1 }
 0x5d8   :  { %v6710_v63 = vadd.f32 %v7568_v61, %v6709_v62  ;;  %v7714_v54 = vpop.f32.mrb[33].mxu1 }
 0x5d9   :  { %v6712_v3 = vpop.f32.mrb[34].mxu1 }
 0x5da   :  { %6716 = vst [vmem:[%s11876_s7] sm:$0xff] %v6710_v63  ;;  %v6713_v49 = vadd.f32 %v7568_v61, %v6712_v3  ;;  %v7715_v57 = vpop.f32.mrb[35].mxu1 }
 0x5dc   :  { %6717 = vst [vmem:[%s11876_s7 + $0x8] sm:$0xff] %v6713_v49 }

</bundles_post_ra>
